<compile_context>
chip_gen: v5e
topology: v5e:2x2
jax: 0.10.0
libtpu: 0.0.40
codegen_flags: <defaults>
</compile_context>

<pallas_src>
import functools

import jax
import jax.numpy as jnp
from jax.experimental import pallas as pl
from jax.experimental.pallas import tpu as pltpu

LANES = 128
EPS = 1e-5
NEG = -1e30


# ------------------------------ fused kernel ------------------------------- #

def _net_kernel(xf_ref, w1_ref, b1_ref, s1_ref, t1_ref,
                w2_ref, b2_ref, s2_ref, t2_ref,
                w3_ref, b3_ref, w4_ref, b4_ref, o_ref, *, H, W, K):
    """Whole-network forward for one image.

    Activations are kept 2-D: rows index the flattened (h*W + w) spatial
    lattice, lanes index channels (padded to 128).  Convs are K*K shifted-slice
    matmuls; pools are shifted-slice maxima on the same lattice.  Rows that
    fall outside the valid conv/pool region are garbage and are never read by
    downstream valid rows.
    """
    L1 = H * W                           # dense conv1 grid (row = h*W + w)
    Lp1 = L1 - (W + 1)                   # dense pool1 grid (lattice spacing (2W, 2))
    L2 = Lp1 - (K - 1) * (2 * W + 2)     # dense conv2 grid

    # ---- conv1 (+bias, ReLU) + BN1: 25 shifted-slice matmuls on the MXU ----
    acc1 = jnp.zeros((L1, LANES), jnp.float32)
    for kh in range(K):
        for kw in range(K):
            patch = xf_ref[0, pl.ds(kh * W + kw, L1), :]           # (L1, Cin_pad) bf16
            acc1 = acc1 + jnp.dot(patch, w1_ref[kh * K + kw],
                                  preferred_element_type=jnp.float32)
    y1 = jnp.maximum(acc1 + b1_ref[...], 0.0) * s1_ref[...] + t1_ref[...]

    # ---- 2x2 max-pool #1: pooled value for (ho, wo) sits at row 2*W*ho + 2*wo ----
    tmp1 = jnp.maximum(y1[0:L1 - 1, :], y1[1:L1, :])
    p1 = jnp.maximum(tmp1[0:Lp1, :], tmp1[W:W + Lp1, :]).astype(jnp.bfloat16)

    # ---- conv2 (+bias, ReLU) + BN2 on the strided pool-1 lattice ----
    acc2 = jnp.zeros((L2, LANES), jnp.float32)
    for kh in range(K):
        for kw in range(K):
            off = kh * 2 * W + kw * 2
            acc2 = acc2 + jnp.dot(p1[off:off + L2, :], w2_ref[kh * K + kw],
                                  preferred_element_type=jnp.float32)
    y2 = jnp.maximum(acc2 + b2_ref[...], 0.0) * s2_ref[...] + t2_ref[...]

    # ---- 2x2 max-pool #2 -> final 1x1-spatial feature (row 0 of the lattice) ----
    tmp2 = jnp.maximum(y2[0:L2 - 2, :], y2[2:L2, :])
    feat = jnp.maximum(tmp2[0:1, :], tmp2[2 * W:2 * W + 1, :])     # (1, 128) f32

    # ---- fc1 + ReLU -> fc2 -> log_softmax (padded lanes masked by -1e30 bias) ----
    h = jnp.dot(feat.astype(jnp.bfloat16), w3_ref[...],
                preferred_element_type=jnp.float32) + b3_ref[...]
    h = jnp.maximum(h, 0.0)
    z = jnp.dot(h.astype(jnp.bfloat16), w4_ref[...],
                preferred_element_type=jnp.float32) + b4_ref[...]
    m = jnp.max(z, axis=-1, keepdims=True)
    s = z - m
    lse = jnp.log(jnp.sum(jnp.exp(s), axis=-1, keepdims=True))
    o_ref[0] = (s - lse).astype(o_ref.dtype)


# ------------------------------- JAX wrapper -------------------------------- #

def net_forward(params, x_nchw, *, num_classes=10):
    N, cin, H, W = x_nchw.shape
    K = 5
    assert H == W, "square inputs only"
    assert ((H - K + 1) // 2 - K + 1) // 2 == 1, \
        "fused kernel assumes a 1x1 post-pool2 spatial size (e.g. im_size=16)"

    cin_p = 8                                   # pad input channels (sublane-friendly K)
    L1 = H * W
    Lx = L1 + (K - 1) * (W + 1)                 # rows reachable by conv1's shifted taps

    # activations: NCHW -> row-flattened NHWC, channel- and row-padded, bf16
    x = jnp.transpose(x_nchw, (0, 2, 3, 1))
    x = jnp.pad(x, ((0, 0), (0, 0), (0, 0), (0, cin_p - cin)))
    xf = x.reshape(N, L1, cin_p)
    xf = jnp.pad(xf, ((0, 0), (0, Lx - L1), (0, 0))).astype(jnp.bfloat16)

    # conv weights -> (K*K, Cin, Cout) taps, bf16, lane-padded Cout
    c1 = params["conv1_w"]                                         # (128, cin, K, K)
    w1 = jnp.transpose(c1, (2, 3, 1, 0)).reshape(K * K, cin, LANES)
    w1 = jnp.pad(w1, ((0, 0), (0, cin_p - cin), (0, 0))).astype(jnp.bfloat16)

    c2 = params["conv2_w"]                                         # (64, 128, K, K)
    cout2 = c2.shape[0]
    w2 = jnp.transpose(c2, (2, 3, 1, 0)).reshape(K * K, LANES, cout2)
    w2 = jnp.pad(w2, ((0, 0), (0, 0), (0, LANES - cout2))).astype(jnp.bfloat16)

    # BatchNorm (eval) folded into per-channel scale/shift
    s1 = params["bn1_gamma"] * jax.lax.rsqrt(params["bn1_var"] + EPS)
    t1 = params["bn1_beta"] - params["bn1_mean"] * s1
    s2 = params["bn2_gamma"] * jax.lax.rsqrt(params["bn2_var"] + EPS)
    t2 = params["bn2_beta"] - params["bn2_mean"] * s2
    pad2 = LANES - cout2
    b1 = params["conv1_b"]
    b2 = jnp.pad(params["conv2_b"], (0, pad2))
    s2 = jnp.pad(s2, (0, pad2))
    t2 = jnp.pad(t2, (0, pad2))

    # fully connected layers, zero-padded to 128x128
    fc1_w, fc1_b = params["fc1_w"], params["fc1_b"]                # (64, 50), (50,)
    fc2_w, fc2_b = params["fc2_w"], params["fc2_b"]                # (50, 10), (10,)
    fin, f1 = fc1_w.shape
    w3 = jnp.zeros((LANES, LANES), jnp.float32).at[:fin, :f1].set(fc1_w)
    w3 = w3.astype(jnp.bfloat16)
    b3 = jnp.pad(fc1_b, (0, LANES - f1))
    w4 = jnp.zeros((LANES, LANES), jnp.float32).at[:f1, :num_classes].set(fc2_w)
    w4 = w4.astype(jnp.bfloat16)
    b4 = jnp.concatenate(
        [fc2_b, jnp.full((LANES - num_classes,), NEG, jnp.float32)])

    def vec(v):
        return v.reshape(1, LANES).astype(jnp.float32)

    vspec = pl.BlockSpec((1, LANES), lambda i: (0, 0))
    mspec = pl.BlockSpec((LANES, LANES), lambda i: (0, 0))

    out = pl.pallas_call(
        functools.partial(_net_kernel, H=H, W=W, K=K),
        out_shape=jax.ShapeDtypeStruct((N, 1, LANES), jnp.float32),
        grid=(N,),
        in_specs=[
            pl.BlockSpec((1, Lx, cin_p), lambda i: (i, 0, 0)),          # xf
            pl.BlockSpec((K * K, cin_p, LANES), lambda i: (0, 0, 0)),   # w1
            vspec, vspec, vspec,                                        # b1, s1, t1
            pl.BlockSpec((K * K, LANES, LANES), lambda i: (0, 0, 0)),   # w2
            vspec, vspec, vspec,                                        # b2, s2, t2
            mspec, vspec,                                               # w3, b3
            mspec, vspec,                                               # w4, b4
        ],
        out_specs=pl.BlockSpec((1, 1, LANES), lambda i: (i, 0, 0)),
        compiler_params=pltpu.CompilerParams(
            dimension_semantics=("parallel",)),
    )(xf, w1, vec(b1), vec(s1), vec(t1),
      w2, vec(b2), vec(s2), vec(t2),
      w3, vec(b3), w4, vec(b4))

    return out.reshape(N, LANES)[:, :num_classes]


# ------------------------- pure-XLA f32 reference --------------------------- #

def net_forward_reference(params, x):
    """Mirror of the PyTorch eval-mode forward in plain XLA (NCHW, f32)."""
    hp = jax.lax.Precision.HIGHEST

    def conv(x, w, b):
        y = jax.lax.conv_general_dilated(
            x, w, window_strides=(1, 1), padding="VALID",
            dimension_numbers=("NCHW", "OIHW", "NCHW"), precision=hp)
        return y + b.reshape(1, -1, 1, 1)

    def bn(x, g, be, m, v):
        s = g * jax.lax.rsqrt(v + EPS)
        return x * s.reshape(1, -1, 1, 1) + (be - m * s).reshape(1, -1, 1, 1)

    def pool(x):
        return jax.lax.reduce_window(x, -jnp.inf, jax.lax.max,
                                     (1, 1, 2, 2), (1, 1, 2, 2), "VALID")

    y = jax.nn.relu(conv(x, params["conv1_w"], params["conv1_b"]))
    y = pool(bn(y, params["bn1_gamma"], params["bn1_beta"],
                params["bn1_mean"], params["bn1_var"]))
    y = jax.nn.relu(conv(y, params["conv2_w"], params["conv2_b"]))
    y = pool(bn(y, params["bn2_gamma"], params["bn2_beta"],
                params["bn2_mean"], params["bn2_var"]))
    y = y.reshape(y.shape[0], -1)                          # NCHW flatten
    y = jax.nn.relu(jnp.dot(y, params["fc1_w"], precision=hp) + params["fc1_b"])
    z = jnp.dot(y, params["fc2_w"], precision=hp) + params["fc2_b"]
    return jax.nn.log_softmax(z, axis=-1)


# --------------------------- parameter creation ------------------------------ #

def init_params(key, channels=3, im_size=16, num_classes=10):
    fc_size = int(64 * (im_size / 4 - 3) ** 2)
    ks = jax.random.split(key, 8)

    def u(k, shape, fan_in):
        bound = 1.0 / (fan_in ** 0.5)
        return jax.random.uniform(k, shape, jnp.float32, -bound, bound)

    return {
        "conv1_w": u(ks[0], (128, channels, 5, 5), channels * 25),
        "conv1_b": u(ks[1], (128,), channels * 25),
        "conv2_w": u(ks[2], (64, 128, 5, 5), 128 * 25),
        "conv2_b": u(ks[3], (64,), 128 * 25),
        "bn1_gamma": jnp.ones((128,), jnp.float32),
        "bn1_beta": jnp.zeros((128,), jnp.float32),
        "bn1_mean": jnp.zeros((128,), jnp.float32),
        "bn1_var": jnp.ones((128,), jnp.float32),
        "bn2_gamma": jnp.ones((64,), jnp.float32),
        "bn2_beta": jnp.zeros((64,), jnp.float32),
        "bn2_mean": jnp.zeros((64,), jnp.float32),
        "bn2_var": jnp.ones((64,), jnp.float32),
        # Linear weights stored as (in, out); equivalent to PyTorch (out, in)^T.
        "fc1_w": u(ks[4], (fc_size, 50), fc_size),
        "fc1_b": u(ks[5], (50,), fc_size),
        "fc2_w": u(ks[6], (50, num_classes), 50),
        "fc2_b": u(ks[7], (num_classes,), 50),
    }


if __name__ == "__main__":
    channels, im_size, num_classes, batch = 3, 16, 10, 2
    key = jax.random.PRNGKey(0)
    pkey, xkey = jax.random.split(key)

    params = init_params(pkey, channels, im_size, num_classes)
    x = jax.random.normal(xkey, (batch, channels, im_size, im_size), jnp.float32)

    out = jax.block_until_ready(jax.jit(net_forward)(params, x))
    ref = jax.block_until_ready(jax.jit(net_forward_reference)(params, x))

    assert out.shape == (batch, num_classes), out.shape
    assert bool(jnp.all(jnp.isfinite(out)))
    # log_softmax rows should sum to 1 after exp.
    assert bool(jnp.allclose(jnp.sum(jnp.exp(out), axis=-1), 1.0, atol=1e-4))
    # match the pure-XLA f32 reference (bf16 MXU operands -> loose tolerance).
    assert bool(jnp.allclose(out, ref, atol=5e-2, rtol=1e-3)), \
        float(jnp.max(jnp.abs(out - ref)))
    print("KERNEL_OK")
</pallas_src>

<mosaic_0001>
module attributes {stable_mosaic.version = 11 : i64} {
  func.func @_net_kernel(%arg0: i32, %arg1: memref<1x324x8xbf16, #tpu.memory_space<vmem>>, %arg2: memref<25x8x128xbf16, #tpu.memory_space<vmem>>, %arg3: memref<1x128xf32, #tpu.memory_space<vmem>>, %arg4: memref<1x128xf32, #tpu.memory_space<vmem>>, %arg5: memref<1x128xf32, #tpu.memory_space<vmem>>, %arg6: memref<25x128x128xbf16, #tpu.memory_space<vmem>>, %arg7: memref<1x128xf32, #tpu.memory_space<vmem>>, %arg8: memref<1x128xf32, #tpu.memory_space<vmem>>, %arg9: memref<1x128xf32, #tpu.memory_space<vmem>>, %arg10: memref<128x128xbf16, #tpu.memory_space<vmem>>, %arg11: memref<1x128xf32, #tpu.memory_space<vmem>>, %arg12: memref<128x128xbf16, #tpu.memory_space<vmem>>, %arg13: memref<1x128xf32, #tpu.memory_space<vmem>>, %arg14: memref<1x1x128xf32, #tpu.memory_space<vmem>>) attributes {dimension_semantics = [#tpu.dimension_semantics<parallel>], iteration_bounds = array<i64: 2>, scalar_prefetch = 0 : i64, scratch_operands = 0 : i64, tpu.core_type = #tpu.core_type<tc>, window_params = [{transform_indices = @transform_0, window_bounds = array<i64: 1, 324, 8>}, {pipeline_mode = #tpu.pipeline_mode<synchronous>, transform_indices = @transform_1, window_bounds = array<i64: 25, 8, 128>}, {pipeline_mode = #tpu.pipeline_mode<synchronous>, transform_indices = @transform_2, window_bounds = array<i64: 1, 128>}, {pipeline_mode = #tpu.pipeline_mode<synchronous>, transform_indices = @transform_3, window_bounds = array<i64: 1, 128>}, {pipeline_mode = #tpu.pipeline_mode<synchronous>, transform_indices = @transform_4, window_bounds = array<i64: 1, 128>}, {pipeline_mode = #tpu.pipeline_mode<synchronous>, transform_indices = @transform_5, window_bounds = array<i64: 25, 128, 128>}, {pipeline_mode = #tpu.pipeline_mode<synchronous>, transform_indices = @transform_6, window_bounds = array<i64: 1, 128>}, {pipeline_mode = #tpu.pipeline_mode<synchronous>, transform_indices = @transform_7, window_bounds = array<i64: 1, 128>}, {pipeline_mode = #tpu.pipeline_mode<synchronous>, transform_indices = @transform_8, window_bounds = array<i64: 1, 128>}, {pipeline_mode = #tpu.pipeline_mode<synchronous>, transform_indices = @transform_9, window_bounds = array<i64: 128, 128>}, {pipeline_mode = #tpu.pipeline_mode<synchronous>, transform_indices = @transform_10, window_bounds = array<i64: 1, 128>}, {pipeline_mode = #tpu.pipeline_mode<synchronous>, transform_indices = @transform_11, window_bounds = array<i64: 128, 128>}, {pipeline_mode = #tpu.pipeline_mode<synchronous>, transform_indices = @transform_12, window_bounds = array<i64: 1, 128>}, {transform_indices = @transform_13, window_bounds = array<i64: 1, 1, 128>}]} {
    %cst = arith.constant 0.000000e+00 : f32
    %0 = vector.broadcast %cst : f32 to vector<256x128xf32>
    %c0 = arith.constant 0 : index
    %c0_0 = arith.constant 0 : index
    %c0_1 = arith.constant 0 : index
    %1 = vector.load %arg1[%c0, %c0_0, %c0_1] : memref<1x324x8xbf16, #tpu.memory_space<vmem>>, vector<1x256x8xbf16>
    %2 = vector.shape_cast %1 : vector<1x256x8xbf16> to vector<256x8xbf16>
    %c0_2 = arith.constant 0 : index
    %c0_3 = arith.constant 0 : index
    %c0_4 = arith.constant 0 : index
    %3 = vector.load %arg2[%c0_2, %c0_3, %c0_4] : memref<25x8x128xbf16, #tpu.memory_space<vmem>>, vector<1x8x128xbf16>
    %4 = vector.shape_cast %3 : vector<1x8x128xbf16> to vector<8x128xbf16>
    %cst_5 = arith.constant dense<0.000000e+00> : vector<256x128xf32>
    %5 = tpu.matmul %2, %4, %cst_5 {dimension_numbers = #tpu.dot_dimension_numbers<[1], [0], [0], [1], [0, 0, 1, 1], [], []>} : vector<256x8xbf16>, vector<8x128xbf16>, vector<256x128xf32> -> vector<256x128xf32>
    %6 = arith.addf %0, %5 : vector<256x128xf32>
    %c0_6 = arith.constant 0 : index
    %c1 = arith.constant 1 : index
    %c0_7 = arith.constant 0 : index
    %7 = vector.load %arg1[%c0_6, %c1, %c0_7] : memref<1x324x8xbf16, #tpu.memory_space<vmem>>, vector<1x256x8xbf16>
    %8 = vector.shape_cast %7 : vector<1x256x8xbf16> to vector<256x8xbf16>
    %c1_8 = arith.constant 1 : index
    %c0_9 = arith.constant 0 : index
    %c0_10 = arith.constant 0 : index
    %9 = vector.load %arg2[%c1_8, %c0_9, %c0_10] : memref<25x8x128xbf16, #tpu.memory_space<vmem>>, vector<1x8x128xbf16>
    %10 = vector.shape_cast %9 : vector<1x8x128xbf16> to vector<8x128xbf16>
    %cst_11 = arith.constant dense<0.000000e+00> : vector<256x128xf32>
    %11 = tpu.matmul %8, %10, %cst_11 {dimension_numbers = #tpu.dot_dimension_numbers<[1], [0], [0], [1], [0, 0, 1, 1], [], []>} : vector<256x8xbf16>, vector<8x128xbf16>, vector<256x128xf32> -> vector<256x128xf32>
    %12 = arith.addf %6, %11 : vector<256x128xf32>
    %c0_12 = arith.constant 0 : index
    %c2 = arith.constant 2 : index
    %c0_13 = arith.constant 0 : index
    %13 = vector.load %arg1[%c0_12, %c2, %c0_13] : memref<1x324x8xbf16, #tpu.memory_space<vmem>>, vector<1x256x8xbf16>
    %14 = vector.shape_cast %13 : vector<1x256x8xbf16> to vector<256x8xbf16>
    %c2_14 = arith.constant 2 : index
    %c0_15 = arith.constant 0 : index
    %c0_16 = arith.constant 0 : index
    %15 = vector.load %arg2[%c2_14, %c0_15, %c0_16] : memref<25x8x128xbf16, #tpu.memory_space<vmem>>, vector<1x8x128xbf16>
    %16 = vector.shape_cast %15 : vector<1x8x128xbf16> to vector<8x128xbf16>
    %cst_17 = arith.constant dense<0.000000e+00> : vector<256x128xf32>
    %17 = tpu.matmul %14, %16, %cst_17 {dimension_numbers = #tpu.dot_dimension_numbers<[1], [0], [0], [1], [0, 0, 1, 1], [], []>} : vector<256x8xbf16>, vector<8x128xbf16>, vector<256x128xf32> -> vector<256x128xf32>
    %18 = arith.addf %12, %17 : vector<256x128xf32>
    %c0_18 = arith.constant 0 : index
    %c3 = arith.constant 3 : index
    %c0_19 = arith.constant 0 : index
    %19 = vector.load %arg1[%c0_18, %c3, %c0_19] : memref<1x324x8xbf16, #tpu.memory_space<vmem>>, vector<1x256x8xbf16>
    %20 = vector.shape_cast %19 : vector<1x256x8xbf16> to vector<256x8xbf16>
    %c3_20 = arith.constant 3 : index
    %c0_21 = arith.constant 0 : index
    %c0_22 = arith.constant 0 : index
    %21 = vector.load %arg2[%c3_20, %c0_21, %c0_22] : memref<25x8x128xbf16, #tpu.memory_space<vmem>>, vector<1x8x128xbf16>
    %22 = vector.shape_cast %21 : vector<1x8x128xbf16> to vector<8x128xbf16>
    %cst_23 = arith.constant dense<0.000000e+00> : vector<256x128xf32>
    %23 = tpu.matmul %20, %22, %cst_23 {dimension_numbers = #tpu.dot_dimension_numbers<[1], [0], [0], [1], [0, 0, 1, 1], [], []>} : vector<256x8xbf16>, vector<8x128xbf16>, vector<256x128xf32> -> vector<256x128xf32>
    %24 = arith.addf %18, %23 : vector<256x128xf32>
    %c0_24 = arith.constant 0 : index
    %c4 = arith.constant 4 : index
    %c0_25 = arith.constant 0 : index
    %25 = vector.load %arg1[%c0_24, %c4, %c0_25] : memref<1x324x8xbf16, #tpu.memory_space<vmem>>, vector<1x256x8xbf16>
    %26 = vector.shape_cast %25 : vector<1x256x8xbf16> to vector<256x8xbf16>
    %c4_26 = arith.constant 4 : index
    %c0_27 = arith.constant 0 : index
    %c0_28 = arith.constant 0 : index
    %27 = vector.load %arg2[%c4_26, %c0_27, %c0_28] : memref<25x8x128xbf16, #tpu.memory_space<vmem>>, vector<1x8x128xbf16>
    %28 = vector.shape_cast %27 : vector<1x8x128xbf16> to vector<8x128xbf16>
    %cst_29 = arith.constant dense<0.000000e+00> : vector<256x128xf32>
    %29 = tpu.matmul %26, %28, %cst_29 {dimension_numbers = #tpu.dot_dimension_numbers<[1], [0], [0], [1], [0, 0, 1, 1], [], []>} : vector<256x8xbf16>, vector<8x128xbf16>, vector<256x128xf32> -> vector<256x128xf32>
    %30 = arith.addf %24, %29 : vector<256x128xf32>
    %c0_30 = arith.constant 0 : index
    %c16 = arith.constant 16 : index
    %c0_31 = arith.constant 0 : index
    %31 = vector.load %arg1[%c0_30, %c16, %c0_31] : memref<1x324x8xbf16, #tpu.memory_space<vmem>>, vector<1x256x8xbf16>
    %32 = vector.shape_cast %31 : vector<1x256x8xbf16> to vector<256x8xbf16>
    %c5 = arith.constant 5 : index
    %c0_32 = arith.constant 0 : index
    %c0_33 = arith.constant 0 : index
    %33 = vector.load %arg2[%c5, %c0_32, %c0_33] : memref<25x8x128xbf16, #tpu.memory_space<vmem>>, vector<1x8x128xbf16>
    %34 = vector.shape_cast %33 : vector<1x8x128xbf16> to vector<8x128xbf16>
    %cst_34 = arith.constant dense<0.000000e+00> : vector<256x128xf32>
    %35 = tpu.matmul %32, %34, %cst_34 {dimension_numbers = #tpu.dot_dimension_numbers<[1], [0], [0], [1], [0, 0, 1, 1], [], []>} : vector<256x8xbf16>, vector<8x128xbf16>, vector<256x128xf32> -> vector<256x128xf32>
    %36 = arith.addf %30, %35 : vector<256x128xf32>
    %c0_35 = arith.constant 0 : index
    %c17 = arith.constant 17 : index
    %c0_36 = arith.constant 0 : index
    %37 = vector.load %arg1[%c0_35, %c17, %c0_36] : memref<1x324x8xbf16, #tpu.memory_space<vmem>>, vector<1x256x8xbf16>
    %38 = vector.shape_cast %37 : vector<1x256x8xbf16> to vector<256x8xbf16>
    %c6 = arith.constant 6 : index
    %c0_37 = arith.constant 0 : index
    %c0_38 = arith.constant 0 : index
    %39 = vector.load %arg2[%c6, %c0_37, %c0_38] : memref<25x8x128xbf16, #tpu.memory_space<vmem>>, vector<1x8x128xbf16>
    %40 = vector.shape_cast %39 : vector<1x8x128xbf16> to vector<8x128xbf16>
    %cst_39 = arith.constant dense<0.000000e+00> : vector<256x128xf32>
    %41 = tpu.matmul %38, %40, %cst_39 {dimension_numbers = #tpu.dot_dimension_numbers<[1], [0], [0], [1], [0, 0, 1, 1], [], []>} : vector<256x8xbf16>, vector<8x128xbf16>, vector<256x128xf32> -> vector<256x128xf32>
    %42 = arith.addf %36, %41 : vector<256x128xf32>
    %c0_40 = arith.constant 0 : index
    %c18 = arith.constant 18 : index
    %c0_41 = arith.constant 0 : index
    %43 = vector.load %arg1[%c0_40, %c18, %c0_41] : memref<1x324x8xbf16, #tpu.memory_space<vmem>>, vector<1x256x8xbf16>
    %44 = vector.shape_cast %43 : vector<1x256x8xbf16> to vector<256x8xbf16>
    %c7 = arith.constant 7 : index
    %c0_42 = arith.constant 0 : index
    %c0_43 = arith.constant 0 : index
    %45 = vector.load %arg2[%c7, %c0_42, %c0_43] : memref<25x8x128xbf16, #tpu.memory_space<vmem>>, vector<1x8x128xbf16>
    %46 = vector.shape_cast %45 : vector<1x8x128xbf16> to vector<8x128xbf16>
    %cst_44 = arith.constant dense<0.000000e+00> : vector<256x128xf32>
    %47 = tpu.matmul %44, %46, %cst_44 {dimension_numbers = #tpu.dot_dimension_numbers<[1], [0], [0], [1], [0, 0, 1, 1], [], []>} : vector<256x8xbf16>, vector<8x128xbf16>, vector<256x128xf32> -> vector<256x128xf32>
    %48 = arith.addf %42, %47 : vector<256x128xf32>
    %c0_45 = arith.constant 0 : index
    %c19 = arith.constant 19 : index
    %c0_46 = arith.constant 0 : index
    %49 = vector.load %arg1[%c0_45, %c19, %c0_46] : memref<1x324x8xbf16, #tpu.memory_space<vmem>>, vector<1x256x8xbf16>
    %50 = vector.shape_cast %49 : vector<1x256x8xbf16> to vector<256x8xbf16>
    %c8 = arith.constant 8 : index
    %c0_47 = arith.constant 0 : index
    %c0_48 = arith.constant 0 : index
    %51 = vector.load %arg2[%c8, %c0_47, %c0_48] : memref<25x8x128xbf16, #tpu.memory_space<vmem>>, vector<1x8x128xbf16>
    %52 = vector.shape_cast %51 : vector<1x8x128xbf16> to vector<8x128xbf16>
    %cst_49 = arith.constant dense<0.000000e+00> : vector<256x128xf32>
    %53 = tpu.matmul %50, %52, %cst_49 {dimension_numbers = #tpu.dot_dimension_numbers<[1], [0], [0], [1], [0, 0, 1, 1], [], []>} : vector<256x8xbf16>, vector<8x128xbf16>, vector<256x128xf32> -> vector<256x128xf32>
    %54 = arith.addf %48, %53 : vector<256x128xf32>
    %c0_50 = arith.constant 0 : index
    %c20 = arith.constant 20 : index
    %c0_51 = arith.constant 0 : index
    %55 = vector.load %arg1[%c0_50, %c20, %c0_51] : memref<1x324x8xbf16, #tpu.memory_space<vmem>>, vector<1x256x8xbf16>
    %56 = vector.shape_cast %55 : vector<1x256x8xbf16> to vector<256x8xbf16>
    %c9 = arith.constant 9 : index
    %c0_52 = arith.constant 0 : index
    %c0_53 = arith.constant 0 : index
    %57 = vector.load %arg2[%c9, %c0_52, %c0_53] : memref<25x8x128xbf16, #tpu.memory_space<vmem>>, vector<1x8x128xbf16>
    %58 = vector.shape_cast %57 : vector<1x8x128xbf16> to vector<8x128xbf16>
    %cst_54 = arith.constant dense<0.000000e+00> : vector<256x128xf32>
    %59 = tpu.matmul %56, %58, %cst_54 {dimension_numbers = #tpu.dot_dimension_numbers<[1], [0], [0], [1], [0, 0, 1, 1], [], []>} : vector<256x8xbf16>, vector<8x128xbf16>, vector<256x128xf32> -> vector<256x128xf32>
    %60 = arith.addf %54, %59 : vector<256x128xf32>
    %c0_55 = arith.constant 0 : index
    %c32 = arith.constant 32 : index
    %c0_56 = arith.constant 0 : index
    %61 = vector.load %arg1[%c0_55, %c32, %c0_56] : memref<1x324x8xbf16, #tpu.memory_space<vmem>>, vector<1x256x8xbf16>
    %62 = vector.shape_cast %61 : vector<1x256x8xbf16> to vector<256x8xbf16>
    %c10 = arith.constant 10 : index
    %c0_57 = arith.constant 0 : index
    %c0_58 = arith.constant 0 : index
    %63 = vector.load %arg2[%c10, %c0_57, %c0_58] : memref<25x8x128xbf16, #tpu.memory_space<vmem>>, vector<1x8x128xbf16>
    %64 = vector.shape_cast %63 : vector<1x8x128xbf16> to vector<8x128xbf16>
    %cst_59 = arith.constant dense<0.000000e+00> : vector<256x128xf32>
    %65 = tpu.matmul %62, %64, %cst_59 {dimension_numbers = #tpu.dot_dimension_numbers<[1], [0], [0], [1], [0, 0, 1, 1], [], []>} : vector<256x8xbf16>, vector<8x128xbf16>, vector<256x128xf32> -> vector<256x128xf32>
    %66 = arith.addf %60, %65 : vector<256x128xf32>
    %c0_60 = arith.constant 0 : index
    %c33 = arith.constant 33 : index
    %c0_61 = arith.constant 0 : index
    %67 = vector.load %arg1[%c0_60, %c33, %c0_61] : memref<1x324x8xbf16, #tpu.memory_space<vmem>>, vector<1x256x8xbf16>
    %68 = vector.shape_cast %67 : vector<1x256x8xbf16> to vector<256x8xbf16>
    %c11 = arith.constant 11 : index
    %c0_62 = arith.constant 0 : index
    %c0_63 = arith.constant 0 : index
    %69 = vector.load %arg2[%c11, %c0_62, %c0_63] : memref<25x8x128xbf16, #tpu.memory_space<vmem>>, vector<1x8x128xbf16>
    %70 = vector.shape_cast %69 : vector<1x8x128xbf16> to vector<8x128xbf16>
    %cst_64 = arith.constant dense<0.000000e+00> : vector<256x128xf32>
    %71 = tpu.matmul %68, %70, %cst_64 {dimension_numbers = #tpu.dot_dimension_numbers<[1], [0], [0], [1], [0, 0, 1, 1], [], []>} : vector<256x8xbf16>, vector<8x128xbf16>, vector<256x128xf32> -> vector<256x128xf32>
    %72 = arith.addf %66, %71 : vector<256x128xf32>
    %c0_65 = arith.constant 0 : index
    %c34 = arith.constant 34 : index
    %c0_66 = arith.constant 0 : index
    %73 = vector.load %arg1[%c0_65, %c34, %c0_66] : memref<1x324x8xbf16, #tpu.memory_space<vmem>>, vector<1x256x8xbf16>
    %74 = vector.shape_cast %73 : vector<1x256x8xbf16> to vector<256x8xbf16>
    %c12 = arith.constant 12 : index
    %c0_67 = arith.constant 0 : index
    %c0_68 = arith.constant 0 : index
    %75 = vector.load %arg2[%c12, %c0_67, %c0_68] : memref<25x8x128xbf16, #tpu.memory_space<vmem>>, vector<1x8x128xbf16>
    %76 = vector.shape_cast %75 : vector<1x8x128xbf16> to vector<8x128xbf16>
    %cst_69 = arith.constant dense<0.000000e+00> : vector<256x128xf32>
    %77 = tpu.matmul %74, %76, %cst_69 {dimension_numbers = #tpu.dot_dimension_numbers<[1], [0], [0], [1], [0, 0, 1, 1], [], []>} : vector<256x8xbf16>, vector<8x128xbf16>, vector<256x128xf32> -> vector<256x128xf32>
    %78 = arith.addf %72, %77 : vector<256x128xf32>
    %c0_70 = arith.constant 0 : index
    %c35 = arith.constant 35 : index
    %c0_71 = arith.constant 0 : index
    %79 = vector.load %arg1[%c0_70, %c35, %c0_71] : memref<1x324x8xbf16, #tpu.memory_space<vmem>>, vector<1x256x8xbf16>
    %80 = vector.shape_cast %79 : vector<1x256x8xbf16> to vector<256x8xbf16>
    %c13 = arith.constant 13 : index
    %c0_72 = arith.constant 0 : index
    %c0_73 = arith.constant 0 : index
    %81 = vector.load %arg2[%c13, %c0_72, %c0_73] : memref<25x8x128xbf16, #tpu.memory_space<vmem>>, vector<1x8x128xbf16>
    %82 = vector.shape_cast %81 : vector<1x8x128xbf16> to vector<8x128xbf16>
    %cst_74 = arith.constant dense<0.000000e+00> : vector<256x128xf32>
    %83 = tpu.matmul %80, %82, %cst_74 {dimension_numbers = #tpu.dot_dimension_numbers<[1], [0], [0], [1], [0, 0, 1, 1], [], []>} : vector<256x8xbf16>, vector<8x128xbf16>, vector<256x128xf32> -> vector<256x128xf32>
    %84 = arith.addf %78, %83 : vector<256x128xf32>
    %c0_75 = arith.constant 0 : index
    %c36 = arith.constant 36 : index
    %c0_76 = arith.constant 0 : index
    %85 = vector.load %arg1[%c0_75, %c36, %c0_76] : memref<1x324x8xbf16, #tpu.memory_space<vmem>>, vector<1x256x8xbf16>
    %86 = vector.shape_cast %85 : vector<1x256x8xbf16> to vector<256x8xbf16>
    %c14 = arith.constant 14 : index
    %c0_77 = arith.constant 0 : index
    %c0_78 = arith.constant 0 : index
    %87 = vector.load %arg2[%c14, %c0_77, %c0_78] : memref<25x8x128xbf16, #tpu.memory_space<vmem>>, vector<1x8x128xbf16>
    %88 = vector.shape_cast %87 : vector<1x8x128xbf16> to vector<8x128xbf16>
    %cst_79 = arith.constant dense<0.000000e+00> : vector<256x128xf32>
    %89 = tpu.matmul %86, %88, %cst_79 {dimension_numbers = #tpu.dot_dimension_numbers<[1], [0], [0], [1], [0, 0, 1, 1], [], []>} : vector<256x8xbf16>, vector<8x128xbf16>, vector<256x128xf32> -> vector<256x128xf32>
    %90 = arith.addf %84, %89 : vector<256x128xf32>
    %c0_80 = arith.constant 0 : index
    %c48 = arith.constant 48 : index
    %c0_81 = arith.constant 0 : index
    %91 = vector.load %arg1[%c0_80, %c48, %c0_81] : memref<1x324x8xbf16, #tpu.memory_space<vmem>>, vector<1x256x8xbf16>
    %92 = vector.shape_cast %91 : vector<1x256x8xbf16> to vector<256x8xbf16>
    %c15 = arith.constant 15 : index
    %c0_82 = arith.constant 0 : index
    %c0_83 = arith.constant 0 : index
    %93 = vector.load %arg2[%c15, %c0_82, %c0_83] : memref<25x8x128xbf16, #tpu.memory_space<vmem>>, vector<1x8x128xbf16>
    %94 = vector.shape_cast %93 : vector<1x8x128xbf16> to vector<8x128xbf16>
    %cst_84 = arith.constant dense<0.000000e+00> : vector<256x128xf32>
    %95 = tpu.matmul %92, %94, %cst_84 {dimension_numbers = #tpu.dot_dimension_numbers<[1], [0], [0], [1], [0, 0, 1, 1], [], []>} : vector<256x8xbf16>, vector<8x128xbf16>, vector<256x128xf32> -> vector<256x128xf32>
    %96 = arith.addf %90, %95 : vector<256x128xf32>
    %c0_85 = arith.constant 0 : index
    %c49 = arith.constant 49 : index
    %c0_86 = arith.constant 0 : index
    %97 = vector.load %arg1[%c0_85, %c49, %c0_86] : memref<1x324x8xbf16, #tpu.memory_space<vmem>>, vector<1x256x8xbf16>
    %98 = vector.shape_cast %97 : vector<1x256x8xbf16> to vector<256x8xbf16>
    %c16_87 = arith.constant 16 : index
    %c0_88 = arith.constant 0 : index
    %c0_89 = arith.constant 0 : index
    %99 = vector.load %arg2[%c16_87, %c0_88, %c0_89] : memref<25x8x128xbf16, #tpu.memory_space<vmem>>, vector<1x8x128xbf16>
    %100 = vector.shape_cast %99 : vector<1x8x128xbf16> to vector<8x128xbf16>
    %cst_90 = arith.constant dense<0.000000e+00> : vector<256x128xf32>
    %101 = tpu.matmul %98, %100, %cst_90 {dimension_numbers = #tpu.dot_dimension_numbers<[1], [0], [0], [1], [0, 0, 1, 1], [], []>} : vector<256x8xbf16>, vector<8x128xbf16>, vector<256x128xf32> -> vector<256x128xf32>
    %102 = arith.addf %96, %101 : vector<256x128xf32>
    %c0_91 = arith.constant 0 : index
    %c50 = arith.constant 50 : index
    %c0_92 = arith.constant 0 : index
    %103 = vector.load %arg1[%c0_91, %c50, %c0_92] : memref<1x324x8xbf16, #tpu.memory_space<vmem>>, vector<1x256x8xbf16>
    %104 = vector.shape_cast %103 : vector<1x256x8xbf16> to vector<256x8xbf16>
    %c17_93 = arith.constant 17 : index
    %c0_94 = arith.constant 0 : index
    %c0_95 = arith.constant 0 : index
    %105 = vector.load %arg2[%c17_93, %c0_94, %c0_95] : memref<25x8x128xbf16, #tpu.memory_space<vmem>>, vector<1x8x128xbf16>
    %106 = vector.shape_cast %105 : vector<1x8x128xbf16> to vector<8x128xbf16>
    %cst_96 = arith.constant dense<0.000000e+00> : vector<256x128xf32>
    %107 = tpu.matmul %104, %106, %cst_96 {dimension_numbers = #tpu.dot_dimension_numbers<[1], [0], [0], [1], [0, 0, 1, 1], [], []>} : vector<256x8xbf16>, vector<8x128xbf16>, vector<256x128xf32> -> vector<256x128xf32>
    %108 = arith.addf %102, %107 : vector<256x128xf32>
    %c0_97 = arith.constant 0 : index
    %c51 = arith.constant 51 : index
    %c0_98 = arith.constant 0 : index
    %109 = vector.load %arg1[%c0_97, %c51, %c0_98] : memref<1x324x8xbf16, #tpu.memory_space<vmem>>, vector<1x256x8xbf16>
    %110 = vector.shape_cast %109 : vector<1x256x8xbf16> to vector<256x8xbf16>
    %c18_99 = arith.constant 18 : index
    %c0_100 = arith.constant 0 : index
    %c0_101 = arith.constant 0 : index
    %111 = vector.load %arg2[%c18_99, %c0_100, %c0_101] : memref<25x8x128xbf16, #tpu.memory_space<vmem>>, vector<1x8x128xbf16>
    %112 = vector.shape_cast %111 : vector<1x8x128xbf16> to vector<8x128xbf16>
    %cst_102 = arith.constant dense<0.000000e+00> : vector<256x128xf32>
    %113 = tpu.matmul %110, %112, %cst_102 {dimension_numbers = #tpu.dot_dimension_numbers<[1], [0], [0], [1], [0, 0, 1, 1], [], []>} : vector<256x8xbf16>, vector<8x128xbf16>, vector<256x128xf32> -> vector<256x128xf32>
    %114 = arith.addf %108, %113 : vector<256x128xf32>
    %c0_103 = arith.constant 0 : index
    %c52 = arith.constant 52 : index
    %c0_104 = arith.constant 0 : index
    %115 = vector.load %arg1[%c0_103, %c52, %c0_104] : memref<1x324x8xbf16, #tpu.memory_space<vmem>>, vector<1x256x8xbf16>
    %116 = vector.shape_cast %115 : vector<1x256x8xbf16> to vector<256x8xbf16>
    %c19_105 = arith.constant 19 : index
    %c0_106 = arith.constant 0 : index
    %c0_107 = arith.constant 0 : index
    %117 = vector.load %arg2[%c19_105, %c0_106, %c0_107] : memref<25x8x128xbf16, #tpu.memory_space<vmem>>, vector<1x8x128xbf16>
    %118 = vector.shape_cast %117 : vector<1x8x128xbf16> to vector<8x128xbf16>
    %cst_108 = arith.constant dense<0.000000e+00> : vector<256x128xf32>
    %119 = tpu.matmul %116, %118, %cst_108 {dimension_numbers = #tpu.dot_dimension_numbers<[1], [0], [0], [1], [0, 0, 1, 1], [], []>} : vector<256x8xbf16>, vector<8x128xbf16>, vector<256x128xf32> -> vector<256x128xf32>
    %120 = arith.addf %114, %119 : vector<256x128xf32>
    %c0_109 = arith.constant 0 : index
    %c64 = arith.constant 64 : index
    %c0_110 = arith.constant 0 : index
    %121 = vector.load %arg1[%c0_109, %c64, %c0_110] : memref<1x324x8xbf16, #tpu.memory_space<vmem>>, vector<1x256x8xbf16>
    %122 = vector.shape_cast %121 : vector<1x256x8xbf16> to vector<256x8xbf16>
    %c20_111 = arith.constant 20 : index
    %c0_112 = arith.constant 0 : index
    %c0_113 = arith.constant 0 : index
    %123 = vector.load %arg2[%c20_111, %c0_112, %c0_113] : memref<25x8x128xbf16, #tpu.memory_space<vmem>>, vector<1x8x128xbf16>
    %124 = vector.shape_cast %123 : vector<1x8x128xbf16> to vector<8x128xbf16>
    %cst_114 = arith.constant dense<0.000000e+00> : vector<256x128xf32>
    %125 = tpu.matmul %122, %124, %cst_114 {dimension_numbers = #tpu.dot_dimension_numbers<[1], [0], [0], [1], [0, 0, 1, 1], [], []>} : vector<256x8xbf16>, vector<8x128xbf16>, vector<256x128xf32> -> vector<256x128xf32>
    %126 = arith.addf %120, %125 : vector<256x128xf32>
    %c0_115 = arith.constant 0 : index
    %c65 = arith.constant 65 : index
    %c0_116 = arith.constant 0 : index
    %127 = vector.load %arg1[%c0_115, %c65, %c0_116] : memref<1x324x8xbf16, #tpu.memory_space<vmem>>, vector<1x256x8xbf16>
    %128 = vector.shape_cast %127 : vector<1x256x8xbf16> to vector<256x8xbf16>
    %c21 = arith.constant 21 : index
    %c0_117 = arith.constant 0 : index
    %c0_118 = arith.constant 0 : index
    %129 = vector.load %arg2[%c21, %c0_117, %c0_118] : memref<25x8x128xbf16, #tpu.memory_space<vmem>>, vector<1x8x128xbf16>
    %130 = vector.shape_cast %129 : vector<1x8x128xbf16> to vector<8x128xbf16>
    %cst_119 = arith.constant dense<0.000000e+00> : vector<256x128xf32>
    %131 = tpu.matmul %128, %130, %cst_119 {dimension_numbers = #tpu.dot_dimension_numbers<[1], [0], [0], [1], [0, 0, 1, 1], [], []>} : vector<256x8xbf16>, vector<8x128xbf16>, vector<256x128xf32> -> vector<256x128xf32>
    %132 = arith.addf %126, %131 : vector<256x128xf32>
    %c0_120 = arith.constant 0 : index
    %c66 = arith.constant 66 : index
    %c0_121 = arith.constant 0 : index
    %133 = vector.load %arg1[%c0_120, %c66, %c0_121] : memref<1x324x8xbf16, #tpu.memory_space<vmem>>, vector<1x256x8xbf16>
    %134 = vector.shape_cast %133 : vector<1x256x8xbf16> to vector<256x8xbf16>
    %c22 = arith.constant 22 : index
    %c0_122 = arith.constant 0 : index
    %c0_123 = arith.constant 0 : index
    %135 = vector.load %arg2[%c22, %c0_122, %c0_123] : memref<25x8x128xbf16, #tpu.memory_space<vmem>>, vector<1x8x128xbf16>
    %136 = vector.shape_cast %135 : vector<1x8x128xbf16> to vector<8x128xbf16>
    %cst_124 = arith.constant dense<0.000000e+00> : vector<256x128xf32>
    %137 = tpu.matmul %134, %136, %cst_124 {dimension_numbers = #tpu.dot_dimension_numbers<[1], [0], [0], [1], [0, 0, 1, 1], [], []>} : vector<256x8xbf16>, vector<8x128xbf16>, vector<256x128xf32> -> vector<256x128xf32>
    %138 = arith.addf %132, %137 : vector<256x128xf32>
    %c0_125 = arith.constant 0 : index
    %c67 = arith.constant 67 : index
    %c0_126 = arith.constant 0 : index
    %139 = vector.load %arg1[%c0_125, %c67, %c0_126] : memref<1x324x8xbf16, #tpu.memory_space<vmem>>, vector<1x256x8xbf16>
    %140 = vector.shape_cast %139 : vector<1x256x8xbf16> to vector<256x8xbf16>
    %c23 = arith.constant 23 : index
    %c0_127 = arith.constant 0 : index
    %c0_128 = arith.constant 0 : index
    %141 = vector.load %arg2[%c23, %c0_127, %c0_128] : memref<25x8x128xbf16, #tpu.memory_space<vmem>>, vector<1x8x128xbf16>
    %142 = vector.shape_cast %141 : vector<1x8x128xbf16> to vector<8x128xbf16>
    %cst_129 = arith.constant dense<0.000000e+00> : vector<256x128xf32>
    %143 = tpu.matmul %140, %142, %cst_129 {dimension_numbers = #tpu.dot_dimension_numbers<[1], [0], [0], [1], [0, 0, 1, 1], [], []>} : vector<256x8xbf16>, vector<8x128xbf16>, vector<256x128xf32> -> vector<256x128xf32>
    %144 = arith.addf %138, %143 : vector<256x128xf32>
    %c0_130 = arith.constant 0 : index
    %c68 = arith.constant 68 : index
    %c0_131 = arith.constant 0 : index
    %145 = vector.load %arg1[%c0_130, %c68, %c0_131] : memref<1x324x8xbf16, #tpu.memory_space<vmem>>, vector<1x256x8xbf16>
    %146 = vector.shape_cast %145 : vector<1x256x8xbf16> to vector<256x8xbf16>
    %c24 = arith.constant 24 : index
    %c0_132 = arith.constant 0 : index
    %c0_133 = arith.constant 0 : index
    %147 = vector.load %arg2[%c24, %c0_132, %c0_133] : memref<25x8x128xbf16, #tpu.memory_space<vmem>>, vector<1x8x128xbf16>
    %148 = vector.shape_cast %147 : vector<1x8x128xbf16> to vector<8x128xbf16>
    %cst_134 = arith.constant dense<0.000000e+00> : vector<256x128xf32>
    %149 = tpu.matmul %146, %148, %cst_134 {dimension_numbers = #tpu.dot_dimension_numbers<[1], [0], [0], [1], [0, 0, 1, 1], [], []>} : vector<256x8xbf16>, vector<8x128xbf16>, vector<256x128xf32> -> vector<256x128xf32>
    %150 = arith.addf %144, %149 : vector<256x128xf32>
    %c0_135 = arith.constant 0 : index
    %c0_136 = arith.constant 0 : index
    %151 = vector.load %arg3[%c0_135, %c0_136] : memref<1x128xf32, #tpu.memory_space<vmem>>, vector<1x128xf32>
    %152 = vector.broadcast %151 : vector<1x128xf32> to vector<256x128xf32>
    %153 = arith.addf %150, %152 : vector<256x128xf32>
    %cst_137 = arith.constant 0.000000e+00 : f32
    %154 = vector.broadcast %cst_137 : f32 to vector<256x128xf32>
    %155 = arith.maximumf %153, %154 : vector<256x128xf32>
    %c0_138 = arith.constant 0 : index
    %c0_139 = arith.constant 0 : index
    %156 = vector.load %arg4[%c0_138, %c0_139] : memref<1x128xf32, #tpu.memory_space<vmem>>, vector<1x128xf32>
    %157 = vector.broadcast %156 : vector<1x128xf32> to vector<256x128xf32>
    %158 = arith.mulf %155, %157 : vector<256x128xf32>
    %c0_140 = arith.constant 0 : index
    %c0_141 = arith.constant 0 : index
    %159 = vector.load %arg5[%c0_140, %c0_141] : memref<1x128xf32, #tpu.memory_space<vmem>>, vector<1x128xf32>
    %160 = vector.broadcast %159 : vector<1x128xf32> to vector<256x128xf32>
    %161 = arith.addf %158, %160 : vector<256x128xf32>
    %162 = vector.extract_strided_slice %161 {offsets = [0, 0], sizes = [255, 128], strides = [1, 1]} : vector<256x128xf32> to vector<255x128xf32>
    %163 = vector.extract_strided_slice %161 {offsets = [1, 0], sizes = [255, 128], strides = [1, 1]} : vector<256x128xf32> to vector<255x128xf32>
    %164 = arith.maximumf %162, %163 : vector<255x128xf32>
    %165 = vector.extract_strided_slice %164 {offsets = [0, 0], sizes = [239, 128], strides = [1, 1]} : vector<255x128xf32> to vector<239x128xf32>
    %166 = vector.extract_strided_slice %164 {offsets = [16, 0], sizes = [239, 128], strides = [1, 1]} : vector<255x128xf32> to vector<239x128xf32>
    %167 = arith.maximumf %165, %166 : vector<239x128xf32>
    %168 = arith.truncf %167 : vector<239x128xf32> to vector<239x128xbf16>
    %cst_142 = arith.constant 0.000000e+00 : f32
    %169 = vector.broadcast %cst_142 : f32 to vector<103x128xf32>
    %170 = vector.extract_strided_slice %168 {offsets = [0, 0], sizes = [103, 128], strides = [1, 1]} : vector<239x128xbf16> to vector<103x128xbf16>
    %c0_143 = arith.constant 0 : index
    %c0_144 = arith.constant 0 : index
    %c0_145 = arith.constant 0 : index
    %171 = vector.load %arg6[%c0_143, %c0_144, %c0_145] : memref<25x128x128xbf16, #tpu.memory_space<vmem>>, vector<1x128x128xbf16>
    %172 = vector.shape_cast %171 : vector<1x128x128xbf16> to vector<128x128xbf16>
    %cst_146 = arith.constant dense<0.000000e+00> : vector<103x128xf32>
    %173 = tpu.matmul %170, %172, %cst_146 {dimension_numbers = #tpu.dot_dimension_numbers<[1], [0], [0], [1], [0, 0, 1, 1], [], []>} : vector<103x128xbf16>, vector<128x128xbf16>, vector<103x128xf32> -> vector<103x128xf32>
    %174 = arith.addf %169, %173 : vector<103x128xf32>
    %175 = vector.extract_strided_slice %168 {offsets = [2, 0], sizes = [103, 128], strides = [1, 1]} : vector<239x128xbf16> to vector<103x128xbf16>
    %c1_147 = arith.constant 1 : index
    %c0_148 = arith.constant 0 : index
    %c0_149 = arith.constant 0 : index
    %176 = vector.load %arg6[%c1_147, %c0_148, %c0_149] : memref<25x128x128xbf16, #tpu.memory_space<vmem>>, vector<1x128x128xbf16>
    %177 = vector.shape_cast %176 : vector<1x128x128xbf16> to vector<128x128xbf16>
    %cst_150 = arith.constant dense<0.000000e+00> : vector<103x128xf32>
    %178 = tpu.matmul %175, %177, %cst_150 {dimension_numbers = #tpu.dot_dimension_numbers<[1], [0], [0], [1], [0, 0, 1, 1], [], []>} : vector<103x128xbf16>, vector<128x128xbf16>, vector<103x128xf32> -> vector<103x128xf32>
    %179 = arith.addf %174, %178 : vector<103x128xf32>
    %180 = vector.extract_strided_slice %168 {offsets = [4, 0], sizes = [103, 128], strides = [1, 1]} : vector<239x128xbf16> to vector<103x128xbf16>
    %c2_151 = arith.constant 2 : index
    %c0_152 = arith.constant 0 : index
    %c0_153 = arith.constant 0 : index
    %181 = vector.load %arg6[%c2_151, %c0_152, %c0_153] : memref<25x128x128xbf16, #tpu.memory_space<vmem>>, vector<1x128x128xbf16>
    %182 = vector.shape_cast %181 : vector<1x128x128xbf16> to vector<128x128xbf16>
    %cst_154 = arith.constant dense<0.000000e+00> : vector<103x128xf32>
    %183 = tpu.matmul %180, %182, %cst_154 {dimension_numbers = #tpu.dot_dimension_numbers<[1], [0], [0], [1], [0, 0, 1, 1], [], []>} : vector<103x128xbf16>, vector<128x128xbf16>, vector<103x128xf32> -> vector<103x128xf32>
    %184 = arith.addf %179, %183 : vector<103x128xf32>
    %185 = vector.extract_strided_slice %168 {offsets = [6, 0], sizes = [103, 128], strides = [1, 1]} : vector<239x128xbf16> to vector<103x128xbf16>
    %c3_155 = arith.constant 3 : index
    %c0_156 = arith.constant 0 : index
    %c0_157 = arith.constant 0 : index
    %186 = vector.load %arg6[%c3_155, %c0_156, %c0_157] : memref<25x128x128xbf16, #tpu.memory_space<vmem>>, vector<1x128x128xbf16>
    %187 = vector.shape_cast %186 : vector<1x128x128xbf16> to vector<128x128xbf16>
    %cst_158 = arith.constant dense<0.000000e+00> : vector<103x128xf32>
    %188 = tpu.matmul %185, %187, %cst_158 {dimension_numbers = #tpu.dot_dimension_numbers<[1], [0], [0], [1], [0, 0, 1, 1], [], []>} : vector<103x128xbf16>, vector<128x128xbf16>, vector<103x128xf32> -> vector<103x128xf32>
    %189 = arith.addf %184, %188 : vector<103x128xf32>
    %190 = vector.extract_strided_slice %168 {offsets = [8, 0], sizes = [103, 128], strides = [1, 1]} : vector<239x128xbf16> to vector<103x128xbf16>
    %c4_159 = arith.constant 4 : index
    %c0_160 = arith.constant 0 : index
    %c0_161 = arith.constant 0 : index
    %191 = vector.load %arg6[%c4_159, %c0_160, %c0_161] : memref<25x128x128xbf16, #tpu.memory_space<vmem>>, vector<1x128x128xbf16>
    %192 = vector.shape_cast %191 : vector<1x128x128xbf16> to vector<128x128xbf16>
    %cst_162 = arith.constant dense<0.000000e+00> : vector<103x128xf32>
    %193 = tpu.matmul %190, %192, %cst_162 {dimension_numbers = #tpu.dot_dimension_numbers<[1], [0], [0], [1], [0, 0, 1, 1], [], []>} : vector<103x128xbf16>, vector<128x128xbf16>, vector<103x128xf32> -> vector<103x128xf32>
    %194 = arith.addf %189, %193 : vector<103x128xf32>
    %195 = vector.extract_strided_slice %168 {offsets = [32, 0], sizes = [103, 128], strides = [1, 1]} : vector<239x128xbf16> to vector<103x128xbf16>
    %c5_163 = arith.constant 5 : index
    %c0_164 = arith.constant 0 : index
    %c0_165 = arith.constant 0 : index
    %196 = vector.load %arg6[%c5_163, %c0_164, %c0_165] : memref<25x128x128xbf16, #tpu.memory_space<vmem>>, vector<1x128x128xbf16>
    %197 = vector.shape_cast %196 : vector<1x128x128xbf16> to vector<128x128xbf16>
    %cst_166 = arith.constant dense<0.000000e+00> : vector<103x128xf32>
    %198 = tpu.matmul %195, %197, %cst_166 {dimension_numbers = #tpu.dot_dimension_numbers<[1], [0], [0], [1], [0, 0, 1, 1], [], []>} : vector<103x128xbf16>, vector<128x128xbf16>, vector<103x128xf32> -> vector<103x128xf32>
    %199 = arith.addf %194, %198 : vector<103x128xf32>
    %200 = vector.extract_strided_slice %168 {offsets = [34, 0], sizes = [103, 128], strides = [1, 1]} : vector<239x128xbf16> to vector<103x128xbf16>
    %c6_167 = arith.constant 6 : index
    %c0_168 = arith.constant 0 : index
    %c0_169 = arith.constant 0 : index
    %201 = vector.load %arg6[%c6_167, %c0_168, %c0_169] : memref<25x128x128xbf16, #tpu.memory_space<vmem>>, vector<1x128x128xbf16>
    %202 = vector.shape_cast %201 : vector<1x128x128xbf16> to vector<128x128xbf16>
    %cst_170 = arith.constant dense<0.000000e+00> : vector<103x128xf32>
    %203 = tpu.matmul %200, %202, %cst_170 {dimension_numbers = #tpu.dot_dimension_numbers<[1], [0], [0], [1], [0, 0, 1, 1], [], []>} : vector<103x128xbf16>, vector<128x128xbf16>, vector<103x128xf32> -> vector<103x128xf32>
    %204 = arith.addf %199, %203 : vector<103x128xf32>
    %205 = vector.extract_strided_slice %168 {offsets = [36, 0], sizes = [103, 128], strides = [1, 1]} : vector<239x128xbf16> to vector<103x128xbf16>
    %c7_171 = arith.constant 7 : index
    %c0_172 = arith.constant 0 : index
    %c0_173 = arith.constant 0 : index
    %206 = vector.load %arg6[%c7_171, %c0_172, %c0_173] : memref<25x128x128xbf16, #tpu.memory_space<vmem>>, vector<1x128x128xbf16>
    %207 = vector.shape_cast %206 : vector<1x128x128xbf16> to vector<128x128xbf16>
    %cst_174 = arith.constant dense<0.000000e+00> : vector<103x128xf32>
    %208 = tpu.matmul %205, %207, %cst_174 {dimension_numbers = #tpu.dot_dimension_numbers<[1], [0], [0], [1], [0, 0, 1, 1], [], []>} : vector<103x128xbf16>, vector<128x128xbf16>, vector<103x128xf32> -> vector<103x128xf32>
    %209 = arith.addf %204, %208 : vector<103x128xf32>
    %210 = vector.extract_strided_slice %168 {offsets = [38, 0], sizes = [103, 128], strides = [1, 1]} : vector<239x128xbf16> to vector<103x128xbf16>
    %c8_175 = arith.constant 8 : index
    %c0_176 = arith.constant 0 : index
    %c0_177 = arith.constant 0 : index
    %211 = vector.load %arg6[%c8_175, %c0_176, %c0_177] : memref<25x128x128xbf16, #tpu.memory_space<vmem>>, vector<1x128x128xbf16>
    %212 = vector.shape_cast %211 : vector<1x128x128xbf16> to vector<128x128xbf16>
    %cst_178 = arith.constant dense<0.000000e+00> : vector<103x128xf32>
    %213 = tpu.matmul %210, %212, %cst_178 {dimension_numbers = #tpu.dot_dimension_numbers<[1], [0], [0], [1], [0, 0, 1, 1], [], []>} : vector<103x128xbf16>, vector<128x128xbf16>, vector<103x128xf32> -> vector<103x128xf32>
    %214 = arith.addf %209, %213 : vector<103x128xf32>
    %215 = vector.extract_strided_slice %168 {offsets = [40, 0], sizes = [103, 128], strides = [1, 1]} : vector<239x128xbf16> to vector<103x128xbf16>
    %c9_179 = arith.constant 9 : index
    %c0_180 = arith.constant 0 : index
    %c0_181 = arith.constant 0 : index
    %216 = vector.load %arg6[%c9_179, %c0_180, %c0_181] : memref<25x128x128xbf16, #tpu.memory_space<vmem>>, vector<1x128x128xbf16>
    %217 = vector.shape_cast %216 : vector<1x128x128xbf16> to vector<128x128xbf16>
    %cst_182 = arith.constant dense<0.000000e+00> : vector<103x128xf32>
    %218 = tpu.matmul %215, %217, %cst_182 {dimension_numbers = #tpu.dot_dimension_numbers<[1], [0], [0], [1], [0, 0, 1, 1], [], []>} : vector<103x128xbf16>, vector<128x128xbf16>, vector<103x128xf32> -> vector<103x128xf32>
    %219 = arith.addf %214, %218 : vector<103x128xf32>
    %220 = vector.extract_strided_slice %168 {offsets = [64, 0], sizes = [103, 128], strides = [1, 1]} : vector<239x128xbf16> to vector<103x128xbf16>
    %c10_183 = arith.constant 10 : index
    %c0_184 = arith.constant 0 : index
    %c0_185 = arith.constant 0 : index
    %221 = vector.load %arg6[%c10_183, %c0_184, %c0_185] : memref<25x128x128xbf16, #tpu.memory_space<vmem>>, vector<1x128x128xbf16>
    %222 = vector.shape_cast %221 : vector<1x128x128xbf16> to vector<128x128xbf16>
    %cst_186 = arith.constant dense<0.000000e+00> : vector<103x128xf32>
    %223 = tpu.matmul %220, %222, %cst_186 {dimension_numbers = #tpu.dot_dimension_numbers<[1], [0], [0], [1], [0, 0, 1, 1], [], []>} : vector<103x128xbf16>, vector<128x128xbf16>, vector<103x128xf32> -> vector<103x128xf32>
    %224 = arith.addf %219, %223 : vector<103x128xf32>
    %225 = vector.extract_strided_slice %168 {offsets = [66, 0], sizes = [103, 128], strides = [1, 1]} : vector<239x128xbf16> to vector<103x128xbf16>
    %c11_187 = arith.constant 11 : index
    %c0_188 = arith.constant 0 : index
    %c0_189 = arith.constant 0 : index
    %226 = vector.load %arg6[%c11_187, %c0_188, %c0_189] : memref<25x128x128xbf16, #tpu.memory_space<vmem>>, vector<1x128x128xbf16>
    %227 = vector.shape_cast %226 : vector<1x128x128xbf16> to vector<128x128xbf16>
    %cst_190 = arith.constant dense<0.000000e+00> : vector<103x128xf32>
    %228 = tpu.matmul %225, %227, %cst_190 {dimension_numbers = #tpu.dot_dimension_numbers<[1], [0], [0], [1], [0, 0, 1, 1], [], []>} : vector<103x128xbf16>, vector<128x128xbf16>, vector<103x128xf32> -> vector<103x128xf32>
    %229 = arith.addf %224, %228 : vector<103x128xf32>
    %230 = vector.extract_strided_slice %168 {offsets = [68, 0], sizes = [103, 128], strides = [1, 1]} : vector<239x128xbf16> to vector<103x128xbf16>
    %c12_191 = arith.constant 12 : index
    %c0_192 = arith.constant 0 : index
    %c0_193 = arith.constant 0 : index
    %231 = vector.load %arg6[%c12_191, %c0_192, %c0_193] : memref<25x128x128xbf16, #tpu.memory_space<vmem>>, vector<1x128x128xbf16>
    %232 = vector.shape_cast %231 : vector<1x128x128xbf16> to vector<128x128xbf16>
    %cst_194 = arith.constant dense<0.000000e+00> : vector<103x128xf32>
    %233 = tpu.matmul %230, %232, %cst_194 {dimension_numbers = #tpu.dot_dimension_numbers<[1], [0], [0], [1], [0, 0, 1, 1], [], []>} : vector<103x128xbf16>, vector<128x128xbf16>, vector<103x128xf32> -> vector<103x128xf32>
    %234 = arith.addf %229, %233 : vector<103x128xf32>
    %235 = vector.extract_strided_slice %168 {offsets = [70, 0], sizes = [103, 128], strides = [1, 1]} : vector<239x128xbf16> to vector<103x128xbf16>
    %c13_195 = arith.constant 13 : index
    %c0_196 = arith.constant 0 : index
    %c0_197 = arith.constant 0 : index
    %236 = vector.load %arg6[%c13_195, %c0_196, %c0_197] : memref<25x128x128xbf16, #tpu.memory_space<vmem>>, vector<1x128x128xbf16>
    %237 = vector.shape_cast %236 : vector<1x128x128xbf16> to vector<128x128xbf16>
    %cst_198 = arith.constant dense<0.000000e+00> : vector<103x128xf32>
    %238 = tpu.matmul %235, %237, %cst_198 {dimension_numbers = #tpu.dot_dimension_numbers<[1], [0], [0], [1], [0, 0, 1, 1], [], []>} : vector<103x128xbf16>, vector<128x128xbf16>, vector<103x128xf32> -> vector<103x128xf32>
    %239 = arith.addf %234, %238 : vector<103x128xf32>
    %240 = vector.extract_strided_slice %168 {offsets = [72, 0], sizes = [103, 128], strides = [1, 1]} : vector<239x128xbf16> to vector<103x128xbf16>
    %c14_199 = arith.constant 14 : index
    %c0_200 = arith.constant 0 : index
    %c0_201 = arith.constant 0 : index
    %241 = vector.load %arg6[%c14_199, %c0_200, %c0_201] : memref<25x128x128xbf16, #tpu.memory_space<vmem>>, vector<1x128x128xbf16>
    %242 = vector.shape_cast %241 : vector<1x128x128xbf16> to vector<128x128xbf16>
    %cst_202 = arith.constant dense<0.000000e+00> : vector<103x128xf32>
    %243 = tpu.matmul %240, %242, %cst_202 {dimension_numbers = #tpu.dot_dimension_numbers<[1], [0], [0], [1], [0, 0, 1, 1], [], []>} : vector<103x128xbf16>, vector<128x128xbf16>, vector<103x128xf32> -> vector<103x128xf32>
    %244 = arith.addf %239, %243 : vector<103x128xf32>
    %245 = vector.extract_strided_slice %168 {offsets = [96, 0], sizes = [103, 128], strides = [1, 1]} : vector<239x128xbf16> to vector<103x128xbf16>
    %c15_203 = arith.constant 15 : index
    %c0_204 = arith.constant 0 : index
    %c0_205 = arith.constant 0 : index
    %246 = vector.load %arg6[%c15_203, %c0_204, %c0_205] : memref<25x128x128xbf16, #tpu.memory_space<vmem>>, vector<1x128x128xbf16>
    %247 = vector.shape_cast %246 : vector<1x128x128xbf16> to vector<128x128xbf16>
    %cst_206 = arith.constant dense<0.000000e+00> : vector<103x128xf32>
    %248 = tpu.matmul %245, %247, %cst_206 {dimension_numbers = #tpu.dot_dimension_numbers<[1], [0], [0], [1], [0, 0, 1, 1], [], []>} : vector<103x128xbf16>, vector<128x128xbf16>, vector<103x128xf32> -> vector<103x128xf32>
    %249 = arith.addf %244, %248 : vector<103x128xf32>
    %250 = vector.extract_strided_slice %168 {offsets = [98, 0], sizes = [103, 128], strides = [1, 1]} : vector<239x128xbf16> to vector<103x128xbf16>
    %c16_207 = arith.constant 16 : index
    %c0_208 = arith.constant 0 : index
    %c0_209 = arith.constant 0 : index
    %251 = vector.load %arg6[%c16_207, %c0_208, %c0_209] : memref<25x128x128xbf16, #tpu.memory_space<vmem>>, vector<1x128x128xbf16>
    %252 = vector.shape_cast %251 : vector<1x128x128xbf16> to vector<128x128xbf16>
    %cst_210 = arith.constant dense<0.000000e+00> : vector<103x128xf32>
    %253 = tpu.matmul %250, %252, %cst_210 {dimension_numbers = #tpu.dot_dimension_numbers<[1], [0], [0], [1], [0, 0, 1, 1], [], []>} : vector<103x128xbf16>, vector<128x128xbf16>, vector<103x128xf32> -> vector<103x128xf32>
    %254 = arith.addf %249, %253 : vector<103x128xf32>
    %255 = vector.extract_strided_slice %168 {offsets = [100, 0], sizes = [103, 128], strides = [1, 1]} : vector<239x128xbf16> to vector<103x128xbf16>
    %c17_211 = arith.constant 17 : index
    %c0_212 = arith.constant 0 : index
    %c0_213 = arith.constant 0 : index
    %256 = vector.load %arg6[%c17_211, %c0_212, %c0_213] : memref<25x128x128xbf16, #tpu.memory_space<vmem>>, vector<1x128x128xbf16>
    %257 = vector.shape_cast %256 : vector<1x128x128xbf16> to vector<128x128xbf16>
    %cst_214 = arith.constant dense<0.000000e+00> : vector<103x128xf32>
    %258 = tpu.matmul %255, %257, %cst_214 {dimension_numbers = #tpu.dot_dimension_numbers<[1], [0], [0], [1], [0, 0, 1, 1], [], []>} : vector<103x128xbf16>, vector<128x128xbf16>, vector<103x128xf32> -> vector<103x128xf32>
    %259 = arith.addf %254, %258 : vector<103x128xf32>
    %260 = vector.extract_strided_slice %168 {offsets = [102, 0], sizes = [103, 128], strides = [1, 1]} : vector<239x128xbf16> to vector<103x128xbf16>
    %c18_215 = arith.constant 18 : index
    %c0_216 = arith.constant 0 : index
    %c0_217 = arith.constant 0 : index
    %261 = vector.load %arg6[%c18_215, %c0_216, %c0_217] : memref<25x128x128xbf16, #tpu.memory_space<vmem>>, vector<1x128x128xbf16>
    %262 = vector.shape_cast %261 : vector<1x128x128xbf16> to vector<128x128xbf16>
    %cst_218 = arith.constant dense<0.000000e+00> : vector<103x128xf32>
    %263 = tpu.matmul %260, %262, %cst_218 {dimension_numbers = #tpu.dot_dimension_numbers<[1], [0], [0], [1], [0, 0, 1, 1], [], []>} : vector<103x128xbf16>, vector<128x128xbf16>, vector<103x128xf32> -> vector<103x128xf32>
    %264 = arith.addf %259, %263 : vector<103x128xf32>
    %265 = vector.extract_strided_slice %168 {offsets = [104, 0], sizes = [103, 128], strides = [1, 1]} : vector<239x128xbf16> to vector<103x128xbf16>
    %c19_219 = arith.constant 19 : index
    %c0_220 = arith.constant 0 : index
    %c0_221 = arith.constant 0 : index
    %266 = vector.load %arg6[%c19_219, %c0_220, %c0_221] : memref<25x128x128xbf16, #tpu.memory_space<vmem>>, vector<1x128x128xbf16>
    %267 = vector.shape_cast %266 : vector<1x128x128xbf16> to vector<128x128xbf16>
    %cst_222 = arith.constant dense<0.000000e+00> : vector<103x128xf32>
    %268 = tpu.matmul %265, %267, %cst_222 {dimension_numbers = #tpu.dot_dimension_numbers<[1], [0], [0], [1], [0, 0, 1, 1], [], []>} : vector<103x128xbf16>, vector<128x128xbf16>, vector<103x128xf32> -> vector<103x128xf32>
    %269 = arith.addf %264, %268 : vector<103x128xf32>
    %270 = vector.extract_strided_slice %168 {offsets = [128, 0], sizes = [103, 128], strides = [1, 1]} : vector<239x128xbf16> to vector<103x128xbf16>
    %c20_223 = arith.constant 20 : index
    %c0_224 = arith.constant 0 : index
    %c0_225 = arith.constant 0 : index
    %271 = vector.load %arg6[%c20_223, %c0_224, %c0_225] : memref<25x128x128xbf16, #tpu.memory_space<vmem>>, vector<1x128x128xbf16>
    %272 = vector.shape_cast %271 : vector<1x128x128xbf16> to vector<128x128xbf16>
    %cst_226 = arith.constant dense<0.000000e+00> : vector<103x128xf32>
    %273 = tpu.matmul %270, %272, %cst_226 {dimension_numbers = #tpu.dot_dimension_numbers<[1], [0], [0], [1], [0, 0, 1, 1], [], []>} : vector<103x128xbf16>, vector<128x128xbf16>, vector<103x128xf32> -> vector<103x128xf32>
    %274 = arith.addf %269, %273 : vector<103x128xf32>
    %275 = vector.extract_strided_slice %168 {offsets = [130, 0], sizes = [103, 128], strides = [1, 1]} : vector<239x128xbf16> to vector<103x128xbf16>
    %c21_227 = arith.constant 21 : index
    %c0_228 = arith.constant 0 : index
    %c0_229 = arith.constant 0 : index
    %276 = vector.load %arg6[%c21_227, %c0_228, %c0_229] : memref<25x128x128xbf16, #tpu.memory_space<vmem>>, vector<1x128x128xbf16>
    %277 = vector.shape_cast %276 : vector<1x128x128xbf16> to vector<128x128xbf16>
    %cst_230 = arith.constant dense<0.000000e+00> : vector<103x128xf32>
    %278 = tpu.matmul %275, %277, %cst_230 {dimension_numbers = #tpu.dot_dimension_numbers<[1], [0], [0], [1], [0, 0, 1, 1], [], []>} : vector<103x128xbf16>, vector<128x128xbf16>, vector<103x128xf32> -> vector<103x128xf32>
    %279 = arith.addf %274, %278 : vector<103x128xf32>
    %280 = vector.extract_strided_slice %168 {offsets = [132, 0], sizes = [103, 128], strides = [1, 1]} : vector<239x128xbf16> to vector<103x128xbf16>
    %c22_231 = arith.constant 22 : index
    %c0_232 = arith.constant 0 : index
    %c0_233 = arith.constant 0 : index
    %281 = vector.load %arg6[%c22_231, %c0_232, %c0_233] : memref<25x128x128xbf16, #tpu.memory_space<vmem>>, vector<1x128x128xbf16>
    %282 = vector.shape_cast %281 : vector<1x128x128xbf16> to vector<128x128xbf16>
    %cst_234 = arith.constant dense<0.000000e+00> : vector<103x128xf32>
    %283 = tpu.matmul %280, %282, %cst_234 {dimension_numbers = #tpu.dot_dimension_numbers<[1], [0], [0], [1], [0, 0, 1, 1], [], []>} : vector<103x128xbf16>, vector<128x128xbf16>, vector<103x128xf32> -> vector<103x128xf32>
    %284 = arith.addf %279, %283 : vector<103x128xf32>
    %285 = vector.extract_strided_slice %168 {offsets = [134, 0], sizes = [103, 128], strides = [1, 1]} : vector<239x128xbf16> to vector<103x128xbf16>
    %c23_235 = arith.constant 23 : index
    %c0_236 = arith.constant 0 : index
    %c0_237 = arith.constant 0 : index
    %286 = vector.load %arg6[%c23_235, %c0_236, %c0_237] : memref<25x128x128xbf16, #tpu.memory_space<vmem>>, vector<1x128x128xbf16>
    %287 = vector.shape_cast %286 : vector<1x128x128xbf16> to vector<128x128xbf16>
    %cst_238 = arith.constant dense<0.000000e+00> : vector<103x128xf32>
    %288 = tpu.matmul %285, %287, %cst_238 {dimension_numbers = #tpu.dot_dimension_numbers<[1], [0], [0], [1], [0, 0, 1, 1], [], []>} : vector<103x128xbf16>, vector<128x128xbf16>, vector<103x128xf32> -> vector<103x128xf32>
    %289 = arith.addf %284, %288 : vector<103x128xf32>
    %290 = vector.extract_strided_slice %168 {offsets = [136, 0], sizes = [103, 128], strides = [1, 1]} : vector<239x128xbf16> to vector<103x128xbf16>
    %c24_239 = arith.constant 24 : index
    %c0_240 = arith.constant 0 : index
    %c0_241 = arith.constant 0 : index
    %291 = vector.load %arg6[%c24_239, %c0_240, %c0_241] : memref<25x128x128xbf16, #tpu.memory_space<vmem>>, vector<1x128x128xbf16>
    %292 = vector.shape_cast %291 : vector<1x128x128xbf16> to vector<128x128xbf16>
    %cst_242 = arith.constant dense<0.000000e+00> : vector<103x128xf32>
    %293 = tpu.matmul %290, %292, %cst_242 {dimension_numbers = #tpu.dot_dimension_numbers<[1], [0], [0], [1], [0, 0, 1, 1], [], []>} : vector<103x128xbf16>, vector<128x128xbf16>, vector<103x128xf32> -> vector<103x128xf32>
    %294 = arith.addf %289, %293 : vector<103x128xf32>
    %c0_243 = arith.constant 0 : index
    %c0_244 = arith.constant 0 : index
    %295 = vector.load %arg7[%c0_243, %c0_244] : memref<1x128xf32, #tpu.memory_space<vmem>>, vector<1x128xf32>
    %296 = vector.broadcast %295 : vector<1x128xf32> to vector<103x128xf32>
    %297 = arith.addf %294, %296 : vector<103x128xf32>
    %cst_245 = arith.constant 0.000000e+00 : f32
    %298 = vector.broadcast %cst_245 : f32 to vector<103x128xf32>
    %299 = arith.maximumf %297, %298 : vector<103x128xf32>
    %c0_246 = arith.constant 0 : index
    %c0_247 = arith.constant 0 : index
    %300 = vector.load %arg8[%c0_246, %c0_247] : memref<1x128xf32, #tpu.memory_space<vmem>>, vector<1x128xf32>
    %301 = vector.broadcast %300 : vector<1x128xf32> to vector<103x128xf32>
    %302 = arith.mulf %299, %301 : vector<103x128xf32>
    %c0_248 = arith.constant 0 : index
    %c0_249 = arith.constant 0 : index
    %303 = vector.load %arg9[%c0_248, %c0_249] : memref<1x128xf32, #tpu.memory_space<vmem>>, vector<1x128xf32>
    %304 = vector.broadcast %303 : vector<1x128xf32> to vector<103x128xf32>
    %305 = arith.addf %302, %304 : vector<103x128xf32>
    %306 = vector.extract_strided_slice %305 {offsets = [0, 0], sizes = [101, 128], strides = [1, 1]} : vector<103x128xf32> to vector<101x128xf32>
    %307 = vector.extract_strided_slice %305 {offsets = [2, 0], sizes = [101, 128], strides = [1, 1]} : vector<103x128xf32> to vector<101x128xf32>
    %308 = arith.maximumf %306, %307 : vector<101x128xf32>
    %309 = vector.extract_strided_slice %308 {offsets = [0, 0], sizes = [1, 128], strides = [1, 1]} : vector<101x128xf32> to vector<1x128xf32>
    %310 = vector.extract_strided_slice %308 {offsets = [32, 0], sizes = [1, 128], strides = [1, 1]} : vector<101x128xf32> to vector<1x128xf32>
    %311 = arith.maximumf %309, %310 : vector<1x128xf32>
    %312 = arith.truncf %311 : vector<1x128xf32> to vector<1x128xbf16>
    %c0_250 = arith.constant 0 : index
    %c0_251 = arith.constant 0 : index
    %313 = vector.load %arg10[%c0_250, %c0_251] : memref<128x128xbf16, #tpu.memory_space<vmem>>, vector<128x128xbf16>
    %cst_252 = arith.constant dense<0.000000e+00> : vector<1x128xf32>
    %314 = tpu.matmul %312, %313, %cst_252 {dimension_numbers = #tpu.dot_dimension_numbers<[1], [0], [0], [1], [0, 0, 1, 1], [], []>} : vector<1x128xbf16>, vector<128x128xbf16>, vector<1x128xf32> -> vector<1x128xf32>
    %c0_253 = arith.constant 0 : index
    %c0_254 = arith.constant 0 : index
    %315 = vector.load %arg11[%c0_253, %c0_254] : memref<1x128xf32, #tpu.memory_space<vmem>>, vector<1x128xf32>
    %316 = arith.addf %314, %315 : vector<1x128xf32>
    %cst_255 = arith.constant 0.000000e+00 : f32
    %317 = vector.broadcast %cst_255 : f32 to vector<1x128xf32>
    %318 = arith.maximumf %316, %317 : vector<1x128xf32>
    %319 = arith.truncf %318 : vector<1x128xf32> to vector<1x128xbf16>
    %c0_256 = arith.constant 0 : index
    %c0_257 = arith.constant 0 : index
    %320 = vector.load %arg12[%c0_256, %c0_257] : memref<128x128xbf16, #tpu.memory_space<vmem>>, vector<128x128xbf16>
    %cst_258 = arith.constant dense<0.000000e+00> : vector<1x128xf32>
    %321 = tpu.matmul %319, %320, %cst_258 {dimension_numbers = #tpu.dot_dimension_numbers<[1], [0], [0], [1], [0, 0, 1, 1], [], []>} : vector<1x128xbf16>, vector<128x128xbf16>, vector<1x128xf32> -> vector<1x128xf32>
    %c0_259 = arith.constant 0 : index
    %c0_260 = arith.constant 0 : index
    %322 = vector.load %arg13[%c0_259, %c0_260] : memref<1x128xf32, #tpu.memory_space<vmem>>, vector<1x128xf32>
    %323 = arith.addf %321, %322 : vector<1x128xf32>
    %cst_261 = arith.constant dense<0xFF800000> : vector<1xf32>
    %324 = vector.multi_reduction <maximumf>, %323, %cst_261 [1] : vector<1x128xf32> to vector<1xf32>
    %325 = vector.shape_cast %324 : vector<1xf32> to vector<1x1xf32>
    %326 = vector.broadcast %325 : vector<1x1xf32> to vector<1x128xf32>
    %327 = arith.subf %323, %326 : vector<1x128xf32>
    %328 = math.exp %327 : vector<1x128xf32>
    %cst_262 = arith.constant dense<0.000000e+00> : vector<1xf32>
    %329 = vector.multi_reduction <add>, %328, %cst_262 [1] : vector<1x128xf32> to vector<1xf32>
    %330 = vector.shape_cast %329 : vector<1xf32> to vector<1x1xf32>
    %331 = math.log %330 : vector<1x1xf32>
    %332 = vector.broadcast %331 : vector<1x1xf32> to vector<1x128xf32>
    %333 = arith.subf %327, %332 : vector<1x128xf32>
    %c0_263 = arith.constant 0 : index
    %c0_264 = arith.constant 0 : index
    %c0_265 = arith.constant 0 : index
    %334 = vector.load %arg14[%c0_263, %c0_264, %c0_265] : memref<1x1x128xf32, #tpu.memory_space<vmem>>, vector<1x1x128xf32>
    %335 = vector.shape_cast %334 : vector<1x1x128xf32> to vector<1x128xf32>
    %336 = vector.shape_cast %333 : vector<1x128xf32> to vector<1x1x128xf32>
    tpu.vector_store %arg14[%c0_263, %c0_264, %c0_265], %336 {strides = array<i32>} : memref<1x1x128xf32, #tpu.memory_space<vmem>>, vector<1x1x128xf32>,
    return
  }
  func.func @transform_0(%arg0: i32) -> (i32, i32, i32) {
    %c0_i32 = arith.constant 0 : i32
    %c0_i32_0 = arith.constant 0 : i32
    %c0_i32_1 = arith.constant 0 : i32
    return %arg0, %c0_i32, %c0_i32_0 : i32, i32, i32
  }
  func.func @transform_1(%arg0: i32) -> (i32, i32, i32) {
    %c0_i32 = arith.constant 0 : i32
    %c0_i32_0 = arith.constant 0 : i32
    %c0_i32_1 = arith.constant 0 : i32
    %c0_i32_2 = arith.constant 0 : i32
    return %c0_i32, %c0_i32_0, %c0_i32_1 : i32, i32, i32
  }
  func.func @transform_2(%arg0: i32) -> (i32, i32) {
    %c0_i32 = arith.constant 0 : i32
    %c0_i32_0 = arith.constant 0 : i32
    %c0_i32_1 = arith.constant 0 : i32
    return %c0_i32, %c0_i32_0 : i32, i32
  }
  func.func @transform_3(%arg0: i32) -> (i32, i32) {
    %c0_i32 = arith.constant 0 : i32
    %c0_i32_0 = arith.constant 0 : i32
    %c0_i32_1 = arith.constant 0 : i32
    return %c0_i32, %c0_i32_0 : i32, i32
  }
  func.func @transform_4(%arg0: i32) -> (i32, i32) {
    %c0_i32 = arith.constant 0 : i32
    %c0_i32_0 = arith.constant 0 : i32
    %c0_i32_1 = arith.constant 0 : i32
    return %c0_i32, %c0_i32_0 : i32, i32
  }
  func.func @transform_5(%arg0: i32) -> (i32, i32, i32) {
    %c0_i32 = arith.constant 0 : i32
    %c0_i32_0 = arith.constant 0 : i32
    %c0_i32_1 = arith.constant 0 : i32
    %c0_i32_2 = arith.constant 0 : i32
    return %c0_i32, %c0_i32_0, %c0_i32_1 : i32, i32, i32
  }
  func.func @transform_6(%arg0: i32) -> (i32, i32) {
    %c0_i32 = arith.constant 0 : i32
    %c0_i32_0 = arith.constant 0 : i32
    %c0_i32_1 = arith.constant 0 : i32
    return %c0_i32, %c0_i32_0 : i32, i32
  }
  func.func @transform_7(%arg0: i32) -> (i32, i32) {
    %c0_i32 = arith.constant 0 : i32
    %c0_i32_0 = arith.constant 0 : i32
    %c0_i32_1 = arith.constant 0 : i32
    return %c0_i32, %c0_i32_0 : i32, i32
  }
  func.func @transform_8(%arg0: i32) -> (i32, i32) {
    %c0_i32 = arith.constant 0 : i32
    %c0_i32_0 = arith.constant 0 : i32
    %c0_i32_1 = arith.constant 0 : i32
    return %c0_i32, %c0_i32_0 : i32, i32
  }
  func.func @transform_9(%arg0: i32) -> (i32, i32) {
    %c0_i32 = arith.constant 0 : i32
    %c0_i32_0 = arith.constant 0 : i32
    %c0_i32_1 = arith.constant 0 : i32
    return %c0_i32, %c0_i32_0 : i32, i32
  }
  func.func @transform_10(%arg0: i32) -> (i32, i32) {
    %c0_i32 = arith.constant 0 : i32
    %c0_i32_0 = arith.constant 0 : i32
    %c0_i32_1 = arith.constant 0 : i32
    return %c0_i32, %c0_i32_0 : i32, i32
  }
  func.func @transform_11(%arg0: i32) -> (i32, i32) {
    %c0_i32 = arith.constant 0 : i32
    %c0_i32_0 = arith.constant 0 : i32
    %c0_i32_1 = arith.constant 0 : i32
    return %c0_i32, %c0_i32_0 : i32, i32
  }
  func.func @transform_12(%arg0: i32) -> (i32, i32) {
    %c0_i32 = arith.constant 0 : i32
    %c0_i32_0 = arith.constant 0 : i32
    %c0_i32_1 = arith.constant 0 : i32
    return %c0_i32, %c0_i32_0 : i32, i32
  }
  func.func @transform_13(%arg0: i32) -> (i32, i32, i32) {
    %c0_i32 = arith.constant 0 : i32
    %c0_i32_0 = arith.constant 0 : i32
    %c0_i32_1 = arith.constant 0 : i32
    return %arg0, %c0_i32, %c0_i32_0 : i32, i32, i32
  }
}

</mosaic_0001>

<bundles_post_ra>
// kernel: net_forward.1
= control target key start
LH: loop header
LB: loop body
LE: loop exit
PB: predicated region body
PF: predicated region fallthrough
CT: control target
= control target key end

     0   :  { %s17456_s0 = inlined_call_operand.vmem [shape: bf16[2,324,8], index: 0, kind: input, shape index: {}]   ;;  %s17457_s1 = inlined_call_operand.vmem [shape: bf16[25,8,128], index: 1, kind: input, shape index: {}]   ;;  %s17458_s2 = inlined_call_operand.vmem [shape: f32[1,128], index: 2, kind: input, shape index: {}]   ;;  %s17459_s3 = inlined_call_operand.vmem [shape: f32[1,128], index: 3, kind: input, shape index: {}]   ;;  %s17460_s4 = inlined_call_operand.vmem [shape: f32[1,128], index: 4, kind: input, shape index: {}]   ;;  %s17461_s5 = inlined_call_operand.vmem [shape: bf16[25,128,128], index: 5, kind: input, shape index: {}]   ;;  %s17462_s6 = inlined_call_operand.vmem [shape: f32[1,128], index: 6, kind: input, shape index: {}]   ;;  %s17463_s7 = inlined_call_operand.vmem [shape: f32[1,128], index: 7, kind: input, shape index: {}]   ;;  %s17464_s8 = inlined_call_operand.vmem [shape: f32[1,128], index: 8, kind: input, shape index: {}]   ;;  %s17465_s9 = inlined_call_operand.vmem [shape: bf16[128,128], index: 9, kind: input, shape index: {}]   ;;  %s17466_s10 = inlined_call_operand.vmem [shape: f32[1,128], index: 10, kind: input, shape index: {}]   ;;  %s17467_s11 = inlined_call_operand.vmem [shape: bf16[128,128], index: 11, kind: input, shape index: {}]   ;;  %s17468_s12 = inlined_call_operand.vmem [shape: f32[1,128], index: 12, kind: input, shape index: {}]   ;;  %s17469_s13 = inlined_call_operand.hbm [shape: f32[2,1,128], index: 13, kind: output, shape index: {}]  }
   0x1   :  { %17548 = sst [smem:[#allocation38_spill]] %s17456_s0 }
   0x2   :  { %17549 = sst [smem:[#allocation39_spill]] %s17457_s1 }
   0x3   :  { %17550 = sst [smem:[#allocation40_spill]] %s17458_s2 }
   0x4   :  { %18 = vsyncpa [#allocation3], 0 }
   0x5   :  { %20 = vsyncpa [#allocation3 + $0x1], 0  ;;  %s13511_s25 = smov 0   ;;  %s13513_s26 = smov 0  }
   0x6   :  { %s13515_s27 = smov 0   ;;  %s13517_s28 = smov 0  }
   0x7 LB: > { %s13532_s29 = sadd.s32 4294967295, %s13439_s28   ;;  %s10670_s30 = sadd.s32 4294967294, %s13439_s28   ;;  %s13439_s28 = sphi %s13517_s28, %s17739_s28   ;;  %s13435_s27 = sphi %s13515_s27, %s17738_s27   ;;  %s13431_s26 = sphi %s13513_s26, %s17737_s26   ;;  %s13427_s25 = sphi %s13511_s25, %s17736_s25  }
   0x8   : > { %s13536_s14 = sadd.s32 1, %s13439_s28   ;;  %s311_s15 = sadd.s32 1, %s13435_s27 }
   0x9   : > { %s308_s16 = ssub.s32 %s13439_s28, %s13536_s14  ;;  %p321_p0 = scmp.ne.s32.totalorder %s13435_s27, %s13431_s26 }
   0xa   : > { %p309_p1 = scmp.eq.s32.totalorder %s308_s16, 0  ;;  %p322_p2 = scmp.eq.s32.totalorder %s13532_s29, 1 }
   0xb   : > { %p327_p3 = scmp.ne.s32.totalorder %s13431_s26, %s13427_s25  ;;  %p328_p4 = scmp.eq.s32.totalorder %s10670_s30, 1 }
   0xc   : > { %s13547_s17 = scalar_select %p309_p1, %s13435_s27, %s311_s15  }
   0xd   : > { %p13549_p5 = por %p322_p2, %p321_p0  ;;  %p13553_p6 = por %p328_p4, %p327_p3 }
   0xe   : > { %17551 = sst [smem:[#allocation5_spill]] %s13547_s17  ;;  %p10673_p7 = scmp.ge.s32.totalorder %s13439_s28, 1 }
   0xf   : > { %p390_p8 = scmp.lt.s32.totalorder %s13439_s28, 3 }
  0x11   : > { %p391_p9 = pnand %p10673_p7, %p390_p8 }
  0x13   : > { %394 = sbr.rel (%p391_p9) target bundleno = 3158 (0xc56), region = 72 }
  0x18   : > { %s17554_s1 = sld [smem:[#allocation39_spill]]  ;;  %vm740_vm0 = vcmask 1043456   ;;  %p433_p10 = scmp.lt.s32.totalorder %s13532_s29, 1  ;;  %vm691_vm1 = vcmask 64512   ;;  %vm558_vm2 = vsmask.f32 7424 }
  0x19   : > { %s17555_s0 = sld [smem:[#allocation38_spill]]  ;;  %vm963_vm3 = vcmask 1046528   ;;  %vm1175_vm4 = vsmask.f32 6400  ;;  %vm1431_vm5 = vcmask 1045504   ;;  %vm7937_vm6 = vcmask 1044480   ;;  %s10611_s16 = scalar_lea.hbm %s17469_s13, %s13532_s29 }
  0x1a   : > { %s434_s15 = scalar_select %p433_p10, %s13532_s29, 1  ;;  %vm10588_vm7 = vcmask 1040384  }
  0x1b   : > { %s17687_s2 = sld [smem:[#allocation40_spill]]  ;;  %s431_s24 = sand.u32 1, %s13431_s26  }
  0x1c   : > { %s13284_s23 = smul.u32 164, %s434_s15  ;;  %s432_s20 = scalar_lea.vmem [#allocation2], %s431_s24 }
  0x1d   : > { %s10613_s21 = sshll.u32 %s432_s20, 4  ;;  %s10615_s22 = sshll.u32 %s10611_s16, 4  ;;  %s10614_s21 = int_to_ptr.vmem [resolvable:$true] %s10613_s21  ;;  %s10616_s22 = int_to_ptr.hbm [resolvable:$true] %s10615_s22 }
  0x1e   : > { %v10675_v0 = vld [vmem:[%s17554_s1 + $0x4] sm:$0xf]  ;;  %v471_v1 = vld [vmem:[%s17554_s1] sm:$0xf]  ;;  %v10768_v4 = vld [vmem:[%s17554_s1 + $0x8] sm:$0xf] }
  0x1f   : > { %v742_v2 = vsel %vm740_vm0, %v10675_v0, 0  ;;  %v866_v3 = vsel %vm740_vm0, %v471_v1, 0  ;;  %v1046_v5 = vsel %vm740_vm0, %v10768_v4, 0  ;;  %v10802_v6 = vld [vmem:[%s17554_s1 + $0x10] sm:$0xf]  ;;  %s13584_s17 = scalar_lea.vmem %s17555_s0, %s13284_s23  ;;  %s10603_s23 = scalar_lea.sflag [#allocation3], %s431_s24 }
  0x20   : > { %751 = vmatpush.bf16.msra.mxu0 %v742_v2  ;;  %875 = vmatpush.bf16.msra.mxu1 %v866_v3  ;;  %v1514_v7 = vsel %vm740_vm0, %v10802_v6, 0  ;;  %v10785_v8 = vld [vmem:[%s17554_s1 + $0xc] sm:$0xf]  ;;  %v13587_v10 = vld [vmem:[%s13584_s17] sm:$0xff]   ;;  %v13608_v35 = vld [vmem:[%s13584_s17 + $0x10] sm:$0xff]  ;;  %s13397_s29 = scalar_lea.hbm %s17469_s13, 2 }
  0x21   : > { %1055 = vmatpush.bf16.msra.mxu2 %v1046_v5  ;;  %v1302_v9 = vsel %vm740_vm0, %v10785_v8, 0  ;;  %v13590_v11 = vld [vmem:[%s13584_s17 + $0x8] sm:$0xff]  ;;  %v957_v12 = vld [vmem:[%s13584_s17] sm:$0xe]  ;;  %v560_v13 = vshrl.u32 %v13587_v10, 16  ;;  %v562_v14 = vshll.u32 %v13587_v10, 16  ;;  %v13263_v15 = vunpack.c.h.b16 %v13587_v10 }
  0x22   : > { %1311 = vmatpush.bf16.msra.mxu3 %v1302_v9  ;;  %v961_v16 = vunpack.c.l.b16 %v957_v12  ;;  %v567_v17 = vshll.u32 %v13590_v11, 16  ;;  %v571_v18 = vshrl.u32 %v13590_v11, 16  ;;  %v965_v21 = vrot.slane %v13590_v11, 1  ;;  %v13623_v48 = vld [vmem:[%s13584_s17 + $0x18] sm:$0xff]  ;;  %v13637_v60 = vld [vmem:[%s13584_s17 + $0x20] sm:$0xff]  ;;  %v13651_v8 = vld [vmem:[%s13584_s17 + $0x28] sm:$0xff] }
  0x23   : > { %10752 = vmatmul.msk.bf16.vlgmr.msra.gmra.mxu1 %vm691_vm1, %v13587_v10  ;;  %v564_v19 = vrot.slane %v562_v14, 1  ;;  %v575_v37 = vshll.u32 %v13608_v35, 16  ;;  %v579_v38 = vshrl.u32 %v13608_v35, 16  ;;  %v967_v39 = vrot.slane %v13608_v35, 1 }
  0x24   : > { %1523 = vmatpush.bf16.msrb.mxu0 %v1514_v7  ;;  %v962_v20 = vpack.c.b16 %v13263_v15, %v961_v16  ;;  %v569_v22 = vrot.slane %v567_v17, 1  ;;  %v1184_v23 = vrot.slane %v571_v18, 1  ;;  %v1185_v24 = vrot.slane %v567_v17, 2 }
  0x25   : > { %v565_v25 = vor.u32 %v564_v19, %v560_v13  ;;  %v577_v41 = vrot.slane %v575_v37, 1  ;;  %v1188_v42 = vrot.slane %v579_v38, 1  ;;  %v1189_v43 = vrot.slane %v575_v37, 2 }
  0x26   : > { %v964_v26 = vrot.slane %v962_v20, 1  ;;  %v1177_v27 = vshrl.u32 %v962_v20, 16  ;;  %v1180_v28 = vshll.u32 %v962_v20, 16  ;;  %v1186_v29 = vor.u32 %v1185_v24, %v1184_v23  ;;  %v13665_v23 = vld [vmem:[%s13584_s17 + $0x30] sm:$0xff] }
  0x27   : > { %v570_v30 = vsel %vm558_vm2, %v565_v25, %v569_v22  ;;  %v573_v40 = vor.u32 %v571_v18, %v569_v22  ;;  %v968_v45 = vsel %vm963_vm3, %v965_v21, %v967_v39  ;;  %v1190_v46 = vor.u32 %v1189_v43, %v1188_v42 }
  0x28   : > { %v966_v31 = vsel %vm963_vm3, %v964_v26, %v965_v21  ;;  %v1179_v32 = vrot.slane %v1177_v27, 1  ;;  %v1182_v33 = vrot.slane %v1180_v28, 2  ;;  %10736 = vmatmul.msk.bf16.vlgmr.msra.gmra.mxu0 %vm691_vm1, %v570_v30  ;;  %v583_v49 = vshll.u32 %v13623_v48, 16 }
  0x29   : > { %10769 = vmatmul.msk.bf16.vlgmr.msra.gmra.mxu2 %vm691_vm1, %v966_v31  ;;  %v578_v44 = vsel %vm558_vm2, %v573_v40, %v577_v41  ;;  %v1191_v47 = vsel %vm1175_vm4, %v1186_v29, %v1190_v46  ;;  %v587_v50 = vshrl.u32 %v13623_v48, 16  ;;  %v581_v51 = vor.u32 %v579_v38, %v577_v41 }
  0x2a   : > { %v1183_v34 = vor.u32 %v1182_v33, %v1179_v32  ;;  %v585_v52 = vrot.slane %v583_v49, 1  ;;  %v969_v53 = vrot.slane %v13623_v48, 1  ;;  %v1193_v55 = vrot.slane %v583_v49, 2  ;;  %v13693_v49 = vld [vmem:[%s13584_s17 + $0x40] sm:$0xff] }
  0x2b   : > { %v1192_v54 = vrot.slane %v587_v50, 1  ;;  %v591_v61 = vshll.u32 %v13637_v60, 16  ;;  %v595_v62 = vshrl.u32 %v13637_v60, 16  ;;  %v971_v1 = vrot.slane %v13637_v60, 1 }
  0x2c   : > { %v1187_v36 = vsel %vm1175_vm4, %v1183_v34, %v1186_v29  ;;  %v586_v56 = vsel %vm558_vm2, %v581_v51, %v585_v52  ;;  %v970_v57 = vsel %vm963_vm3, %v967_v39, %v969_v53  ;;  %v589_v63 = vor.u32 %v587_v50, %v585_v52 }
  0x2d   : > { %10786 = vmatmul.msk.bf16.vlgmr.msra.gmra.mxu3 %vm691_vm1, %v1187_v36  ;;  %v1194_v58 = vor.u32 %v1193_v55, %v1192_v54  ;;  %v593_v0 = vrot.slane %v591_v61, 1  ;;  %v1196_v2 = vrot.slane %v595_v62, 1  ;;  %v1197_v3 = vrot.slane %v591_v61, 2  ;;  %v13679_v36 = vld [vmem:[%s13584_s17 + $0x38] sm:$0xff] }
  0x2e   : > { %v972_v5 = vsel %vm963_vm3, %v969_v53, %v971_v1  ;;  %v599_v9 = vshll.u32 %v13651_v8, 16  ;;  %v603_v12 = vshrl.u32 %v13651_v8, 16  ;;  %v973_v16 = vrot.slane %v13651_v8, 1 }
  0x2f   : > { %v1195_v59 = vsel %vm1175_vm4, %v1190_v46, %v1194_v58  ;;  %v594_v4 = vsel %vm558_vm2, %v589_v63, %v593_v0  ;;  %v1198_v6 = vor.u32 %v1197_v3, %v1196_v2  ;;  %v597_v13 = vor.u32 %v595_v62, %v593_v0  ;;  %v13707_v62 = vld [vmem:[%s13584_s17 + $0x48] sm:$0xff] }
  0x30   : > { %v601_v14 = vrot.slane %v599_v9, 1  ;;  %v1200_v17 = vrot.slane %v603_v12, 1  ;;  %v1201_v18 = vrot.slane %v599_v9, 2  ;;  %v974_v20 = vsel %vm963_vm3, %v971_v1, %v973_v16 }
  0x31   : > { %v1199_v7 = vsel %vm1175_vm4, %v1194_v58, %v1198_v6  ;;  %v607_v24 = vshll.u32 %v13665_v23, 16  ;;  %v611_v25 = vshrl.u32 %v13665_v23, 16  ;;  %v975_v28 = vrot.slane %v13665_v23, 1 }
  0x32   : > { %v602_v19 = vsel %vm558_vm2, %v597_v13, %v601_v14  ;;  %v1202_v21 = vor.u32 %v1201_v18, %v1200_v17  ;;  %v605_v26 = vor.u32 %v603_v12, %v601_v14  ;;  %v615_v37 = vshll.u32 %v13679_v36, 16  ;;  %v12914_v18 = vld [vmem:[%s13584_s17 + $0x50] sm:$0xff] }
  0x33   : > { %10753 = vmatmul.msk.bf16.gmra.mxu1 %vm691_vm1, %v13590_v11  ;;  %v609_v27 = vrot.slane %v607_v24, 1  ;;  %v1204_v29 = vrot.slane %v611_v25, 1  ;;  %v1205_v30 = vrot.slane %v607_v24, 2  ;;  %v976_v32 = vsel %vm963_vm3, %v973_v16, %v975_v28 }
  0x34   : > { %v1203_v22 = vsel %vm1175_vm4, %v1198_v6, %v1202_v21  ;;  %v619_v38 = vshrl.u32 %v13679_v36, 16  ;;  %v617_v40 = vrot.slane %v615_v37, 1  ;;  %v977_v41 = vrot.slane %v13679_v36, 1 }
  0x35   : > { %v610_v31 = vsel %vm558_vm2, %v605_v26, %v609_v27  ;;  %v1206_v33 = vor.u32 %v1205_v30, %v1204_v29  ;;  %v613_v39 = vor.u32 %v611_v25, %v609_v27  ;;  %v1209_v43 = vrot.slane %v615_v37, 2 }
  0x36   : > { %v1208_v42 = vrot.slane %v619_v38, 1  ;;  %v623_v50 = vshll.u32 %v13693_v49, 16  ;;  %v627_v51 = vshrl.u32 %v13693_v49, 16  ;;  %v621_v52 = vor.u32 %v619_v38, %v617_v40 }
  0x37   : > { %v1207_v34 = vsel %vm1175_vm4, %v1202_v21, %v1206_v33  ;;  %v979_v54 = vrot.slane %v13693_v49, 1  ;;  %v631_v63 = vshll.u32 %v13707_v62, 16  ;;  %v635_v0 = vshrl.u32 %v13707_v62, 16 }
  0x38   : > { %10737 = vmatmul.msk.bf16.gmra.mxu0 %vm691_vm1, %v578_v44  ;;  %v618_v44 = vsel %vm558_vm2, %v613_v39, %v617_v40  ;;  %v1210_v46 = vor.u32 %v1209_v43, %v1208_v42  ;;  %v625_v53 = vrot.slane %v623_v50, 1  ;;  %v1212_v55 = vrot.slane %v627_v51, 1 }
  0x39   : > { %10770 = vmatmul.msk.bf16.gmra.mxu2 %vm691_vm1, %v968_v45  ;;  %v978_v45 = vsel %vm963_vm3, %v975_v28, %v977_v41  ;;  %v980_v58 = vsel %vm963_vm3, %v977_v41, %v979_v54  ;;  %v633_v3 = vrot.slane %v631_v63, 1  ;;  %v1217_v6 = vrot.slane %v631_v63, 2 }
  0x3a   : > { %v629_v2 = vor.u32 %v627_v51, %v625_v53  ;;  %v643_v24 = vshrl.u32 %v12914_v18, 16 }
  0x3b   : > { %v637_v29 = vor.u32 %v635_v0, %v633_v3 }
  0x3c   : > { %v634_v9 = vsel %vm558_vm2, %v629_v2, %v633_v3 }
  0x3d   : > { %10787 = vmatmul.msk.bf16.gmra.mxu3 %vm691_vm1, %v1191_v47  ;;  %v1211_v47 = vsel %vm1175_vm4, %v1206_v33, %v1210_v46 }
  0x43   : > { %10754 = vmatmul.msk.bf16.gmra.mxu1 %vm691_vm1, %v13608_v35 }
  0x48   : > { %10738 = vmatmul.msk.bf16.gmra.mxu0 %vm691_vm1, %v586_v56  ;;  %v1213_v56 = vrot.slane %v623_v50, 2 }
  0x49   : > { %10771 = vmatmul.msk.bf16.gmra.mxu2 %vm691_vm1, %v970_v57  ;;  %v626_v57 = vsel %vm558_vm2, %v621_v52, %v625_v53 }
  0x4d   : > { %10788 = vmatmul.msk.bf16.gmra.mxu3 %vm691_vm1, %v1195_v59  ;;  %v1214_v59 = vor.u32 %v1213_v56, %v1212_v55 }
  0x4f   : > { %v1215_v61 = vsel %vm1175_vm4, %v1210_v46, %v1214_v59 }
  0x53   : > { %10755 = vmatmul.msk.bf16.gmra.mxu1 %vm691_vm1, %v13623_v48 }
  0x58   : > { %10739 = vmatmul.msk.bf16.gmra.mxu0 %vm691_vm1, %v594_v4  ;;  %v981_v4 = vrot.slane %v13707_v62, 1 }
  0x59   : > { %10772 = vmatmul.msk.bf16.gmra.mxu2 %vm691_vm1, %v972_v5  ;;  %v1216_v5 = vrot.slane %v635_v0, 1 }
  0x5a   : > { %v982_v12 = vsel %vm963_vm3, %v979_v54, %v981_v4 }
  0x5b   : > { %v1218_v13 = vor.u32 %v1217_v6, %v1216_v5 }
  0x5d   : > { %10789 = vmatmul.msk.bf16.gmra.mxu3 %vm691_vm1, %v1199_v7  ;;  %v1219_v17 = vsel %vm1175_vm4, %v1214_v59, %v1218_v13 }
  0x63   : > { %10756 = vmatmul.msk.bf16.gmra.mxu1 %vm691_vm1, %v13637_v60 }
  0x68   : > { %10740 = vmatmul.msk.bf16.gmra.mxu0 %vm691_vm1, %v602_v19 }
  0x69   : > { %10773 = vmatmul.msk.bf16.gmra.mxu2 %vm691_vm1, %v974_v20 }
  0x6d   : > { %10790 = vmatmul.msk.bf16.gmra.mxu3 %vm691_vm1, %v1203_v22  ;;  %v639_v22 = vshll.u32 %v12914_v18, 16 }
  0x6f   : > { %v641_v30 = vrot.slane %v639_v22, 1  ;;  %v1221_v33 = vrot.slane %v639_v22, 2 }
  0x71   : > { %v642_v39 = vsel %vm558_vm2, %v637_v29, %v641_v30  ;;  %v645_v59 = vor.u32 %v643_v24, %v641_v30 }
  0x73   : > { %10757 = vmatmul.msk.bf16.gmra.mxu1 %vm691_vm1, %v13651_v8 }
  0x78   : > { %10741 = vmatmul.msk.bf16.gmra.mxu0 %vm691_vm1, %v610_v31  ;;  %v983_v31 = vrot.slane %v12914_v18, 1 }
  0x79   : > { %10774 = vmatmul.msk.bf16.gmra.mxu2 %vm691_vm1, %v976_v32  ;;  %v1220_v32 = vrot.slane %v643_v24, 1 }
  0x7a   : > { %v984_v40 = vsel %vm963_vm3, %v981_v4, %v983_v31 }
  0x7b   : > { %v1222_v41 = vor.u32 %v1221_v33, %v1220_v32 }
  0x7d   : > { %10791 = vmatmul.msk.bf16.gmra.mxu3 %vm691_vm1, %v1207_v34  ;;  %v1223_v46 = vsel %vm1175_vm4, %v1218_v13, %v1222_v41 }
  0x83   : > { %10758 = vmatmul.msk.bf16.gmra.mxu1 %vm691_vm1, %v13665_v23 }
  0x88   : > { %10742 = vmatmul.msk.bf16.gmra.mxu0 %vm691_vm1, %v618_v44 }
  0x89   : > { %10775 = vmatmul.msk.bf16.gmra.mxu2 %vm691_vm1, %v978_v45 }
  0x8d   : > { %10792 = vmatmul.msk.bf16.gmra.mxu3 %vm691_vm1, %v1211_v47  ;;  %v12915_v47 = vld [vmem:[%s13584_s17 + $0x58] sm:$0xff] }
  0x8e   : > { %v647_v53 = vshll.u32 %v12915_v47, 16  ;;  %v651_v54 = vshrl.u32 %v12915_v47, 16  ;;  %v985_v63 = vrot.slane %v12915_v47, 1 }
  0x90   : > { %v1224_v0 = vrot.slane %v651_v54, 1  ;;  %v986_v6 = vsel %vm963_vm3, %v983_v31, %v985_v63 }
  0x93   : > { %10759 = vmatmul.msk.bf16.gmra.mxu1 %vm691_vm1, %v13679_v36 }
  0x98   : > { %10743 = vmatmul.msk.bf16.gmra.mxu0 %vm691_vm1, %v626_v57 }
  0x99   : > { %10776 = vmatmul.msk.bf16.gmra.mxu2 %vm691_vm1, %v980_v58 }
  0x9d   : > { %10793 = vmatmul.msk.bf16.gmra.mxu3 %vm691_vm1, %v1215_v61  ;;  %v649_v61 = vrot.slane %v647_v53, 1 }
  0x9f   : > { %v650_v5 = vsel %vm558_vm2, %v645_v59, %v649_v61  ;;  %v653_v31 = vor.u32 %v651_v54, %v649_v61 }
  0xa0   : > { %v877_v1 = vpop.f32.mrf.mxu1 }
  0xa3   : > { %10760 = vmatmul.msk.bf16.gmra.mxu1 %vm691_vm1, %v13693_v49 }
  0xa5   : > { %v753_v7 = vpop.f32.mrf.mxu0 }
  0xa6   : > { %v878_v14 = vadd.f32 %v877_v1, %v753_v7  ;;  %v1225_v1 = vrot.slane %v647_v53, 2 }
  0xa8   : > { %v879_v16 = vpop.f32.mrf.mxu1  ;;  %10744 = vmatmul.msk.bf16.gmra.mxu0 %vm691_vm1, %v634_v9  ;;  %v1226_v7 = vor.u32 %v1225_v1, %v1224_v0 }
  0xa9   : > { %10777 = vmatmul.msk.bf16.gmra.mxu2 %vm691_vm1, %v982_v12 }
  0xac   : > { %v1057_v19 = vpop.f32.mrf.mxu2 }
  0xad   : > { %v1137_v20 = vadd.f32 %v1057_v19, %v878_v14  ;;  %10794 = vmatmul.msk.bf16.gmra.mxu3 %vm691_vm1, %v1219_v17  ;;  %v755_v21 = vpop.f32.mrf.mxu0  ;;  %v1227_v17 = vsel %vm1175_vm4, %v1222_v41, %v1226_v7 }
  0xae   : > { %v880_v25 = vadd.f32 %v879_v16, %v755_v21  ;;  %v13745_v16 = vld [vmem:[%s13584_s17 + $0x60] sm:$0xff] }
  0xaf   : > { %v659_v22 = vshrl.u32 %v13745_v16, 16  ;;  %v987_v33 = vrot.slane %v13745_v16, 1 }
  0xb0   : > { %v882_v26 = vpop.f32.mrf.mxu1  ;;  %v1313_v27 = vpop.f32.mrf.mxu3 }
  0xb1   : > { %v13722_v28 = vadd.f32 %v1313_v27, %v1137_v20  ;;  %v655_v20 = vshll.u32 %v13745_v16, 16 }
  0xb3   : > { %10761 = vmatmul.msk.bf16.gmra.mxu1 %vm691_vm1, %v13707_v62  ;;  %v657_v32 = vrot.slane %v655_v20, 1 }
  0xb4   : > { %v1059_v34 = vpop.f32.mrf.mxu2 }
  0xb5   : > { %v1138_v37 = vadd.f32 %v1059_v34, %v880_v25  ;;  %v758_v38 = vpop.f32.mrf.mxu0  ;;  %v10977_v34 = vld [vmem:[%s17554_s1 + $0x1c] sm:$0xf] }
  0xb6   : > { %v883_v42 = vadd.f32 %v882_v26, %v758_v38  ;;  %v10900_v26 = vld [vmem:[%s17554_s1 + $0x18] sm:$0xf]  ;;  %v1228_v38 = vrot.slane %v659_v22, 1 }
  0xb7   : > { %v2222_v29 = vsel %vm740_vm0, %v10900_v26, 0 }
  0xb8   : > { %v884_v43 = vpop.f32.mrf.mxu1  ;;  %v1315_v44 = vpop.f32.mrf.mxu3  ;;  %10745 = vmatmul.msk.bf16.gmra.mxu0 %vm691_vm1, %v642_v39  ;;  %2231 = vmatpush.bf16.msrb.mxu2 %v2222_v29  ;;  %v1229_v39 = vrot.slane %v655_v20, 2 }
  0xb9   : > { %v13728_v45 = vadd.f32 %v1315_v44, %v1138_v37  ;;  %10778 = vmatmul.msk.bf16.gmra.mxu2 %vm691_vm1, %v984_v40  ;;  %v10819_v37 = vld [vmem:[%s17554_s1 + $0x14] sm:$0xf]  ;;  %v2433_v40 = vsel %vm740_vm0, %v10977_v34, 0 }
  0xba   : > { %v1800_v41 = vsel %vm740_vm0, %v10819_v37, 0  ;;  %2442 = vmatpush.bf16.msrb.mxu3 %v2433_v40 }
  0xbb   : > { %1809 = vmatpush.bf16.msrb.mxu1 %v1800_v41 }
  0xbc   : > { %v1062_v50 = vpop.f32.mrf.mxu2 }
  0xbd   : > { %v1139_v51 = vadd.f32 %v1062_v50, %v883_v42  ;;  %10795 = vmatmul.msk.bf16.gmra.mxu3 %vm691_vm1, %v1223_v46  ;;  %v760_v52 = vpop.f32.mrf.mxu0  ;;  %v658_v46 = vsel %vm558_vm2, %v653_v31, %v657_v32  ;;  %v988_v50 = vsel %vm963_vm3, %v985_v63, %v987_v33 }
  0xbe   : > { %v885_v55 = vadd.f32 %v884_v43, %v760_v52 }
  0xc0   : > { %v887_v56 = vpop.f32.mrf.mxu1  ;;  %v1318_v57 = vpop.f32.mrf.mxu3 }
  0xc1   : > { %v13735_v58 = vadd.f32 %v1318_v57, %v1139_v51  ;;  %v1230_v51 = vor.u32 %v1229_v39, %v1228_v38 }
  0xc3   : > { %10762 = vmatmul.msk.bf16.gmra.mxu1 %vm691_vm1, %v12914_v18 }
  0xc4   : > { %v1064_v2 = vpop.f32.mrf.mxu2 }
  0xc5   : > { %v1140_v3 = vadd.f32 %v1064_v2, %v885_v55  ;;  %v763_v4 = vpop.f32.mrf.mxu0  ;;  %v1231_v55 = vsel %vm1175_vm4, %v1226_v7, %v1230_v51 }
  0xc6   : > { %v888_v9 = vadd.f32 %v887_v56, %v763_v4  ;;  %v12917_v56 = vld [vmem:[%s13584_s17 + $0x68] sm:$0xff] }
  0xc7   : > { %v663_v0 = vshll.u32 %v12917_v56, 16  ;;  %v667_v63 = vshrl.u32 %v12917_v56, 16 }
  0xc8   : > { %v889_v12 = vpop.f32.mrf.mxu1  ;;  %v1320_v13 = vpop.f32.mrf.mxu3  ;;  %10746 = vmatmul.msk.bf16.gmra.mxu0 %vm691_vm1, %v650_v5  ;;  %v661_v5 = vor.u32 %v659_v22, %v657_v32 }
  0xc9   : > { %v13740_v14 = vadd.f32 %v1320_v13, %v1140_v3  ;;  %10779 = vmatmul.msk.bf16.gmra.mxu2 %vm691_vm1, %v986_v6  ;;  %v665_v6 = vrot.slane %v663_v0, 1  ;;  %v1232_v7 = vrot.slane %v667_v63, 1 }
  0xcb   : > { %v669_v41 = vor.u32 %v667_v63, %v665_v6 }
  0xcc   : > { %v1067_v18 = vpop.f32.mrf.mxu2 }
  0xcd   : > { %v1141_v19 = vadd.f32 %v1067_v18, %v888_v9  ;;  %10796 = vmatmul.msk.bf16.gmra.mxu3 %vm691_vm1, %v1227_v17  ;;  %v765_v21 = vpop.f32.mrf.mxu0  ;;  %v989_v9 = vrot.slane %v12917_v56, 1 }
  0xce   : > { %v890_v24 = vadd.f32 %v889_v12, %v765_v21  ;;  %v1233_v12 = vrot.slane %v663_v0, 2 }
  0xcf   : > { %v990_v20 = vsel %vm963_vm3, %v987_v33, %v989_v9 }
  0xd0   : > { %v892_v25 = vpop.f32.mrf.mxu1  ;;  %v1323_v27 = vpop.f32.mrf.mxu3  ;;  %v1234_v21 = vor.u32 %v1233_v12, %v1232_v7 }
  0xd1   : > { %v13755_v30 = vadd.f32 %v1323_v27, %v1141_v19  ;;  %v666_v19 = vsel %vm558_vm2, %v661_v5, %v665_v6  ;;  %v12918_v27 = vld [vmem:[%s13584_s17 + $0x70] sm:$0xff] }
  0xd2   : > { %v671_v34 = vshll.u32 %v12918_v27, 16  ;;  %v675_v33 = vshrl.u32 %v12918_v27, 16 }
  0xd3   : > { %10763 = vmatmul.msk.bf16.gmra.mxu1 %vm691_vm1, %v12915_v47 }
  0xd4   : > { %v1069_v42 = vpop.f32.mrf.mxu2 }
  0xd5   : > { %v1142_v43 = vadd.f32 %v1069_v42, %v890_v24  ;;  %v768_v44 = vpop.f32.mrf.mxu0  ;;  %v673_v42 = vrot.slane %v671_v34, 1 }
  0xd6   : > { %v893_v52 = vadd.f32 %v892_v25, %v768_v44  ;;  %v1236_v44 = vrot.slane %v675_v33, 1 }
  0xd8   : > { %v894_v53 = vpop.f32.mrf.mxu1  ;;  %v1325_v47 = vpop.f32.mrf.mxu3  ;;  %10747 = vmatmul.msk.bf16.gmra.mxu0 %vm691_vm1, %v658_v46  ;;  %v1237_v46 = vrot.slane %v671_v34, 2 }
  0xd9   : > { %v13769_v54 = vadd.f32 %v1325_v47, %v1142_v43  ;;  %10780 = vmatmul.msk.bf16.gmra.mxu2 %vm691_vm1, %v988_v50  ;;  %v991_v43 = vrot.slane %v12918_v27, 1 }
  0xdb   : > { %v992_v47 = vsel %vm963_vm3, %v989_v9, %v991_v43 }
  0xdc   : > { %v1072_v57 = vpop.f32.mrf.mxu2 }
  0xdd   : > { %v1143_v59 = vadd.f32 %v1072_v57, %v893_v52  ;;  %10797 = vmatmul.msk.bf16.gmra.mxu3 %vm691_vm1, %v1231_v55  ;;  %v770_v61 = vpop.f32.mrf.mxu0  ;;  %v1238_v55 = vor.u32 %v1237_v46, %v1236_v44 }
  0xde   : > { %v895_v1 = vadd.f32 %v894_v53, %v770_v61  ;;  %v674_v53 = vsel %vm558_vm2, %v669_v41, %v673_v42 }
  0xdf   : > { %v1239_v63 = vsel %vm1175_vm4, %v1234_v21, %v1238_v55 }
  0xe0   : > { %v897_v2 = vpop.f32.mrf.mxu1  ;;  %v1328_v3 = vpop.f32.mrf.mxu3 }
  0xe1   : > { %v13776_v4 = vadd.f32 %v1328_v3, %v1143_v59 }
  0xe3   : > { %10764 = vmatmul.msk.bf16.gmra.mxu1 %vm691_vm1, %v13745_v16  ;;  %v1235_v16 = vsel %vm1175_vm4, %v1230_v51, %v1234_v21 }
  0xe4   : > { %v1074_v13 = vpop.f32.mrf.mxu2 }
  0xe5   : > { %v1144_v17 = vadd.f32 %v1074_v13, %v895_v1  ;;  %v773_v18 = vpop.f32.mrf.mxu0 }
  0xe6   : > { %v898_v24 = vadd.f32 %v897_v2, %v773_v18 }
  0xe8   : > { %v899_v25 = vpop.f32.mrf.mxu1  ;;  %v1330_v26 = vpop.f32.mrf.mxu3  ;;  %10748 = vmatmul.msk.bf16.gmra.mxu0 %vm691_vm1, %v666_v19 }
  0xe9   : > { %v13782_v22 = vadd.f32 %v1330_v26, %v1144_v17  ;;  %10781 = vmatmul.msk.bf16.gmra.mxu2 %vm691_vm1, %v990_v20  ;;  %v677_v17 = vor.u32 %v675_v33, %v673_v42  ;;  %v10994_v42 = vld [vmem:[%s17554_s1 + $0x20] sm:$0xf] }
  0xec   : > { %v1077_v29 = vpop.f32.mrf.mxu2 }
  0xed   : > { %v1145_v31 = vadd.f32 %v1077_v29, %v898_v24  ;;  %10798 = vmatmul.msk.bf16.gmra.mxu3 %vm691_vm1, %v1235_v16  ;;  %v775_v32 = vpop.f32.mrf.mxu0  ;;  %v472_v24 = vld [vmem:[%s13584_s17 + $0x80] sm:$0x1] }
  0xee   : > { %v900_v37 = vadd.f32 %v899_v25, %v775_v32  ;;  %v1169_v25 = vld [vmem:[%s13584_s17 + $0x80] sm:$0x3] }
  0xf0   : > { %v902_v38 = vpop.f32.mrf.mxu1  ;;  %v1333_v39 = vpop.f32.mrf.mxu3 }
  0xf1   : > { %v13789_v40 = vadd.f32 %v1333_v39, %v1145_v31 }
  0xf3   : > { %10765 = vmatmul.msk.bf16.gmra.mxu1 %vm691_vm1, %v12917_v56  ;;  %v13799_v56 = vld [vmem:[%s13584_s17 + $0x78] sm:$0xff] }
  0xf4   : > { %v1079_v50 = vpop.f32.mrf.mxu2  ;;  %v679_v3 = vshll.u32 %v13799_v56, 16  ;;  %v683_v6 = vshrl.u32 %v13799_v56, 16  ;;  %v993_v19 = vrot.slane %v13799_v56, 1 }
  0xf5   : > { %v1146_v51 = vadd.f32 %v1079_v50, %v900_v37  ;;  %v778_v52 = vpop.f32.mrf.mxu0  ;;  %v540_v37 = vunpack.c.l.b16 %v472_v24  ;;  %v2688_v50 = vsel %vm740_vm0, %v10994_v42, 0 }
  0xf6   : > { %v903_v57 = vadd.f32 %v902_v38, %v778_v52  ;;  %v681_v18 = vrot.slane %v679_v3, 1  ;;  %v1240_v20 = vrot.slane %v683_v6, 1  ;;  %v1241_v21 = vrot.slane %v679_v3, 2  ;;  %2697 = vmatpush.bf16.msra.mxu0 %v2688_v50 }
  0xf7   : > { %v994_v32 = vsel %vm963_vm3, %v991_v43, %v993_v19  ;;  %v1173_v38 = vunpack.c.l.b16 %v1169_v25  ;;  %v557_v46 = vpack.c.b16 %v540_v37, %v540_v37  ;;  %v13843_v37 = vld [vmem:[%s13584_s17 + $0x10] sm:$0xff] }
  0xf8   : > { %v904_v59 = vpop.f32.mrf.mxu1  ;;  %v1335_v61 = vpop.f32.mrf.mxu3  ;;  %10749 = vmatmul.msk.bf16.gmra.mxu0 %vm691_vm1, %v674_v53  ;;  %v682_v29 = vsel %vm558_vm2, %v677_v17, %v681_v18  ;;  %v1242_v34 = vor.u32 %v1241_v21, %v1240_v20  ;;  %v17487_v50 = vshll.u32 %v13843_v37, 16 }
  0xf9   : > { %v13794_v0 = vadd.f32 %v1335_v61, %v1146_v51  ;;  %10782 = vmatmul.msk.bf16.gmra.mxu2 %vm691_vm1, %v992_v47  ;;  %v13821_v43 = vpack.c.b16 %v1173_v38, %v1173_v38  ;;  %v687_v47 = vshll.u32 %v557_v46, 16  ;;  %v2345_v38 = vld [vmem:[%s13584_s17 + $0x8] sm:$0xe] }
  0xfa   : > { %v1243_v44 = vsel %vm1175_vm4, %v1238_v55, %v1242_v34 }
  0xfb   : > { %v689_v3 = vrot.slane %v687_v47, 1 }
  0xfc   : > { %v1082_v1 = vpop.f32.mrf.mxu2 }
  0xfd   : > { %v1147_v2 = vadd.f32 %v1082_v1, %v903_v57  ;;  %10799 = vmatmul.msk.bf16.gmra.mxu3 %vm691_vm1, %v1239_v63  ;;  %v780_v5 = vpop.f32.mrf.mxu0  ;;  %v1245_v57 = vshrl.u32 %v13821_v43, 16 }
  0xfe   : > { %v905_v9 = vadd.f32 %v904_v59, %v780_v5  ;;  %v1248_v59 = vshll.u32 %v13821_v43, 16  ;;  %v995_v5 = vrot.slane %v557_v46, 1 }
 0x100   : > { %v907_v7 = vpop.f32.mrf.mxu1  ;;  %v1338_v12 = vpop.f32.mrf.mxu3  ;;  %v996_v24 = vsel %vm963_vm3, %v993_v19, %v995_v5 }
 0x101   : > { %v13805_v13 = vadd.f32 %v1338_v12, %v1147_v2  ;;  %v685_v2 = vor.u32 %v683_v6, %v681_v18  ;;  %v13835_v18 = vld [vmem:[%s13584_s17 + $0x8] sm:$0xff]  }
 0x102   : > { %v2044_v19 = vshll.u32 %v13835_v18, 16  ;;  %v2042_v42 = vshrl.u32 %v13835_v18, 16 }
 0x103   : > { %10766 = vmatmul.msk.bf16.gmra.mxu1 %vm691_vm1, %v12918_v27  ;;  %v690_v21 = vsel %vm558_vm2, %v685_v2, %v689_v3 }
 0x104   : > { %v1084_v26 = vpop.f32.mrf.mxu2  ;;  %v2046_v46 = vrot.slane %v2044_v19, 1  ;;  %v12921_v19 = vld [vmem:[%s13584_s17 + $0x10] sm:$0xff] }
 0x105   : > { %v1148_v16 = vadd.f32 %v1084_v26, %v905_v9  ;;  %v783_v31 = vpop.f32.mrf.mxu0  ;;  %v1247_v9 = vrot.slane %v1245_v57, 1  ;;  %v1425_v26 = vld [vmem:[%s13584_s17] sm:$0xc] }
 0x106   : > { %v908_v33 = vadd.f32 %v907_v7, %v783_v31  ;;  %v1250_v7 = vrot.slane %v1248_v59, 2  ;;  %v1429_v31 = vunpack.c.l.b16 %v1425_v26  ;;  %v2047_v10 = vor.u32 %v2046_v46, %v2042_v42  ;;  %v13874_v26 = vld [vmem:[%s13584_s17 + $0x18] sm:$0xff] }
 0x107   : > { %v1435_v42 = vrot.slane %v13608_v35, 2 }
 0x108   : > { %v909_v39 = vpop.f32.mrf.mxu1  ;;  %v1340_v41 = vpop.f32.mrf.mxu3  ;;  %10750 = vmatmul.msk.bf16.gmra.mxu0 %vm691_vm1, %v682_v29  ;;  %v1251_v25 = vor.u32 %v1250_v7, %v1247_v9 }
 0x109   : > { %v13813_v27 = vadd.f32 %v1340_v41, %v1148_v16  ;;  %10783 = vmatmul.msk.bf16.gmra.mxu2 %vm691_vm1, %v994_v32  ;;  %v1430_v41 = vpack.c.b16 %v13263_v15, %v1429_v31  ;;  %v2051_v15 = vrot.slane %v17487_v50, 1  ;;  %v17486_v31 = vshrl.u32 %v13843_v37, 16 }
 0x10a   : > { %v1252_v32 = vsel %vm1175_vm4, %v1242_v34, %v1251_v25  ;;  %v17483_v34 = vunpack.c.h.b16 %v13835_v18 }
 0x10b   : > { %v2052_v7 = vsel %vm558_vm2, %v2047_v10, %v2051_v15 }
 0x10c   : > { %v1087_v51 = vpop.f32.mrf.mxu2 }
 0x10d   : > { %v1149_v52 = vadd.f32 %v1087_v51, %v908_v33  ;;  %10800 = vmatmul.msk.bf16.gmra.mxu3 %vm691_vm1, %v1243_v44  ;;  %v785_v53 = vpop.f32.mrf.mxu0  ;;  %v12920_v51 = vld [vmem:[%s13584_s17 + $0x8] sm:$0xff] }
 0x10e   : > { %v910_v61 = vadd.f32 %v909_v39, %v785_v53 }
 0x110   : > { %v912_v63 = vpop.f32.mrf.mxu1  ;;  %v1343_v55 = vpop.f32.mrf.mxu3 }
 0x111   : > { %v13827_v1 = vadd.f32 %v1343_v55, %v1149_v52  ;;  %v2349_v52 = vunpack.c.l.b16 %v2345_v38 }
 0x113   : > { %10767 = vmatmul.msk.bf16.gmra.mxu1 %vm691_vm1, %v13799_v56  ;;  %v13862_v55 = vpack.c.b16 %v17483_v34, %v2349_v52 }
 0x114   : > { %v1089_v12 = vpop.f32.mrf.mxu2 }
 0x115   : > { %v1150_v17 = vadd.f32 %v1089_v12, %v910_v61  ;;  %v788_v20 = vpop.f32.mrf.mxu0  ;;  %v1432_v61 = vrot.slane %v1430_v41, 2  ;;  %v2352_v12 = vrot.slane %v13843_v37, 1 }
 0x116   : > { %v913_v16 = vadd.f32 %v912_v63, %v788_v20  ;;  %v1433_v63 = vrot.slane %v13590_v11, 2  ;;  %v2351_v11 = vrot.slane %v13862_v55, 1 }
 0x118   : > { %v914_v6 = vpop.f32.mrf.mxu1  ;;  %v1345_v29 = vpop.f32.mrf.mxu3  ;;  %10751 = vmatmul.msk.bf16.gmra.mxu0 %vm691_vm1, %v690_v21  ;;  %v1434_v9 = vsel %vm1431_vm5, %v1432_v61, %v1433_v63  ;;  %v2353_v25 = vsel %vm963_vm3, %v2351_v11, %v2352_v12  ;;  %v2354_v61 = vrot.slane %v13874_v26, 1  ;;  %v17480_v11 = vshrl.u32 %v13874_v26, 16 }
 0x119   : > { %v13837_v56 = vadd.f32 %v1345_v29, %v1150_v17  ;;  %10784 = vmatmul.msk.bf16.gmra.mxu2 %vm691_vm1, %v996_v24 }
 0x11c   : > { %v1092_v33 = vpop.f32.mrf.mxu2 }
 0x11d   : > { %v1151_v39 = vadd.f32 %v1092_v33, %v913_v16  ;;  %10801 = vmatmul.msk.bf16.gmra.mxu3 %vm691_vm1, %v1252_v32  ;;  %v790_v44 = vpop.f32.mrf.mxu0  ;;  %v17479_v32 = vshll.u32 %v13874_v26, 16 }
 0x11e   : > { %v915_v53 = vadd.f32 %v914_v6, %v790_v44  ;;  %v2055_v44 = vor.u32 %v17486_v31, %v2051_v15 }
 0x11f   : > { %v2059_v46 = vrot.slane %v17479_v32, 1 }
 0x120   : > { %v917_v47 = vpop.f32.mrf.mxu1  ;;  %v1348_v57 = vpop.f32.mrf.mxu3 }
 0x121   : > { %v13854_v59 = vadd.f32 %v1348_v57, %v1151_v39  ;;  %v2060_v57 = vsel %vm558_vm2, %v2055_v44, %v2059_v46 }
 0x123   : > { %10884 = vmatmul.msk.bf16.vlgmr.msrb.gmra.mxu1 %vm691_vm1, %v12920_v51 }
 0x124   : > { %v1094_v2 = vpop.f32.mrf.mxu2 }
 0x125   : > { %v1152_v3 = vadd.f32 %v1094_v2, %v915_v53  ;;  %v793_v5 = vpop.f32.mrf.mxu0 }
 0x126   : > { %v918_v17 = vadd.f32 %v917_v47, %v793_v5  ;;  %v1436_v47 = vsel %vm1431_vm5, %v1433_v63, %v1435_v42  ;;  %v13897_v5 = vld [vmem:[%s13584_s17 + $0x20] sm:$0xff] }
 0x128   : > { %v919_v20 = vpop.f32.mrf.mxu1  ;;  %v1350_v21 = vpop.f32.mrf.mxu3  ;;  %10803 = vmatmul.msk.bf16.vlgmr.msrb.gmra.mxu0 %vm691_vm1, %v1434_v9 }
 0x129   : > { %v13868_v24 = vadd.f32 %v1350_v21, %v1152_v3  ;;  %10961 = vmatmul.msk.bf16.vlgmr.msrb.gmra.mxu2 %vm691_vm1, %v2052_v7  ;;  %v2355_v3 = vsel %vm963_vm3, %v2352_v12, %v2354_v61  ;;  %v2063_v12 = vor.u32 %v17480_v11, %v2059_v46 }
 0x12c   : > { %v1097_v16 = vpop.f32.mrf.mxu2 }
 0x12d   : > { %v1153_v6 = vadd.f32 %v1097_v16, %v918_v17  ;;  %10978 = vmatmul.msk.bf16.vlgmr.msrb.gmra.mxu3 %vm691_vm1, %v2353_v25  ;;  %v795_v29 = vpop.f32.mrf.mxu0  ;;  %v17475_v17 = vshll.u32 %v13897_v5, 16 }
 0x12e   : > { %v920_v38 = vadd.f32 %v919_v20, %v795_v29  ;;  %v12922_v20 = vld [vmem:[%s13584_s17 + $0x18] sm:$0xff]  ;;  %v1437_v29 = vrot.slane %v13623_v48, 2 }
 0x130   : > { %v922_v33 = vpop.f32.mrf.mxu1  ;;  %v1353_v39 = vpop.f32.mrf.mxu3  ;;  %v1438_v44 = vsel %vm1431_vm5, %v1435_v42, %v1437_v29 }
 0x131   : > { %v13880_v41 = vadd.f32 %v1353_v39, %v1153_v6 }
 0x133   : > { %10885 = vmatmul.msk.bf16.gmra.mxu1 %vm691_vm1, %v12921_v19  ;;  %v2067_v19 = vrot.slane %v17475_v17, 1 }
 0x134   : > { %v1099_v51 = vpop.f32.mrf.mxu2 }
 0x135   : > { %v1154_v52 = vadd.f32 %v1099_v51, %v920_v38  ;;  %v798_v53 = vpop.f32.mrf.mxu0  ;;  %v2068_v51 = vsel %vm558_vm2, %v2063_v12, %v2067_v19 }
 0x136   : > { %v923_v35 = vadd.f32 %v922_v33, %v798_v53 }
 0x138   : > { %v924_v10 = vpop.f32.mrf.mxu1  ;;  %v1355_v2 = vpop.f32.mrf.mxu3  ;;  %10804 = vmatmul.msk.bf16.gmra.mxu0 %vm691_vm1, %v1436_v47 }
 0x139   : > { %v13891_v15 = vadd.f32 %v1355_v2, %v1154_v52  ;;  %10962 = vmatmul.msk.bf16.gmra.mxu2 %vm691_vm1, %v2060_v57  ;;  %v2356_v52 = vrot.slane %v13897_v5, 1 }
 0x13b   : > { %v2357_v57 = vsel %vm963_vm3, %v2354_v61, %v2356_v52 }
 0x13c   : > { %v1102_v9 = vpop.f32.mrf.mxu2 }
 0x13d   : > { %v1155_v63 = vadd.f32 %v1102_v9, %v923_v35  ;;  %10979 = vmatmul.msk.bf16.gmra.mxu3 %vm691_vm1, %v2355_v3  ;;  %v800_v7 = vpop.f32.mrf.mxu0  ;;  %v13920_v35 = vld [vmem:[%s13584_s17 + $0x28] sm:$0xff]  ;;  %v17476_v3 = vshrl.u32 %v13897_v5, 16 }
 0x13e   : > { %v925_v21 = vadd.f32 %v924_v10, %v800_v7  ;;  %v17471_v9 = vshll.u32 %v13920_v35, 16 }
 0x13f   : > { %v2071_v61 = vor.u32 %v17476_v3, %v2067_v19 }
 0x140   : > { %v927_v25 = vpop.f32.mrf.mxu1  ;;  %v1358_v16 = vpop.f32.mrf.mxu3  ;;  %v2075_v12 = vrot.slane %v17471_v9, 1 }
 0x141   : > { %v13903_v6 = vadd.f32 %v1358_v16, %v1155_v63  ;;  %v12923_v63 = vld [vmem:[%s13584_s17 + $0x20] sm:$0xff]  ;;  %v1439_v16 = vrot.slane %v13637_v60, 2 }
 0x143   : > { %10886 = vmatmul.msk.bf16.gmra.mxu1 %vm691_vm1, %v12922_v20 }
 0x144   : > { %v1104_v38 = vpop.f32.mrf.mxu2 }
 0x145   : > { %v1156_v33 = vadd.f32 %v1104_v38, %v925_v21  ;;  %v803_v39 = vpop.f32.mrf.mxu0 }
 0x146   : > { %v928_v48 = vadd.f32 %v927_v25, %v803_v39 }
 0x148   : > { %v929_v53 = vpop.f32.mrf.mxu1  ;;  %v1360_v47 = vpop.f32.mrf.mxu3  ;;  %10805 = vmatmul.msk.bf16.gmra.mxu0 %vm691_vm1, %v1438_v44  ;;  %v1440_v44 = vsel %vm1431_vm5, %v1437_v29, %v1439_v16 }
 0x149   : > { %v13914_v46 = vadd.f32 %v1360_v47, %v1156_v33  ;;  %10963 = vmatmul.msk.bf16.gmra.mxu2 %vm691_vm1, %v2068_v51  ;;  %v2076_v51 = vsel %vm558_vm2, %v2071_v61, %v2075_v12 }
 0x14c   : > { %v1107_v10 = vpop.f32.mrf.mxu2 }
 0x14d   : > { %v1157_v42 = vadd.f32 %v1107_v10, %v928_v48  ;;  %10980 = vmatmul.msk.bf16.gmra.mxu3 %vm691_vm1, %v2357_v57  ;;  %v805_v2 = vpop.f32.mrf.mxu0  ;;  %v2358_v48 = vrot.slane %v13920_v35, 1  ;;  %v13943_v10 = vld [vmem:[%s13584_s17 + $0x30] sm:$0xff] }
 0x14e   : > { %v930_v7 = vadd.f32 %v929_v53, %v805_v2 }
 0x14f   : > { %v2359_v57 = vsel %vm963_vm3, %v2356_v52, %v2358_v48 }
 0x150   : > { %v932_v20 = vpop.f32.mrf.mxu1  ;;  %v1363_v21 = vpop.f32.mrf.mxu3 }
 0x151   : > { %v13926_v25 = vadd.f32 %v1363_v21, %v1157_v42 }
 0x153   : > { %10887 = vmatmul.msk.bf16.gmra.mxu1 %vm691_vm1, %v12923_v63  ;;  %v17472_v63 = vshrl.u32 %v13920_v35, 16 }
 0x154   : > { %v1109_v38 = vpop.f32.mrf.mxu2 }
 0x155   : > { %v1158_v33 = vadd.f32 %v1109_v38, %v930_v7  ;;  %v808_v39 = vpop.f32.mrf.mxu0  ;;  %v17470_v7 = vshll.u32 %v13943_v10, 16  ;;  %v2079_v52 = vor.u32 %v17472_v63, %v2075_v12 }
 0x156   : > { %v933_v60 = vadd.f32 %v932_v20, %v808_v39  ;;  %v12924_v20 = vld [vmem:[%s13584_s17 + $0x28] sm:$0xff]  ;;  %v1441_v39 = vrot.slane %v13651_v8, 2 }
 0x158   : > { %v934_v53 = vpop.f32.mrf.mxu1  ;;  %v1365_v47 = vpop.f32.mrf.mxu3  ;;  %10806 = vmatmul.msk.bf16.gmra.mxu0 %vm691_vm1, %v1440_v44  ;;  %v2083_v44 = vrot.slane %v17470_v7, 1 }
 0x159   : > { %v13937_v19 = vadd.f32 %v1365_v47, %v1158_v33  ;;  %10964 = vmatmul.msk.bf16.gmra.mxu2 %vm691_vm1, %v2076_v51 }
 0x15c   : > { %v1112_v42 = vpop.f32.mrf.mxu2 }
 0x15d   : > { %v1159_v29 = vadd.f32 %v1112_v42, %v933_v60  ;;  %10981 = vmatmul.msk.bf16.gmra.mxu3 %vm691_vm1, %v2359_v57  ;;  %v810_v2 = vpop.f32.mrf.mxu0  ;;  %v2084_v57 = vsel %vm558_vm2, %v2079_v52, %v2083_v44  ;;  %v2360_v42 = vrot.slane %v13943_v10, 1 }
 0x15e   : > { %v935_v21 = vadd.f32 %v934_v53, %v810_v2  ;;  %v1442_v53 = vsel %vm1431_vm5, %v1439_v16, %v1441_v39 }
 0x160   : > { %v937_v61 = vpop.f32.mrf.mxu1  ;;  %v1368_v38 = vpop.f32.mrf.mxu3 }
 0x161   : > { %v13949_v33 = vadd.f32 %v1368_v38, %v1159_v29 }
 0x163   : > { %10888 = vmatmul.msk.bf16.gmra.mxu1 %vm691_vm1, %v12924_v20  ;;  %v2361_v20 = vsel %vm963_vm3, %v2358_v48, %v2360_v42 }
 0x164   : > { %v1114_v51 = vpop.f32.mrf.mxu2 }
 0x165   : > { %v1160_v60 = vadd.f32 %v1114_v51, %v935_v21  ;;  %v813_v47 = vpop.f32.mrf.mxu0  ;;  %v13966_v21 = vld [vmem:[%s13584_s17 + $0x38] sm:$0xff]  ;;  %v17474_v51 = vshrl.u32 %v13943_v10, 16 }
 0x166   : > { %v938_v8 = vadd.f32 %v937_v61, %v813_v47  ;;  %v17473_v61 = vshll.u32 %v13966_v21, 16  ;;  %v12925_v47 = vld [vmem:[%s13584_s17 + $0x30] sm:$0xff] }
 0x167   : > { %v2087_v48 = vor.u32 %v17474_v51, %v2083_v44 }
 0x168   : > { %v939_v29 = vpop.f32.mrf.mxu1  ;;  %v1370_v2 = vpop.f32.mrf.mxu3  ;;  %10807 = vmatmul.msk.bf16.gmra.mxu0 %vm691_vm1, %v1442_v53 }
 0x169   : > { %v13960_v12 = vadd.f32 %v1370_v2, %v1160_v60  ;;  %10965 = vmatmul.msk.bf16.gmra.mxu2 %vm691_vm1, %v2084_v57  ;;  %v1443_v57 = vrot.slane %v13665_v23, 2 }
 0x16c   : > { %v1117_v38 = vpop.f32.mrf.mxu2 }
 0x16d   : > { %v1161_v16 = vadd.f32 %v1117_v38, %v938_v8  ;;  %10982 = vmatmul.msk.bf16.gmra.mxu3 %vm691_vm1, %v2361_v20  ;;  %v815_v52 = vpop.f32.mrf.mxu0  ;;  %v2091_v8 = vrot.slane %v17473_v61, 1  ;;  %v17478_v61 = vshrl.u32 %v13966_v21, 16 }
 0x16e   : > { %v940_v60 = vadd.f32 %v939_v29, %v815_v52  ;;  %v1444_v29 = vsel %vm1431_vm5, %v1441_v39, %v1443_v57 }
 0x16f   : > { %v2092_v52 = vsel %vm558_vm2, %v2087_v48, %v2091_v8 }
 0x170   : > { %v942_v2 = vpop.f32.mrf.mxu1  ;;  %v1373_v7 = vpop.f32.mrf.mxu3 }
 0x171   : > { %v13972_v53 = vadd.f32 %v1373_v7, %v1161_v16  ;;  %v2362_v7 = vrot.slane %v13966_v21, 1 }
 0x173   : > { %10889 = vmatmul.msk.bf16.gmra.mxu1 %vm691_vm1, %v12925_v47  ;;  %v2363_v47 = vsel %vm963_vm3, %v2360_v42, %v2362_v7  ;;  %v2095_v42 = vor.u32 %v17478_v61, %v2091_v8 }
 0x174   : > { %v1119_v20 = vpop.f32.mrf.mxu2 }
 0x175   : > { %v1162_v38 = vadd.f32 %v1119_v20, %v940_v60  ;;  %v818_v9 = vpop.f32.mrf.mxu0  ;;  %v13989_v60 = vld [vmem:[%s13584_s17 + $0x40] sm:$0xff] }
 0x176   : > { %v943_v23 = vadd.f32 %v942_v2, %v818_v9  ;;  %v17477_v9 = vshll.u32 %v13989_v60, 16  ;;  %v12926_v2 = vld [vmem:[%s13584_s17 + $0x38] sm:$0xff] }
 0x178   : > { %v944_v16 = vpop.f32.mrf.mxu1  ;;  %v1375_v63 = vpop.f32.mrf.mxu3  ;;  %10808 = vmatmul.msk.bf16.gmra.mxu0 %vm691_vm1, %v1444_v29 }
 0x179   : > { %v13983_v44 = vadd.f32 %v1375_v63, %v1162_v38  ;;  %10966 = vmatmul.msk.bf16.gmra.mxu2 %vm691_vm1, %v2092_v52  ;;  %v1445_v52 = vrot.slane %v13679_v36, 2 }
 0x17c   : > { %v1122_v20 = vpop.f32.mrf.mxu2 }
 0x17d   : > { %v1163_v39 = vadd.f32 %v1122_v20, %v943_v23  ;;  %10983 = vmatmul.msk.bf16.gmra.mxu3 %vm691_vm1, %v2363_v47  ;;  %v820_v48 = vpop.f32.mrf.mxu0  ;;  %v2099_v23 = vrot.slane %v17477_v9, 1  ;;  %v17482_v9 = vshrl.u32 %v13989_v60, 16 }
 0x17e   : > { %v945_v63 = vadd.f32 %v944_v16, %v820_v48  ;;  %v1446_v16 = vsel %vm1431_vm5, %v1443_v57, %v1445_v52 }
 0x17f   : > { %v2100_v48 = vsel %vm558_vm2, %v2095_v42, %v2099_v23 }
 0x180   : > { %v947_v38 = vpop.f32.mrf.mxu1  ;;  %v1378_v51 = vpop.f32.mrf.mxu3 }
 0x181   : > { %v13995_v29 = vadd.f32 %v1378_v51, %v1163_v39  ;;  %v2364_v51 = vrot.slane %v13989_v60, 1 }
 0x183   : > { %10890 = vmatmul.msk.bf16.gmra.mxu1 %vm691_vm1, %v12926_v2  ;;  %v2365_v2 = vsel %vm963_vm3, %v2362_v7, %v2364_v51  ;;  %v2103_v7 = vor.u32 %v17482_v9, %v2099_v23 }
 0x184   : > { %v1124_v47 = vpop.f32.mrf.mxu2 }
 0x185   : > { %v1164_v20 = vadd.f32 %v1124_v47, %v945_v63  ;;  %v823_v17 = vpop.f32.mrf.mxu0  ;;  %v14012_v63 = vld [vmem:[%s13584_s17 + $0x48] sm:$0xff] }
 0x186   : > { %v948_v36 = vadd.f32 %v947_v38, %v823_v17  ;;  %v17481_v17 = vshll.u32 %v14012_v63, 16  ;;  %v12927_v38 = vld [vmem:[%s13584_s17 + $0x40] sm:$0xff] }
 0x188   : > { %v949_v39 = vpop.f32.mrf.mxu1  ;;  %v1380_v3 = vpop.f32.mrf.mxu3  ;;  %10809 = vmatmul.msk.bf16.gmra.mxu0 %vm691_vm1, %v1446_v16 }
 0x189   : > { %v14006_v8 = vadd.f32 %v1380_v3, %v1164_v20  ;;  %10967 = vmatmul.msk.bf16.gmra.mxu2 %vm691_vm1, %v2100_v48  ;;  %v1447_v48 = vrot.slane %v13693_v49, 2 }
 0x18c   : > { %v1127_v47 = vpop.f32.mrf.mxu2 }
 0x18d   : > { %v1165_v57 = vadd.f32 %v1127_v47, %v948_v36  ;;  %10984 = vmatmul.msk.bf16.gmra.mxu3 %vm691_vm1, %v2365_v2  ;;  %v825_v42 = vpop.f32.mrf.mxu0  ;;  %v2107_v36 = vrot.slane %v17481_v17, 1  ;;  %v17484_v17 = vshrl.u32 %v14012_v63, 16 }
 0x18e   : > { %v950_v3 = vadd.f32 %v949_v39, %v825_v42  ;;  %v1448_v39 = vsel %vm1431_vm5, %v1445_v52, %v1447_v48 }
 0x18f   : > { %v2108_v42 = vsel %vm558_vm2, %v2103_v7, %v2107_v36 }
 0x190   : > { %v952_v20 = vpop.f32.mrf.mxu1  ;;  %v1383_v61 = vpop.f32.mrf.mxu3 }
 0x191   : > { %v14018_v16 = vadd.f32 %v1383_v61, %v1165_v57  ;;  %v2366_v61 = vrot.slane %v14012_v63, 1 }
 0x193   : > { %10891 = vmatmul.msk.bf16.gmra.mxu1 %vm691_vm1, %v12927_v38  ;;  %v2367_v38 = vsel %vm963_vm3, %v2364_v51, %v2366_v61  ;;  %v2111_v51 = vor.u32 %v17484_v17, %v2107_v36 }
 0x194   : > { %v1129_v2 = vpop.f32.mrf.mxu2 }
 0x195   : > { %v1166_v47 = vadd.f32 %v1129_v2, %v950_v3  ;;  %v828_v32 = vpop.f32.mrf.mxu0  ;;  %v14035_v3 = vld [vmem:[%s13584_s17 + $0x50] sm:$0xff] }
 0x196   : > { %v953_v49 = vadd.f32 %v952_v20, %v828_v32  ;;  %v17485_v32 = vshll.u32 %v14035_v3, 16  ;;  %v12928_v20 = vld [vmem:[%s13584_s17 + $0x48] sm:$0xff] }
 0x198   : > { %v954_v57 = vpop.f32.mrf.mxu1  ;;  %v1385_v11 = vpop.f32.mrf.mxu3  ;;  %10810 = vmatmul.msk.bf16.gmra.mxu0 %vm691_vm1, %v1448_v39 }
 0x199   : > { %v14029_v23 = vadd.f32 %v1385_v11, %v1166_v47  ;;  %10968 = vmatmul.msk.bf16.gmra.mxu2 %vm691_vm1, %v2108_v42  ;;  %v1449_v42 = vrot.slane %v13707_v62, 2 }
 0x19c   : > { %v1132_v2 = vpop.f32.mrf.mxu2 }
 0x19d   : > { %v1167_v52 = vadd.f32 %v1132_v2, %v953_v49  ;;  %10985 = vmatmul.msk.bf16.gmra.mxu3 %vm691_vm1, %v2367_v38  ;;  %v830_v7 = vpop.f32.mrf.mxu0  ;;  %v2115_v49 = vrot.slane %v17485_v32, 1 }
 0x19e   : > { %v955_v11 = vadd.f32 %v954_v57, %v830_v7  ;;  %v1450_v57 = vsel %vm1431_vm5, %v1447_v48, %v1449_v42  ;;  %v14059_v48 = vld [vmem:[%s13584_s17 + $0x58] sm:$0xff] }
 0x19f   : > { %v2116_v7 = vsel %vm558_vm2, %v2111_v51, %v2115_v49 }
 0x1a0   : > { %v1811_v47 = vpop.f32.mrf.mxu1  ;;  %v1388_v9 = vpop.f32.mrf.mxu3 }
 0x1a1   : > { %v14041_v39 = vadd.f32 %v1388_v9, %v1167_v52  ;;  %v2368_v9 = vrot.slane %v14035_v3, 1 }
 0x1a3   : > { %10892 = vmatmul.msk.bf16.gmra.mxu1 %vm691_vm1, %v12928_v20  ;;  %v2369_v20 = vsel %vm963_vm3, %v2366_v61, %v2368_v9  ;;  %v13334_v61 = vld [vmem:[%s13584_s17 + $0x50] sm:$0xff] }
 0x1a4   : > { %v1134_v38 = vpop.f32.mrf.mxu2  ;;  %v1451_v31 = vrot.slane %v13334_v61, 2 }
 0x1a5   : > { %v1168_v2 = vadd.f32 %v1134_v38, %v955_v11  ;;  %v1525_v34 = vpop.f32.mrf.mxu0 }
 0x1a6   : > { %v1605_v62 = vadd.f32 %v1525_v34, %v13722_v28  ;;  %v17489_v28 = vshrl.u32 %v14035_v3, 16  ;;  %v17488_v34 = vshll.u32 %v14059_v48, 16 }
 0x1a8   : > { %v1813_v52 = vpop.f32.mrf.mxu1  ;;  %v1390_v36 = vpop.f32.mrf.mxu3  ;;  %v1891_v32 = vadd.f32 %v1811_v47, %v1605_v62  ;;  %10811 = vmatmul.msk.bf16.gmra.mxu0 %vm691_vm1, %v1450_v57 }
 0x1a9   : > { %v14053_v17 = vadd.f32 %v1390_v36, %v1168_v2  ;;  %10969 = vmatmul.msk.bf16.gmra.mxu2 %vm691_vm1, %v2116_v7  ;;  %v12929_v2 = vld [vmem:[%s13584_s17 + $0x50] sm:$0xff] }
 0x1ab   : > { %17556 = vst [vmem:[#allocation6_spill] sm:$0xff] %v14053_v17 }
 0x1ac   : > { %v2233_v11 = vpop.f32.mrf.mxu2 }
 0x1ad   : > { %v2313_v51 = vadd.f32 %v2233_v11, %v1891_v32  ;;  %10986 = vmatmul.msk.bf16.gmra.mxu3 %vm691_vm1, %v2369_v20  ;;  %v1527_v38 = vpop.f32.mrf.mxu0  ;;  %v2119_v32 = vor.u32 %v17489_v28, %v2115_v49  ;;  %v2123_v20 = vrot.slane %v17488_v34, 1 }
 0x1ae   : > { %v1606_v47 = vadd.f32 %v1527_v38, %v13728_v45  ;;  %v1452_v45 = vsel %vm1431_vm5, %v1449_v42, %v1451_v31  ;;  %v14084_v42 = vld [vmem:[%s13584_s17 + $0x60] sm:$0xff] }
 0x1b0   : > { %v1816_v57 = vpop.f32.mrf.mxu1  ;;  %v2444_v62 = vpop.f32.mrf.mxu3  ;;  %v1892_v36 = vadd.f32 %v1813_v52, %v1606_v47  ;;  %v2124_v52 = vsel %vm558_vm2, %v2119_v32, %v2123_v20 }
 0x1b1   : > { %v14066_v7 = vadd.f32 %v2444_v62, %v2313_v51  ;;  %v2370_v51 = vrot.slane %v14059_v48, 1 }
 0x1b3   : > { %10893 = vmatmul.msk.bf16.gmra.mxu1 %vm691_vm1, %v12929_v2  ;;  %v2371_v2 = vsel %vm963_vm3, %v2368_v9, %v2370_v51  ;;  %v13335_v9 = vld [vmem:[%s13584_s17 + $0x58] sm:$0xff] }
 0x1b4   : > { %v2235_v11 = vpop.f32.mrf.mxu2  ;;  %v1453_v34 = vrot.slane %v13335_v9, 2 }
 0x1b5   : > { %v2314_v50 = vadd.f32 %v2235_v11, %v1892_v36  ;;  %v1530_v17 = vpop.f32.mrf.mxu0 }
 0x1b6   : > { %v1607_v38 = vadd.f32 %v1530_v17, %v13735_v58  ;;  %v17491_v58 = vshrl.u32 %v14059_v48, 16  ;;  %v17490_v17 = vshll.u32 %v14084_v42, 16 }
 0x1b8   : > { %v1818_v47 = vpop.f32.mrf.mxu1  ;;  %v2446_v49 = vpop.f32.mrf.mxu3  ;;  %v1893_v62 = vadd.f32 %v1816_v57, %v1607_v38  ;;  %10812 = vmatmul.msk.bf16.gmra.mxu0 %vm691_vm1, %v1452_v45 }
 0x1b9   : > { %v14078_v61 = vadd.f32 %v2446_v49, %v2314_v50  ;;  %10970 = vmatmul.msk.bf16.gmra.mxu2 %vm691_vm1, %v2124_v52  ;;  %v12930_v50 = vld [vmem:[%s13584_s17 + $0x58] sm:$0xff] }
 0x1bb   : > { %17557 = vst [vmem:[#allocation7_spill] sm:$0xff] %v14078_v61 }
 0x1bc   : > { %v2238_v36 = vpop.f32.mrf.mxu2 }
 0x1bd   : > { %v2315_v32 = vadd.f32 %v2238_v36, %v1893_v62  ;;  %10987 = vmatmul.msk.bf16.gmra.mxu3 %vm691_vm1, %v2371_v2  ;;  %v1532_v11 = vpop.f32.mrf.mxu0  ;;  %v2127_v62 = vor.u32 %v17491_v58, %v2123_v20  ;;  %v2131_v2 = vrot.slane %v17490_v17, 1  ;;  %v11109_v17 = vld [vmem:[%s17554_s1 + $0x2c] sm:$0xf] }
 0x1be   : > { %v1608_v57 = vadd.f32 %v1532_v11, %v13740_v14  ;;  %v1454_v14 = vsel %vm1431_vm5, %v1451_v31, %v1453_v34  ;;  %v14109_v31 = vld [vmem:[%s13584_s17 + $0x68] sm:$0xff] }
 0x1c0   : > { %v1821_v45 = vpop.f32.mrf.mxu1  ;;  %v2449_v38 = vpop.f32.mrf.mxu3  ;;  %v1894_v49 = vadd.f32 %v1818_v47, %v1608_v57  ;;  %v2132_v47 = vsel %vm558_vm2, %v2127_v62, %v2131_v2 }
 0x1c1   : > { %v14091_v52 = vadd.f32 %v2449_v38, %v2315_v32  ;;  %v2372_v32 = vrot.slane %v14084_v42, 1 }
 0x1c3   : > { %10894 = vmatmul.msk.bf16.gmra.mxu1 %vm691_vm1, %v12930_v50  ;;  %v2373_v50 = vsel %vm963_vm3, %v2370_v51, %v2372_v32  ;;  %v11028_v51 = vld [vmem:[%s17554_s1 + $0x28] sm:$0xf] }
 0x1c4   : > { %v2240_v36 = vpop.f32.mrf.mxu2 }
 0x1c5   : > { %v2316_v28 = vadd.f32 %v2240_v36, %v1894_v49  ;;  %v1535_v61 = vpop.f32.mrf.mxu0 }
 0x1c6   : > { %v1609_v11 = vadd.f32 %v1535_v61, %v13755_v30  ;;  %v17493_v30 = vshrl.u32 %v14084_v42, 16  ;;  %v17492_v61 = vshll.u32 %v14109_v31, 16 }
 0x1c8   : > { %v1823_v57 = vpop.f32.mrf.mxu1  ;;  %v2451_v20 = vpop.f32.mrf.mxu3  ;;  %v1895_v38 = vadd.f32 %v1821_v45, %v1609_v11  ;;  %10813 = vmatmul.msk.bf16.gmra.mxu0 %vm691_vm1, %v1454_v14  ;;  %v3185_v11 = vsel %vm740_vm0, %v11028_v51, 0  ;;  %v2139_v51 = vrot.slane %v17492_v61, 1 }
 0x1c9   : > { %v14103_v9 = vadd.f32 %v2451_v20, %v2316_v28  ;;  %10971 = vmatmul.msk.bf16.gmra.mxu2 %vm691_vm1, %v2132_v47  ;;  %v12931_v28 = vld [vmem:[%s13584_s17 + $0x60] sm:$0xff] }
 0x1ca   : > { %3194 = vmatpush.bf16.msra.mxu2 %v3185_v11 }
 0x1cc   : > { %v2243_v49 = vpop.f32.mrf.mxu2 }
 0x1cd   : > { %v2317_v62 = vadd.f32 %v2243_v49, %v1895_v38  ;;  %10988 = vmatmul.msk.bf16.gmra.mxu3 %vm691_vm1, %v2373_v50  ;;  %v1537_v36 = vpop.f32.mrf.mxu0  ;;  %v13336_v50 = vld [vmem:[%s13584_s17 + $0x60] sm:$0xff] }
 0x1ce   : > { %v1610_v45 = vadd.f32 %v1537_v36, %v13769_v54  ;;  %v1455_v49 = vrot.slane %v13336_v50, 2  ;;  %v11011_v54 = vld [vmem:[%s17554_s1 + $0x24] sm:$0xf]  ;;  %v2135_v36 = vor.u32 %v17493_v30, %v2131_v2  ;;  %v2374_v2 = vrot.slane %v14109_v31, 1 }
 0x1d0   : > { %v1826_v14 = vpop.f32.mrf.mxu1  ;;  %v2454_v47 = vpop.f32.mrf.mxu3  ;;  %v1896_v20 = vadd.f32 %v1823_v57, %v1610_v45  ;;  %v3607_v57 = vsel %vm740_vm0, %v11109_v17, 0  ;;  %v1456_v50 = vsel %vm1431_vm5, %v1453_v34, %v1455_v49  ;;  %v2140_v58 = vsel %vm558_vm2, %v2135_v36, %v2139_v51  ;;  %v14146_v34 = vld [vmem:[%s13584_s17 + $0x70] sm:$0xff] }
 0x1d1   : > { %v14120_v38 = vadd.f32 %v2454_v47, %v2317_v62  ;;  %v2899_v62 = vsel %vm740_vm0, %v11011_v54, 0  ;;  %3616 = vmatpush.bf16.msra.mxu3 %v3607_v57 }
 0x1d2   : > { %2908 = vmatpush.bf16.msra.mxu1 %v2899_v62 }
 0x1d3   : > { %17558 = vst [vmem:[#allocation8_spill] sm:$0xff] %v14120_v38  ;;  %10895 = vmatmul.msk.bf16.gmra.mxu1 %vm691_vm1, %v12931_v28 }
 0x1d4   : > { %v2245_v45 = vpop.f32.mrf.mxu2 }
 0x1d5   : > { %v2318_v47 = vadd.f32 %v2245_v45, %v1896_v20  ;;  %v1540_v11 = vpop.f32.mrf.mxu0  ;;  %v2375_v20 = vsel %vm963_vm3, %v2372_v32, %v2374_v2  ;;  %v13337_v32 = vld [vmem:[%s13584_s17 + $0x68] sm:$0xff] }
 0x1d6   : > { %v1611_v61 = vadd.f32 %v1540_v11, %v13776_v4  ;;  %v17495_v4 = vshrl.u32 %v14109_v31, 16  ;;  %v1457_v11 = vrot.slane %v13337_v32, 2 }
 0x1d8   : > { %v1828_v28 = vpop.f32.mrf.mxu1  ;;  %v2456_v30 = vpop.f32.mrf.mxu3  ;;  %v1897_v17 = vadd.f32 %v1826_v14, %v1611_v61  ;;  %10814 = vmatmul.msk.bf16.gmra.mxu0 %vm691_vm1, %v1456_v50  ;;  %v17494_v61 = vshll.u32 %v14146_v34, 16  ;;  %v2143_v50 = vor.u32 %v17495_v4, %v2139_v51 }
 0x1d9   : > { %v14140_v38 = vadd.f32 %v2456_v30, %v2318_v47  ;;  %10972 = vmatmul.msk.bf16.gmra.mxu2 %vm691_vm1, %v2140_v58  ;;  %v12932_v30 = vld [vmem:[%s13584_s17 + $0x68] sm:$0xff] }
 0x1db   : > { %17559 = vst [vmem:[#allocation9_spill] sm:$0xff] %v14140_v38 }
 0x1dc   : > { %v2248_v54 = vpop.f32.mrf.mxu2 }
 0x1dd   : > { %v2319_v36 = vadd.f32 %v2248_v54, %v1897_v17  ;;  %10989 = vmatmul.msk.bf16.gmra.mxu3 %vm691_vm1, %v2375_v20  ;;  %v1542_v57 = vpop.f32.mrf.mxu0  ;;  %v2147_v17 = vrot.slane %v17494_v61, 1 }
 0x1de   : > { %v1612_v14 = vadd.f32 %v1542_v57, %v13782_v22  ;;  %v1458_v22 = vsel %vm1431_vm5, %v1455_v49, %v1457_v11  ;;  %v14171_v49 = vld [vmem:[%s13584_s17 + $0x78] sm:$0xff] }
 0x1e0   : > { %v1831_v62 = vpop.f32.mrf.mxu1  ;;  %v2459_v45 = vpop.f32.mrf.mxu3  ;;  %v1898_v47 = vadd.f32 %v1828_v28, %v1612_v14  ;;  %v2148_v28 = vsel %vm558_vm2, %v2143_v50, %v2147_v17 }
 0x1e1   : > { %v14153_v58 = vadd.f32 %v2459_v45, %v2319_v36  ;;  %v2376_v36 = vrot.slane %v14146_v34, 1 }
 0x1e3   : > { %10896 = vmatmul.msk.bf16.gmra.mxu1 %vm691_vm1, %v12932_v30  ;;  %v2377_v30 = vsel %vm963_vm3, %v2374_v2, %v2376_v36  ;;  %v13338_v2 = vld [vmem:[%s13584_s17 + $0x70] sm:$0xff] }
 0x1e4   : > { %v2250_v20 = vpop.f32.mrf.mxu2  ;;  %v1459_v61 = vrot.slane %v13338_v2, 2 }
 0x1e5   : > { %v2320_v54 = vadd.f32 %v2250_v20, %v1898_v47  ;;  %v1545_v38 = vpop.f32.mrf.mxu0 }
 0x1e6   : > { %v1613_v57 = vadd.f32 %v1545_v38, %v13789_v40  ;;  %v17497_v40 = vshrl.u32 %v14146_v34, 16  ;;  %v17496_v38 = vshll.u32 %v14171_v49, 16 }
 0x1e8   : > { %v1833_v14 = vpop.f32.mrf.mxu1  ;;  %v2461_v51 = vpop.f32.mrf.mxu3  ;;  %v1899_v45 = vadd.f32 %v1831_v62, %v1613_v57  ;;  %10815 = vmatmul.msk.bf16.gmra.mxu0 %vm691_vm1, %v1458_v22  ;;  %v12933_v62 = vld [vmem:[%s13584_s17 + $0x70] sm:$0xff] }
 0x1e9   : > { %v14165_v32 = vadd.f32 %v2461_v51, %v2320_v54  ;;  %10973 = vmatmul.msk.bf16.gmra.mxu2 %vm691_vm1, %v2148_v28 }
 0x1eb   : > { %17560 = vst [vmem:[#allocation10_spill] sm:$0xff] %v14165_v32 }
 0x1ec   : > { %v2253_v47 = vpop.f32.mrf.mxu2 }
 0x1ed   : > { %v2321_v50 = vadd.f32 %v2253_v47, %v1899_v45  ;;  %10990 = vmatmul.msk.bf16.gmra.mxu3 %vm691_vm1, %v2377_v30  ;;  %v1547_v20 = vpop.f32.mrf.mxu0  ;;  %v2151_v45 = vor.u32 %v17497_v40, %v2147_v17  ;;  %v2155_v30 = vrot.slane %v17496_v38, 1 }
 0x1ee   : > { %v1614_v54 = vadd.f32 %v1547_v20, %v13794_v0  ;;  %v1460_v0 = vsel %vm1431_vm5, %v1457_v11, %v1459_v61  ;;  %v14196_v11 = vld [vmem:[%s13584_s17 + $0x80] sm:$0xff] }
 0x1f0   : > { %v1836_v22 = vpop.f32.mrf.mxu1  ;;  %v2464_v57 = vpop.f32.mrf.mxu3  ;;  %v1900_v51 = vadd.f32 %v1833_v14, %v1614_v54  ;;  %v2156_v14 = vsel %vm558_vm2, %v2151_v45, %v2155_v30 }
 0x1f1   : > { %v14178_v28 = vadd.f32 %v2464_v57, %v2321_v50  ;;  %v2378_v50 = vrot.slane %v14171_v49, 1 }
 0x1f3   : > { %17561 = vst [vmem:[#allocation11_spill] sm:$0xff] %v14178_v28  ;;  %10897 = vmatmul.msk.bf16.gmra.mxu1 %vm691_vm1, %v12933_v62  ;;  %v2379_v62 = vsel %vm963_vm3, %v2376_v36, %v2378_v50  ;;  %v13339_v36 = vld [vmem:[%s13584_s17 + $0x78] sm:$0xff] }
 0x1f4   : > { %v2255_v47 = vpop.f32.mrf.mxu2  ;;  %v1461_v38 = vrot.slane %v13339_v36, 2  ;;  %v2380_v36 = vrot.slane %v14196_v11, 1 }
 0x1f5   : > { %v2322_v4 = vadd.f32 %v2255_v47, %v1900_v51  ;;  %v1550_v32 = vpop.f32.mrf.mxu0 }
 0x1f6   : > { %v1615_v20 = vadd.f32 %v1550_v32, %v13805_v13  ;;  %v17498_v13 = vshrl.u32 %v14171_v49, 16  ;;  %v12934_v32 = vld [vmem:[%s13584_s17 + $0x78] sm:$0xff] }
 0x1f8   : > { %v1838_v54 = vpop.f32.mrf.mxu1  ;;  %v2466_v17 = vpop.f32.mrf.mxu3  ;;  %v1901_v57 = vadd.f32 %v1836_v22, %v1615_v20  ;;  %10816 = vmatmul.msk.bf16.gmra.mxu0 %vm691_vm1, %v1460_v0 }
 0x1f9   : > { %v14190_v2 = vadd.f32 %v2466_v17, %v2322_v4  ;;  %10974 = vmatmul.msk.bf16.gmra.mxu2 %vm691_vm1, %v2156_v14  ;;  %v17499_v4 = vshll.u32 %v14196_v11, 16 }
 0x1fb   : > { %17562 = vst [vmem:[#allocation12_spill] sm:$0xff] %v14190_v2  ;;  %v2159_v2 = vor.u32 %v17498_v13, %v2155_v30  ;;  %v2163_v28 = vrot.slane %v17499_v4, 1 }
 0x1fc   : > { %v2258_v51 = vpop.f32.mrf.mxu2 }
 0x1fd   : > { %v2323_v45 = vadd.f32 %v2258_v51, %v1901_v57  ;;  %10991 = vmatmul.msk.bf16.gmra.mxu3 %vm691_vm1, %v2379_v62  ;;  %v1552_v47 = vpop.f32.mrf.mxu0  ;;  %v17563_v57 = vshll.u32 %v13843_v37, 16  ;;  %v17564_v62 = vshrl.u32 %v13843_v37, 16 }
 0x1fe   : > { %v1616_v22 = vadd.f32 %v1552_v47, %v13813_v27  ;;  %v1955_v27 = vld [vmem:[%s13584_s17 + $0x88] sm:$0x1]  ;;  %v1462_v47 = vsel %vm1431_vm5, %v1459_v61, %v1461_v38  ;;  %v11186_v61 = vld [vmem:[%s17554_s1 + $0x30] sm:$0xf] }
 0x1ff   : > { %v2571_v51 = vrot.slane %v17563_v57, 2  ;;  %v2570_v40 = vrot.slane %v17564_v62, 1  ;;  %v2023_v37 = vunpack.c.l.b16 %v1955_v27 }
 0x200   : > { %v1841_v0 = vpop.f32.mrf.mxu1  ;;  %v2469_v20 = vpop.f32.mrf.mxu3  ;;  %v1902_v14 = vadd.f32 %v1838_v54, %v1616_v22 }
 0x201   : > { %v14203_v17 = vadd.f32 %v2469_v20, %v2323_v45  ;;  %v2164_v20 = vsel %vm558_vm2, %v2159_v2, %v2163_v28  ;;  %v14219_v57 = vor.u32 %v2571_v51, %v2570_v40  ;;  %v2381_v40 = vsel %vm963_vm3, %v2378_v50, %v2380_v36 }
 0x202   : > { %v2040_v2 = vpack.c.b16 %v2023_v37, %v2023_v37  ;;  %v1463_v37 = vrot.slane %v13821_v43, 2 }
 0x203   : > { %10898 = vmatmul.msk.bf16.gmra.mxu1 %vm691_vm1, %v12934_v32 }
 0x204   : > { %v2260_v54 = vpop.f32.mrf.mxu2  ;;  %v2169_v27 = vshll.u32 %v2040_v2, 16 }
 0x205   : > { %v2324_v45 = vadd.f32 %v2260_v54, %v1902_v14  ;;  %v1555_v22 = vpop.f32.mrf.mxu0  ;;  %v12935_v54 = vld [vmem:[%s13584_s17 + $0x80] sm:$0xff] }
 0x206   : > { %v1617_v30 = vadd.f32 %v1555_v22, %v13827_v1  ;;  %v3818_v1 = vsel %vm740_vm0, %v11186_v61, 0  ;;  %v2171_v61 = vrot.slane %v2169_v27, 1 }
 0x207   : > { %3827 = vmatpush.bf16.msrb.mxu0 %v3818_v1 }
 0x208   : > { %v1843_v62 = vpop.f32.mrf.mxu1  ;;  %v2471_v13 = vpop.f32.mrf.mxu3  ;;  %v1903_v4 = vadd.f32 %v1841_v0, %v1617_v30  ;;  %10817 = vmatmul.msk.bf16.gmra.mxu0 %vm691_vm1, %v1462_v47  ;;  %v17523_v0 = vshrl.u32 %v14196_v11, 16 }
 0x209   : > { %v14222_v32 = vadd.f32 %v2471_v13, %v2324_v45  ;;  %10975 = vmatmul.msk.bf16.gmra.mxu2 %vm691_vm1, %v2164_v20  ;;  %v2811_v20 = vld [vmem:[%s13584_s17 + $0x8] sm:$0xc] }
 0x20b   : > { %17565 = vst [vmem:[#allocation13_spill] sm:$0xff] %v14222_v32 }
 0x20c   : > { %v2263_v14 = vpop.f32.mrf.mxu2 }
 0x20d   : > { %v2325_v51 = vadd.f32 %v2263_v14, %v1903_v4  ;;  %10992 = vmatmul.msk.bf16.gmra.mxu3 %vm691_vm1, %v2381_v40  ;;  %v1557_v13 = vpop.f32.mrf.mxu0  ;;  %v2167_v4 = vor.u32 %v17523_v0, %v2163_v28  ;;  %v2815_v40 = vunpack.c.l.b16 %v2811_v20  ;;  %v2563_v20 = vshrl.u32 %v13862_v55, 16  ;;  %v12963_v0 = vld [vmem:[%s13584_s17 + $0x70] sm:$0xff] }
 0x20e   : > { %v1618_v45 = vadd.f32 %v1557_v13, %v13837_v56  ;;  %v1464_v56 = vsel %vm1431_vm5, %v1461_v38, %v1463_v37 }
 0x20f   : > { %v2172_v13 = vsel %vm558_vm2, %v2167_v4, %v2171_v61  ;;  %v2565_v61 = vrot.slane %v2563_v20, 1 }
 0x210   : > { %v1846_v47 = vpop.f32.mrf.mxu1  ;;  %v2474_v22 = vpop.f32.mrf.mxu3  ;;  %v1904_v30 = vadd.f32 %v1843_v62, %v1618_v45  ;;  %v2382_v62 = vrot.slane %v2040_v2, 1  ;;  %v17566_v45 = vunpack.c.h.b16 %v13835_v18  ;;  %v2566_v2 = vshll.u32 %v13862_v55, 16  ;;  %v13281_v18 = vld [vmem:[%s13584_s17 + $0x10] sm:$0xff]  }
 0x211   : > { %v14236_v50 = vadd.f32 %v2474_v22, %v2325_v51 }
 0x212   : > { %v2816_v28 = vpack.c.b16 %v17566_v45, %v2815_v40  ;;  %v2383_v38 = vsel %vm963_vm3, %v2380_v36, %v2382_v62  ;;  %v2568_v40 = vrot.slane %v2566_v2, 2  ;;  %v12951_v2 = vld [vmem:[%s13584_s17 + $0x10] sm:$0xff] }
 0x213   : > { %10899 = vmatmul.msk.bf16.gmra.mxu1 %vm691_vm1, %v12935_v54 }
 0x214   : > { %v2265_v1 = vpop.f32.mrf.mxu2  ;;  %v2569_v45 = vor.u32 %v2568_v40, %v2565_v61 }
 0x215   : > { %v2326_v14 = vadd.f32 %v2265_v1, %v1904_v30  ;;  %v1560_v32 = vpop.f32.mrf.mxu0  ;;  %v14258_v1 = vld [vmem:[%s13584_s17 + $0x18] sm:$0xff] }
 0x216   : > { %v1619_v51 = vadd.f32 %v1560_v32, %v13854_v59  ;;  %v2817_v59 = vrot.slane %v2816_v28, 2  ;;  %v13340_v32 = vld [vmem:[%s13584_s17 + $0x10] sm:$0xff]  ;;  %v3427_v28 = vshrl.u32 %v13281_v18, 16 }
 0x217   : > { %v2818_v30 = vrot.slane %v13340_v32, 2 }
 0x218   : > { %v1848_v43 = vpop.f32.mrf.mxu1  ;;  %v2476_v27 = vpop.f32.mrf.mxu3  ;;  %v1905_v22 = vadd.f32 %v1846_v47, %v1619_v51  ;;  %10818 = vmatmul.msk.bf16.gmra.mxu0 %vm691_vm1, %v1464_v56 }
 0x219   : > { %v14247_v54 = vadd.f32 %v2476_v27, %v2326_v14  ;;  %10976 = vmatmul.msk.bf16.gmra.mxu2 %vm691_vm1, %v2172_v13  ;;  %v3429_v14 = vshll.u32 %v13281_v18, 16  ;;  %v2819_v55 = vsel %vm1431_vm5, %v2817_v59, %v2818_v30 }
 0x21b   : > { %v3431_v27 = vrot.slane %v3429_v14, 1  ;;  %v2820_v14 = vrot.slane %v13874_v26, 2 }
 0x21c   : > { %v2268_v37 = vpop.f32.mrf.mxu2 }
 0x21d   : > { %v2327_v4 = vadd.f32 %v2268_v37, %v1905_v22  ;;  %10993 = vmatmul.msk.bf16.gmra.mxu3 %vm691_vm1, %v2383_v38  ;;  %v1562_v47 = vpop.f32.mrf.mxu0  ;;  %v17515_v22 = vshll.u32 %v14258_v1, 16  ;;  %v3432_v37 = vor.u32 %v3431_v27, %v3427_v28  ;;  %v14284_v28 = vld [vmem:[%s13584_s17 + $0x20] sm:$0xff] }
 0x21e   : > { %v1620_v36 = vadd.f32 %v1562_v47, %v13868_v24  ;;  %v2573_v24 = vsel %vm1175_vm4, %v2569_v45, %v14219_v57 }
 0x220   : > { %v1851_v56 = vpop.f32.mrf.mxu1  ;;  %v2479_v13 = vpop.f32.mrf.mxu3  ;;  %v1906_v62 = vadd.f32 %v1848_v43, %v1620_v36  ;;  %v3436_v43 = vrot.slane %v17515_v22, 1 }
 0x221   : > { %v14262_v51 = vadd.f32 %v2479_v13, %v2327_v4 }
 0x222   : > { %v3437_v40 = vsel %vm558_vm2, %v3432_v37, %v3436_v43 }
 0x223   : > { %11012 = vmatmul.msk.bf16.vlgmr.msra.gmra.mxu1 %vm691_vm1, %v2819_v55 }
 0x224   : > { %v2270_v38 = vpop.f32.mrf.mxu2 }
 0x225   : > { %v2328_v20 = vadd.f32 %v2270_v38, %v1906_v62  ;;  %v1565_v32 = vpop.f32.mrf.mxu0 }
 0x226   : > { %v1621_v59 = vadd.f32 %v1565_v32, %v13880_v41  ;;  %v17567_v41 = vshrl.u32 %v13874_v26, 16 }
 0x228   : > { %v1853_v4 = vpop.f32.mrf.mxu1  ;;  %v2481_v47 = vpop.f32.mrf.mxu3  ;;  %v1907_v18 = vadd.f32 %v1851_v56, %v1621_v59  ;;  %10995 = vmatmul.msk.bf16.vlgmr.msra.gmra.mxu0 %vm691_vm1, %v2573_v24  ;;  %v2574_v62 = vrot.slane %v17567_v41, 1  ;;  %v17568_v56 = vshll.u32 %v13874_v26, 16  ;;  %v17522_v59 = vshrl.u32 %v14258_v1, 16 }
 0x229   : > { %v14272_v61 = vadd.f32 %v2481_v47, %v2328_v20  ;;  %11093 = vmatmul.msk.bf16.vlgmr.msra.gmra.mxu2 %vm691_vm1, %v12951_v2  ;;  %v2821_v20 = vsel %vm1431_vm5, %v2818_v30, %v2820_v14  ;;  %v17501_v47 = vshll.u32 %v14284_v28, 16 }
 0x22a   : > { %v2575_v45 = vrot.slane %v17568_v56, 2  ;;  %v3440_v30 = vor.u32 %v17522_v59, %v3436_v43 }
 0x22c   : > { %v2273_v36 = vpop.f32.mrf.mxu2  ;;  %v2576_v37 = vor.u32 %v2575_v45, %v2574_v62  ;;  %v13341_v45 = vld [vmem:[%s13584_s17 + $0x20] sm:$0xff] }
 0x22d   : > { %v2329_v55 = vadd.f32 %v2273_v36, %v1907_v18  ;;  %11170 = vmatmul.msk.bf16.vlgmr.msra.gmra.mxu3 %vm691_vm1, %v3437_v40  ;;  %v1567_v13 = vpop.f32.mrf.mxu0  ;;  %v12952_v40 = vld [vmem:[%s13584_s17 + $0x18] sm:$0xff] }
 0x22e   : > { %v1622_v27 = vadd.f32 %v1567_v13, %v13891_v15  ;;  %v2577_v15 = vsel %vm1175_vm4, %v14219_v57, %v2576_v37 }
 0x230   : > { %v1856_v38 = vpop.f32.mrf.mxu1  ;;  %v2484_v2 = vpop.f32.mrf.mxu3  ;;  %v1908_v32 = vadd.f32 %v1853_v4, %v1622_v27  ;;  %v3444_v4 = vrot.slane %v17501_v47, 1  ;;  %v2822_v27 = vrot.slane %v13341_v45, 2 }
 0x231   : > { %v14288_v24 = vadd.f32 %v2484_v2, %v2329_v55 }
 0x232   : > { %v3445_v57 = vsel %vm558_vm2, %v3440_v30, %v3444_v4 }
 0x233   : > { %11013 = vmatmul.msk.bf16.gmra.mxu1 %vm691_vm1, %v2821_v20 }
 0x234   : > { %v2275_v26 = vpop.f32.mrf.mxu2 }
 0x235   : > { %v2330_v18 = vadd.f32 %v2275_v26, %v1908_v32  ;;  %v1570_v36 = vpop.f32.mrf.mxu0 }
 0x236   : > { %v1623_v55 = vadd.f32 %v1570_v36, %v13903_v6  ;;  %v17569_v6 = vshrl.u32 %v13897_v5, 16 }
 0x238   : > { %v1858_v13 = vpop.f32.mrf.mxu1  ;;  %v2486_v41 = vpop.f32.mrf.mxu3  ;;  %v1909_v62 = vadd.f32 %v1856_v38, %v1623_v55  ;;  %10996 = vmatmul.msk.bf16.gmra.mxu0 %vm691_vm1, %v2577_v15  ;;  %v2578_v32 = vrot.slane %v17569_v6, 1  ;;  %v17570_v38 = vshll.u32 %v13897_v5, 16  ;;  %v2823_v15 = vsel %vm1431_vm5, %v2820_v14, %v2822_v27  ;;  %v12953_v6 = vld [vmem:[%s13584_s17 + $0x20] sm:$0xff] }
 0x239   : > { %v14301_v56 = vadd.f32 %v2486_v41, %v2330_v18  ;;  %11094 = vmatmul.msk.bf16.gmra.mxu2 %vm691_vm1, %v12952_v40  ;;  %v14313_v18 = vld [vmem:[%s13584_s17 + $0x28] sm:$0xff] }
 0x23a   : > { %v2579_v26 = vrot.slane %v17570_v38, 2  ;;  %v17500_v45 = vshll.u32 %v14313_v18, 16 }
 0x23c   : > { %v2278_v43 = vpop.f32.mrf.mxu2 }
 0x23d   : > { %v2331_v20 = vadd.f32 %v2278_v43, %v1909_v62  ;;  %11171 = vmatmul.msk.bf16.gmra.mxu3 %vm691_vm1, %v3445_v57  ;;  %v1572_v2 = vpop.f32.mrf.mxu0  ;;  %v2580_v62 = vor.u32 %v2579_v26, %v2578_v32  ;;  %v17512_v57 = vshrl.u32 %v14284_v28, 16 }
 0x23e   : > { %v1624_v40 = vadd.f32 %v1572_v2, %v13914_v46 }
 0x23f   : > { %v2581_v46 = vsel %vm1175_vm4, %v2576_v37, %v2580_v62  ;;  %v3448_v14 = vor.u32 %v17512_v57, %v3444_v4 }
 0x240   : > { %v1861_v36 = vpop.f32.mrf.mxu1  ;;  %v2489_v30 = vpop.f32.mrf.mxu3  ;;  %v1910_v55 = vadd.f32 %v1858_v13, %v1624_v40  ;;  %v3452_v13 = vrot.slane %v17500_v45, 1  ;;  %v12954_v45 = vld [vmem:[%s13584_s17 + $0x28] sm:$0xff] }
 0x241   : > { %v14317_v41 = vadd.f32 %v2489_v30, %v2331_v20 }
 0x242   : > { %v3453_v37 = vsel %vm558_vm2, %v3448_v14, %v3452_v13 }
 0x243   : > { %11014 = vmatmul.msk.bf16.gmra.mxu1 %vm691_vm1, %v2823_v15  ;;  %v13342_v15 = vld [vmem:[%s13584_s17 + $0x28] sm:$0xff] }
 0x244   : > { %v2280_v5 = vpop.f32.mrf.mxu2  ;;  %v2824_v30 = vrot.slane %v13342_v15, 2 }
 0x245   : > { %v2332_v43 = vadd.f32 %v2280_v5, %v1910_v55  ;;  %v1575_v38 = vpop.f32.mrf.mxu0 }
 0x246   : > { %v1625_v20 = vadd.f32 %v1575_v38, %v13926_v25  ;;  %v17571_v25 = vshrl.u32 %v13920_v35, 16  ;;  %v2825_v14 = vsel %vm1431_vm5, %v2822_v27, %v2824_v30 }
 0x248   : > { %v1863_v2 = vpop.f32.mrf.mxu1  ;;  %v2491_v32 = vpop.f32.mrf.mxu3  ;;  %v1911_v26 = vadd.f32 %v1861_v36, %v1625_v20  ;;  %10997 = vmatmul.msk.bf16.gmra.mxu0 %vm691_vm1, %v2581_v46  ;;  %v2582_v38 = vrot.slane %v17571_v25, 1  ;;  %v17572_v36 = vshll.u32 %v13920_v35, 16  ;;  %v14341_v20 = vld [vmem:[%s13584_s17 + $0x30] sm:$0xff] }
 0x249   : > { %v14329_v40 = vadd.f32 %v2491_v32, %v2332_v43  ;;  %11095 = vmatmul.msk.bf16.gmra.mxu2 %vm691_vm1, %v12953_v6  ;;  %v17502_v25 = vshll.u32 %v14341_v20, 16 }
 0x24a   : > { %v2583_v43 = vrot.slane %v17572_v36, 2 }
 0x24c   : > { %v2283_v4 = vpop.f32.mrf.mxu2 }
 0x24d   : > { %v2333_v55 = vadd.f32 %v2283_v4, %v1911_v26  ;;  %11172 = vmatmul.msk.bf16.gmra.mxu3 %vm691_vm1, %v3453_v37  ;;  %v1577_v5 = vpop.f32.mrf.mxu0  ;;  %v2584_v37 = vor.u32 %v2583_v43, %v2582_v38  ;;  %v17503_v4 = vshrl.u32 %v14313_v18, 16 }
 0x24e   : > { %v1626_v6 = vadd.f32 %v1577_v5, %v13937_v19 }
 0x24f   : > { %v2585_v19 = vsel %vm1175_vm4, %v2580_v62, %v2584_v37  ;;  %v3456_v27 = vor.u32 %v17503_v4, %v3452_v13 }
 0x250   : > { %v1866_v46 = vpop.f32.mrf.mxu1  ;;  %v2494_v32 = vpop.f32.mrf.mxu3  ;;  %v1912_v15 = vadd.f32 %v1863_v2, %v1626_v6  ;;  %v3460_v2 = vrot.slane %v17502_v25, 1  ;;  %v12955_v25 = vld [vmem:[%s13584_s17 + $0x30] sm:$0xff] }
 0x251   : > { %v14345_v26 = vadd.f32 %v2494_v32, %v2333_v55 }
 0x252   : > { %v3461_v62 = vsel %vm558_vm2, %v3456_v27, %v3460_v2 }
 0x253   : > { %11015 = vmatmul.msk.bf16.gmra.mxu1 %vm691_vm1, %v2825_v14  ;;  %v13343_v14 = vld [vmem:[%s13584_s17 + $0x30] sm:$0xff] }
 0x254   : > { %v2285_v35 = vpop.f32.mrf.mxu2  ;;  %v2826_v32 = vrot.slane %v13343_v14, 2 }
 0x255   : > { %v2334_v36 = vadd.f32 %v2285_v35, %v1912_v15  ;;  %v1580_v47 = vpop.f32.mrf.mxu0 }
 0x256   : > { %v1627_v55 = vadd.f32 %v1580_v47, %v13949_v33  ;;  %v17573_v33 = vshrl.u32 %v13943_v10, 16  ;;  %v2827_v27 = vsel %vm1431_vm5, %v2824_v30, %v2826_v32 }
 0x258   : > { %v1868_v5 = vpop.f32.mrf.mxu1  ;;  %v2496_v38 = vpop.f32.mrf.mxu3  ;;  %v1913_v43 = vadd.f32 %v1866_v46, %v1627_v55  ;;  %10998 = vmatmul.msk.bf16.gmra.mxu0 %vm691_vm1, %v2585_v19  ;;  %v2586_v47 = vrot.slane %v17573_v33, 1  ;;  %v17574_v46 = vshll.u32 %v13943_v10, 16  ;;  %v14369_v55 = vld [vmem:[%s13584_s17 + $0x38] sm:$0xff] }
 0x259   : > { %v14357_v6 = vadd.f32 %v2496_v38, %v2334_v36  ;;  %11096 = vmatmul.msk.bf16.gmra.mxu2 %vm691_vm1, %v12954_v45  ;;  %v17504_v33 = vshll.u32 %v14369_v55, 16 }
 0x25a   : > { %v2587_v36 = vrot.slane %v17574_v46, 2 }
 0x25c   : > { %v2288_v13 = vpop.f32.mrf.mxu2 }
 0x25d   : > { %v2335_v15 = vadd.f32 %v2288_v13, %v1913_v43  ;;  %11173 = vmatmul.msk.bf16.gmra.mxu3 %vm691_vm1, %v3461_v62  ;;  %v1582_v35 = vpop.f32.mrf.mxu0  ;;  %v2588_v62 = vor.u32 %v2587_v36, %v2586_v47  ;;  %v17505_v13 = vshrl.u32 %v14341_v20, 16 }
 0x25e   : > { %v1628_v45 = vadd.f32 %v1582_v35, %v13960_v12 }
 0x25f   : > { %v2589_v12 = vsel %vm1175_vm4, %v2584_v37, %v2588_v62  ;;  %v3464_v30 = vor.u32 %v17505_v13, %v3460_v2 }
 0x260   : > { %v1871_v19 = vpop.f32.mrf.mxu1  ;;  %v2499_v38 = vpop.f32.mrf.mxu3  ;;  %v1914_v14 = vadd.f32 %v1868_v5, %v1628_v45  ;;  %v3468_v5 = vrot.slane %v17504_v33, 1  ;;  %v12956_v33 = vld [vmem:[%s13584_s17 + $0x38] sm:$0xff] }
 0x261   : > { %v14373_v43 = vadd.f32 %v2499_v38, %v2335_v15 }
 0x262   : > { %v3469_v37 = vsel %vm558_vm2, %v3464_v30, %v3468_v5 }
 0x263   : > { %11016 = vmatmul.msk.bf16.gmra.mxu1 %vm691_vm1, %v2827_v27  ;;  %v13344_v27 = vld [vmem:[%s13584_s17 + $0x38] sm:$0xff] }
 0x264   : > { %v2290_v10 = vpop.f32.mrf.mxu2  ;;  %v2828_v38 = vrot.slane %v13344_v27, 2 }
 0x265   : > { %v2336_v46 = vadd.f32 %v2290_v10, %v1914_v14  ;;  %v1585_v4 = vpop.f32.mrf.mxu0 }
 0x266   : > { %v1629_v15 = vadd.f32 %v1585_v4, %v13972_v53  ;;  %v17575_v53 = vshrl.u32 %v13966_v21, 16  ;;  %v2829_v30 = vsel %vm1431_vm5, %v2826_v32, %v2828_v38 }
 0x268   : > { %v1873_v35 = vpop.f32.mrf.mxu1  ;;  %v2501_v47 = vpop.f32.mrf.mxu3  ;;  %v1915_v36 = vadd.f32 %v1871_v19, %v1629_v15  ;;  %10999 = vmatmul.msk.bf16.gmra.mxu0 %vm691_vm1, %v2589_v12  ;;  %v2590_v4 = vrot.slane %v17575_v53, 1  ;;  %v17576_v19 = vshll.u32 %v13966_v21, 16  ;;  %v14397_v15 = vld [vmem:[%s13584_s17 + $0x40] sm:$0xff] }
 0x269   : > { %v14385_v45 = vadd.f32 %v2501_v47, %v2336_v46  ;;  %11097 = vmatmul.msk.bf16.gmra.mxu2 %vm691_vm1, %v12955_v25  ;;  %v17506_v53 = vshll.u32 %v14397_v15, 16 }
 0x26a   : > { %v2591_v46 = vrot.slane %v17576_v19, 2 }
 0x26c   : > { %v2293_v2 = vpop.f32.mrf.mxu2 }
 0x26d   : > { %v2337_v14 = vadd.f32 %v2293_v2, %v1915_v36  ;;  %11174 = vmatmul.msk.bf16.gmra.mxu3 %vm691_vm1, %v3469_v37  ;;  %v1587_v10 = vpop.f32.mrf.mxu0  ;;  %v2592_v37 = vor.u32 %v2591_v46, %v2590_v4  ;;  %v17507_v2 = vshrl.u32 %v14369_v55, 16 }
 0x26e   : > { %v1630_v25 = vadd.f32 %v1587_v10, %v13983_v44 }
 0x26f   : > { %v2593_v44 = vsel %vm1175_vm4, %v2588_v62, %v2592_v37  ;;  %v3472_v32 = vor.u32 %v17507_v2, %v3468_v5 }
 0x270   : > { %v1876_v12 = vpop.f32.mrf.mxu1  ;;  %v2504_v47 = vpop.f32.mrf.mxu3  ;;  %v1916_v27 = vadd.f32 %v1873_v35, %v1630_v25  ;;  %v3476_v35 = vrot.slane %v17506_v53, 1  ;;  %v12957_v53 = vld [vmem:[%s13584_s17 + $0x40] sm:$0xff] }
 0x271   : > { %v14401_v36 = vadd.f32 %v2504_v47, %v2337_v14 }
 0x272   : > { %v3477_v62 = vsel %vm558_vm2, %v3472_v32, %v3476_v35 }
 0x273   : > { %11017 = vmatmul.msk.bf16.gmra.mxu1 %vm691_vm1, %v2829_v30  ;;  %v13345_v30 = vld [vmem:[%s13584_s17 + $0x40] sm:$0xff] }
 0x274   : > { %v2295_v21 = vpop.f32.mrf.mxu2  ;;  %v2830_v47 = vrot.slane %v13345_v30, 2 }
 0x275   : > { %v2338_v19 = vadd.f32 %v2295_v21, %v1916_v27  ;;  %v1590_v13 = vpop.f32.mrf.mxu0 }
 0x276   : > { %v1631_v14 = vadd.f32 %v1590_v13, %v13995_v29  ;;  %v17577_v29 = vshrl.u32 %v13989_v60, 16  ;;  %v2831_v32 = vsel %vm1431_vm5, %v2828_v38, %v2830_v47 }
 0x278   : > { %v1878_v10 = vpop.f32.mrf.mxu1  ;;  %v2506_v4 = vpop.f32.mrf.mxu3  ;;  %v1917_v46 = vadd.f32 %v1876_v12, %v1631_v14  ;;  %11000 = vmatmul.msk.bf16.gmra.mxu0 %vm691_vm1, %v2593_v44  ;;  %v2594_v13 = vrot.slane %v17577_v29, 1  ;;  %v17578_v12 = vshll.u32 %v13989_v60, 16  ;;  %v14425_v14 = vld [vmem:[%s13584_s17 + $0x48] sm:$0xff] }
 0x279   : > { %v14413_v25 = vadd.f32 %v2506_v4, %v2338_v19  ;;  %11098 = vmatmul.msk.bf16.gmra.mxu2 %vm691_vm1, %v12956_v33  ;;  %v17508_v29 = vshll.u32 %v14425_v14, 16 }
 0x27a   : > { %v2595_v19 = vrot.slane %v17578_v12, 2 }
 0x27c   : > { %v2298_v5 = vpop.f32.mrf.mxu2 }
 0x27d   : > { %v2339_v27 = vadd.f32 %v2298_v5, %v1917_v46  ;;  %11175 = vmatmul.msk.bf16.gmra.mxu3 %vm691_vm1, %v3477_v62  ;;  %v1592_v21 = vpop.f32.mrf.mxu0  ;;  %v2596_v62 = vor.u32 %v2595_v19, %v2594_v13  ;;  %v17509_v5 = vshrl.u32 %v14397_v15, 16 }
 0x27e   : > { %v1632_v33 = vadd.f32 %v1592_v21, %v14006_v8 }
 0x27f   : > { %v2597_v8 = vsel %vm1175_vm4, %v2592_v37, %v2596_v62  ;;  %v3480_v38 = vor.u32 %v17509_v5, %v3476_v35 }
 0x280   : > { %v1881_v44 = vpop.f32.mrf.mxu1  ;;  %v2509_v4 = vpop.f32.mrf.mxu3  ;;  %v1918_v30 = vadd.f32 %v1878_v10, %v1632_v33  ;;  %v3484_v10 = vrot.slane %v17508_v29, 1  ;;  %v12958_v29 = vld [vmem:[%s13584_s17 + $0x48] sm:$0xff] }
 0x281   : > { %v14429_v46 = vadd.f32 %v2509_v4, %v2339_v27 }
 0x282   : > { %v3485_v37 = vsel %vm558_vm2, %v3480_v38, %v3484_v10 }
 0x283   : > { %11018 = vmatmul.msk.bf16.gmra.mxu1 %vm691_vm1, %v2831_v32  ;;  %v13346_v32 = vld [vmem:[%s13584_s17 + $0x48] sm:$0xff] }
 0x284   : > { %v2300_v60 = vpop.f32.mrf.mxu2  ;;  %v2832_v4 = vrot.slane %v13346_v32, 2 }
 0x285   : > { %v2340_v12 = vadd.f32 %v2300_v60, %v1918_v30  ;;  %v1595_v2 = vpop.f32.mrf.mxu0 }
 0x286   : > { %v1633_v27 = vadd.f32 %v1595_v2, %v14018_v16  ;;  %v17579_v16 = vshrl.u32 %v14012_v63, 16  ;;  %v2833_v38 = vsel %vm1431_vm5, %v2830_v47, %v2832_v4 }
 0x288   : > { %v1883_v21 = vpop.f32.mrf.mxu1  ;;  %v2511_v13 = vpop.f32.mrf.mxu3  ;;  %v1919_v19 = vadd.f32 %v1881_v44, %v1633_v27  ;;  %11001 = vmatmul.msk.bf16.gmra.mxu0 %vm691_vm1, %v2597_v8  ;;  %v2598_v2 = vrot.slane %v17579_v16, 1  ;;  %v17580_v44 = vshll.u32 %v14012_v63, 16  ;;  %v14453_v27 = vld [vmem:[%s13584_s17 + $0x50] sm:$0xff] }
 0x289   : > { %v14441_v33 = vadd.f32 %v2511_v13, %v2340_v12  ;;  %11099 = vmatmul.msk.bf16.gmra.mxu2 %vm691_vm1, %v12957_v53  ;;  %v17510_v16 = vshll.u32 %v14453_v27, 16 }
 0x28a   : > { %v2599_v12 = vrot.slane %v17580_v44, 2 }
 0x28c   : > { %v2303_v35 = vpop.f32.mrf.mxu2 }
 0x28d   : > { %v2341_v30 = vadd.f32 %v2303_v35, %v1919_v19  ;;  %11176 = vmatmul.msk.bf16.gmra.mxu3 %vm691_vm1, %v3485_v37  ;;  %v1597_v60 = vpop.f32.mrf.mxu0  ;;  %v2600_v37 = vor.u32 %v2599_v12, %v2598_v2  ;;  %v17511_v35 = vshrl.u32 %v14425_v14, 16 }
 0x28e   : > { %v1634_v53 = vadd.f32 %v1597_v60, %v14029_v23 }
 0x28f   : > { %v2601_v23 = vsel %vm1175_vm4, %v2596_v62, %v2600_v37  ;;  %v3488_v47 = vor.u32 %v17511_v35, %v3484_v10  ;;  %v12959_v35 = vld [vmem:[%s13584_s17 + $0x50] sm:$0xff] }
 0x290   : > { %v1886_v8 = vpop.f32.mrf.mxu1  ;;  %v2514_v13 = vpop.f32.mrf.mxu3  ;;  %v1920_v32 = vadd.f32 %v1883_v21, %v1634_v53  ;;  %v3492_v21 = vrot.slane %v17510_v16, 1 }
 0x291   : > { %v14457_v19 = vadd.f32 %v2514_v13, %v2341_v30 }
 0x292   : > { %v3493_v62 = vsel %vm558_vm2, %v3488_v47, %v3492_v21 }
 0x293   : > { %11019 = vmatmul.msk.bf16.gmra.mxu1 %vm691_vm1, %v2833_v38  ;;  %v13347_v38 = vld [vmem:[%s13584_s17 + $0x50] sm:$0xff] }
 0x294   : > { %v2305_v63 = vpop.f32.mrf.mxu2  ;;  %v2834_v13 = vrot.slane %v13347_v38, 2 }
 0x295   : > { %v2342_v44 = vadd.f32 %v2305_v63, %v1920_v32  ;;  %v1600_v5 = vpop.f32.mrf.mxu0 }
 0x296   : > { %v1635_v30 = vadd.f32 %v1600_v5, %v14041_v39  ;;  %v17581_v39 = vshrl.u32 %v14035_v3, 16  ;;  %v2835_v47 = vsel %vm1431_vm5, %v2832_v4, %v2834_v13 }
 0x298   : > { %v1888_v60 = vpop.f32.mrf.mxu1  ;;  %v2516_v2 = vpop.f32.mrf.mxu3  ;;  %v1921_v12 = vadd.f32 %v1886_v8, %v1635_v30  ;;  %11002 = vmatmul.msk.bf16.gmra.mxu0 %vm691_vm1, %v2601_v23  ;;  %v2602_v5 = vrot.slane %v17581_v39, 1  ;;  %v17582_v8 = vshll.u32 %v14035_v3, 16  ;;  %v14481_v30 = vld [vmem:[%s13584_s17 + $0x58] sm:$0xff]  ;;  %v17583_v23 = vld [vmem:[#allocation6_spill] sm:$0xff] }
 0x299   : > { %v14469_v53 = vadd.f32 %v2516_v2, %v2342_v44  ;;  %11100 = vmatmul.msk.bf16.gmra.mxu2 %vm691_vm1, %v12958_v29  ;;  %v17513_v39 = vshll.u32 %v14481_v30, 16 }
 0x29a   : > { %v2603_v44 = vrot.slane %v17582_v8, 2 }
 0x29c   : > { %v2308_v10 = vpop.f32.mrf.mxu2 }
 0x29d   : > { %v2343_v32 = vadd.f32 %v2308_v10, %v1921_v12  ;;  %11177 = vmatmul.msk.bf16.gmra.mxu3 %vm691_vm1, %v3493_v62  ;;  %v1602_v63 = vpop.f32.mrf.mxu0  ;;  %v2604_v62 = vor.u32 %v2603_v44, %v2602_v5  ;;  %v17514_v10 = vshrl.u32 %v14453_v27, 16 }
 0x29e   : > { %v1636_v29 = vadd.f32 %v1602_v63, %v17583_v23 }
 0x29f   : > { %v2605_v63 = vsel %vm1175_vm4, %v2600_v37, %v2604_v62  ;;  %v3496_v4 = vor.u32 %v17514_v10, %v3492_v21  ;;  %v12960_v10 = vld [vmem:[%s13584_s17 + $0x58] sm:$0xff] }
 0x2a0   : > { %v2910_v2 = vpop.f32.mrf.mxu1  ;;  %v2519_v38 = vpop.f32.mrf.mxu3  ;;  %v1922_v16 = vadd.f32 %v1888_v60, %v1636_v29  ;;  %v3500_v60 = vrot.slane %v17513_v39, 1 }
 0x2a1   : > { %v14485_v12 = vadd.f32 %v2519_v38, %v2343_v32 }
 0x2a2   : > { %v3501_v37 = vsel %vm558_vm2, %v3496_v4, %v3500_v60 }
 0x2a3   : > { %11020 = vmatmul.msk.bf16.gmra.mxu1 %vm691_vm1, %v2835_v47 }
 0x2a4   : > { %v2310_v3 = vpop.f32.mrf.mxu2 }
 0x2a5   : > { %v2344_v8 = vadd.f32 %v2310_v3, %v1922_v16  ;;  %v2699_v57 = vpop.f32.mrf.mxu0  ;;  %v13348_v16 = vld [vmem:[%s13584_s17 + $0x58] sm:$0xff] }
 0x2a6   : > { %v2779_v32 = vadd.f32 %v2699_v57, %v14066_v7  ;;  %v2836_v47 = vrot.slane %v13348_v16, 2  ;;  %v17584_v7 = vshrl.u32 %v14059_v48, 16 }
 0x2a8   : > { %v2912_v5 = vpop.f32.mrf.mxu1  ;;  %v2521_v44 = vpop.f32.mrf.mxu3  ;;  %v2990_v29 = vadd.f32 %v2910_v2, %v2779_v32  ;;  %11003 = vmatmul.msk.bf16.gmra.mxu0 %vm691_vm1, %v2605_v63  ;;  %v2606_v57 = vrot.slane %v17584_v7, 1  ;;  %v14509_v32 = vld [vmem:[%s13584_s17 + $0x60] sm:$0xff]  ;;  %v17586_v63 = vld [vmem:[#allocation7_spill] sm:$0xff]  ;;  %v2837_v4 = vsel %vm1431_vm5, %v2834_v13, %v2836_v47 }
 0x2a9   : > { %v14497_v23 = vadd.f32 %v2521_v44, %v2344_v8  ;;  %11101 = vmatmul.msk.bf16.gmra.mxu2 %vm691_vm1, %v12959_v35  ;;  %v17585_v8 = vshll.u32 %v14059_v48, 16  ;;  %v17516_v7 = vshll.u32 %v14509_v32, 16 }
 0x2ab   : > { %v2607_v2 = vrot.slane %v17585_v8, 2 }
 0x2ac   : > { %v3196_v21 = vpop.f32.mrf.mxu2 }
 0x2ad   : > { %v3276_v38 = vadd.f32 %v3196_v21, %v2990_v29  ;;  %11178 = vmatmul.msk.bf16.gmra.mxu3 %vm691_vm1, %v3501_v37  ;;  %v2701_v3 = vpop.f32.mrf.mxu0  ;;  %v2608_v37 = vor.u32 %v2607_v2, %v2606_v57  ;;  %v17517_v21 = vshrl.u32 %v14481_v30, 16 }
 0x2ae   : > { %v2780_v35 = vadd.f32 %v2701_v3, %v17586_v63 }
 0x2af   : > { %v2609_v3 = vsel %vm1175_vm4, %v2604_v62, %v2608_v37  ;;  %v3504_v13 = vor.u32 %v17517_v21, %v3500_v60 }
 0x2b0   : > { %v2915_v44 = vpop.f32.mrf.mxu1  ;;  %v3618_v16 = vpop.f32.mrf.mxu3  ;;  %v2991_v39 = vadd.f32 %v2912_v5, %v2780_v35  ;;  %v3508_v5 = vrot.slane %v17516_v7, 1  ;;  %v12961_v7 = vld [vmem:[%s13584_s17 + $0x60] sm:$0xff] }
 0x2b1   : > { %v14513_v29 = vadd.f32 %v3618_v16, %v3276_v38 }
 0x2b2   : > { %v3509_v62 = vsel %vm558_vm2, %v3504_v13, %v3508_v5 }
 0x2b3   : > { %11021 = vmatmul.msk.bf16.gmra.mxu1 %vm691_vm1, %v2837_v4 }
 0x2b4   : > { %v3198_v48 = vpop.f32.mrf.mxu2 }
 0x2b5   : > { %v3277_v8 = vadd.f32 %v3198_v48, %v2991_v39  ;;  %v2704_v22 = vpop.f32.mrf.mxu0  ;;  %v13349_v39 = vld [vmem:[%s13584_s17 + $0x60] sm:$0xff] }
 0x2b6   : > { %v2781_v38 = vadd.f32 %v2704_v22, %v14091_v52  ;;  %v2838_v4 = vrot.slane %v13349_v39, 2  ;;  %v17587_v52 = vshrl.u32 %v14084_v42, 16 }
 0x2b8   : > { %v2917_v57 = vpop.f32.mrf.mxu1  ;;  %v3620_v2 = vpop.f32.mrf.mxu3  ;;  %v2992_v63 = vadd.f32 %v2915_v44, %v2781_v38  ;;  %11004 = vmatmul.msk.bf16.gmra.mxu0 %vm691_vm1, %v2609_v3  ;;  %v2610_v22 = vrot.slane %v17587_v52, 1  ;;  %v17588_v44 = vshll.u32 %v14084_v42, 16  ;;  %v14537_v38 = vld [vmem:[%s13584_s17 + $0x68] sm:$0xff]  ;;  %v2839_v13 = vsel %vm1431_vm5, %v2836_v47, %v2838_v4 }
 0x2b9   : > { %v14525_v35 = vadd.f32 %v3620_v2, %v3277_v8  ;;  %11102 = vmatmul.msk.bf16.gmra.mxu2 %vm691_vm1, %v12960_v10  ;;  %v17518_v52 = vshll.u32 %v14537_v38, 16 }
 0x2ba   : > { %v2611_v8 = vrot.slane %v17588_v44, 2 }
 0x2bc   : > { %v3201_v60 = vpop.f32.mrf.mxu2 }
 0x2bd   : > { %v3278_v16 = vadd.f32 %v3201_v60, %v2992_v63  ;;  %11179 = vmatmul.msk.bf16.gmra.mxu3 %vm691_vm1, %v3509_v62  ;;  %v2706_v48 = vpop.f32.mrf.mxu0  ;;  %v2612_v62 = vor.u32 %v2611_v8, %v2610_v22  ;;  %v17519_v60 = vshrl.u32 %v14509_v32, 16 }
 0x2be   : > { %v2782_v10 = vadd.f32 %v2706_v48, %v14103_v9 }
 0x2bf   : > { %v2613_v9 = vsel %vm1175_vm4, %v2608_v37, %v2612_v62  ;;  %v3512_v47 = vor.u32 %v17519_v60, %v3508_v5 }
 0x2c0   : > { %v2920_v3 = vpop.f32.mrf.mxu1  ;;  %v3623_v2 = vpop.f32.mrf.mxu3  ;;  %v2993_v39 = vadd.f32 %v2917_v57, %v2782_v10  ;;  %v3516_v57 = vrot.slane %v17518_v52, 1  ;;  %v17591_v52 = vshll.u32 %v14109_v31, 16 }
 0x2c1   : > { %v14541_v63 = vadd.f32 %v3623_v2, %v3278_v16  ;;  %v17589_v16 = vld [vmem:[#allocation8_spill] sm:$0xff]  ;;  %v13350_v2 = vld [vmem:[%s13584_s17 + $0x68] sm:$0xff] }
 0x2c2   : > { %v3517_v37 = vsel %vm558_vm2, %v3512_v47, %v3516_v57 }
 0x2c3   : > { %11022 = vmatmul.msk.bf16.gmra.mxu1 %vm691_vm1, %v2839_v13 }
 0x2c4   : > { %v3203_v42 = vpop.f32.mrf.mxu2 }
 0x2c5   : > { %v3279_v44 = vadd.f32 %v3203_v42, %v2993_v39  ;;  %v2709_v21 = vpop.f32.mrf.mxu0  ;;  %v2840_v39 = vrot.slane %v13350_v2, 2 }
 0x2c6   : > { %v2783_v48 = vadd.f32 %v2709_v21, %v17589_v16  ;;  %v17590_v21 = vshrl.u32 %v14109_v31, 16 }
 0x2c7   : > { %v2841_v47 = vsel %vm1431_vm5, %v2838_v4, %v2840_v39  ;;  %v11203_v4 = vld [vmem:[%s17554_s1 + $0x34] sm:$0xf] }
 0x2c8   : > { %v2922_v22 = vpop.f32.mrf.mxu1  ;;  %v3625_v8 = vpop.f32.mrf.mxu3  ;;  %v2994_v10 = vadd.f32 %v2920_v3, %v2783_v48  ;;  %11005 = vmatmul.msk.bf16.gmra.mxu0 %vm691_vm1, %v2613_v9  ;;  %v2614_v16 = vrot.slane %v17590_v21, 1  ;;  %v2615_v3 = vrot.slane %v17591_v52, 2  ;;  %v14565_v48 = vld [vmem:[%s13584_s17 + $0x70] sm:$0xff]  ;;  %v17592_v9 = vld [vmem:[#allocation9_spill] sm:$0xff] }
 0x2c9   : > { %v14553_v13 = vadd.f32 %v3625_v8, %v3279_v44  ;;  %11103 = vmatmul.msk.bf16.gmra.mxu2 %vm691_vm1, %v12961_v7  ;;  %v11237_v52 = vld [vmem:[%s17554_s1 + $0x3c] sm:$0xf] }
 0x2ca   : > { %v2616_v31 = vor.u32 %v2615_v3, %v2614_v16 }
 0x2cc   : > { %v3206_v5 = vpop.f32.mrf.mxu2 }
 0x2cd   : > { %v3280_v42 = vadd.f32 %v3206_v5, %v2994_v10  ;;  %11180 = vmatmul.msk.bf16.gmra.mxu3 %vm691_vm1, %v3517_v37  ;;  %v2711_v44 = vpop.f32.mrf.mxu0  ;;  %v11220_v10 = vld [vmem:[%s17554_s1 + $0x38] sm:$0xf] }
 0x2ce   : > { %v2784_v8 = vadd.f32 %v2711_v44, %v17592_v9  ;;  %v4284_v37 = vsel %vm740_vm0, %v11220_v10, 0  ;;  %v17520_v44 = vshrl.u32 %v14537_v38, 16  ;;  %v17521_v9 = vshll.u32 %v14565_v48, 16 }
 0x2cf   : > { %4293 = vmatpush.bf16.msrb.mxu2 %v4284_v37 }
 0x2d0   : > { %v2925_v7 = vpop.f32.mrf.mxu1  ;;  %v3628_v2 = vpop.f32.mrf.mxu3  ;;  %v2995_v5 = vadd.f32 %v2922_v22, %v2784_v8  ;;  %v4570_v22 = vsel %vm740_vm0, %v11237_v52, 0  ;;  %v12962_v8 = vld [vmem:[%s13584_s17 + $0x68] sm:$0xff]  ;;  %v3524_v37 = vrot.slane %v17521_v9, 1 }
 0x2d1   : > { %v14573_v21 = vadd.f32 %v3628_v2, %v3280_v42  ;;  %v4073_v42 = vsel %vm740_vm0, %v11203_v4, 0  ;;  %4579 = vmatpush.bf16.msrb.mxu3 %v4570_v22  ;;  %v2617_v2 = vsel %vm1175_vm4, %v2612_v62, %v2616_v31 }
 0x2d2   : > { %4082 = vmatpush.bf16.msrb.mxu1 %v4073_v42 }
 0x2d3   : > { %11023 = vmatmul.msk.bf16.gmra.mxu1 %vm691_vm1, %v2841_v47  ;;  %v3520_v47 = vor.u32 %v17520_v44, %v3516_v57 }
 0x2d4   : > { %v3208_v16 = vpop.f32.mrf.mxu2 }
 0x2d5   : > { %v3281_v3 = vadd.f32 %v3208_v16, %v2995_v5  ;;  %v2714_v10 = vpop.f32.mrf.mxu0  ;;  %v3525_v62 = vsel %vm558_vm2, %v3520_v47, %v3524_v37  ;;  %v13351_v5 = vld [vmem:[%s13584_s17 + $0x70] sm:$0xff] }
 0x2d6   : > { %v2785_v60 = vadd.f32 %v2714_v10, %v14153_v58  ;;  %v2842_v16 = vrot.slane %v13351_v5, 2  ;;  %v17594_v58 = vshrl.u32 %v14146_v34, 16 }
 0x2d8   : > { %v2927_v52 = vpop.f32.mrf.mxu1  ;;  %v3630_v4 = vpop.f32.mrf.mxu3  ;;  %v2996_v22 = vadd.f32 %v2925_v7, %v2785_v60  ;;  %11006 = vmatmul.msk.bf16.gmra.mxu0 %vm691_vm1, %v2617_v2  ;;  %v2618_v10 = vrot.slane %v17594_v58, 1  ;;  %v17595_v60 = vshll.u32 %v14146_v34, 16  ;;  %v17597_v2 = vld [vmem:[#allocation10_spill] sm:$0xff]  ;;  %v2843_v47 = vsel %vm1431_vm5, %v2840_v39, %v2842_v16 }
 0x2d9   : > { %v14593_v42 = vadd.f32 %v3630_v4, %v3281_v3  ;;  %11104 = vmatmul.msk.bf16.gmra.mxu2 %vm691_vm1, %v12962_v8  ;;  %v14605_v3 = vld [vmem:[%s13584_s17 + $0x78] sm:$0xff] }
 0x2da   : > { %v2619_v7 = vrot.slane %v17595_v60, 2  ;;  %17596 = vst [vmem:[#allocation7_spill] sm:$0xff] %v14605_v3  ;;  %v17524_v58 = vshll.u32 %v14605_v3, 16 }
 0x2db   : > { %17593 = vst [vmem:[#allocation6_spill] sm:$0xff] %v14593_v42 }
 0x2dc   : > { %v3211_v57 = vpop.f32.mrf.mxu2 }
 0x2dd   : > { %v3282_v44 = vadd.f32 %v3211_v57, %v2996_v22  ;;  %11181 = vmatmul.msk.bf16.gmra.mxu3 %vm691_vm1, %v3525_v62  ;;  %v2716_v9 = vpop.f32.mrf.mxu0  ;;  %v2620_v62 = vor.u32 %v2619_v7, %v2618_v10  ;;  %v17525_v57 = vshrl.u32 %v14565_v48, 16 }
 0x2de   : > { %v2786_v8 = vadd.f32 %v2716_v9, %v17597_v2 }
 0x2df   : > { %v2621_v9 = vsel %vm1175_vm4, %v2616_v31, %v2620_v62  ;;  %v3528_v39 = vor.u32 %v17525_v57, %v3524_v37  ;;  %v13352_v31 = vld [vmem:[%s13584_s17 + $0x78] sm:$0xff] }
 0x2e0   : > { %v2930_v4 = vpop.f32.mrf.mxu1  ;;  %v3633_v5 = vpop.f32.mrf.mxu3  ;;  %v2997_v59 = vadd.f32 %v2927_v52, %v2786_v8  ;;  %v17599_v52 = vld [vmem:[#allocation11_spill] sm:$0xff] }
 0x2e1   : > { %v14609_v22 = vadd.f32 %v3633_v5, %v3282_v44  ;;  %v3532_v44 = vrot.slane %v17524_v58, 1  ;;  %v2844_v5 = vrot.slane %v13352_v31, 2 }
 0x2e3   : > { %17598 = vst [vmem:[#allocation8_spill] sm:$0xff] %v14609_v22  ;;  %11024 = vmatmul.msk.bf16.gmra.mxu1 %vm691_vm1, %v2843_v47 }
 0x2e4   : > { %v3213_v34 = vpop.f32.mrf.mxu2 }
 0x2e5   : > { %v3283_v60 = vadd.f32 %v3213_v34, %v2997_v59  ;;  %v2719_v42 = vpop.f32.mrf.mxu0  ;;  %v3533_v59 = vsel %vm558_vm2, %v3528_v39, %v3532_v44  ;;  %v2845_v39 = vsel %vm1431_vm5, %v2842_v16, %v2844_v5 }
 0x2e6   : > { %v2787_v10 = vadd.f32 %v2719_v42, %v17599_v52  ;;  %v17601_v42 = vshrl.u32 %v14171_v49, 16 }
 0x2e8   : > { %v2932_v7 = vpop.f32.mrf.mxu1  ;;  %v3635_v2 = vpop.f32.mrf.mxu3  ;;  %v2998_v8 = vadd.f32 %v2930_v4, %v2787_v10  ;;  %11007 = vmatmul.msk.bf16.gmra.mxu0 %vm691_vm1, %v2621_v9  ;;  %v2622_v52 = vrot.slane %v17601_v42, 1  ;;  %v17602_v4 = vshll.u32 %v14171_v49, 16  ;;  %v14633_v10 = vld [vmem:[%s13584_s17 + $0x80] sm:$0xff]  ;;  %v17604_v9 = vld [vmem:[#allocation12_spill] sm:$0xff] }
 0x2e9   : > { %v14621_v47 = vadd.f32 %v3635_v2, %v3283_v60  ;;  %11105 = vmatmul.msk.bf16.gmra.mxu2 %vm691_vm1, %v12963_v0  ;;  %17603 = vst [vmem:[#allocation10_spill] sm:$0xff] %v14633_v10  ;;  %v17526_v42 = vshll.u32 %v14633_v10, 16 }
 0x2ea   : > { %v2623_v60 = vrot.slane %v17602_v4, 2 }
 0x2eb   : > { %17600 = vst [vmem:[#allocation9_spill] sm:$0xff] %v14621_v47  ;;  %v12964_v47 = vld [vmem:[%s13584_s17 + $0x78] sm:$0xff] }
 0x2ec   : > { %v3216_v37 = vpop.f32.mrf.mxu2 }
 0x2ed   : > { %v3284_v34 = vadd.f32 %v3216_v37, %v2998_v8  ;;  %11182 = vmatmul.msk.bf16.gmra.mxu3 %vm691_vm1, %v3533_v59  ;;  %v2721_v58 = vpop.f32.mrf.mxu0  ;;  %v2624_v59 = vor.u32 %v2623_v60, %v2622_v52  ;;  %v17527_v37 = vshrl.u32 %v14605_v3, 16 }
 0x2ee   : > { %v2788_v0 = vadd.f32 %v2721_v58, %v17604_v9 }
 0x2ef   : > { %v2625_v58 = vsel %vm1175_vm4, %v2620_v62, %v2624_v59  ;;  %v3536_v16 = vor.u32 %v17527_v37, %v3532_v44 }
 0x2f0   : > { %v2935_v2 = vpop.f32.mrf.mxu1  ;;  %v3638_v31 = vpop.f32.mrf.mxu3  ;;  %v2999_v57 = vadd.f32 %v2932_v7, %v2788_v0  ;;  %v3540_v7 = vrot.slane %v17526_v42, 1 }
 0x2f1   : > { %v14637_v8 = vadd.f32 %v3638_v31, %v3284_v34 }
 0x2f2   : > { %v3541_v62 = vsel %vm558_vm2, %v3536_v16, %v3540_v7 }
 0x2f3   : > { %17605 = vst [vmem:[#allocation11_spill] sm:$0xff] %v14637_v8  ;;  %11025 = vmatmul.msk.bf16.gmra.mxu1 %vm691_vm1, %v2845_v39 }
 0x2f4   : > { %v3218_v49 = vpop.f32.mrf.mxu2 }
 0x2f5   : > { %v3285_v4 = vadd.f32 %v3218_v49, %v2999_v57  ;;  %v2724_v22 = vpop.f32.mrf.mxu0  ;;  %v13353_v57 = vld [vmem:[%s13584_s17 + $0x80] sm:$0xff]  ;;  %v14657_v49 = vld [vmem:[%s13584_s17 + $0x88] sm:$0xff] }
 0x2f6   : > { %v2789_v34 = vadd.f32 %v2724_v22, %v14203_v17  ;;  %v2846_v39 = vrot.slane %v13353_v57, 2  ;;  %v17607_v22 = vshrl.u32 %v14196_v11, 16  ;;  %v2556_v57 = vld [vmem:[%s13584_s17 + $0x88] sm:$0x3]  ;;  %v17528_v37 = vshll.u32 %v14657_v49, 16 }
 0x2f8   : > { %v2937_v52 = vpop.f32.mrf.mxu1  ;;  %v3640_v60 = vpop.f32.mrf.mxu3  ;;  %v3000_v9 = vadd.f32 %v2935_v2, %v2789_v34  ;;  %11008 = vmatmul.msk.bf16.gmra.mxu0 %vm691_vm1, %v2625_v58  ;;  %v2626_v2 = vrot.slane %v17607_v22, 1  ;;  %v17609_v34 = vld [vmem:[#allocation13_spill] sm:$0xff]  ;;  %v2847_v16 = vsel %vm1431_vm5, %v2844_v5, %v2846_v39 }
 0x2f9   : > { %v14649_v0 = vadd.f32 %v3640_v60, %v3285_v4  ;;  %11106 = vmatmul.msk.bf16.gmra.mxu2 %vm691_vm1, %v12964_v47  ;;  %v17608_v4 = vshll.u32 %v14196_v11, 16  ;;  %v2560_v11 = vunpack.c.l.b16 %v2556_v57  ;;  %v3730_v57 = vld [vmem:[%s13584_s17 + $0x10] sm:$0xe] }
 0x2fb   : > { %17606 = vst [vmem:[#allocation12_spill] sm:$0xff] %v14649_v0  ;;  %v2627_v58 = vrot.slane %v17608_v4, 2 }
 0x2fc   : > { %v3221_v44 = vpop.f32.mrf.mxu2 }
 0x2fd   : > { %v3286_v31 = vadd.f32 %v3221_v44, %v3000_v9  ;;  %11183 = vmatmul.msk.bf16.gmra.mxu3 %vm691_vm1, %v3541_v62  ;;  %v2726_v17 = vpop.f32.mrf.mxu0  ;;  %v17529_v62 = vshrl.u32 %v14633_v10, 16  ;;  %v2628_v22 = vor.u32 %v2627_v58, %v2626_v2  ;;  %v3340_v58 = vld [vmem:[%s13584_s17 + $0x90] sm:$0x1] }
 0x2fe   : > { %v2790_v47 = vadd.f32 %v2726_v17, %v17609_v34  ;;  %v12965_v34 = vld [vmem:[%s13584_s17 + $0x80] sm:$0xff] }
 0x2ff   : > { %v3544_v5 = vor.u32 %v17529_v62, %v3540_v7  ;;  %v13354_v62 = vld [vmem:[%s13584_s17 + $0x10] sm:$0xff]  }
 0x300   : > { %v2940_v60 = vpop.f32.mrf.mxu1  ;;  %v3643_v42 = vpop.f32.mrf.mxu3  ;;  %v3001_v9 = vadd.f32 %v2937_v52, %v2790_v47  ;;  %v2561_v47 = vpack.c.b16 %v2560_v11, %v2560_v11 }
 0x301   : > { %v14666_v44 = vadd.f32 %v3643_v42, %v3286_v31  ;;  %v3548_v42 = vrot.slane %v17528_v37, 1  ;;  %v2629_v31 = vsel %vm1175_vm4, %v2624_v59, %v2628_v22  ;;  %v11318_v59 = vld [vmem:[%s17554_s1 + $0x40] sm:$0xf] }
 0x302   : > { %v2631_v11 = vshrl.u32 %v2561_v47, 16  ;;  %v2848_v37 = vrot.slane %v2561_v47, 2 }
 0x303   : > { %17610 = vst [vmem:[#allocation13_spill] sm:$0xff] %v14666_v44  ;;  %11026 = vmatmul.msk.bf16.gmra.mxu1 %vm691_vm1, %v2847_v16  ;;  %v3549_v7 = vsel %vm558_vm2, %v3544_v5, %v3548_v42 }
 0x304   : > { %v3223_v4 = vpop.f32.mrf.mxu2  ;;  %v2633_v5 = vrot.slane %v2631_v11, 1 }
 0x305   : > { %v3287_v17 = vadd.f32 %v3223_v4, %v3001_v9  ;;  %v2729_v52 = vpop.f32.mrf.mxu0  ;;  %v3408_v4 = vunpack.c.l.b16 %v3340_v58 }
 0x306   : > { %v2791_v44 = vadd.f32 %v2729_v52, %v14236_v50  ;;  %v2634_v50 = vshll.u32 %v2561_v47, 16  ;;  %v4992_v52 = vsel %vm740_vm0, %v11318_v59, 0  ;;  %v2849_v59 = vsel %vm1431_vm5, %v2846_v39, %v2848_v37 }
 0x307   : > { %5001 = vmatpush.bf16.msra.mxu0 %v4992_v52  ;;  %v17614_v37 = vshrl.u32 %v14258_v1, 16 }
 0x308   : > { %v2942_v2 = vpop.f32.mrf.mxu1  ;;  %v3645_v16 = vpop.f32.mrf.mxu3  ;;  %v3002_v0 = vadd.f32 %v2940_v60, %v2791_v44  ;;  %11009 = vmatmul.msk.bf16.gmra.mxu0 %vm691_vm1, %v2629_v31  ;;  %v13271_v60 = vunpack.c.h.b16 %v13354_v62  ;;  %v3734_v44 = vunpack.c.l.b16 %v3730_v57 }
 0x309   : > { %v14680_v9 = vadd.f32 %v3645_v16, %v3287_v17  ;;  %11107 = vmatmul.msk.bf16.gmra.mxu2 %vm691_vm1, %v12965_v34  ;;  %v2636_v16 = vrot.slane %v2634_v50, 2  ;;  %v3955_v39 = vrot.slane %v17614_v37, 1 }
 0x30a   : > { %v3735_v47 = vpack.c.b16 %v13271_v60, %v3734_v44 }
 0x30b   : > { %17611 = vst [vmem:[#allocation14_spill] sm:$0xff] %v14680_v9  ;;  %v14691_v9 = vpack.c.b16 %v3408_v4, %v3408_v4  ;;  %v2637_v52 = vor.u32 %v2636_v16, %v2633_v5  ;;  %v4196_v5 = vld [vmem:[%s13584_s17 + $0x10] sm:$0xc] }
 0x30c   : > { %v3226_v17 = vpop.f32.mrf.mxu2  ;;  %v3948_v11 = vshrl.u32 %v3735_v47, 16  ;;  %v3951_v50 = vshll.u32 %v3735_v47, 16 }
 0x30d   : > { %v3288_v31 = vadd.f32 %v3226_v17, %v3002_v0  ;;  %11184 = vmatmul.msk.bf16.gmra.mxu3 %vm691_vm1, %v3549_v7  ;;  %v2731_v34 = vpop.f32.mrf.mxu0  ;;  %17612 = vst [vmem:[#allocation15_spill] sm:$0xff] %v14691_v9  ;;  %v3550_v0 = vshrl.u32 %v14657_v49, 16  ;;  %v3554_v7 = vshll.u32 %v14691_v9, 16  ;;  %v12966_v17 = vld [vmem:[%s13584_s17 + $0x88] sm:$0xff]  ;;  %v17615_v9 = vshll.u32 %v14258_v1, 16 }
 0x30e   : > { %v2792_v10 = vadd.f32 %v2731_v34, %v14247_v54  ;;  %v3950_v16 = vrot.slane %v3948_v11, 1 }
 0x310   : > { %v2945_v58 = vpop.f32.mrf.mxu1  ;;  %v3648_v8 = vpop.f32.mrf.mxu3  ;;  %v3003_v62 = vadd.f32 %v2942_v2, %v2792_v10  ;;  %v2638_v10 = vsel %vm1175_vm4, %v2628_v22, %v2637_v52  ;;  %v3556_v2 = vrot.slane %v3554_v7, 1 }
 0x311   : > { %v14695_v57 = vadd.f32 %v3648_v8, %v3288_v31  ;;  %v3552_v8 = vor.u32 %v3550_v0, %v3548_v42  ;;  %v4200_v42 = vunpack.c.l.b16 %v4196_v5 }
 0x313   : > { %17613 = vst [vmem:[#allocation16_spill] sm:$0xff] %v14695_v57  ;;  %11027 = vmatmul.msk.bf16.gmra.mxu1 %vm691_vm1, %v2849_v59  ;;  %v3953_v59 = vrot.slane %v3951_v50, 2  ;;  %v3557_v22 = vsel %vm558_vm2, %v3552_v8, %v3556_v2  ;;  %v13355_v8 = vld [vmem:[%s13584_s17 + $0x18] sm:$0xff] }
 0x314   : > { %v3228_v4 = vpop.f32.mrf.mxu2  ;;  %v3737_v2 = vrot.slane %v13355_v8, 1 }
 0x315   : > { %v3289_v54 = vadd.f32 %v3228_v4, %v3003_v62  ;;  %v2734_v44 = vpop.f32.mrf.mxu0  ;;  %v3956_v62 = vrot.slane %v17615_v9, 2  ;;  %v4201_v9 = vpack.c.b16 %v13271_v60, %v4200_v42 }
 0x316   : > { %v2793_v31 = vadd.f32 %v2734_v44, %v14262_v51  ;;  %v3954_v51 = vor.u32 %v3953_v59, %v3950_v16 }
 0x317   : > { %v3957_v52 = vor.u32 %v3956_v62, %v3955_v39  ;;  %v4203_v39 = vrot.slane %v13355_v8, 2  ;;  %v17616_v62 = vshrl.u32 %v14284_v28, 16  ;;  %v13356_v8 = vld [vmem:[%s13584_s17 + $0x20] sm:$0xff] }
 0x318   : > { %v2947_v34 = vpop.f32.mrf.mxu1  ;;  %v3650_v4 = vpop.f32.mrf.mxu3  ;;  %v3004_v57 = vadd.f32 %v2945_v58, %v2793_v31  ;;  %11010 = vmatmul.msk.bf16.gmra.mxu0 %vm691_vm1, %v2638_v10  ;;  %v3736_v10 = vrot.slane %v3735_v47, 1  ;;  %v4202_v31 = vrot.slane %v4201_v9, 2 }
 0x319   : > { %v14710_v3 = vadd.f32 %v3650_v4, %v3289_v54  ;;  %11108 = vmatmul.msk.bf16.gmra.mxu2 %vm691_vm1, %v12966_v17  ;;  %v3958_v54 = vsel %vm1175_vm4, %v3954_v51, %v3957_v52  ;;  %v3959_v47 = vrot.slane %v17616_v62, 1  ;;  %v17617_v4 = vshll.u32 %v14284_v28, 16 }
 0x31a   : > { %v4204_v16 = vsel %vm1431_vm5, %v4202_v31, %v4203_v39  ;;  %v3739_v31 = vrot.slane %v13356_v8, 1 }
 0x31c   : > { %v3231_v7 = vpop.f32.mrf.mxu2 }
 0x31d   : > { %v3290_v11 = vadd.f32 %v3231_v7, %v3004_v57  ;;  %11185 = vmatmul.msk.bf16.gmra.mxu3 %vm691_vm1, %v3557_v22  ;;  %v2736_v1 = vpop.f32.mrf.mxu0  ;;  %v3960_v22 = vrot.slane %v17617_v4, 2 }
 0x31e   : > { %v2794_v58 = vadd.f32 %v2736_v1, %v14272_v61  ;;  %v3738_v61 = vsel %vm963_vm3, %v3736_v10, %v3737_v2 }
 0x31f   : > { %v3961_v1 = vor.u32 %v3960_v22, %v3959_v47  ;;  %v17619_v47 = vshll.u32 %v14313_v18, 16 }
 0x320   : > { %v2950_v50 = vpop.f32.mrf.mxu1  ;;  %v3653_v37 = vpop.f32.mrf.mxu3  ;;  %v3005_v44 = vadd.f32 %v2947_v34, %v2794_v58 }
 0x321   : > { %v14718_v17 = vadd.f32 %v3653_v37, %v3290_v11  ;;  %v12982_v11 = vld [vmem:[%s13584_s17 + $0x18] sm:$0xff]  ;;  %v3962_v37 = vsel %vm1175_vm4, %v3957_v52, %v3961_v1  ;;  %v3964_v4 = vrot.slane %v17619_v47, 2 }
 0x323   : > { %11204 = vmatmul.msk.bf16.vlgmr.msrb.gmra.mxu1 %vm691_vm1, %v3958_v54 }
 0x324   : > { %v3233_v57 = vpop.f32.mrf.mxu2 }
 0x325   : > { %v3291_v5 = vadd.f32 %v3233_v57, %v3005_v44  ;;  %v2739_v60 = vpop.f32.mrf.mxu0  ;;  %v4205_v57 = vrot.slane %v13356_v8, 2 }
 0x326   : > { %v2795_v59 = vadd.f32 %v2739_v60, %v14288_v24 }
 0x328   : > { %v2952_v34 = vpop.f32.mrf.mxu1  ;;  %v3655_v42 = vpop.f32.mrf.mxu3  ;;  %v3006_v51 = vadd.f32 %v2950_v50, %v2795_v59  ;;  %11187 = vmatmul.msk.bf16.vlgmr.msrb.gmra.mxu0 %vm691_vm1, %v3738_v61 }
 0x329   : > { %v14729_v7 = vadd.f32 %v3655_v42, %v3291_v5  ;;  %11221 = vmatmul.msk.bf16.vlgmr.msrb.gmra.mxu2 %vm691_vm1, %v4204_v16  ;;  %v3740_v16 = vsel %vm963_vm3, %v3737_v2, %v3739_v31  ;;  %v12983_v2 = vld [vmem:[%s13584_s17 + $0x20] sm:$0xff] }
 0x32c   : > { %v3236_v9 = vpop.f32.mrf.mxu2 }
 0x32d   : > { %v3292_v24 = vadd.f32 %v3236_v9, %v3006_v51  ;;  %11302 = vmatmul.msk.bf16.vlgmr.msrb.gmra.mxu3 %vm691_vm1, %v12982_v11  ;;  %v2741_v58 = vpop.f32.mrf.mxu0 }
 0x32e   : > { %v2796_v54 = vadd.f32 %v2741_v58, %v14301_v56  ;;  %v4206_v56 = vsel %vm1431_vm5, %v4203_v39, %v4205_v57 }
 0x330   : > { %v2955_v28 = vpop.f32.mrf.mxu1  ;;  %v3658_v50 = vpop.f32.mrf.mxu3  ;;  %v3007_v44 = vadd.f32 %v2952_v34, %v2796_v54  ;;  %v17618_v34 = vshrl.u32 %v14313_v18, 16 }
 0x331   : > { %v14737_v10 = vadd.f32 %v3658_v50, %v3292_v24  ;;  %v13357_v50 = vld [vmem:[%s13584_s17 + $0x28] sm:$0xff] }
 0x332   : > { %v3963_v62 = vrot.slane %v17618_v34, 1  ;;  %v4207_v8 = vrot.slane %v13357_v50, 2  ;;  %v17621_v34 = vshll.u32 %v14341_v20, 16 }
 0x333   : > { %11205 = vmatmul.msk.bf16.gmra.mxu1 %vm691_vm1, %v3962_v37 }
 0x334   : > { %v3238_v5 = vpop.f32.mrf.mxu2  ;;  %v3965_v39 = vor.u32 %v3964_v4, %v3963_v62  ;;  %v3968_v62 = vrot.slane %v17621_v34, 2 }
 0x335   : > { %v3293_v60 = vadd.f32 %v3238_v5, %v3007_v44  ;;  %v2744_v61 = vpop.f32.mrf.mxu0  ;;  %v3741_v44 = vrot.slane %v13357_v50, 1 }
 0x336   : > { %v2797_v59 = vadd.f32 %v2744_v61, %v14317_v41  ;;  %v3966_v58 = vsel %vm1175_vm4, %v3961_v1, %v3965_v39 }
 0x338   : > { %v2957_v52 = vpop.f32.mrf.mxu1  ;;  %v3660_v22 = vpop.f32.mrf.mxu3  ;;  %v3008_v42 = vadd.f32 %v2955_v28, %v2797_v59  ;;  %11188 = vmatmul.msk.bf16.gmra.mxu0 %vm691_vm1, %v3740_v16  ;;  %v3742_v16 = vsel %vm963_vm3, %v3739_v31, %v3741_v44  ;;  %v17620_v59 = vshrl.u32 %v14341_v20, 16  ;;  %v12984_v31 = vld [vmem:[%s13584_s17 + $0x28] sm:$0xff] }
 0x339   : > { %v14748_v51 = vadd.f32 %v3660_v22, %v3293_v60  ;;  %11222 = vmatmul.msk.bf16.gmra.mxu2 %vm691_vm1, %v4206_v56 }
 0x33c   : > { %v3241_v11 = vpop.f32.mrf.mxu2 }
 0x33d   : > { %v3294_v41 = vadd.f32 %v3241_v11, %v3008_v42  ;;  %11303 = vmatmul.msk.bf16.gmra.mxu3 %vm691_vm1, %v12983_v2  ;;  %v2746_v9 = vpop.f32.mrf.mxu0 }
 0x33e   : > { %v2798_v24 = vadd.f32 %v2746_v9, %v14329_v40  ;;  %v4208_v40 = vsel %vm1431_vm5, %v4205_v57, %v4207_v8 }
 0x340   : > { %v2960_v18 = vpop.f32.mrf.mxu1  ;;  %v3663_v54 = vpop.f32.mrf.mxu3  ;;  %v3009_v28 = vadd.f32 %v2957_v52, %v2798_v24  ;;  %v3967_v52 = vrot.slane %v17620_v59, 1 }
 0x341   : > { %v14756_v37 = vadd.f32 %v3663_v54, %v3294_v41 }
 0x342   : > { %v3969_v57 = vor.u32 %v3968_v62, %v3967_v52 }
 0x343   : > { %11206 = vmatmul.msk.bf16.gmra.mxu1 %vm691_vm1, %v3966_v58  ;;  %v13358_v58 = vld [vmem:[%s13584_s17 + $0x30] sm:$0xff] }
 0x344   : > { %v3243_v5 = vpop.f32.mrf.mxu2  ;;  %v3970_v41 = vsel %vm1175_vm4, %v3965_v39, %v3969_v57  ;;  %v3743_v54 = vrot.slane %v13358_v58, 1 }
 0x345   : > { %v3295_v60 = vadd.f32 %v3243_v5, %v3009_v28  ;;  %v2749_v61 = vpop.f32.mrf.mxu0  ;;  %v4209_v28 = vrot.slane %v13358_v58, 2 }
 0x346   : > { %v2799_v56 = vadd.f32 %v2749_v61, %v14345_v26  ;;  %v3744_v61 = vsel %vm963_vm3, %v3741_v44, %v3743_v54  ;;  %v12985_v44 = vld [vmem:[%s13584_s17 + $0x30] sm:$0xff] }
 0x348   : > { %v2962_v1 = vpop.f32.mrf.mxu1  ;;  %v3665_v47 = vpop.f32.mrf.mxu3  ;;  %v3010_v4 = vadd.f32 %v2960_v18, %v2799_v56  ;;  %11189 = vmatmul.msk.bf16.gmra.mxu0 %vm691_vm1, %v3742_v16 }
 0x349   : > { %v14767_v22 = vadd.f32 %v3665_v47, %v3295_v60  ;;  %11223 = vmatmul.msk.bf16.gmra.mxu2 %vm691_vm1, %v4208_v40  ;;  %v17622_v40 = vshrl.u32 %v14369_v55, 16 }
 0x34b   : > { %v3971_v56 = vrot.slane %v17622_v40, 1 }
 0x34c   : > { %v3246_v42 = vpop.f32.mrf.mxu2 }
 0x34d   : > { %v3296_v26 = vadd.f32 %v3246_v42, %v3010_v4  ;;  %11304 = vmatmul.msk.bf16.gmra.mxu3 %vm691_vm1, %v12984_v31  ;;  %v2751_v2 = vpop.f32.mrf.mxu0 }
 0x34e   : > { %v2800_v11 = vadd.f32 %v2751_v2, %v14357_v6  ;;  %v4210_v6 = vsel %vm1431_vm5, %v4207_v8, %v4209_v28 }
 0x350   : > { %v2965_v20 = vpop.f32.mrf.mxu1  ;;  %v3668_v9 = vpop.f32.mrf.mxu3  ;;  %v3011_v24 = vadd.f32 %v2962_v1, %v2800_v11  ;;  %v17623_v1 = vshll.u32 %v14369_v55, 16 }
 0x351   : > { %v14775_v18 = vadd.f32 %v3668_v9, %v3296_v26 }
 0x352   : > { %v3972_v59 = vrot.slane %v17623_v1, 2 }
 0x353   : > { %11207 = vmatmul.msk.bf16.gmra.mxu1 %vm691_vm1, %v3970_v41 }
 0x354   : > { %v3248_v50 = vpop.f32.mrf.mxu2  ;;  %v3973_v8 = vor.u32 %v3972_v59, %v3971_v56 }
 0x355   : > { %v3297_v5 = vadd.f32 %v3248_v50, %v3011_v24  ;;  %v2754_v60 = vpop.f32.mrf.mxu0 }
 0x356   : > { %v2801_v16 = vadd.f32 %v2754_v60, %v14373_v43  ;;  %v3974_v42 = vsel %vm1175_vm4, %v3969_v57, %v3973_v8 }
 0x358   : > { %v2967_v39 = vpop.f32.mrf.mxu1  ;;  %v3670_v52 = vpop.f32.mrf.mxu3  ;;  %v3012_v34 = vadd.f32 %v2965_v20, %v2801_v16  ;;  %11190 = vmatmul.msk.bf16.gmra.mxu0 %vm691_vm1, %v3744_v61  ;;  %v13359_v20 = vld [vmem:[%s13584_s17 + $0x38] sm:$0xff]  ;;  %v17624_v61 = vshrl.u32 %v14397_v15, 16  ;;  %v17625_v16 = vshll.u32 %v14397_v15, 16 }
 0x359   : > { %v14786_v62 = vadd.f32 %v3670_v52, %v3297_v5  ;;  %11224 = vmatmul.msk.bf16.gmra.mxu2 %vm691_vm1, %v4210_v6  ;;  %v3745_v41 = vrot.slane %v13359_v20, 1  ;;  %v4211_v9 = vrot.slane %v13359_v20, 2 }
 0x35a   : > { %v3975_v6 = vrot.slane %v17624_v61, 1 }
 0x35b   : > { %v3746_v5 = vsel %vm963_vm3, %v3743_v54, %v3745_v41  ;;  %v12986_v54 = vld [vmem:[%s13584_s17 + $0x38] sm:$0xff] }
 0x35c   : > { %v3251_v47 = vpop.f32.mrf.mxu2 }
 0x35d   : > { %v3298_v43 = vadd.f32 %v3251_v47, %v3012_v34  ;;  %11305 = vmatmul.msk.bf16.gmra.mxu3 %vm691_vm1, %v12985_v44  ;;  %v2756_v4 = vpop.f32.mrf.mxu0 }
 0x35e   : > { %v2802_v31 = vadd.f32 %v2756_v4, %v14385_v45  ;;  %v4212_v45 = vsel %vm1431_vm5, %v4209_v28, %v4211_v9 }
 0x360   : > { %v2970_v55 = vpop.f32.mrf.mxu1  ;;  %v3673_v26 = vpop.f32.mrf.mxu3  ;;  %v3013_v2 = vadd.f32 %v2967_v39, %v2802_v31  ;;  %v3976_v39 = vrot.slane %v17625_v16, 2  ;;  %v13360_v31 = vld [vmem:[%s13584_s17 + $0x40] sm:$0xff] }
 0x361   : > { %v14794_v11 = vadd.f32 %v3673_v26, %v3298_v43 }
 0x362   : > { %v3977_v28 = vor.u32 %v3976_v39, %v3975_v6 }
 0x363   : > { %11208 = vmatmul.msk.bf16.gmra.mxu1 %vm691_vm1, %v3974_v42  ;;  %v4213_v42 = vrot.slane %v13360_v31, 2 }
 0x364   : > { %v3253_v24 = vpop.f32.mrf.mxu2  ;;  %v3978_v44 = vsel %vm1175_vm4, %v3973_v8, %v3977_v28 }
 0x365   : > { %v3299_v58 = vadd.f32 %v3253_v24, %v3013_v2  ;;  %v2759_v50 = vpop.f32.mrf.mxu0 }
 0x366   : > { %v2803_v60 = vadd.f32 %v2759_v50, %v14401_v36  ;;  %v17626_v50 = vshrl.u32 %v14425_v14, 16 }
 0x368   : > { %v2972_v57 = vpop.f32.mrf.mxu1  ;;  %v3675_v40 = vpop.f32.mrf.mxu3  ;;  %v3014_v56 = vadd.f32 %v2970_v55, %v2803_v60  ;;  %11191 = vmatmul.msk.bf16.gmra.mxu0 %vm691_vm1, %v3746_v5  ;;  %v3747_v55 = vrot.slane %v13360_v31, 1  ;;  %v3979_v5 = vrot.slane %v17626_v50, 1 }
 0x369   : > { %v14805_v1 = vadd.f32 %v3675_v40, %v3299_v58  ;;  %11225 = vmatmul.msk.bf16.gmra.mxu2 %vm691_vm1, %v4212_v45  ;;  %v17627_v45 = vshll.u32 %v14425_v14, 16 }
 0x36a   : > { %v3748_v24 = vsel %vm963_vm3, %v3745_v41, %v3747_v55  ;;  %v12987_v41 = vld [vmem:[%s13584_s17 + $0x40] sm:$0xff] }
 0x36b   : > { %v3980_v60 = vrot.slane %v17627_v45, 2 }
 0x36c   : > { %v3256_v59 = vpop.f32.mrf.mxu2 }
 0x36d   : > { %v3300_v36 = vadd.f32 %v3256_v59, %v3014_v56  ;;  %11306 = vmatmul.msk.bf16.gmra.mxu3 %vm691_vm1, %v12986_v54  ;;  %v2761_v52 = vpop.f32.mrf.mxu0 }
 0x36e   : > { %v2804_v34 = vadd.f32 %v2761_v52, %v14413_v25  ;;  %v4214_v25 = vsel %vm1431_vm5, %v4211_v9, %v4213_v42  ;;  %v3981_v9 = vor.u32 %v3980_v60, %v3979_v5  ;;  %v13361_v52 = vld [vmem:[%s13584_s17 + $0x48] sm:$0xff] }
 0x370   : > { %v2975_v15 = vpop.f32.mrf.mxu1  ;;  %v3678_v47 = vpop.f32.mrf.mxu3  ;;  %v3015_v43 = vadd.f32 %v2972_v57, %v2804_v34  ;;  %v3982_v56 = vsel %vm1175_vm4, %v3977_v28, %v3981_v9  ;;  %v3749_v34 = vrot.slane %v13361_v52, 1 }
 0x371   : > { %v14813_v4 = vadd.f32 %v3678_v47, %v3300_v36 }
 0x372   : > { %v3750_v31 = vsel %vm963_vm3, %v3747_v55, %v3749_v34  ;;  %v12988_v55 = vld [vmem:[%s13584_s17 + $0x48] sm:$0xff] }
 0x373   : > { %11209 = vmatmul.msk.bf16.gmra.mxu1 %vm691_vm1, %v3978_v44 }
 0x374   : > { %v3258_v26 = vpop.f32.mrf.mxu2 }
 0x375   : > { %v3301_v2 = vadd.f32 %v3258_v26, %v3015_v43  ;;  %v2764_v20 = vpop.f32.mrf.mxu0 }
 0x376   : > { %v2805_v58 = vadd.f32 %v2764_v20, %v14429_v46 }
 0x378   : > { %v2977_v8 = vpop.f32.mrf.mxu1  ;;  %v3680_v57 = vpop.f32.mrf.mxu3  ;;  %v3016_v61 = vadd.f32 %v2975_v15, %v2805_v58  ;;  %11192 = vmatmul.msk.bf16.gmra.mxu0 %vm691_vm1, %v3748_v24  ;;  %v4215_v15 = vrot.slane %v13361_v52, 2  ;;  %v17629_v24 = vshll.u32 %v14453_v27, 16 }
 0x379   : > { %v14824_v6 = vadd.f32 %v3680_v57, %v3301_v2  ;;  %11226 = vmatmul.msk.bf16.gmra.mxu2 %vm691_vm1, %v4214_v25  ;;  %v17628_v2 = vshrl.u32 %v14453_v27, 16 }
 0x37a   : > { %v3984_v25 = vrot.slane %v17629_v24, 2 }
 0x37b   : > { %v3983_v20 = vrot.slane %v17628_v2, 1 }
 0x37c   : > { %v3261_v16 = vpop.f32.mrf.mxu2 }
 0x37d   : > { %v3302_v46 = vadd.f32 %v3261_v16, %v3016_v61  ;;  %11307 = vmatmul.msk.bf16.gmra.mxu3 %vm691_vm1, %v12987_v41  ;;  %v2766_v39 = vpop.f32.mrf.mxu0 }
 0x37e   : > { %v2806_v40 = vadd.f32 %v2766_v39, %v14441_v33  ;;  %v4216_v33 = vsel %vm1431_vm5, %v4213_v42, %v4215_v15  ;;  %v3985_v42 = vor.u32 %v3984_v25, %v3983_v20 }
 0x380   : > { %v2980_v14 = vpop.f32.mrf.mxu1  ;;  %v3683_v54 = vpop.f32.mrf.mxu3  ;;  %v3017_v59 = vadd.f32 %v2977_v8, %v2806_v40  ;;  %v3986_v57 = vsel %vm1175_vm4, %v3981_v9, %v3985_v42 }
 0x381   : > { %v14832_v36 = vadd.f32 %v3683_v54, %v3302_v46  ;;  %v13362_v46 = vld [vmem:[%s13584_s17 + $0x50] sm:$0xff] }
 0x382   : > { %v3751_v39 = vrot.slane %v13362_v46, 1  ;;  %v4217_v40 = vrot.slane %v13362_v46, 2  ;;  %v17632_v46 = vshrl.u32 %v14509_v32, 16 }
 0x383   : > { %11210 = vmatmul.msk.bf16.gmra.mxu1 %vm691_vm1, %v3982_v56 }
 0x384   : > { %v3263_v44 = vpop.f32.mrf.mxu2 }
 0x385   : > { %v3303_v47 = vadd.f32 %v3263_v44, %v3017_v59  ;;  %v2769_v43 = vpop.f32.mrf.mxu0  ;;  %v3752_v59 = vsel %vm963_vm3, %v3749_v34, %v3751_v39  ;;  %v17630_v44 = vshrl.u32 %v14481_v30, 16  ;;  %v12989_v34 = vld [vmem:[%s13584_s17 + $0x50] sm:$0xff] }
 0x386   : > { %v2807_v26 = vadd.f32 %v2769_v43, %v14457_v19  ;;  %v17631_v43 = vshll.u32 %v14481_v30, 16 }
 0x388   : > { %v2982_v28 = vpop.f32.mrf.mxu1  ;;  %v3685_v58 = vpop.f32.mrf.mxu3  ;;  %v3018_v8 = vadd.f32 %v2980_v14, %v2807_v26  ;;  %11193 = vmatmul.msk.bf16.gmra.mxu0 %vm691_vm1, %v3750_v31  ;;  %v3988_v31 = vrot.slane %v17631_v43, 2 }
 0x389   : > { %v14843_v50 = vadd.f32 %v3685_v58, %v3303_v47  ;;  %11227 = vmatmul.msk.bf16.gmra.mxu2 %vm691_vm1, %v4216_v33  ;;  %v3987_v47 = vrot.slane %v17630_v44, 1 }
 0x38c   : > { %v3266_v5 = vpop.f32.mrf.mxu2 }
 0x38d   : > { %v3304_v19 = vadd.f32 %v3266_v5, %v3018_v8  ;;  %11308 = vmatmul.msk.bf16.gmra.mxu3 %vm691_vm1, %v12988_v55  ;;  %v2771_v45 = vpop.f32.mrf.mxu0  ;;  %v13363_v5 = vld [vmem:[%s13584_s17 + $0x58] sm:$0xff] }
 0x38e   : > { %v2808_v60 = vadd.f32 %v2771_v45, %v14469_v53  ;;  %v4218_v53 = vsel %vm1431_vm5, %v4215_v15, %v4217_v40  ;;  %v3989_v15 = vor.u32 %v3988_v31, %v3987_v47  ;;  %v4219_v45 = vrot.slane %v13363_v5, 2 }
 0x390   : > { %v2985_v27 = vpop.f32.mrf.mxu1  ;;  %v3688_v61 = vpop.f32.mrf.mxu3  ;;  %v3019_v41 = vadd.f32 %v2982_v28, %v2808_v60  ;;  %v3990_v25 = vsel %vm1175_vm4, %v3985_v42, %v3989_v15 }
 0x391   : > { %v14851_v16 = vadd.f32 %v3688_v61, %v3304_v19  ;;  %v3753_v19 = vrot.slane %v13363_v5, 1 }
 0x393   : > { %11211 = vmatmul.msk.bf16.gmra.mxu1 %vm691_vm1, %v3986_v57  ;;  %v3754_v61 = vsel %vm963_vm3, %v3751_v39, %v3753_v19  ;;  %v12990_v39 = vld [vmem:[%s13584_s17 + $0x58] sm:$0xff] }
 0x394   : > { %v3268_v14 = vpop.f32.mrf.mxu2 }
 0x395   : > { %v3305_v56 = vadd.f32 %v3268_v14, %v3019_v41  ;;  %v2774_v54 = vpop.f32.mrf.mxu0  ;;  %v3991_v14 = vrot.slane %v17632_v46, 1 }
 0x396   : > { %v2809_v52 = vadd.f32 %v2774_v54, %v14485_v12 }
 0x398   : > { %v2987_v9 = vpop.f32.mrf.mxu1  ;;  %v3690_v33 = vpop.f32.mrf.mxu3  ;;  %v3020_v26 = vadd.f32 %v2985_v27, %v2809_v52  ;;  %11194 = vmatmul.msk.bf16.gmra.mxu0 %vm691_vm1, %v3752_v59 }
 0x399   : > { %v14862_v28 = vadd.f32 %v3690_v33, %v3305_v56  ;;  %11228 = vmatmul.msk.bf16.gmra.mxu2 %vm691_vm1, %v4218_v53  ;;  %v17633_v56 = vshll.u32 %v14509_v32, 16 }
 0x39b   : > { %v3992_v54 = vrot.slane %v17633_v56, 2 }
 0x39c   : > { %v3271_v2 = vpop.f32.mrf.mxu2 }
 0x39d   : > { %v3306_v12 = vadd.f32 %v3271_v2, %v3020_v26  ;;  %11309 = vmatmul.msk.bf16.gmra.mxu3 %vm691_vm1, %v12989_v34  ;;  %v2776_v20 = vpop.f32.mrf.mxu0  ;;  %v13364_v34 = vld [vmem:[%s13584_s17 + $0x60] sm:$0xff] }
 0x39e   : > { %v2810_v24 = vadd.f32 %v2776_v20, %v14497_v23  ;;  %v4220_v23 = vsel %vm1431_vm5, %v4217_v40, %v4219_v45  ;;  %v3993_v40 = vor.u32 %v3992_v54, %v3991_v14  ;;  %v3755_v2 = vrot.slane %v13364_v34, 1 }
 0x3a0   : > { %v4084_v30 = vpop.f32.mrf.mxu1  ;;  %v3693_v58 = vpop.f32.mrf.mxu3  ;;  %v3021_v8 = vadd.f32 %v2987_v9, %v2810_v24  ;;  %v3994_v43 = vsel %vm1175_vm4, %v3989_v15, %v3993_v40 }
 0x3a1   : > { %v14870_v55 = vadd.f32 %v3693_v58, %v3306_v12  ;;  %v4221_v12 = vrot.slane %v13364_v34, 2  ;;  %v17637_v34 = vshll.u32 %v14565_v48, 16 }
 0x3a3   : > { %11212 = vmatmul.msk.bf16.gmra.mxu1 %vm691_vm1, %v3990_v25  ;;  %v3756_v25 = vsel %vm963_vm3, %v3753_v19, %v3755_v2  ;;  %v12991_v19 = vld [vmem:[%s13584_s17 + $0x60] sm:$0xff] }
 0x3a4   : > { %v3273_v60 = vpop.f32.mrf.mxu2 }
 0x3a5   : > { %v3307_v27 = vadd.f32 %v3273_v60, %v3021_v8  ;;  %v3829_v57 = vpop.f32.mrf.mxu0  ;;  %v17634_v8 = vshrl.u32 %v14537_v38, 16  ;;  %v17635_v60 = vshll.u32 %v14537_v38, 16 }
 0x3a6   : > { %v3909_v41 = vadd.f32 %v3829_v57, %v14513_v29 }
 0x3a7   : > { %v3995_v5 = vrot.slane %v17634_v8, 1 }
 0x3a8   : > { %v4086_v42 = vpop.f32.mrf.mxu1  ;;  %v3695_v59 = vpop.f32.mrf.mxu3  ;;  %v4164_v52 = vadd.f32 %v4084_v30, %v3909_v41  ;;  %11195 = vmatmul.msk.bf16.gmra.mxu0 %vm691_vm1, %v3754_v61 }
 0x3a9   : > { %v14881_v53 = vadd.f32 %v3695_v59, %v3307_v27  ;;  %11229 = vmatmul.msk.bf16.gmra.mxu2 %vm691_vm1, %v4220_v23  ;;  %v3996_v27 = vrot.slane %v17635_v60, 2  ;;  %v11412_v60 = vld [vmem:[%s17554_s1 + $0x48] sm:$0xf] }
 0x3ac   : > { %v4295_v9 = vpop.f32.mrf.mxu2 }
 0x3ad   : > { %v4375_v29 = vadd.f32 %v4295_v9, %v4164_v52  ;;  %11310 = vmatmul.msk.bf16.gmra.mxu3 %vm691_vm1, %v12990_v39  ;;  %v3831_v44 = vpop.f32.mrf.mxu0  ;;  %v13365_v52 = vld [vmem:[%s13584_s17 + $0x68] sm:$0xff] }
 0x3ae   : > { %v3910_v47 = vadd.f32 %v3831_v44, %v14525_v35  ;;  %v4222_v35 = vsel %vm1431_vm5, %v4219_v45, %v4221_v12  ;;  %v3997_v45 = vor.u32 %v3996_v27, %v3995_v5  ;;  %v3757_v39 = vrot.slane %v13365_v52, 1 }
 0x3af   : > { %v4223_v9 = vrot.slane %v13365_v52, 2 }
 0x3b0   : > { %v4089_v32 = vpop.f32.mrf.mxu1  ;;  %v4581_v31 = vpop.f32.mrf.mxu3  ;;  %v4165_v33 = vadd.f32 %v4086_v42, %v3910_v47  ;;  %v3998_v14 = vsel %vm1175_vm4, %v3993_v40, %v3997_v45 }
 0x3b1   : > { %v14889_v26 = vadd.f32 %v4581_v31, %v4375_v29  ;;  %v17636_v31 = vshrl.u32 %v14565_v48, 16 }
 0x3b3   : > { %11213 = vmatmul.msk.bf16.gmra.mxu1 %vm691_vm1, %v3994_v43 }
 0x3b4   : > { %v4297_v20 = vpop.f32.mrf.mxu2 }
 0x3b5   : > { %v4376_v24 = vadd.f32 %v4297_v20, %v4165_v33  ;;  %v3834_v30 = vpop.f32.mrf.mxu0  ;;  %v3999_v33 = vrot.slane %v17636_v31, 1  ;;  %v4000_v20 = vrot.slane %v17637_v34, 2 }
 0x3b6   : > { %v3911_v58 = vadd.f32 %v3834_v30, %v14541_v63 }
 0x3b8   : > { %v4091_v15 = vpop.f32.mrf.mxu1  ;;  %v4583_v57 = vpop.f32.mrf.mxu3  ;;  %v4166_v61 = vadd.f32 %v4089_v32, %v3911_v58  ;;  %11196 = vmatmul.msk.bf16.gmra.mxu0 %vm691_vm1, %v3756_v25  ;;  %v3758_v32 = vsel %vm963_vm3, %v3755_v2, %v3757_v39  ;;  %v12992_v2 = vld [vmem:[%s13584_s17 + $0x68] sm:$0xff] }
 0x3b9   : > { %v14900_v23 = vadd.f32 %v4583_v57, %v4376_v24  ;;  %11230 = vmatmul.msk.bf16.gmra.mxu2 %vm691_vm1, %v4222_v35  ;;  %v4001_v35 = vor.u32 %v4000_v20, %v3999_v33  ;;  %v5458_v57 = vsel %vm740_vm0, %v11412_v60, 0 }
 0x3ba   : > { %5467 = vmatpush.bf16.msra.mxu2 %v5458_v57  ;;  %v13367_v57 = vld [vmem:[%s13584_s17 + $0x78] sm:$0xff] }
 0x3bb   : > { %v4002_v5 = vsel %vm1175_vm4, %v3997_v45, %v4001_v35  ;;  %v13366_v45 = vld [vmem:[%s13584_s17 + $0x70] sm:$0xff] }
 0x3bc   : > { %v4300_v41 = vpop.f32.mrf.mxu2 }
 0x3bd   : > { %v4377_v63 = vadd.f32 %v4300_v41, %v4166_v61  ;;  %11311 = vmatmul.msk.bf16.gmra.mxu3 %vm691_vm1, %v12991_v19  ;;  %v3836_v42 = vpop.f32.mrf.mxu0  ;;  %v11429_v41 = vld [vmem:[%s17554_s1 + $0x4c] sm:$0xf] }
 0x3be   : > { %v3912_v46 = vadd.f32 %v3836_v42, %v14553_v13  ;;  %v4224_v13 = vsel %vm1431_vm5, %v4221_v12, %v4223_v9  ;;  %v3759_v42 = vrot.slane %v13366_v45, 1 }
 0x3c0   : > { %v4094_v38 = vpop.f32.mrf.mxu1  ;;  %v4586_v56 = vpop.f32.mrf.mxu3  ;;  %v4167_v54 = vadd.f32 %v4091_v15, %v3912_v46  ;;  %v17638_v15 = vld [vmem:[#allocation6_spill] sm:$0xff]  ;;  %v4225_v46 = vrot.slane %v13366_v45, 2 }
 0x3c1   : > { %v14908_v59 = vadd.f32 %v4586_v56, %v4377_v63  ;;  %v11395_v63 = vld [vmem:[%s17554_s1 + $0x44] sm:$0xf] }
 0x3c3   : > { %11214 = vmatmul.msk.bf16.gmra.mxu1 %vm691_vm1, %v3998_v14  ;;  %v5203_v14 = vsel %vm740_vm0, %v11395_v63, 0 }
 0x3c4   : > { %v4302_v29 = vpop.f32.mrf.mxu2  ;;  %5212 = vmatpush.bf16.msra.mxu1 %v5203_v14 }
 0x3c5   : > { %v4378_v44 = vadd.f32 %v4302_v29, %v4167_v54  ;;  %v3839_v47 = vpop.f32.mrf.mxu0  ;;  %v3760_v29 = vsel %vm963_vm3, %v3757_v39, %v3759_v42  ;;  %v12993_v39 = vld [vmem:[%s13584_s17 + $0x70] sm:$0xff] }
 0x3c6   : > { %v3913_v43 = vadd.f32 %v3839_v47, %v14573_v21  ;;  %v17639_v47 = vld [vmem:[#allocation8_spill] sm:$0xff] }
 0x3c8   : > { %v4096_v40 = vpop.f32.mrf.mxu1  ;;  %v4588_v24 = vpop.f32.mrf.mxu3  ;;  %v4168_v30 = vadd.f32 %v4094_v38, %v3913_v43  ;;  %11197 = vmatmul.msk.bf16.gmra.mxu0 %vm691_vm1, %v3758_v32  ;;  %v5669_v38 = vsel %vm740_vm0, %v11429_v41, 0  ;;  %v17640_v43 = vld [vmem:[#allocation7_spill] sm:$0xff]  ;;  %v4227_v41 = vrot.slane %v13367_v57, 2 }
 0x3c9   : > { %v14919_v25 = vadd.f32 %v4588_v24, %v4378_v44  ;;  %11231 = vmatmul.msk.bf16.gmra.mxu2 %vm691_vm1, %v4224_v13  ;;  %5678 = vmatpush.bf16.msra.mxu3 %v5669_v38  ;;  %v4226_v44 = vsel %vm1431_vm5, %v4223_v9, %v4225_v46  ;;  %v17642_v33 = vshll.u32 %v17640_v43, 16 }
 0x3cb   : > { %v4004_v34 = vrot.slane %v17642_v33, 2 }
 0x3cc   : > { %v4305_v12 = vpop.f32.mrf.mxu2 }
 0x3cd   : > { %v4379_v21 = vadd.f32 %v4305_v12, %v4168_v30  ;;  %11312 = vmatmul.msk.bf16.gmra.mxu3 %vm691_vm1, %v12992_v2  ;;  %v3841_v58 = vpop.f32.mrf.mxu0 }
 0x3ce   : > { %v3914_v8 = vadd.f32 %v3841_v58, %v17638_v15  ;;  %v17643_v58 = vld [vmem:[#allocation9_spill] sm:$0xff] }
 0x3d0   : > { %v4099_v48 = vpop.f32.mrf.mxu1  ;;  %v4591_v27 = vpop.f32.mrf.mxu3  ;;  %v4169_v61 = vadd.f32 %v4096_v40, %v3914_v8  ;;  %v17641_v40 = vshrl.u32 %v17640_v43, 16 }
 0x3d1   : > { %v14931_v19 = vadd.f32 %v4591_v27, %v4379_v21 }
 0x3d2   : > { %v4003_v31 = vrot.slane %v17641_v40, 1 }
 0x3d3   : > { %11215 = vmatmul.msk.bf16.gmra.mxu1 %vm691_vm1, %v4002_v5 }
 0x3d4   : > { %v4307_v56 = vpop.f32.mrf.mxu2  ;;  %v4005_v9 = vor.u32 %v4004_v34, %v4003_v31 }
 0x3d5   : > { %v4380_v54 = vadd.f32 %v4307_v56, %v4169_v61  ;;  %v3844_v52 = vpop.f32.mrf.mxu0  ;;  %v3761_v61 = vrot.slane %v13367_v57, 1  ;;  %v4228_v56 = vsel %vm1431_vm5, %v4225_v46, %v4227_v41 }
 0x3d6   : > { %v3915_v32 = vadd.f32 %v3844_v52, %v17639_v47  ;;  %v4006_v5 = vsel %vm1175_vm4, %v4001_v35, %v4005_v9 }
 0x3d7   : > { %v3762_v14 = vsel %vm963_vm3, %v3759_v42, %v3761_v61  ;;  %v12994_v42 = vld [vmem:[%s13584_s17 + $0x78] sm:$0xff] }
 0x3d8   : > { %v4101_v13 = vpop.f32.mrf.mxu1  ;;  %v4593_v20 = vpop.f32.mrf.mxu3  ;;  %v4170_v24 = vadd.f32 %v4099_v48, %v3915_v32  ;;  %11198 = vmatmul.msk.bf16.gmra.mxu0 %vm691_vm1, %v3760_v29  ;;  %v17645_v29 = vld [vmem:[#allocation10_spill] sm:$0xff] }
 0x3d9   : > { %v14950_v30 = vadd.f32 %v4593_v20, %v4380_v54  ;;  %11232 = vmatmul.msk.bf16.gmra.mxu2 %vm691_vm1, %v4226_v44  ;;  %v17644_v54 = vld [vmem:[#allocation11_spill] sm:$0xff]  ;;  %v17646_v44 = vshrl.u32 %v17645_v29, 16  ;;  %v17647_v32 = vshll.u32 %v17645_v29, 16 }
 0x3db   : > { %v4007_v47 = vrot.slane %v17646_v44, 1  ;;  %v3941_v44 = vld [vmem:[%s13584_s17 + $0x90] sm:$0x3] }
 0x3dc   : > { %v4310_v2 = vpop.f32.mrf.mxu2 }
 0x3dd   : > { %v4381_v12 = vadd.f32 %v4310_v2, %v4170_v24  ;;  %11313 = vmatmul.msk.bf16.gmra.mxu3 %vm691_vm1, %v12993_v39  ;;  %v3846_v21 = vpop.f32.mrf.mxu0  ;;  %v17648_v24 = vld [vmem:[#allocation12_spill] sm:$0xff] }
 0x3de   : > { %v3916_v15 = vadd.f32 %v3846_v21, %v17643_v58 }
 0x3e0   : > { %v4104_v8 = vpop.f32.mrf.mxu1  ;;  %v4596_v48 = vpop.f32.mrf.mxu3  ;;  %v4171_v60 = vadd.f32 %v4101_v13, %v3916_v15  ;;  %v4008_v13 = vrot.slane %v17647_v32, 2 }
 0x3e1   : > { %v14958_v27 = vadd.f32 %v4596_v48, %v4381_v12 }
 0x3e2   : > { %v4009_v46 = vor.u32 %v4008_v13, %v4007_v47  ;;  %v3945_v13 = vunpack.c.l.b16 %v3941_v44 }
 0x3e3   : > { %11216 = vmatmul.msk.bf16.gmra.mxu1 %vm691_vm1, %v4006_v5 }
 0x3e4   : > { %v4312_v63 = vpop.f32.mrf.mxu2  ;;  %v4010_v12 = vsel %vm1175_vm4, %v4005_v9, %v4009_v46 }
 0x3e5   : > { %v4382_v45 = vadd.f32 %v4312_v63, %v4171_v60  ;;  %v3849_v38 = vpop.f32.mrf.mxu0 }
 0x3e6   : > { %v3917_v52 = vadd.f32 %v3849_v38, %v17644_v54  ;;  %v4011_v54 = vrot.slane %v3550_v0, 1 }
 0x3e8   : > { %v4106_v35 = vpop.f32.mrf.mxu1  ;;  %v4598_v43 = vpop.f32.mrf.mxu3  ;;  %v4172_v40 = vadd.f32 %v4104_v8, %v3917_v52  ;;  %11199 = vmatmul.msk.bf16.gmra.mxu0 %vm691_vm1, %v3762_v14  ;;  %v13368_v8 = vld [vmem:[%s13584_s17 + $0x80] sm:$0xff]  ;;  %v17650_v52 = vshll.u32 %v14657_v49, 16 }
 0x3e9   : > { %v14969_v31 = vadd.f32 %v4598_v43, %v4382_v45  ;;  %11233 = vmatmul.msk.bf16.gmra.mxu2 %vm691_vm1, %v4228_v56  ;;  %v3763_v5 = vrot.slane %v13368_v8, 1  ;;  %v4229_v48 = vrot.slane %v13368_v8, 2  ;;  %v17649_v14 = vld [vmem:[#allocation13_spill] sm:$0xff]  ;;  %v17651_v49 = vld [vmem:[#allocation14_spill] sm:$0xff] }
 0x3eb   : > { %v3764_v45 = vsel %vm963_vm3, %v3761_v61, %v3763_v5  ;;  %v4230_v38 = vsel %vm1431_vm5, %v4227_v41, %v4229_v48  ;;  %v12995_v61 = vld [vmem:[%s13584_s17 + $0x80] sm:$0xff] }
 0x3ec   : > { %v4315_v33 = vpop.f32.mrf.mxu2 }
 0x3ed   : > { %v4383_v34 = vadd.f32 %v4315_v33, %v4172_v40  ;;  %11314 = vmatmul.msk.bf16.gmra.mxu3 %vm691_vm1, %v12994_v42  ;;  %v3851_v20 = vpop.f32.mrf.mxu0 }
 0x3ee   : > { %v3918_v39 = vadd.f32 %v3851_v20, %v17648_v24  ;;  %v3946_v20 = vpack.c.b16 %v3945_v13, %v3945_v13 }
 0x3f0   : > { %v4109_v2 = vpop.f32.mrf.mxu1  ;;  %v4601_v21 = vpop.f32.mrf.mxu3  ;;  %v4173_v58 = vadd.f32 %v4106_v35, %v3918_v39  ;;  %v4012_v35 = vrot.slane %v17650_v52, 2  ;;  %v4016_v8 = vshrl.u32 %v3946_v20, 16 }
 0x3f1   : > { %v14977_v15 = vadd.f32 %v4601_v21, %v4383_v34 }
 0x3f2   : > { %v4013_v41 = vor.u32 %v4012_v35, %v4011_v54  ;;  %v4018_v54 = vrot.slane %v4016_v8, 1 }
 0x3f3   : > { %11217 = vmatmul.msk.bf16.gmra.mxu1 %vm691_vm1, %v4010_v12  ;;  %v13369_v12 = vld [vmem:[%s13584_s17 + $0x88] sm:$0xff] }
 0x3f4   : > { %v4317_v60 = vpop.f32.mrf.mxu2  ;;  %v4014_v34 = vsel %vm1175_vm4, %v4009_v46, %v4013_v41  ;;  %v3765_v21 = vrot.slane %v13369_v12, 1 }
 0x3f5   : > { %v4384_v57 = vadd.f32 %v4317_v60, %v4173_v58  ;;  %v3854_v63 = vpop.f32.mrf.mxu0  ;;  %v4231_v58 = vrot.slane %v13369_v12, 2  ;;  %v4019_v60 = vshll.u32 %v3946_v20, 16 }
 0x3f6   : > { %v3919_v9 = vadd.f32 %v3854_v63, %v17649_v14  ;;  %v17652_v14 = vld [vmem:[#allocation16_spill] sm:$0xff] }
 0x3f7   : > { %v4232_v46 = vsel %vm1431_vm5, %v4229_v48, %v4231_v58  ;;  %v4021_v52 = vrot.slane %v4019_v60, 2 }
 0x3f8   : > { %v4111_v56 = vpop.f32.mrf.mxu1  ;;  %v4603_v29 = vpop.f32.mrf.mxu3  ;;  %v4174_v47 = vadd.f32 %v4109_v2, %v3919_v9  ;;  %11200 = vmatmul.msk.bf16.gmra.mxu0 %vm691_vm1, %v3764_v45 }
 0x3f9   : > { %v14989_v32 = vadd.f32 %v4603_v29, %v4384_v57  ;;  %11234 = vmatmul.msk.bf16.gmra.mxu2 %vm691_vm1, %v4230_v38  ;;  %v3766_v38 = vsel %vm963_vm3, %v3763_v5, %v3765_v21  ;;  %v11446_v5 = vld [vmem:[%s17554_s1 + $0x50] sm:$0xf] }
 0x3fa   : > { %v5955_v48 = vsel %vm740_vm0, %v11446_v5, 0 }
 0x3fb   : > { %5964 = vmatpush.bf16.msrb.mxu0 %v5955_v48 }
 0x3fc   : > { %v4320_v43 = vpop.f32.mrf.mxu2 }
 0x3fd   : > { %v4385_v40 = vadd.f32 %v4320_v43, %v4174_v47  ;;  %11315 = vmatmul.msk.bf16.gmra.mxu3 %vm691_vm1, %v12995_v61  ;;  %v3856_v0 = vpop.f32.mrf.mxu0  ;;  %v12996_v47 = vld [vmem:[%s13584_s17 + $0x88] sm:$0xff]  ;;  %v4022_v61 = vor.u32 %v4021_v52, %v4018_v54  ;;  %v15025_v54 = vld [vmem:[%s13584_s17 + $0x20] sm:$0xff] }
 0x3fe   : > { %v3920_v42 = vadd.f32 %v3856_v0, %v17651_v49  ;;  %v13282_v0 = vld [vmem:[%s13584_s17 + $0x18] sm:$0xff]  }
 0x3ff   : > { %v5115_v49 = vld [vmem:[%s13584_s17 + $0x18] sm:$0xe]  ;;  %v13275_v8 = vunpack.c.h.b16 %v13282_v0  ;;  %v4814_v5 = vshll.u32 %v13282_v0, 16 }
 0x400   : > { %v4114_v33 = vpop.f32.mrf.mxu1  ;;  %v4606_v24 = vpop.f32.mrf.mxu3  ;;  %v4175_v39 = vadd.f32 %v4111_v56, %v3920_v42  ;;  %v5119_v60 = vunpack.c.l.b16 %v5115_v49 }
 0x401   : > { %v14997_v2 = vadd.f32 %v4606_v24, %v4385_v40 }
 0x403   : > { %11218 = vmatmul.msk.bf16.gmra.mxu1 %vm691_vm1, %v4014_v34  ;;  %v4023_v34 = vsel %vm1175_vm4, %v4013_v41, %v4022_v61 }
 0x404   : > { %v4322_v57 = vpop.f32.mrf.mxu2 }
 0x405   : > { %v4386_v63 = vadd.f32 %v4322_v57, %v4175_v39  ;;  %v3859_v45 = vpop.f32.mrf.mxu0  ;;  %v17653_v57 = vld [vmem:[#allocation15_spill] sm:$0xff] }
 0x406   : > { %v3921_v9 = vadd.f32 %v3859_v45, %v17652_v14  ;;  %v4233_v45 = vrot.slane %v3946_v20, 2  ;;  %v5120_v14 = vpack.c.b16 %v13275_v8, %v5119_v60 }
 0x408   : > { %v4116_v56 = vpop.f32.mrf.mxu1  ;;  %v4608_v35 = vpop.f32.mrf.mxu3  ;;  %v4176_v29 = vadd.f32 %v4114_v33, %v3921_v9  ;;  %11201 = vmatmul.msk.bf16.gmra.mxu0 %vm691_vm1, %v3766_v38  ;;  %v4234_v41 = vsel %vm1431_vm5, %v4231_v58, %v4233_v45  ;;  %v5333_v48 = vshrl.u32 %v5120_v14, 16  ;;  %v4823_v58 = vshrl.u32 %v15025_v54, 16 }
 0x409   : > { %v15004_v44 = vadd.f32 %v4608_v35, %v4386_v63  ;;  %11235 = vmatmul.msk.bf16.gmra.mxu2 %vm691_vm1, %v4232_v46  ;;  %v3767_v63 = vrot.slane %v17653_v57, 1  ;;  %v5336_v61 = vshll.u32 %v5120_v14, 16 }
 0x40a   : > { %v5340_v60 = vrot.slane %v4823_v58, 1 }
 0x40b   : > { %v3768_v9 = vsel %vm963_vm3, %v3765_v21, %v3767_v63  ;;  %v4819_v21 = vshll.u32 %v15025_v54, 16 }
 0x40c   : > { %v4325_v13 = vpop.f32.mrf.mxu2 }
 0x40d   : > { %v4387_v43 = vadd.f32 %v4325_v13, %v4176_v29  ;;  %11316 = vmatmul.msk.bf16.gmra.mxu3 %vm691_vm1, %v12996_v47  ;;  %v3861_v40 = vpop.f32.mrf.mxu0  ;;  %v12997_v47 = vld [vmem:[%s13584_s17 + $0x90] sm:$0xff]  ;;  %v5121_v13 = vrot.slane %v5120_v14, 1  ;;  %v5341_v57 = vrot.slane %v4819_v21, 2 }
 0x40e   : > { %v3922_v42 = vadd.f32 %v3861_v40, %v14710_v3 }
 0x410   : > { %v4119_v33 = vpop.f32.mrf.mxu1  ;;  %v4611_v24 = vpop.f32.mrf.mxu3  ;;  %v4177_v39 = vadd.f32 %v4116_v56, %v3922_v42  ;;  %v4812_v42 = vshrl.u32 %v13282_v0, 16 }
 0x411   : > { %v15018_v12 = vadd.f32 %v4611_v24, %v4387_v43  ;;  %v5581_v43 = vld [vmem:[%s13584_s17 + $0x18] sm:$0xc] }
 0x412   : > { %v5585_v63 = vunpack.c.l.b16 %v5581_v43  ;;  %v5588_v43 = vrot.slane %v15025_v54, 2 }
 0x413   : > { %11219 = vmatmul.msk.bf16.gmra.mxu1 %vm691_vm1, %v4023_v34  ;;  %v5335_v34 = vrot.slane %v5333_v48, 1 }
 0x414   : > { %v4327_v38 = vpop.f32.mrf.mxu2 }
 0x415   : > { %v4388_v46 = vadd.f32 %v4327_v38, %v4177_v39  ;;  %v3864_v3 = vpop.f32.mrf.mxu0  ;;  %v5338_v39 = vrot.slane %v5336_v61, 2 }
 0x416   : > { %v3923_v56 = vadd.f32 %v3864_v3, %v14718_v17  ;;  %v5122_v17 = vrot.slane %v15025_v54, 1 }
 0x417   : > { %v5339_v0 = vor.u32 %v5338_v39, %v5335_v34 }
 0x418   : > { %v4121_v52 = vpop.f32.mrf.mxu1  ;;  %v4613_v35 = vpop.f32.mrf.mxu3  ;;  %v4178_v29 = vadd.f32 %v4119_v33, %v3923_v56  ;;  %11202 = vmatmul.msk.bf16.gmra.mxu0 %vm691_vm1, %v3768_v9  ;;  %v4816_v33 = vrot.slane %v4814_v5, 1  ;;  %v4821_v56 = vrot.slane %v4819_v21, 1 }
 0x419   : > { %v15028_v20 = vadd.f32 %v4613_v35, %v4388_v46  ;;  %11236 = vmatmul.msk.bf16.gmra.mxu2 %vm691_vm1, %v4234_v41  ;;  %v5123_v46 = vsel %vm963_vm3, %v5121_v13, %v5122_v17  ;;  %v5342_v35 = vor.u32 %v5341_v57, %v5340_v60 }
 0x41a   : > { %v4817_v41 = vor.u32 %v4816_v33, %v4812_v42 }
 0x41b   : > { %v5343_v61 = vsel %vm1175_vm4, %v5339_v0, %v5342_v35  ;;  %v4825_v0 = vor.u32 %v4823_v58, %v4821_v56 }
 0x41c   : > { %v4330_v40 = vpop.f32.mrf.mxu2 }
 0x41d   : > { %v4389_v49 = vadd.f32 %v4330_v40, %v4178_v29  ;;  %11317 = vmatmul.msk.bf16.gmra.mxu3 %vm691_vm1, %v12997_v47  ;;  %v3866_v24 = vpop.f32.mrf.mxu0  ;;  %v5586_v29 = vpack.c.b16 %v13275_v8, %v5585_v63 }
 0x41e   : > { %v3924_v45 = vadd.f32 %v3866_v24, %v14729_v7  ;;  %v4822_v7 = vsel %vm558_vm2, %v4817_v41, %v4821_v56 }
 0x41f   : > { %v5587_v13 = vrot.slane %v5586_v29, 2 }
 0x420   : > { %v4124_v38 = vpop.f32.mrf.mxu1  ;;  %v4616_v14 = vpop.f32.mrf.mxu3  ;;  %v4179_v3 = vadd.f32 %v4121_v52, %v3924_v45  ;;  %v15047_v52 = vld [vmem:[%s13584_s17 + $0x28] sm:$0xff] }
 0x421   : > { %v15040_v9 = vadd.f32 %v4616_v14, %v4389_v49  ;;  %v5589_v8 = vsel %vm1431_vm5, %v5587_v13, %v5588_v43  ;;  %v4827_v34 = vshll.u32 %v15047_v52, 16  ;;  %v4831_v24 = vshrl.u32 %v15047_v52, 16 }
 0x422   : > { %v5124_v54 = vrot.slane %v15047_v52, 1  ;;  %v5590_v13 = vrot.slane %v15047_v52, 2 }
 0x423   : > { %11396 = vmatmul.msk.bf16.vlgmr.msra.gmra.mxu1 %vm691_vm1, %v5123_v46  ;;  %v5344_v57 = vrot.slane %v4831_v24, 1  ;;  %v5345_v63 = vrot.slane %v4827_v34, 2  ;;  %v4829_v29 = vrot.slane %v4827_v34, 1 }
 0x424   : > { %v4332_v47 = vpop.f32.mrf.mxu2  ;;  %v5125_v46 = vsel %vm963_vm3, %v5122_v17, %v5124_v54 }
 0x425   : > { %v4390_v5 = vadd.f32 %v4332_v47, %v4179_v3  ;;  %v3869_v48 = vpop.f32.mrf.mxu0  ;;  %v5346_v47 = vor.u32 %v5345_v63, %v5344_v57 }
 0x426   : > { %v3925_v40 = vadd.f32 %v3869_v48, %v14737_v10 }
 0x428   : > { %v4126_v21 = vpop.f32.mrf.mxu1  ;;  %v4618_v49 = vpop.f32.mrf.mxu3  ;;  %v4180_v42 = vadd.f32 %v4124_v38, %v3925_v40  ;;  %11379 = vmatmul.msk.bf16.vlgmr.msra.gmra.mxu0 %vm691_vm1, %v4822_v7  ;;  %v15068_v40 = vld [vmem:[%s13584_s17 + $0x30] sm:$0xff] }
 0x429   : > { %v15050_v33 = vadd.f32 %v4618_v49, %v4390_v5  ;;  %11413 = vmatmul.msk.bf16.vlgmr.msra.gmra.mxu2 %vm691_vm1, %v5343_v61  ;;  %v4830_v61 = vsel %vm558_vm2, %v4825_v0, %v4829_v29  ;;  %v5126_v52 = vrot.slane %v15068_v40, 1 }
 0x42c   : > { %v4335_v39 = vpop.f32.mrf.mxu2 }
 0x42d   : > { %v4391_v60 = vadd.f32 %v4335_v39, %v4180_v42  ;;  %11430 = vmatmul.msk.bf16.vlgmr.msra.gmra.mxu3 %vm691_vm1, %v5589_v8  ;;  %v3871_v10 = vpop.f32.mrf.mxu0  ;;  %v5591_v42 = vsel %vm1431_vm5, %v5588_v43, %v5590_v13  ;;  %v4835_v8 = vshll.u32 %v15068_v40, 16 }
 0x42e   : > { %v3926_v45 = vadd.f32 %v3871_v10, %v14748_v51  ;;  %v5347_v51 = vsel %vm1175_vm4, %v5342_v35, %v5346_v47  ;;  %v4839_v35 = vshrl.u32 %v15068_v40, 16 }
 0x42f   : > { %v5349_v10 = vrot.slane %v4835_v8, 2 }
 0x430   : > { %v4129_v38 = vpop.f32.mrf.mxu1  ;;  %v4621_v14 = vpop.f32.mrf.mxu3  ;;  %v4181_v3 = vadd.f32 %v4126_v21, %v3926_v45  ;;  %v5127_v45 = vsel %vm963_vm3, %v5124_v54, %v5126_v52 }
 0x431   : > { %v15061_v41 = vadd.f32 %v4621_v14, %v4391_v60  ;;  %v5348_v60 = vrot.slane %v4839_v35, 1  ;;  %v4833_v14 = vor.u32 %v4831_v24, %v4829_v29 }
 0x433   : > { %11397 = vmatmul.msk.bf16.gmra.mxu1 %vm691_vm1, %v5125_v46  ;;  %v5350_v0 = vor.u32 %v5349_v10, %v5348_v60 }
 0x434   : > { %v4337_v5 = vpop.f32.mrf.mxu2 }
 0x435   : > { %v4392_v48 = vadd.f32 %v4337_v5, %v4181_v3  ;;  %v3874_v7 = vpop.f32.mrf.mxu0  ;;  %v4837_v3 = vrot.slane %v4835_v8, 1 }
 0x436   : > { %v3927_v17 = vadd.f32 %v3874_v7, %v14756_v37 }
 0x438   : > { %v4131_v21 = vpop.f32.mrf.mxu1  ;;  %v4623_v49 = vpop.f32.mrf.mxu3  ;;  %v4182_v58 = vadd.f32 %v4129_v38, %v3927_v17  ;;  %11380 = vmatmul.msk.bf16.gmra.mxu0 %vm691_vm1, %v4830_v61  ;;  %v4838_v61 = vsel %vm558_vm2, %v4833_v14, %v4837_v3  ;;  %v15089_v17 = vld [vmem:[%s13584_s17 + $0x38] sm:$0xff] }
 0x439   : > { %v15071_v56 = vadd.f32 %v4623_v49, %v4392_v48  ;;  %11414 = vmatmul.msk.bf16.gmra.mxu2 %vm691_vm1, %v5347_v51  ;;  %v5592_v51 = vrot.slane %v15068_v40, 2  ;;  %v5128_v40 = vrot.slane %v15089_v17, 1 }
 0x43c   : > { %v4340_v34 = vpop.f32.mrf.mxu2 }
 0x43d   : > { %v4393_v39 = vadd.f32 %v4340_v34, %v4182_v58  ;;  %11431 = vmatmul.msk.bf16.gmra.mxu3 %vm691_vm1, %v5591_v42  ;;  %v3876_v37 = vpop.f32.mrf.mxu0  ;;  %v5593_v58 = vsel %vm1431_vm5, %v5590_v13, %v5592_v51  ;;  %v4843_v42 = vshll.u32 %v15089_v17, 16 }
 0x43e   : > { %v3928_v57 = vadd.f32 %v3876_v37, %v14767_v22  ;;  %v5351_v22 = vsel %vm1175_vm4, %v5346_v47, %v5350_v0  ;;  %v4847_v47 = vshrl.u32 %v15089_v17, 16 }
 0x43f   : > { %v5353_v37 = vrot.slane %v4843_v42, 2 }
 0x440   : > { %v4134_v63 = vpop.f32.mrf.mxu1  ;;  %v4626_v43 = vpop.f32.mrf.mxu3  ;;  %v4183_v38 = vadd.f32 %v4131_v21, %v3928_v57  ;;  %v5129_v57 = vsel %vm963_vm3, %v5126_v52, %v5128_v40 }
 0x441   : > { %v15082_v46 = vadd.f32 %v4626_v43, %v4393_v39  ;;  %v5352_v39 = vrot.slane %v4847_v47, 1  ;;  %v4841_v43 = vor.u32 %v4839_v35, %v4837_v3 }
 0x443   : > { %11398 = vmatmul.msk.bf16.gmra.mxu1 %vm691_vm1, %v5127_v45  ;;  %v5354_v14 = vor.u32 %v5353_v37, %v5352_v39 }
 0x444   : > { %v4342_v5 = vpop.f32.mrf.mxu2 }
 0x445   : > { %v4394_v48 = vadd.f32 %v4342_v5, %v4183_v38  ;;  %v3879_v7 = vpop.f32.mrf.mxu0  ;;  %v4845_v38 = vrot.slane %v4843_v42, 1 }
 0x446   : > { %v3929_v54 = vadd.f32 %v3879_v7, %v14775_v18 }
 0x448   : > { %v4136_v21 = vpop.f32.mrf.mxu1  ;;  %v4628_v49 = vpop.f32.mrf.mxu3  ;;  %v4184_v24 = vadd.f32 %v4134_v63, %v3929_v54  ;;  %11381 = vmatmul.msk.bf16.gmra.mxu0 %vm691_vm1, %v4838_v61  ;;  %v4846_v61 = vsel %vm558_vm2, %v4841_v43, %v4845_v38  ;;  %v15110_v54 = vld [vmem:[%s13584_s17 + $0x40] sm:$0xff] }
 0x449   : > { %v15092_v29 = vadd.f32 %v4628_v49, %v4394_v48  ;;  %11415 = vmatmul.msk.bf16.gmra.mxu2 %vm691_vm1, %v5351_v22  ;;  %v5594_v22 = vrot.slane %v15089_v17, 2  ;;  %v5130_v17 = vrot.slane %v15110_v54, 1 }
 0x44c   : > { %v4345_v8 = vpop.f32.mrf.mxu2 }
 0x44d   : > { %v4395_v34 = vadd.f32 %v4345_v8, %v4184_v24  ;;  %11432 = vmatmul.msk.bf16.gmra.mxu3 %vm691_vm1, %v5593_v58  ;;  %v3881_v18 = vpop.f32.mrf.mxu0  ;;  %v5595_v24 = vsel %vm1431_vm5, %v5592_v51, %v5594_v22  ;;  %v4851_v58 = vshll.u32 %v15110_v54, 16 }
 0x44e   : > { %v3930_v60 = vadd.f32 %v3881_v18, %v14786_v62  ;;  %v5355_v62 = vsel %vm1175_vm4, %v5350_v0, %v5354_v14  ;;  %v4855_v0 = vshrl.u32 %v15110_v54, 16 }
 0x44f   : > { %v5357_v18 = vrot.slane %v4851_v58, 2 }
 0x450   : > { %v4139_v10 = vpop.f32.mrf.mxu1  ;;  %v4631_v13 = vpop.f32.mrf.mxu3  ;;  %v4185_v63 = vadd.f32 %v4136_v21, %v3930_v60  ;;  %v5131_v60 = vsel %vm963_vm3, %v5128_v40, %v5130_v17 }
 0x451   : > { %v15103_v45 = vadd.f32 %v4631_v13, %v4395_v34  ;;  %v5356_v34 = vrot.slane %v4855_v0, 1  ;;  %v4849_v13 = vor.u32 %v4847_v47, %v4845_v38 }
 0x453   : > { %11399 = vmatmul.msk.bf16.gmra.mxu1 %vm691_vm1, %v5129_v57  ;;  %v5358_v43 = vor.u32 %v5357_v18, %v5356_v34 }
 0x454   : > { %v4347_v5 = vpop.f32.mrf.mxu2 }
 0x455   : > { %v4396_v48 = vadd.f32 %v4347_v5, %v4185_v63  ;;  %v3884_v7 = vpop.f32.mrf.mxu0  ;;  %v4853_v63 = vrot.slane %v4851_v58, 1 }
 0x456   : > { %v3931_v52 = vadd.f32 %v3884_v7, %v14794_v11 }
 0x458   : > { %v4141_v21 = vpop.f32.mrf.mxu1  ;;  %v4633_v49 = vpop.f32.mrf.mxu3  ;;  %v4186_v35 = vadd.f32 %v4139_v10, %v3931_v52  ;;  %11382 = vmatmul.msk.bf16.gmra.mxu0 %vm691_vm1, %v4846_v61  ;;  %v4854_v61 = vsel %vm558_vm2, %v4849_v13, %v4853_v63  ;;  %v15131_v52 = vld [vmem:[%s13584_s17 + $0x48] sm:$0xff] }
 0x459   : > { %v15113_v3 = vadd.f32 %v4633_v49, %v4396_v48  ;;  %11416 = vmatmul.msk.bf16.gmra.mxu2 %vm691_vm1, %v5355_v62  ;;  %v5596_v62 = vrot.slane %v15110_v54, 2  ;;  %v5132_v54 = vrot.slane %v15131_v52, 1 }
 0x45c   : > { %v4350_v42 = vpop.f32.mrf.mxu2 }
 0x45d   : > { %v4397_v8 = vadd.f32 %v4350_v42, %v4186_v35  ;;  %11433 = vmatmul.msk.bf16.gmra.mxu3 %vm691_vm1, %v5595_v24  ;;  %v3886_v11 = vpop.f32.mrf.mxu0  ;;  %v5597_v35 = vsel %vm1431_vm5, %v5594_v22, %v5596_v62  ;;  %v4859_v24 = vshll.u32 %v15131_v52, 16 }
 0x45e   : > { %v3932_v39 = vadd.f32 %v3886_v11, %v14805_v1  ;;  %v5359_v1 = vsel %vm1175_vm4, %v5354_v14, %v5358_v43  ;;  %v4863_v14 = vshrl.u32 %v15131_v52, 16 }
 0x45f   : > { %v5361_v11 = vrot.slane %v4859_v24, 2 }
 0x460   : > { %v4144_v37 = vpop.f32.mrf.mxu1  ;;  %v4636_v51 = vpop.f32.mrf.mxu3  ;;  %v4187_v10 = vadd.f32 %v4141_v21, %v3932_v39  ;;  %v5133_v39 = vsel %vm963_vm3, %v5130_v17, %v5132_v54 }
 0x461   : > { %v15124_v57 = vadd.f32 %v4636_v51, %v4397_v8  ;;  %v5360_v8 = vrot.slane %v4863_v14, 1  ;;  %v4857_v51 = vor.u32 %v4855_v0, %v4853_v63 }
 0x463   : > { %11400 = vmatmul.msk.bf16.gmra.mxu1 %vm691_vm1, %v5131_v60  ;;  %v5362_v13 = vor.u32 %v5361_v11, %v5360_v8 }
 0x464   : > { %v4352_v5 = vpop.f32.mrf.mxu2 }
 0x465   : > { %v4398_v48 = vadd.f32 %v4352_v5, %v4187_v10  ;;  %v3889_v7 = vpop.f32.mrf.mxu0  ;;  %v4861_v10 = vrot.slane %v4859_v24, 1 }
 0x466   : > { %v3933_v40 = vadd.f32 %v3889_v7, %v14813_v4 }
 0x468   : > { %v4146_v21 = vpop.f32.mrf.mxu1  ;;  %v4638_v49 = vpop.f32.mrf.mxu3  ;;  %v4188_v47 = vadd.f32 %v4144_v37, %v3933_v40  ;;  %11383 = vmatmul.msk.bf16.gmra.mxu0 %vm691_vm1, %v4854_v61  ;;  %v4862_v61 = vsel %vm558_vm2, %v4857_v51, %v4861_v10  ;;  %v15152_v40 = vld [vmem:[%s13584_s17 + $0x50] sm:$0xff] }
 0x469   : > { %v15134_v38 = vadd.f32 %v4638_v49, %v4398_v48  ;;  %11417 = vmatmul.msk.bf16.gmra.mxu2 %vm691_vm1, %v5359_v1  ;;  %v5598_v1 = vrot.slane %v15131_v52, 2  ;;  %v5134_v52 = vrot.slane %v15152_v40, 1 }
 0x46c   : > { %v4355_v58 = vpop.f32.mrf.mxu2 }
 0x46d   : > { %v4399_v42 = vadd.f32 %v4355_v58, %v4188_v47  ;;  %11434 = vmatmul.msk.bf16.gmra.mxu3 %vm691_vm1, %v5597_v35  ;;  %v3891_v4 = vpop.f32.mrf.mxu0  ;;  %v5599_v47 = vsel %vm1431_vm5, %v5596_v62, %v5598_v1  ;;  %v4867_v35 = vshll.u32 %v15152_v40, 16 }
 0x46e   : > { %v3934_v34 = vadd.f32 %v3891_v4, %v14824_v6  ;;  %v5363_v6 = vsel %vm1175_vm4, %v5358_v43, %v5362_v13  ;;  %v4871_v43 = vshrl.u32 %v15152_v40, 16 }
 0x46f   : > { %v5365_v4 = vrot.slane %v4867_v35, 2 }
 0x470   : > { %v4149_v18 = vpop.f32.mrf.mxu1  ;;  %v4641_v22 = vpop.f32.mrf.mxu3  ;;  %v4189_v37 = vadd.f32 %v4146_v21, %v3934_v34  ;;  %v5135_v34 = vsel %vm963_vm3, %v5132_v54, %v5134_v52 }
 0x471   : > { %v15145_v60 = vadd.f32 %v4641_v22, %v4399_v42  ;;  %v5364_v42 = vrot.slane %v4871_v43, 1  ;;  %v4865_v22 = vor.u32 %v4863_v14, %v4861_v10 }
 0x473   : > { %11401 = vmatmul.msk.bf16.gmra.mxu1 %vm691_vm1, %v5133_v39  ;;  %v5366_v51 = vor.u32 %v5365_v4, %v5364_v42 }
 0x474   : > { %v4357_v5 = vpop.f32.mrf.mxu2 }
 0x475   : > { %v4400_v48 = vadd.f32 %v4357_v5, %v4189_v37  ;;  %v3894_v7 = vpop.f32.mrf.mxu0  ;;  %v4869_v37 = vrot.slane %v4867_v35, 1 }
 0x476   : > { %v3935_v17 = vadd.f32 %v3894_v7, %v14832_v36 }
 0x478   : > { %v4151_v21 = vpop.f32.mrf.mxu1  ;;  %v4643_v49 = vpop.f32.mrf.mxu3  ;;  %v4190_v0 = vadd.f32 %v4149_v18, %v3935_v17  ;;  %11384 = vmatmul.msk.bf16.gmra.mxu0 %vm691_vm1, %v4862_v61  ;;  %v4870_v61 = vsel %vm558_vm2, %v4865_v22, %v4869_v37  ;;  %v15173_v17 = vld [vmem:[%s13584_s17 + $0x58] sm:$0xff] }
 0x479   : > { %v15155_v63 = vadd.f32 %v4643_v49, %v4400_v48  ;;  %11418 = vmatmul.msk.bf16.gmra.mxu2 %vm691_vm1, %v5363_v6  ;;  %v5600_v6 = vrot.slane %v15152_v40, 2  ;;  %v5136_v40 = vrot.slane %v15173_v17, 1 }
 0x47c   : > { %v4360_v24 = vpop.f32.mrf.mxu2 }
 0x47d   : > { %v4401_v58 = vadd.f32 %v4360_v24, %v4190_v0  ;;  %11435 = vmatmul.msk.bf16.gmra.mxu3 %vm691_vm1, %v5599_v47  ;;  %v3896_v36 = vpop.f32.mrf.mxu0  ;;  %v5601_v0 = vsel %vm1431_vm5, %v5598_v1, %v5600_v6  ;;  %v4875_v47 = vshll.u32 %v15173_v17, 16 }
 0x47e   : > { %v3936_v8 = vadd.f32 %v3896_v36, %v14843_v50  ;;  %v5367_v50 = vsel %vm1175_vm4, %v5362_v13, %v5366_v51  ;;  %v4879_v13 = vshrl.u32 %v15173_v17, 16 }
 0x47f   : > { %v5369_v36 = vrot.slane %v4875_v47, 2 }
 0x480   : > { %v4154_v11 = vpop.f32.mrf.mxu1  ;;  %v4646_v62 = vpop.f32.mrf.mxu3  ;;  %v4191_v18 = vadd.f32 %v4151_v21, %v3936_v8  ;;  %v5137_v8 = vsel %vm963_vm3, %v5134_v52, %v5136_v40 }
 0x481   : > { %v15166_v39 = vadd.f32 %v4646_v62, %v4401_v58  ;;  %v5368_v58 = vrot.slane %v4879_v13, 1  ;;  %v4873_v62 = vor.u32 %v4871_v43, %v4869_v37 }
 0x483   : > { %11402 = vmatmul.msk.bf16.gmra.mxu1 %vm691_vm1, %v5135_v34  ;;  %v5370_v22 = vor.u32 %v5369_v36, %v5368_v58 }
 0x484   : > { %v4362_v5 = vpop.f32.mrf.mxu2 }
 0x485   : > { %v4402_v48 = vadd.f32 %v4362_v5, %v4191_v18  ;;  %v3899_v7 = vpop.f32.mrf.mxu0  ;;  %v4877_v18 = vrot.slane %v4875_v47, 1 }
 0x486   : > { %v3937_v54 = vadd.f32 %v3899_v7, %v14851_v16 }
 0x488   : > { %v4156_v21 = vpop.f32.mrf.mxu1  ;;  %v4648_v49 = vpop.f32.mrf.mxu3  ;;  %v4192_v14 = vadd.f32 %v4154_v11, %v3937_v54  ;;  %11385 = vmatmul.msk.bf16.gmra.mxu0 %vm691_vm1, %v4870_v61  ;;  %v4878_v61 = vsel %vm558_vm2, %v4873_v62, %v4877_v18  ;;  %v15194_v54 = vld [vmem:[%s13584_s17 + $0x60] sm:$0xff] }
 0x489   : > { %v15176_v10 = vadd.f32 %v4648_v49, %v4402_v48  ;;  %11419 = vmatmul.msk.bf16.gmra.mxu2 %vm691_vm1, %v5367_v50  ;;  %v5602_v50 = vrot.slane %v15173_v17, 2  ;;  %v5138_v17 = vrot.slane %v15194_v54, 1 }
 0x48c   : > { %v4365_v35 = vpop.f32.mrf.mxu2 }
 0x48d   : > { %v4403_v24 = vadd.f32 %v4365_v35, %v4192_v14  ;;  %11436 = vmatmul.msk.bf16.gmra.mxu3 %vm691_vm1, %v5601_v0  ;;  %v3901_v16 = vpop.f32.mrf.mxu0  ;;  %v5603_v14 = vsel %vm1431_vm5, %v5600_v6, %v5602_v50  ;;  %v4883_v0 = vshll.u32 %v15194_v54, 16 }
 0x48e   : > { %v3938_v42 = vadd.f32 %v3901_v16, %v14862_v28  ;;  %v5371_v28 = vsel %vm1175_vm4, %v5366_v51, %v5370_v22  ;;  %v4887_v51 = vshrl.u32 %v15194_v54, 16 }
 0x48f   : > { %v5373_v16 = vrot.slane %v4883_v0, 2 }
 0x490   : > { %v4159_v4 = vpop.f32.mrf.mxu1  ;;  %v4651_v1 = vpop.f32.mrf.mxu3  ;;  %v4193_v11 = vadd.f32 %v4156_v21, %v3938_v42  ;;  %v5139_v42 = vsel %vm963_vm3, %v5136_v40, %v5138_v17 }
 0x491   : > { %v15187_v34 = vadd.f32 %v4651_v1, %v4403_v24  ;;  %v5372_v24 = vrot.slane %v4887_v51, 1  ;;  %v4881_v1 = vor.u32 %v4879_v13, %v4877_v18 }
 0x493   : > { %11403 = vmatmul.msk.bf16.gmra.mxu1 %vm691_vm1, %v5137_v8  ;;  %v5374_v62 = vor.u32 %v5373_v16, %v5372_v24 }
 0x494   : > { %v4367_v5 = vpop.f32.mrf.mxu2 }
 0x495   : > { %v4404_v48 = vadd.f32 %v4367_v5, %v4193_v11  ;;  %v3904_v7 = vpop.f32.mrf.mxu0  ;;  %v4885_v11 = vrot.slane %v4883_v0, 1 }
 0x496   : > { %v3939_v52 = vadd.f32 %v3904_v7, %v14870_v55 }
 0x498   : > { %v4161_v21 = vpop.f32.mrf.mxu1  ;;  %v4653_v49 = vpop.f32.mrf.mxu3  ;;  %v4194_v43 = vadd.f32 %v4159_v4, %v3939_v52  ;;  %11386 = vmatmul.msk.bf16.gmra.mxu0 %vm691_vm1, %v4878_v61  ;;  %v4886_v61 = vsel %vm558_vm2, %v4881_v1, %v4885_v11  ;;  %v15215_v52 = vld [vmem:[%s13584_s17 + $0x68] sm:$0xff] }
 0x499   : > { %v15197_v37 = vadd.f32 %v4653_v49, %v4404_v48  ;;  %11420 = vmatmul.msk.bf16.gmra.mxu2 %vm691_vm1, %v5371_v28  ;;  %v5604_v28 = vrot.slane %v15194_v54, 2  ;;  %v5140_v54 = vrot.slane %v15215_v52, 1 }
 0x49c   : > { %v4370_v47 = vpop.f32.mrf.mxu2 }
 0x49d   : > { %v4405_v35 = vadd.f32 %v4370_v47, %v4194_v43  ;;  %11437 = vmatmul.msk.bf16.gmra.mxu3 %vm691_vm1, %v5603_v14  ;;  %v3906_v55 = vpop.f32.mrf.mxu0  ;;  %v5605_v43 = vsel %vm1431_vm5, %v5602_v50, %v5604_v28  ;;  %v4891_v14 = vshll.u32 %v15215_v52, 16 }
 0x49e   : > { %v3940_v58 = vadd.f32 %v3906_v55, %v14881_v53  ;;  %v5375_v53 = vsel %vm1175_vm4, %v5370_v22, %v5374_v62  ;;  %v4895_v22 = vshrl.u32 %v15215_v52, 16 }
 0x49f   : > { %v5377_v55 = vrot.slane %v4891_v14, 2 }
 0x4a0   : > { %v5214_v36 = vpop.f32.mrf.mxu1  ;;  %v4656_v6 = vpop.f32.mrf.mxu3  ;;  %v4195_v4 = vadd.f32 %v4161_v21, %v3940_v58  ;;  %v5141_v58 = vsel %vm963_vm3, %v5138_v17, %v5140_v54 }
 0x4a1   : > { %v15208_v8 = vadd.f32 %v4656_v6, %v4405_v35  ;;  %v5376_v35 = vrot.slane %v4895_v22, 1  ;;  %v4889_v6 = vor.u32 %v4887_v51, %v4885_v11 }
 0x4a3   : > { %11404 = vmatmul.msk.bf16.gmra.mxu1 %vm691_vm1, %v5139_v42  ;;  %v5378_v1 = vor.u32 %v5377_v55, %v5376_v35 }
 0x4a4   : > { %v4372_v5 = vpop.f32.mrf.mxu2 }
 0x4a5   : > { %v4406_v48 = vadd.f32 %v4372_v5, %v4195_v4  ;;  %v5003_v7 = vpop.f32.mrf.mxu0  ;;  %v4893_v4 = vrot.slane %v4891_v14, 1 }
 0x4a6   : > { %v5083_v40 = vadd.f32 %v5003_v7, %v14889_v26 }
 0x4a8   : > { %v5216_v21 = vpop.f32.mrf.mxu1  ;;  %v4658_v49 = vpop.f32.mrf.mxu3  ;;  %v5294_v18 = vadd.f32 %v5214_v36, %v5083_v40  ;;  %11387 = vmatmul.msk.bf16.gmra.mxu0 %vm691_vm1, %v4886_v61  ;;  %v4894_v61 = vsel %vm558_vm2, %v4889_v6, %v4893_v4  ;;  %v15236_v40 = vld [vmem:[%s13584_s17 + $0x70] sm:$0xff] }
 0x4a9   : > { %v15218_v13 = vadd.f32 %v4658_v49, %v4406_v48  ;;  %11421 = vmatmul.msk.bf16.gmra.mxu2 %vm691_vm1, %v5375_v53  ;;  %v5606_v53 = vrot.slane %v15215_v52, 2  ;;  %v5142_v52 = vrot.slane %v15236_v40, 1 }
 0x4ac   : > { %v5469_v0 = vpop.f32.mrf.mxu2 }
 0x4ad   : > { %v5549_v47 = vadd.f32 %v5469_v0, %v5294_v18  ;;  %11438 = vmatmul.msk.bf16.gmra.mxu3 %vm691_vm1, %v5605_v43  ;;  %v5005_v26 = vpop.f32.mrf.mxu0  ;;  %v5607_v18 = vsel %vm1431_vm5, %v5604_v28, %v5606_v53  ;;  %v4899_v43 = vshll.u32 %v15236_v40, 16 }
 0x4ae   : > { %v5084_v24 = vadd.f32 %v5005_v26, %v14900_v23  ;;  %v5379_v23 = vsel %vm1175_vm4, %v5374_v62, %v5378_v1  ;;  %v4903_v62 = vshrl.u32 %v15236_v40, 16 }
 0x4af   : > { %v5381_v26 = vrot.slane %v4899_v43, 2 }
 0x4b0   : > { %v5219_v16 = vpop.f32.mrf.mxu1  ;;  %v5680_v50 = vpop.f32.mrf.mxu3  ;;  %v5295_v36 = vadd.f32 %v5216_v21, %v5084_v24  ;;  %v5143_v24 = vsel %vm963_vm3, %v5140_v54, %v5142_v52 }
 0x4b1   : > { %v15229_v42 = vadd.f32 %v5680_v50, %v5549_v47  ;;  %v5380_v47 = vrot.slane %v4903_v62, 1  ;;  %v4897_v50 = vor.u32 %v4895_v22, %v4893_v4 }
 0x4b3   : > { %11405 = vmatmul.msk.bf16.gmra.mxu1 %vm691_vm1, %v5141_v58  ;;  %v5382_v6 = vor.u32 %v5381_v26, %v5380_v47 }
 0x4b4   : > { %v5471_v5 = vpop.f32.mrf.mxu2 }
 0x4b5   : > { %v5550_v48 = vadd.f32 %v5471_v5, %v5295_v36  ;;  %v5008_v7 = vpop.f32.mrf.mxu0  ;;  %v4901_v36 = vrot.slane %v4899_v43, 1 }
 0x4b6   : > { %v5085_v17 = vadd.f32 %v5008_v7, %v14908_v59 }
 0x4b8   : > { %v5221_v21 = vpop.f32.mrf.mxu1  ;;  %v5682_v49 = vpop.f32.mrf.mxu3  ;;  %v5296_v51 = vadd.f32 %v5219_v16, %v5085_v17  ;;  %11388 = vmatmul.msk.bf16.gmra.mxu0 %vm691_vm1, %v4894_v61  ;;  %v4902_v61 = vsel %vm558_vm2, %v4897_v50, %v4901_v36  ;;  %v15257_v17 = vld [vmem:[%s13584_s17 + $0x78] sm:$0xff]  ;;  %v4905_v50 = vor.u32 %v4903_v62, %v4901_v36 }
 0x4b9   : > { %v15239_v11 = vadd.f32 %v5682_v49, %v5550_v48  ;;  %11422 = vmatmul.msk.bf16.gmra.mxu2 %vm691_vm1, %v5379_v23  ;;  %v5608_v23 = vrot.slane %v15236_v40, 2  ;;  %v5144_v40 = vrot.slane %v15257_v17, 1 }
 0x4bc   : > { %v5474_v14 = vpop.f32.mrf.mxu2 }
 0x4bd   : > { %v5551_v0 = vadd.f32 %v5474_v14, %v5296_v51  ;;  %11439 = vmatmul.msk.bf16.gmra.mxu3 %vm691_vm1, %v5607_v18  ;;  %v5010_v59 = vpop.f32.mrf.mxu0  ;;  %v5609_v51 = vsel %vm1431_vm5, %v5606_v53, %v5608_v23  ;;  %v4907_v18 = vshll.u32 %v15257_v17, 16  ;;  %v11604_v53 = vld [vmem:[%s17554_s1 + $0x58] sm:$0xf] }
 0x4be   : > { %v5086_v35 = vadd.f32 %v5010_v59, %v14919_v25  ;;  %v5383_v25 = vsel %vm1175_vm4, %v5378_v1, %v5382_v6  ;;  %v4911_v1 = vshrl.u32 %v15257_v17, 16 }
 0x4bf   : > { %v5385_v59 = vrot.slane %v4907_v18, 2 }
 0x4c0   : > { %v5224_v55 = vpop.f32.mrf.mxu1  ;;  %v5685_v28 = vpop.f32.mrf.mxu3  ;;  %v5297_v16 = vadd.f32 %v5221_v21, %v5086_v35  ;;  %v5145_v35 = vsel %vm963_vm3, %v5142_v52, %v5144_v40  ;;  %v11527_v52 = vld [vmem:[%s17554_s1 + $0x54] sm:$0xf] }
 0x4c1   : > { %v15250_v58 = vadd.f32 %v5685_v28, %v5551_v0  ;;  %v5384_v0 = vrot.slane %v4911_v1, 1 }
 0x4c3   : > { %11406 = vmatmul.msk.bf16.gmra.mxu1 %vm691_vm1, %v5143_v24  ;;  %v6588_v24 = vsel %vm740_vm0, %v11604_v53, 0 }
 0x4c4   : > { %v5476_v5 = vpop.f32.mrf.mxu2  ;;  %6597 = vmatpush.bf16.msrb.mxu2 %v6588_v24 }
 0x4c5   : > { %v5552_v48 = vadd.f32 %v5476_v5, %v5297_v16  ;;  %v5013_v7 = vpop.f32.mrf.mxu0  ;;  %v4909_v5 = vrot.slane %v4907_v18, 1 }
 0x4c6   : > { %v5087_v54 = vadd.f32 %v5013_v7, %v14931_v19 }
 0x4c8   : > { %v5226_v21 = vpop.f32.mrf.mxu1  ;;  %v5687_v49 = vpop.f32.mrf.mxu3  ;;  %v5298_v22 = vadd.f32 %v5224_v55, %v5087_v54  ;;  %11389 = vmatmul.msk.bf16.gmra.mxu0 %vm691_vm1, %v4902_v61  ;;  %v6377_v61 = vsel %vm740_vm0, %v11527_v52, 0  ;;  %v4910_v54 = vsel %vm558_vm2, %v4905_v50, %v4909_v5  ;;  %v4913_v52 = vor.u32 %v4911_v1, %v4909_v5 }
 0x4c9   : > { %v15260_v4 = vadd.f32 %v5687_v49, %v5552_v48  ;;  %11423 = vmatmul.msk.bf16.gmra.mxu2 %vm691_vm1, %v5383_v25  ;;  %v5386_v48 = vor.u32 %v5385_v59, %v5384_v0  ;;  %6386 = vmatpush.bf16.msrb.mxu1 %v6377_v61  ;;  %v5610_v49 = vrot.slane %v15257_v17, 2 }
 0x4cb   : > { %v5611_v0 = vsel %vm1431_vm5, %v5608_v23, %v5610_v49 }
 0x4cc   : > { %v5479_v43 = vpop.f32.mrf.mxu2 }
 0x4cd   : > { %v5553_v14 = vadd.f32 %v5479_v43, %v5298_v22  ;;  %11440 = vmatmul.msk.bf16.gmra.mxu3 %vm691_vm1, %v5609_v51  ;;  %v5015_v19 = vpop.f32.mrf.mxu0  ;;  %v15290_v22 = vld [vmem:[%s13584_s17 + $0x80] sm:$0xff] }
 0x4ce   : > { %v5088_v47 = vadd.f32 %v5015_v19, %v14950_v30  ;;  %v11621_v30 = vld [vmem:[%s17554_s1 + $0x5c] sm:$0xf]  ;;  %v4915_v59 = vshll.u32 %v15290_v22, 16  ;;  %v5146_v17 = vrot.slane %v15290_v22, 1 }
 0x4cf   : > { %v6843_v7 = vsel %vm740_vm0, %v11621_v30, 0 }
 0x4d0   : > { %v5229_v26 = vpop.f32.mrf.mxu1  ;;  %v5690_v55 = vpop.f32.mrf.mxu3  ;;  %v5299_v28 = vadd.f32 %v5226_v21, %v5088_v47  ;;  %6852 = vmatpush.bf16.msrb.mxu3 %v6843_v7  ;;  %v5387_v21 = vsel %vm1175_vm4, %v5382_v6, %v5386_v48  ;;  %v4919_v6 = vshrl.u32 %v15290_v22, 16  ;;  %v5389_v53 = vrot.slane %v4915_v59, 2 }
 0x4d1   : > { %v15275_v16 = vadd.f32 %v5690_v55, %v5553_v14  ;;  %v4917_v7 = vrot.slane %v4915_v59, 1 }
 0x4d3   : > { %11407 = vmatmul.msk.bf16.gmra.mxu1 %vm691_vm1, %v5145_v35 }
 0x4d4   : > { %v5481_v62 = vpop.f32.mrf.mxu2 }
 0x4d5   : > { %v5554_v36 = vadd.f32 %v5481_v62, %v5299_v28  ;;  %v5018_v25 = vpop.f32.mrf.mxu0  ;;  %v5147_v28 = vsel %vm963_vm3, %v5144_v40, %v5146_v17 }
 0x4d6   : > { %v5089_v51 = vadd.f32 %v5018_v25, %v14958_v27 }
 0x4d8   : > { %v5231_v18 = vpop.f32.mrf.mxu1  ;;  %v5692_v43 = vpop.f32.mrf.mxu3  ;;  %v5300_v14 = vadd.f32 %v5229_v26, %v5089_v51  ;;  %11390 = vmatmul.msk.bf16.gmra.mxu0 %vm691_vm1, %v4910_v54  ;;  %v5388_v26 = vrot.slane %v4919_v6, 1  ;;  %v4918_v54 = vsel %vm558_vm2, %v4913_v52, %v4917_v7  ;;  %v15311_v51 = vld [vmem:[%s13584_s17 + $0x88] sm:$0xff] }
 0x4d9   : > { %v15293_v19 = vadd.f32 %v5692_v43, %v5554_v36  ;;  %11424 = vmatmul.msk.bf16.gmra.mxu2 %vm691_vm1, %v5387_v21  ;;  %v5612_v21 = vrot.slane %v15290_v22, 2  ;;  %v5148_v22 = vrot.slane %v15311_v51, 1 }
 0x4da   : > { %v5390_v61 = vor.u32 %v5389_v53, %v5388_v26 }
 0x4dc   : > { %v5484_v47 = vpop.f32.mrf.mxu2 }
 0x4dd   : > { %v5555_v35 = vadd.f32 %v5484_v47, %v5300_v14  ;;  %11441 = vmatmul.msk.bf16.gmra.mxu3 %vm691_vm1, %v5611_v0  ;;  %v5020_v27 = vpop.f32.mrf.mxu0  ;;  %v5613_v14 = vsel %vm1431_vm5, %v5610_v49, %v5612_v21  ;;  %v4923_v0 = vshll.u32 %v15311_v51, 16 }
 0x4de   : > { %v5090_v55 = vadd.f32 %v5020_v27, %v14969_v31  ;;  %v5391_v31 = vsel %vm1175_vm4, %v5386_v48, %v5390_v61  ;;  %v4927_v48 = vshrl.u32 %v15311_v51, 16 }
 0x4df   : > { %v5393_v27 = vrot.slane %v4923_v0, 2 }
 0x4e0   : > { %v5234_v24 = vpop.f32.mrf.mxu1  ;;  %v5695_v23 = vpop.f32.mrf.mxu3  ;;  %v5301_v50 = vadd.f32 %v5231_v18, %v5090_v55  ;;  %v5149_v55 = vsel %vm963_vm3, %v5146_v17, %v5148_v22 }
 0x4e1   : > { %v15304_v30 = vadd.f32 %v5695_v23, %v5555_v35  ;;  %v5392_v35 = vrot.slane %v4927_v48, 1  ;;  %v4921_v23 = vor.u32 %v4919_v6, %v4917_v7 }
 0x4e3   : > { %11408 = vmatmul.msk.bf16.gmra.mxu1 %vm691_vm1, %v5147_v28  ;;  %v5394_v52 = vor.u32 %v5393_v27, %v5392_v35 }
 0x4e4   : > { %v5486_v62 = vpop.f32.mrf.mxu2 }
 0x4e5   : > { %v5556_v36 = vadd.f32 %v5486_v62, %v5301_v50  ;;  %v5023_v25 = vpop.f32.mrf.mxu0  ;;  %v4925_v50 = vrot.slane %v4923_v0, 1 }
 0x4e6   : > { %v5091_v40 = vadd.f32 %v5023_v25, %v14977_v15 }
 0x4e8   : > { %v5236_v18 = vpop.f32.mrf.mxu1  ;;  %v5697_v43 = vpop.f32.mrf.mxu3  ;;  %v5302_v1 = vadd.f32 %v5234_v24, %v5091_v40  ;;  %11391 = vmatmul.msk.bf16.gmra.mxu0 %vm691_vm1, %v4918_v54  ;;  %v4926_v54 = vsel %vm558_vm2, %v4921_v23, %v4925_v50  ;;  %v15332_v40 = vld [vmem:[%s13584_s17 + $0x90] sm:$0xff] }
 0x4e9   : > { %v15314_v5 = vadd.f32 %v5697_v43, %v5556_v36  ;;  %11425 = vmatmul.msk.bf16.gmra.mxu2 %vm691_vm1, %v5391_v31  ;;  %v5614_v31 = vrot.slane %v15311_v51, 2  ;;  %v4935_v51 = vshrl.u32 %v15332_v40, 16 }
 0x4ec   : > { %v5489_v59 = vpop.f32.mrf.mxu2 }
 0x4ed   : > { %v5557_v47 = vadd.f32 %v5489_v59, %v5302_v1  ;;  %11442 = vmatmul.msk.bf16.gmra.mxu3 %vm691_vm1, %v5613_v14  ;;  %v5025_v15 = vpop.f32.mrf.mxu0  ;;  %v5615_v1 = vsel %vm1431_vm5, %v5612_v21, %v5614_v31  ;;  %v5150_v14 = vrot.slane %v15332_v40, 1  ;;  %v5326_v21 = vld [vmem:[%s13584_s17 + $0x98] sm:$0x3] }
 0x4ee   : > { %v5092_v26 = vadd.f32 %v5025_v15, %v14989_v32  ;;  %v5395_v32 = vsel %vm1175_vm4, %v5390_v61, %v5394_v52  ;;  %v4931_v61 = vshll.u32 %v15332_v40, 16 }
 0x4f0   : > { %v5239_v53 = vpop.f32.mrf.mxu1  ;;  %v5700_v49 = vpop.f32.mrf.mxu3  ;;  %v5303_v24 = vadd.f32 %v5236_v18, %v5092_v26  ;;  %v5397_v15 = vrot.slane %v4931_v61, 2  ;;  %v5151_v26 = vsel %vm963_vm3, %v5148_v22, %v5150_v14  ;;  %v4933_v23 = vrot.slane %v4931_v61, 1 }
 0x4f1   : > { %v15325_v28 = vadd.f32 %v5700_v49, %v5557_v47  ;;  %v5396_v47 = vrot.slane %v4935_v51, 1 }
 0x4f3   : > { %11409 = vmatmul.msk.bf16.gmra.mxu1 %vm691_vm1, %v5149_v55 }
 0x4f4   : > { %v5491_v62 = vpop.f32.mrf.mxu2 }
 0x4f5   : > { %v5558_v36 = vadd.f32 %v5491_v62, %v5303_v24  ;;  %v5028_v25 = vpop.f32.mrf.mxu0  ;;  %v4929_v24 = vor.u32 %v4927_v48, %v4925_v50  ;;  %v5398_v62 = vor.u32 %v5397_v15, %v5396_v47 }
 0x4f6   : > { %v5093_v17 = vadd.f32 %v5028_v25, %v14997_v2  ;;  %v5330_v25 = vunpack.c.l.b16 %v5326_v21 }
 0x4f7   : > { %v5399_v22 = vsel %vm1175_vm4, %v5394_v52, %v5398_v62 }
 0x4f8   : > { %v5241_v18 = vpop.f32.mrf.mxu1  ;;  %v5702_v43 = vpop.f32.mrf.mxu3  ;;  %v5304_v6 = vadd.f32 %v5239_v53, %v5093_v17  ;;  %11392 = vmatmul.msk.bf16.gmra.mxu0 %vm691_vm1, %v4926_v54 }
 0x4f9   : > { %v15335_v7 = vadd.f32 %v5702_v43, %v5558_v36  ;;  %11426 = vmatmul.msk.bf16.gmra.mxu2 %vm691_vm1, %v5395_v32  ;;  %v4725_v36 = vld [vmem:[%s13584_s17 + $0x98] sm:$0x1] }
 0x4fa   : > { %v4793_v17 = vunpack.c.l.b16 %v4725_v36 }
 0x4fc   : > { %v5494_v0 = vpop.f32.mrf.mxu2 }
 0x4fd   : > { %v5559_v2 = vadd.f32 %v5494_v0, %v5304_v6  ;;  %11443 = vmatmul.msk.bf16.gmra.mxu3 %vm691_vm1, %v5615_v1  ;;  %v5030_v59 = vpop.f32.mrf.mxu0  ;;  %v5616_v6 = vrot.slane %v15332_v40, 2 }
 0x4fe   : > { %v5094_v35 = vadd.f32 %v5030_v59, %v15004_v44  ;;  %v4934_v44 = vsel %vm558_vm2, %v4929_v24, %v4933_v23  ;;  %v11638_v59 = vld [vmem:[%s17554_s1 + $0x60] sm:$0xf] }
 0x4ff   : > { %v5617_v52 = vsel %vm1431_vm5, %v5614_v31, %v5616_v6 }
 0x500   : > { %v5244_v27 = vpop.f32.mrf.mxu1  ;;  %v5705_v53 = vpop.f32.mrf.mxu3  ;;  %v5305_v55 = vadd.f32 %v5241_v18, %v5094_v35  ;;  %v5331_v18 = vpack.c.b16 %v5330_v25, %v5330_v25 }
 0x501   : > { %v15347_v49 = vadd.f32 %v5705_v53, %v5559_v2  ;;  %v4810_v2 = vpack.c.b16 %v4793_v17, %v4793_v17  ;;  %v4937_v17 = vor.u32 %v4935_v51, %v4933_v23 }
 0x502   : > { %v5401_v40 = vshrl.u32 %v5331_v18, 16  ;;  %v5404_v47 = vshll.u32 %v5331_v18, 16 }
 0x503   : > { %11410 = vmatmul.msk.bf16.gmra.mxu1 %vm691_vm1, %v5151_v26  ;;  %v5152_v15 = vrot.slane %v4810_v2, 1  ;;  %v4939_v26 = vshll.u32 %v4810_v2, 16 }
 0x504   : > { %v5496_v54 = vpop.f32.mrf.mxu2  ;;  %v5403_v53 = vrot.slane %v5401_v40, 1 }
 0x505   : > { %v5560_v32 = vadd.f32 %v5496_v54, %v5305_v55  ;;  %v5033_v43 = vpop.f32.mrf.mxu0  ;;  %v5406_v55 = vrot.slane %v5404_v47, 2  ;;  %v5153_v36 = vsel %vm963_vm3, %v5150_v14, %v5152_v15 }
 0x506   : > { %v5095_v1 = vadd.f32 %v5033_v43, %v15018_v12  ;;  %v7054_v12 = vsel %vm740_vm0, %v11638_v59, 0  ;;  %v4941_v43 = vrot.slane %v4939_v26, 1 }
 0x507   : > { %7063 = vmatpush.bf16.msra.mxu0 %v7054_v12 }
 0x508   : > { %v5246_v48 = vpop.f32.mrf.mxu1  ;;  %v5707_v50 = vpop.f32.mrf.mxu3  ;;  %v5306_v61 = vadd.f32 %v5244_v27, %v5095_v1  ;;  %11393 = vmatmul.msk.bf16.gmra.mxu0 %vm691_vm1, %v4934_v44  ;;  %v5407_v44 = vor.u32 %v5406_v55, %v5403_v53  ;;  %v15374_v1 = vld [vmem:[%s13584_s17 + $0x28] sm:$0xff]  ;;  %v4942_v14 = vsel %vm558_vm2, %v4937_v17, %v4941_v43 }
 0x509   : > { %v15355_v0 = vadd.f32 %v5707_v50, %v5560_v32  ;;  %11427 = vmatmul.msk.bf16.gmra.mxu2 %vm691_vm1, %v5399_v22  ;;  %v15371_v22 = vld [vmem:[%s13584_s17 + $0x20] sm:$0xff]  }
 0x50a   : > { %v6500_v50 = vld [vmem:[%s13584_s17 + $0x20] sm:$0xe]  ;;  %v17535_v51 = vunpack.c.h.b16 %v15371_v22  ;;  %v6197_v12 = vshrl.u32 %v15371_v22, 16 }
 0x50b   : > { %v6504_v23 = vunpack.c.l.b16 %v6500_v50 }
 0x50c   : > { %v5499_v35 = vpop.f32.mrf.mxu2 }
 0x50d   : > { %v5561_v27 = vadd.f32 %v5499_v35, %v5306_v61  ;;  %11444 = vmatmul.msk.bf16.gmra.mxu3 %vm691_vm1, %v5617_v52  ;;  %v5035_v21 = vpop.f32.mrf.mxu0  ;;  %v6199_v61 = vshll.u32 %v15371_v22, 16  ;;  %v5618_v52 = vrot.slane %v5331_v18, 2  ;;  %v6204_v35 = vshll.u32 %v15374_v1, 16 }
 0x50e   : > { %v5096_v24 = vadd.f32 %v5035_v21, %v15028_v20  ;;  %v6505_v18 = vpack.c.b16 %v17535_v51, %v6504_v23  ;;  %v15400_v23 = vld [vmem:[%s13584_s17 + $0x30] sm:$0xff] }
 0x50f   : > { %v6201_v15 = vrot.slane %v6199_v61, 1  ;;  %v6206_v53 = vrot.slane %v6204_v35, 1 }
 0x510   : > { %v5249_v31 = vpop.f32.mrf.mxu1  ;;  %v5710_v25 = vpop.f32.mrf.mxu3  ;;  %v5307_v54 = vadd.f32 %v5246_v48, %v5096_v24  ;;  %v5408_v48 = vsel %vm1175_vm4, %v5398_v62, %v5407_v44  ;;  %v5619_v62 = vsel %vm1431_vm5, %v5616_v6, %v5618_v52  ;;  %v6726_v52 = vrot.slane %v6204_v35, 2 }
 0x511   : > { %v15367_v32 = vadd.f32 %v5710_v25, %v5561_v27  ;;  %v6718_v25 = vshrl.u32 %v6505_v18, 16 }
 0x513   : > { %11411 = vmatmul.msk.bf16.gmra.mxu1 %vm691_vm1, %v5153_v36 }
 0x514   : > { %v5501_v20 = vpop.f32.mrf.mxu2 }
 0x515   : > { %v5562_v2 = vadd.f32 %v5501_v20, %v5307_v54  ;;  %v5038_v59 = vpop.f32.mrf.mxu0  ;;  %v6721_v54 = vshll.u32 %v6505_v18, 16  ;;  %v6506_v20 = vrot.slane %v6505_v18, 1 }
 0x516   : > { %v5097_v40 = vadd.f32 %v5038_v59, %v15040_v9  ;;  %v6202_v9 = vor.u32 %v6201_v15, %v6197_v12  ;;  %v13013_v12 = vld [vmem:[%s13584_s17 + $0x20] sm:$0xff] }
 0x517   : > { %v6723_v59 = vrot.slane %v6721_v54, 2 }
 0x518   : > { %v5251_v47 = vpop.f32.mrf.mxu1  ;;  %v5712_v27 = vpop.f32.mrf.mxu3  ;;  %v5308_v26 = vadd.f32 %v5249_v31, %v5097_v40  ;;  %11394 = vmatmul.msk.bf16.gmra.mxu0 %vm691_vm1, %v4942_v14  ;;  %v6208_v31 = vshrl.u32 %v15374_v1, 16  ;;  %v6207_v6 = vsel %vm558_vm2, %v6202_v9, %v6206_v53  ;;  %v6720_v14 = vrot.slane %v6718_v25, 1 }
 0x519   : > { %v15384_v21 = vadd.f32 %v5712_v27, %v5562_v2  ;;  %11428 = vmatmul.msk.bf16.gmra.mxu2 %vm691_vm1, %v5408_v48  ;;  %v6507_v2 = vrot.slane %v15374_v1, 1  ;;  %v6212_v1 = vshll.u32 %v15400_v23, 16 }
 0x51a   : > { %v6725_v48 = vrot.slane %v6208_v31, 1 }
 0x51b   : > { %v6508_v27 = vsel %vm963_vm3, %v6506_v20, %v6507_v2  ;;  %v6214_v25 = vrot.slane %v6212_v1, 1 }
 0x51c   : > { %v5504_v55 = vpop.f32.mrf.mxu2 }
 0x51d   : > { %v5563_v24 = vadd.f32 %v5504_v55, %v5308_v26  ;;  %11445 = vmatmul.msk.bf16.gmra.mxu3 %vm691_vm1, %v5619_v62  ;;  %v5040_v36 = vpop.f32.mrf.mxu0  ;;  %v6727_v26 = vor.u32 %v6726_v52, %v6725_v48  ;;  %v6730_v48 = vrot.slane %v6212_v1, 2  ;;  %v15420_v52 = vld [vmem:[%s13584_s17 + $0x38] sm:$0xff] }
 0x51e   : > { %v5098_v17 = vadd.f32 %v5040_v36, %v15050_v33  ;;  %v6210_v36 = vor.u32 %v6208_v31, %v6206_v53  ;;  %v6509_v53 = vrot.slane %v15400_v23, 1 }
 0x520   : > { %v5254_v43 = vpop.f32.mrf.mxu1  ;;  %v5715_v44 = vpop.f32.mrf.mxu3  ;;  %v5309_v50 = vadd.f32 %v5251_v47, %v5098_v17  ;;  %v6724_v47 = vor.u32 %v6723_v59, %v6720_v14 }
 0x521   : > { %v15395_v61 = vadd.f32 %v5715_v44, %v5563_v24 }
 0x522   : > { %v6728_v35 = vsel %vm1175_vm4, %v6724_v47, %v6727_v26 }
 0x523   : > { %11588 = vmatmul.msk.bf16.vlgmr.msrb.gmra.mxu1 %vm691_vm1, %v6207_v6  ;;  %v6216_v6 = vshrl.u32 %v15400_v23, 16 }
 0x524   : > { %v5506_v33 = vpop.f32.mrf.mxu2 }
 0x525   : > { %v5564_v40 = vadd.f32 %v5506_v33, %v5309_v50  ;;  %v5043_v15 = vpop.f32.mrf.mxu0  ;;  %v6215_v50 = vsel %vm558_vm2, %v6210_v36, %v6214_v25  ;;  %v6729_v31 = vrot.slane %v6216_v6, 1 }
 0x526   : > { %v5099_v62 = vadd.f32 %v5043_v15, %v15061_v41 }
 0x528   : > { %v5256_v18 = vpop.f32.mrf.mxu1  ;;  %v5717_v9 = vpop.f32.mrf.mxu3  ;;  %v5310_v55 = vadd.f32 %v5254_v43, %v5099_v62  ;;  %11511 = vmatmul.msk.bf16.vlgmr.msrb.gmra.mxu0 %vm691_vm1, %v13013_v12  ;;  %v13014_v12 = vld [vmem:[%s13584_s17 + $0x28] sm:$0xff] }
 0x529   : > { %v15406_v24 = vadd.f32 %v5717_v9, %v5564_v40  ;;  %11605 = vmatmul.msk.bf16.vlgmr.msrb.gmra.mxu2 %vm691_vm1, %v6508_v27  ;;  %v6731_v27 = vor.u32 %v6730_v48, %v6729_v31  ;;  %v15440_v31 = vld [vmem:[%s13584_s17 + $0x40] sm:$0xff] }
 0x52b   : > { %v6732_v1 = vsel %vm1175_vm4, %v6727_v26, %v6731_v27  ;;  %v6511_v26 = vrot.slane %v15420_v52, 1 }
 0x52c   : > { %v5509_v54 = vpop.f32.mrf.mxu2 }
 0x52d   : > { %v5565_v17 = vadd.f32 %v5509_v54, %v5310_v55  ;;  %11622 = vmatmul.msk.bf16.vlgmr.msrb.gmra.mxu3 %vm691_vm1, %v6728_v35  ;;  %v5045_v41 = vpop.f32.mrf.mxu0  ;;  %v6218_v35 = vor.u32 %v6216_v6, %v6214_v25 }
 0x52e   : > { %v5100_v43 = vadd.f32 %v5045_v41, %v15071_v56  ;;  %v6510_v56 = vsel %vm963_vm3, %v6507_v2, %v6509_v53 }
 0x530   : > { %v5259_v44 = vpop.f32.mrf.mxu1  ;;  %v5720_v20 = vpop.f32.mrf.mxu3  ;;  %v5311_v14 = vadd.f32 %v5256_v18, %v5100_v43  ;;  %v6220_v18 = vshll.u32 %v15420_v52, 16 }
 0x531   : > { %v15415_v59 = vadd.f32 %v5720_v20, %v5565_v17  ;;  %v6224_v17 = vshrl.u32 %v15420_v52, 16 }
 0x532   : > { %v6222_v36 = vrot.slane %v6220_v18, 1  ;;  %v6734_v6 = vrot.slane %v6220_v18, 2 }
 0x533   : > { %11589 = vmatmul.msk.bf16.gmra.mxu1 %vm691_vm1, %v6215_v50  ;;  %v6733_v25 = vrot.slane %v6224_v17, 1 }
 0x534   : > { %v5511_v33 = vpop.f32.mrf.mxu2 }
 0x535   : > { %v5566_v40 = vadd.f32 %v5511_v33, %v5311_v14  ;;  %v5048_v15 = vpop.f32.mrf.mxu0 }
 0x536   : > { %v5101_v47 = vadd.f32 %v5048_v15, %v15082_v46  ;;  %v6735_v15 = vor.u32 %v6734_v6, %v6733_v25  ;;  %v15460_v25 = vld [vmem:[%s13584_s17 + $0x48] sm:$0xff] }
 0x538   : > { %v5261_v62 = vpop.f32.mrf.mxu1  ;;  %v5722_v9 = vpop.f32.mrf.mxu3  ;;  %v5312_v23 = vadd.f32 %v5259_v44, %v5101_v47  ;;  %11512 = vmatmul.msk.bf16.gmra.mxu0 %vm691_vm1, %v13014_v12  ;;  %v6223_v44 = vsel %vm558_vm2, %v6218_v35, %v6222_v36  ;;  %v6736_v18 = vsel %vm1175_vm4, %v6731_v27, %v6735_v15  ;;  %v6513_v27 = vrot.slane %v15440_v31, 1 }
 0x539   : > { %v15426_v55 = vadd.f32 %v5722_v9, %v5566_v40  ;;  %11606 = vmatmul.msk.bf16.gmra.mxu2 %vm691_vm1, %v6510_v56  ;;  %v13015_v40 = vld [vmem:[%s13584_s17 + $0x30] sm:$0xff] }
 0x53c   : > { %v5514_v2 = vpop.f32.mrf.mxu2 }
 0x53d   : > { %v5567_v54 = vadd.f32 %v5514_v2, %v5312_v23  ;;  %11623 = vmatmul.msk.bf16.gmra.mxu3 %vm691_vm1, %v6732_v1  ;;  %v5050_v46 = vpop.f32.mrf.mxu0  ;;  %v6226_v1 = vor.u32 %v6224_v17, %v6222_v36 }
 0x53e   : > { %v5102_v41 = vadd.f32 %v5050_v46, %v15092_v29  ;;  %v6512_v29 = vsel %vm963_vm3, %v6509_v53, %v6511_v26 }
 0x540   : > { %v5264_v43 = vpop.f32.mrf.mxu1  ;;  %v5725_v50 = vpop.f32.mrf.mxu3  ;;  %v5313_v20 = vadd.f32 %v5261_v62, %v5102_v41  ;;  %v6228_v62 = vshll.u32 %v15440_v31, 16 }
 0x541   : > { %v15435_v14 = vadd.f32 %v5725_v50, %v5567_v54  ;;  %v6232_v54 = vshrl.u32 %v15440_v31, 16 }
 0x542   : > { %v6230_v35 = vrot.slane %v6228_v62, 1  ;;  %v6738_v17 = vrot.slane %v6228_v62, 2 }
 0x543   : > { %11590 = vmatmul.msk.bf16.gmra.mxu1 %vm691_vm1, %v6223_v44  ;;  %v6737_v36 = vrot.slane %v6232_v54, 1 }
 0x544   : > { %v5516_v48 = vpop.f32.mrf.mxu2 }
 0x545   : > { %v5568_v33 = vadd.f32 %v5516_v48, %v5313_v20  ;;  %v5053_v12 = vpop.f32.mrf.mxu0 }
 0x546   : > { %v5103_v56 = vadd.f32 %v5053_v12, %v15103_v45  ;;  %v6739_v12 = vor.u32 %v6738_v17, %v6737_v36  ;;  %v15480_v36 = vld [vmem:[%s13584_s17 + $0x50] sm:$0xff] }
 0x548   : > { %v5266_v47 = vpop.f32.mrf.mxu1  ;;  %v5727_v9 = vpop.f32.mrf.mxu3  ;;  %v5314_v52 = vadd.f32 %v5264_v43, %v5103_v56  ;;  %11513 = vmatmul.msk.bf16.gmra.mxu0 %vm691_vm1, %v13015_v40  ;;  %v6231_v43 = vsel %vm558_vm2, %v6226_v1, %v6230_v35  ;;  %v6740_v62 = vsel %vm1175_vm4, %v6735_v15, %v6739_v12  ;;  %v6515_v15 = vrot.slane %v15460_v25, 1 }
 0x549   : > { %v15446_v23 = vadd.f32 %v5727_v9, %v5568_v33  ;;  %11607 = vmatmul.msk.bf16.gmra.mxu2 %vm691_vm1, %v6512_v29  ;;  %v13016_v33 = vld [vmem:[%s13584_s17 + $0x38] sm:$0xff] }
 0x54c   : > { %v5519_v53 = vpop.f32.mrf.mxu2 }
 0x54d   : > { %v5569_v2 = vadd.f32 %v5519_v53, %v5314_v52  ;;  %11624 = vmatmul.msk.bf16.gmra.mxu3 %vm691_vm1, %v6736_v18  ;;  %v5055_v45 = vpop.f32.mrf.mxu0  ;;  %v6234_v18 = vor.u32 %v6232_v54, %v6230_v35 }
 0x54e   : > { %v5104_v46 = vadd.f32 %v5055_v45, %v15113_v3  ;;  %v6514_v3 = vsel %vm963_vm3, %v6511_v26, %v6513_v27 }
 0x550   : > { %v5269_v41 = vpop.f32.mrf.mxu1  ;;  %v5730_v44 = vpop.f32.mrf.mxu3  ;;  %v5315_v50 = vadd.f32 %v5266_v47, %v5104_v46  ;;  %v6236_v47 = vshll.u32 %v15460_v25, 16 }
 0x551   : > { %v15455_v20 = vadd.f32 %v5730_v44, %v5569_v2  ;;  %v6240_v2 = vshrl.u32 %v15460_v25, 16 }
 0x552   : > { %v6238_v1 = vrot.slane %v6236_v47, 1  ;;  %v6742_v54 = vrot.slane %v6236_v47, 2 }
 0x553   : > { %11591 = vmatmul.msk.bf16.gmra.mxu1 %vm691_vm1, %v6231_v43  ;;  %v6741_v35 = vrot.slane %v6240_v2, 1 }
 0x554   : > { %v5521_v6 = vpop.f32.mrf.mxu2 }
 0x555   : > { %v5570_v48 = vadd.f32 %v5521_v6, %v5315_v50  ;;  %v5058_v40 = vpop.f32.mrf.mxu0 }
 0x556   : > { %v5105_v29 = vadd.f32 %v5058_v40, %v15124_v57  ;;  %v6743_v40 = vor.u32 %v6742_v54, %v6741_v35  ;;  %v15500_v54 = vld [vmem:[%s13584_s17 + $0x58] sm:$0xff] }
 0x558   : > { %v5271_v56 = vpop.f32.mrf.mxu1  ;;  %v5732_v9 = vpop.f32.mrf.mxu3  ;;  %v5316_v31 = vadd.f32 %v5269_v41, %v5105_v29  ;;  %11514 = vmatmul.msk.bf16.gmra.mxu0 %vm691_vm1, %v13016_v33  ;;  %v6239_v41 = vsel %vm558_vm2, %v6234_v18, %v6238_v1  ;;  %v6744_v47 = vsel %vm1175_vm4, %v6739_v12, %v6743_v40  ;;  %v6242_v18 = vor.u32 %v6240_v2, %v6238_v1 }
 0x559   : > { %v15466_v52 = vadd.f32 %v5732_v9, %v5570_v48  ;;  %11608 = vmatmul.msk.bf16.gmra.mxu2 %vm691_vm1, %v6514_v3  ;;  %v13017_v48 = vld [vmem:[%s13584_s17 + $0x40] sm:$0xff]  ;;  %v6517_v12 = vrot.slane %v15480_v36, 1 }
 0x55c   : > { %v5524_v26 = vpop.f32.mrf.mxu2 }
 0x55d   : > { %v5571_v53 = vadd.f32 %v5524_v26, %v5316_v31  ;;  %11625 = vmatmul.msk.bf16.gmra.mxu3 %vm691_vm1, %v6740_v62  ;;  %v5060_v57 = vpop.f32.mrf.mxu0 }
 0x55e   : > { %v5106_v45 = vadd.f32 %v5060_v57, %v15134_v38  ;;  %v6516_v38 = vsel %vm963_vm3, %v6513_v27, %v6515_v15  ;;  %v6248_v57 = vshrl.u32 %v15480_v36, 16 }
 0x560   : > { %v5274_v46 = vpop.f32.mrf.mxu1  ;;  %v5735_v43 = vpop.f32.mrf.mxu3  ;;  %v5317_v44 = vadd.f32 %v5271_v56, %v5106_v45  ;;  %v6244_v56 = vshll.u32 %v15480_v36, 16  ;;  %v6745_v1 = vrot.slane %v6248_v57, 1 }
 0x561   : > { %v15475_v50 = vadd.f32 %v5735_v43, %v5571_v53 }
 0x562   : > { %v6246_v26 = vrot.slane %v6244_v56, 1  ;;  %v6746_v2 = vrot.slane %v6244_v56, 2 }
 0x563   : > { %11592 = vmatmul.msk.bf16.gmra.mxu1 %vm691_vm1, %v6239_v41 }
 0x564   : > { %v5526_v17 = vpop.f32.mrf.mxu2  ;;  %v6247_v41 = vsel %vm558_vm2, %v6242_v18, %v6246_v26 }
 0x565   : > { %v5572_v6 = vadd.f32 %v5526_v17, %v5317_v44  ;;  %v5063_v33 = vpop.f32.mrf.mxu0 }
 0x566   : > { %v5107_v3 = vadd.f32 %v5063_v33, %v15145_v60 }
 0x568   : > { %v5276_v29 = vpop.f32.mrf.mxu1  ;;  %v5737_v9 = vpop.f32.mrf.mxu3  ;;  %v5318_v31 = vadd.f32 %v5274_v46, %v5107_v3  ;;  %11515 = vmatmul.msk.bf16.gmra.mxu0 %vm691_vm1, %v13017_v48  ;;  %v13018_v48 = vld [vmem:[%s13584_s17 + $0x48] sm:$0xff] }
 0x569   : > { %v15486_v62 = vadd.f32 %v5737_v9, %v5572_v6  ;;  %11609 = vmatmul.msk.bf16.gmra.mxu2 %vm691_vm1, %v6516_v38  ;;  %v6747_v38 = vor.u32 %v6746_v2, %v6745_v1  ;;  %v6252_v9 = vshll.u32 %v15500_v54, 16 }
 0x56b   : > { %v6748_v56 = vsel %vm1175_vm4, %v6743_v40, %v6747_v38  ;;  %v6519_v40 = vrot.slane %v15500_v54, 1 }
 0x56c   : > { %v5529_v27 = vpop.f32.mrf.mxu2 }
 0x56d   : > { %v5573_v53 = vadd.f32 %v5529_v27, %v5318_v31  ;;  %11626 = vmatmul.msk.bf16.gmra.mxu3 %vm691_vm1, %v6744_v47  ;;  %v5065_v60 = vpop.f32.mrf.mxu0  ;;  %v6250_v27 = vor.u32 %v6248_v57, %v6246_v26  ;;  %v6750_v57 = vrot.slane %v6252_v9, 2 }
 0x56e   : > { %v5108_v45 = vadd.f32 %v5065_v60, %v15155_v63  ;;  %v6518_v63 = vsel %vm963_vm3, %v6515_v15, %v6517_v12 }
 0x570   : > { %v5279_v46 = vpop.f32.mrf.mxu1  ;;  %v5740_v43 = vpop.f32.mrf.mxu3  ;;  %v5319_v44 = vadd.f32 %v5276_v29, %v5108_v45  ;;  %v6256_v45 = vshrl.u32 %v15500_v54, 16 }
 0x571   : > { %v15495_v35 = vadd.f32 %v5740_v43, %v5573_v53  ;;  %v6254_v53 = vrot.slane %v6252_v9, 1 }
 0x572   : > { %v6749_v26 = vrot.slane %v6256_v45, 1 }
 0x573   : > { %11593 = vmatmul.msk.bf16.gmra.mxu1 %vm691_vm1, %v6247_v41  ;;  %v6255_v43 = vsel %vm558_vm2, %v6250_v27, %v6254_v53 }
 0x574   : > { %v5531_v17 = vpop.f32.mrf.mxu2 }
 0x575   : > { %v5574_v6 = vadd.f32 %v5531_v17, %v5319_v44  ;;  %v5068_v33 = vpop.f32.mrf.mxu0  ;;  %v15520_v17 = vld [vmem:[%s13584_s17 + $0x60] sm:$0xff] }
 0x576   : > { %v5109_v3 = vadd.f32 %v5068_v33, %v15166_v39  ;;  %v13019_v33 = vld [vmem:[%s13584_s17 + $0x50] sm:$0xff] }
 0x578   : > { %v5281_v29 = vpop.f32.mrf.mxu1  ;;  %v5742_v31 = vpop.f32.mrf.mxu3  ;;  %v5320_v47 = vadd.f32 %v5279_v46, %v5109_v3  ;;  %11516 = vmatmul.msk.bf16.gmra.mxu0 %vm691_vm1, %v13018_v48  ;;  %v6751_v3 = vor.u32 %v6750_v57, %v6749_v26 }
 0x579   : > { %v15506_v18 = vadd.f32 %v5742_v31, %v5574_v6  ;;  %11610 = vmatmul.msk.bf16.gmra.mxu2 %vm691_vm1, %v6518_v63 }
 0x57a   : > { %v6752_v9 = vsel %vm1175_vm4, %v6747_v38, %v6751_v3  ;;  %v6521_v38 = vrot.slane %v15520_v17, 1 }
 0x57c   : > { %v5534_v15 = vpop.f32.mrf.mxu2 }
 0x57d   : > { %v5575_v60 = vadd.f32 %v5534_v15, %v5320_v47  ;;  %11627 = vmatmul.msk.bf16.gmra.mxu3 %vm691_vm1, %v6748_v56  ;;  %v5070_v39 = vpop.f32.mrf.mxu0  ;;  %v6260_v47 = vshll.u32 %v15520_v17, 16 }
 0x57e   : > { %v5110_v46 = vadd.f32 %v5070_v39, %v15176_v10  ;;  %v6520_v10 = vsel %vm963_vm3, %v6517_v12, %v6519_v40 }
 0x57f   : > { %v6262_v39 = vrot.slane %v6260_v47, 1 }
 0x580   : > { %v5284_v41 = vpop.f32.mrf.mxu1  ;;  %v5745_v44 = vpop.f32.mrf.mxu3  ;;  %v5321_v1 = vadd.f32 %v5281_v29, %v5110_v46 }
 0x581   : > { %v15515_v2 = vadd.f32 %v5745_v44, %v5575_v60  ;;  %v6258_v60 = vor.u32 %v6256_v45, %v6254_v53  ;;  %v6754_v45 = vrot.slane %v6260_v47, 2 }
 0x583   : > { %11594 = vmatmul.msk.bf16.gmra.mxu1 %vm691_vm1, %v6255_v43  ;;  %v6264_v43 = vshrl.u32 %v15520_v17, 16 }
 0x584   : > { %v5536_v6 = vpop.f32.mrf.mxu2 }
 0x585   : > { %v5576_v48 = vadd.f32 %v5536_v6, %v5321_v1  ;;  %v5073_v63 = vpop.f32.mrf.mxu0  ;;  %v6263_v1 = vsel %vm558_vm2, %v6258_v60, %v6262_v39  ;;  %v6753_v53 = vrot.slane %v6264_v43, 1 }
 0x586   : > { %v5111_v31 = vadd.f32 %v5073_v63, %v15187_v34 }
 0x588   : > { %v5286_v29 = vpop.f32.mrf.mxu1  ;;  %v5747_v56 = vpop.f32.mrf.mxu3  ;;  %v5322_v27 = vadd.f32 %v5284_v41, %v5111_v31  ;;  %11517 = vmatmul.msk.bf16.gmra.mxu0 %vm691_vm1, %v13019_v33 }
 0x589   : > { %v15526_v15 = vadd.f32 %v5747_v56, %v5576_v48  ;;  %11611 = vmatmul.msk.bf16.gmra.mxu2 %vm691_vm1, %v6520_v10  ;;  %v15540_v48 = vld [vmem:[%s13584_s17 + $0x68] sm:$0xff]  ;;  %v13020_v10 = vld [vmem:[%s13584_s17 + $0x58] sm:$0xff]  ;;  %v6755_v56 = vor.u32 %v6754_v45, %v6753_v53 }
 0x58b   : > { %v6756_v47 = vsel %vm1175_vm4, %v6751_v3, %v6755_v56  ;;  %v6523_v3 = vrot.slane %v15540_v48, 1 }
 0x58c   : > { %v5539_v12 = vpop.f32.mrf.mxu2 }
 0x58d   : > { %v5577_v46 = vadd.f32 %v5539_v12, %v5322_v27  ;;  %11628 = vmatmul.msk.bf16.gmra.mxu3 %vm691_vm1, %v6752_v9  ;;  %v5075_v34 = vpop.f32.mrf.mxu0  ;;  %v6268_v9 = vshll.u32 %v15540_v48, 16 }
 0x58e   : > { %v5112_v41 = vadd.f32 %v5075_v34, %v15197_v37  ;;  %v6522_v37 = vsel %vm963_vm3, %v6519_v40, %v6521_v38  ;;  %v6266_v34 = vor.u32 %v6264_v43, %v6262_v39 }
 0x58f   : > { %v6758_v43 = vrot.slane %v6268_v9, 2 }
 0x590   : > { %v5289_v44 = vpop.f32.mrf.mxu1  ;;  %v5750_v26 = vpop.f32.mrf.mxu3  ;;  %v5323_v57 = vadd.f32 %v5286_v29, %v5112_v41  ;;  %v6270_v41 = vrot.slane %v6268_v9, 1 }
 0x591   : > { %v15535_v6 = vadd.f32 %v5750_v26, %v5577_v46  ;;  %v6272_v26 = vshrl.u32 %v15540_v48, 16 }
 0x592   : > { %v6271_v53 = vsel %vm558_vm2, %v6266_v34, %v6270_v41 }
 0x593   : > { %11595 = vmatmul.msk.bf16.gmra.mxu1 %vm691_vm1, %v6263_v1  ;;  %v6757_v39 = vrot.slane %v6272_v26, 1 }
 0x594   : > { %v5541_v33 = vpop.f32.mrf.mxu2 }
 0x595   : > { %v5578_v63 = vadd.f32 %v5541_v33, %v5323_v57  ;;  %v5078_v31 = vpop.f32.mrf.mxu0 }
 0x596   : > { %v5113_v27 = vadd.f32 %v5078_v31, %v15208_v8 }
 0x598   : > { %v5291_v29 = vpop.f32.mrf.mxu1  ;;  %v5752_v60 = vpop.f32.mrf.mxu3  ;;  %v5324_v12 = vadd.f32 %v5289_v44, %v5113_v27  ;;  %11518 = vmatmul.msk.bf16.gmra.mxu0 %vm691_vm1, %v13020_v10  ;;  %v15560_v10 = vld [vmem:[%s13584_s17 + $0x70] sm:$0xff]  ;;  %v13021_v27 = vld [vmem:[%s13584_s17 + $0x60] sm:$0xff] }
 0x599   : > { %v15546_v46 = vadd.f32 %v5752_v60, %v5578_v63  ;;  %11612 = vmatmul.msk.bf16.gmra.mxu2 %vm691_vm1, %v6522_v37  ;;  %v6276_v34 = vshll.u32 %v15560_v10, 16 }
 0x59c   : > { %v5544_v40 = vpop.f32.mrf.mxu2 }
 0x59d   : > { %v5579_v1 = vadd.f32 %v5544_v40, %v5324_v12  ;;  %11629 = vmatmul.msk.bf16.gmra.mxu3 %vm691_vm1, %v6756_v47  ;;  %v5080_v8 = vpop.f32.mrf.mxu0  ;;  %v6759_v12 = vor.u32 %v6758_v43, %v6757_v39 }
 0x59e   : > { %v5114_v44 = vadd.f32 %v5080_v8, %v15218_v13  ;;  %v6524_v13 = vsel %vm963_vm3, %v6521_v38, %v6523_v3 }
 0x59f   : > { %v6760_v9 = vsel %vm1175_vm4, %v6755_v56, %v6759_v12  ;;  %v6525_v56 = vrot.slane %v15560_v10, 1 }
 0x5a0   : > { %v6388_v57 = vpop.f32.mrf.mxu1  ;;  %v5755_v45 = vpop.f32.mrf.mxu3  ;;  %v5325_v33 = vadd.f32 %v5291_v29, %v5114_v44  ;;  %v6274_v44 = vor.u32 %v6272_v26, %v6270_v41  ;;  %v6762_v26 = vrot.slane %v6276_v34, 2 }
 0x5a1   : > { %v15555_v63 = vadd.f32 %v5755_v45, %v5579_v1 }
 0x5a3   : > { %11596 = vmatmul.msk.bf16.gmra.mxu1 %vm691_vm1, %v6271_v53  ;;  %v6278_v53 = vrot.slane %v6276_v34, 1 }
 0x5a4   : > { %v5546_v31 = vpop.f32.mrf.mxu2 }
 0x5a5   : > { %v5580_v37 = vadd.f32 %v5546_v31, %v5325_v33  ;;  %v5966_v60 = vpop.f32.mrf.mxu0  ;;  %v6280_v33 = vshrl.u32 %v15560_v10, 16  ;;  %v6279_v43 = vsel %vm558_vm2, %v6274_v44, %v6278_v53 }
 0x5a6   : > { %v6046_v47 = vadd.f32 %v5966_v60, %v15229_v42  ;;  %v15580_v60 = vld [vmem:[%s13584_s17 + $0x78] sm:$0xff] }
 0x5a7   : > { %v6761_v41 = vrot.slane %v6280_v33, 1 }
 0x5a8   : > { %v6390_v29 = vpop.f32.mrf.mxu1  ;;  %v5757_v40 = vpop.f32.mrf.mxu3  ;;  %v6468_v8 = vadd.f32 %v6388_v57, %v6046_v47  ;;  %11519 = vmatmul.msk.bf16.gmra.mxu0 %vm691_vm1, %v13021_v27 }
 0x5a9   : > { %v15566_v1 = vadd.f32 %v5757_v40, %v5580_v37  ;;  %11613 = vmatmul.msk.bf16.gmra.mxu2 %vm691_vm1, %v6524_v13  ;;  %v13022_v40 = vld [vmem:[%s13584_s17 + $0x68] sm:$0xff] }
 0x5ac   : > { %v6599_v38 = vpop.f32.mrf.mxu2 }
 0x5ad   : > { %v6679_v45 = vadd.f32 %v6599_v38, %v6468_v8  ;;  %11630 = vmatmul.msk.bf16.gmra.mxu3 %vm691_vm1, %v6760_v9  ;;  %v5968_v42 = vpop.f32.mrf.mxu0  ;;  %v6763_v9 = vor.u32 %v6762_v26, %v6761_v41  ;;  %v6284_v38 = vshll.u32 %v15580_v60, 16  ;;  %v6288_v41 = vshrl.u32 %v15580_v60, 16 }
 0x5ae   : > { %v6047_v39 = vadd.f32 %v5968_v42, %v15239_v11  ;;  %v6526_v11 = vsel %vm963_vm3, %v6523_v3, %v6525_v56 }
 0x5af   : > { %v6764_v34 = vsel %vm1175_vm4, %v6759_v12, %v6763_v9  ;;  %v6527_v12 = vrot.slane %v15580_v60, 1 }
 0x5b0   : > { %v6393_v57 = vpop.f32.mrf.mxu1  ;;  %v6854_v31 = vpop.f32.mrf.mxu3  ;;  %v6469_v37 = vadd.f32 %v6390_v29, %v6047_v39 }
 0x5b1   : > { %v15575_v27 = vadd.f32 %v6854_v31, %v6679_v45  ;;  %v6286_v31 = vrot.slane %v6284_v38, 1 }
 0x5b3   : > { %11597 = vmatmul.msk.bf16.gmra.mxu1 %vm691_vm1, %v6279_v43  ;;  %v6282_v43 = vor.u32 %v6280_v33, %v6278_v53  ;;  %v6765_v53 = vrot.slane %v6288_v41, 1  ;;  %v6766_v33 = vrot.slane %v6284_v38, 2 }
 0x5b4   : > { %v6601_v13 = vpop.f32.mrf.mxu2 }
 0x5b5   : > { %v6680_v47 = vadd.f32 %v6601_v13, %v6469_v37  ;;  %v5971_v8 = vpop.f32.mrf.mxu0  ;;  %v6287_v13 = vsel %vm558_vm2, %v6282_v43, %v6286_v31 }
 0x5b6   : > { %v6048_v44 = vadd.f32 %v5971_v8, %v15250_v58 }
 0x5b8   : > { %v6395_v29 = vpop.f32.mrf.mxu1  ;;  %v6856_v45 = vpop.f32.mrf.mxu3  ;;  %v6470_v42 = vadd.f32 %v6393_v57, %v6048_v44  ;;  %11520 = vmatmul.msk.bf16.gmra.mxu0 %vm691_vm1, %v13022_v40 }
 0x5b9   : > { %v15586_v39 = vadd.f32 %v6856_v45, %v6680_v47  ;;  %11614 = vmatmul.msk.bf16.gmra.mxu2 %vm691_vm1, %v6526_v11  ;;  %v15600_v11 = vld [vmem:[%s13584_s17 + $0x80] sm:$0xff] }
 0x5ba   : > { %17654 = vst [vmem:[#allocation6_spill] sm:$0xff] %v15600_v11 }
 0x5bc   : > { %v6604_v3 = vpop.f32.mrf.mxu2 }
 0x5bd   : > { %v6681_v37 = vadd.f32 %v6604_v3, %v6470_v42  ;;  %11631 = vmatmul.msk.bf16.gmra.mxu3 %vm691_vm1, %v6764_v34  ;;  %v5973_v58 = vpop.f32.mrf.mxu0  ;;  %v13023_v42 = vld [vmem:[%s13584_s17 + $0x70] sm:$0xff]  ;;  %v6767_v3 = vor.u32 %v6766_v33, %v6765_v53  ;;  %v6296_v53 = vshrl.u32 %v15600_v11, 16 }
 0x5be   : > { %v6049_v57 = vadd.f32 %v5973_v58, %v15260_v4  ;;  %v6528_v4 = vsel %vm963_vm3, %v6525_v56, %v6527_v12 }
 0x5bf   : > { %v6768_v38 = vsel %vm1175_vm4, %v6763_v9, %v6767_v3 }
 0x5c0   : > { %v6398_v26 = vpop.f32.mrf.mxu1  ;;  %v6859_v47 = vpop.f32.mrf.mxu3  ;;  %v6471_v40 = vadd.f32 %v6395_v29, %v6049_v57 }
 0x5c1   : > { %v15595_v8 = vadd.f32 %v6859_v47, %v6681_v37  ;;  %v6292_v37 = vshll.u32 %v15600_v11, 16 }
 0x5c3   : > { %11598 = vmatmul.msk.bf16.gmra.mxu1 %vm691_vm1, %v6287_v13  ;;  %v6290_v13 = vor.u32 %v6288_v41, %v6286_v31 }
 0x5c4   : > { %v6606_v44 = vpop.f32.mrf.mxu2 }
 0x5c5   : > { %v6682_v45 = vadd.f32 %v6606_v44, %v6471_v40  ;;  %v5976_v34 = vpop.f32.mrf.mxu0  ;;  %v6294_v40 = vrot.slane %v6292_v37, 1 }
 0x5c6   : > { %v6050_v43 = vadd.f32 %v5976_v34, %v15275_v16  ;;  %v13067_v34 = vld [vmem:[%s17461_s5 + $0xb8] sm:$0xff] }
 0x5c7   : > { %7882 = vmatpush.bf16.msra.mxu3 %v13067_v34 }
 0x5c8   : > { %v6400_v29 = vpop.f32.mrf.mxu1  ;;  %v6861_v58 = vpop.f32.mrf.mxu3  ;;  %v6472_v57 = vadd.f32 %v6398_v26, %v6050_v43  ;;  %11521 = vmatmul.msk.bf16.gmra.mxu0 %vm691_vm1, %v13023_v42  ;;  %v13051_v42 = vld [vmem:[%s17461_s5 + $0x38] sm:$0xff]  ;;  %v6769_v43 = vrot.slane %v6296_v53, 1 }
 0x5c9   : > { %v15606_v47 = vadd.f32 %v6861_v58, %v6682_v45  ;;  %11615 = vmatmul.msk.bf16.gmra.mxu2 %vm691_vm1, %v6528_v4  ;;  %v6295_v45 = vsel %vm558_vm2, %v6290_v13, %v6294_v40  ;;  %v6529_v4 = vrot.slane %v15600_v11, 1  ;;  %v6770_v58 = vrot.slane %v6292_v37, 2  ;;  %v13024_v13 = vld [vmem:[%s13584_s17 + $0x78] sm:$0xff] }
 0x5ca   : > { %7763 = vmatpush.bf16.msra.mxu2 %v13051_v42 }
 0x5cc   : > { %v6609_v44 = vpop.f32.mrf.mxu2 }
 0x5cd   : > { %v6683_v56 = vadd.f32 %v6609_v44, %v6472_v57  ;;  %11632 = vmatmul.msk.bf16.gmra.mxu3 %vm691_vm1, %v6768_v38  ;;  %v5978_v16 = vpop.f32.mrf.mxu0  ;;  %v15629_v57 = vld [vmem:[%s13584_s17 + $0x88] sm:$0xff] }
 0x5ce   : > { %v6051_v26 = vadd.f32 %v5978_v16, %v15293_v19  ;;  %v13059_v19 = vld [vmem:[%s17461_s5 + $0x78] sm:$0xff]  ;;  %v6771_v16 = vor.u32 %v6770_v58, %v6769_v43  ;;  %v6304_v43 = vshrl.u32 %v15629_v57, 16 }
 0x5cf   : > { %7673 = vmatpush.bf16.msra.mxu1 %v13059_v19 }
 0x5d0   : > { %v6403_v33 = vpop.f32.mrf.mxu1  ;;  %v6864_v9 = vpop.f32.mrf.mxu3  ;;  %v6473_v31 = vadd.f32 %v6400_v29, %v6051_v26  ;;  %v6772_v37 = vsel %vm1175_vm4, %v6767_v3, %v6771_v16  ;;  %v6531_v3 = vrot.slane %v15629_v57, 1 }
 0x5d1   : > { %v15618_v41 = vadd.f32 %v6864_v9, %v6683_v56  ;;  %v6530_v56 = vsel %vm963_vm3, %v6527_v12, %v6529_v4  ;;  %v6300_v9 = vshll.u32 %v15629_v57, 16 }
 0x5d3   : > { %11599 = vmatmul.msk.bf16.gmra.mxu1 %vm691_vm1, %v6295_v45  ;;  %v6302_v34 = vrot.slane %v6300_v9, 1 }
 0x5d4   : > { %v6611_v29 = vpop.f32.mrf.mxu2 }
 0x5d5   : > { %v6684_v38 = vadd.f32 %v6611_v29, %v6473_v31  ;;  %v5981_v44 = vpop.f32.mrf.mxu0  ;;  %v6298_v31 = vor.u32 %v6296_v53, %v6294_v40  ;;  %v6773_v40 = vrot.slane %v6304_v43, 1  ;;  %v6774_v53 = vrot.slane %v6300_v9, 2 }
 0x5d6   : > { %v6052_v26 = vadd.f32 %v5981_v44, %v15304_v30  ;;  %v15649_v44 = vld [vmem:[%s13584_s17 + $0x90] sm:$0xff] }
 0x5d7   : > { %v6303_v58 = vsel %vm558_vm2, %v6298_v31, %v6302_v34  ;;  %17655 = vst [vmem:[#allocation8_spill] sm:$0xff] %v15649_v44 }
 0x5d8   : > { %v6405_v42 = vpop.f32.mrf.mxu1  ;;  %v6866_v51 = vpop.f32.mrf.mxu3  ;;  %v6474_v45 = vadd.f32 %v6403_v33, %v6052_v26  ;;  %11522 = vmatmul.msk.bf16.gmra.mxu0 %vm691_vm1, %v13024_v13 }
 0x5d9   : > { %v15635_v11 = vadd.f32 %v6866_v51, %v6684_v38  ;;  %11616 = vmatmul.msk.bf16.gmra.mxu2 %vm691_vm1, %v6530_v56 }
 0x5dc   : > { %v6614_v12 = vpop.f32.mrf.mxu2 }
 0x5dd   : > { %v6685_v19 = vadd.f32 %v6614_v12, %v6474_v45  ;;  %11633 = vmatmul.msk.bf16.gmra.mxu3 %vm691_vm1, %v6772_v37  ;;  %v5983_v30 = vpop.f32.mrf.mxu0  ;;  %v13025_v45 = vld [vmem:[%s13584_s17 + $0x80] sm:$0xff]  ;;  %v6775_v12 = vor.u32 %v6774_v53, %v6773_v40  ;;  %v6312_v53 = vshrl.u32 %v15649_v44, 16 }
 0x5de   : > { %v6053_v51 = vadd.f32 %v5983_v30, %v15314_v5  ;;  %v6532_v5 = vsel %vm963_vm3, %v6529_v4, %v6531_v3 }
 0x5df   : > { %v6776_v9 = vsel %vm1175_vm4, %v6771_v16, %v6775_v12  ;;  %v13050_v16 = vld [vmem:[%s17461_s5 + $0x30] sm:$0xff] }
 0x5e0   : > { %v6408_v33 = vpop.f32.mrf.mxu1  ;;  %v6869_v29 = vpop.f32.mrf.mxu3  ;;  %v6475_v38 = vadd.f32 %v6405_v42, %v6053_v51  ;;  %7764 = vmatpush.bf16.msra.mxu2 %v13050_v16 }
 0x5e1   : > { %v15644_v13 = vadd.f32 %v6869_v29, %v6685_v19  ;;  %v6308_v19 = vshll.u32 %v15649_v44, 16  ;;  %v6306_v29 = vor.u32 %v6304_v43, %v6302_v34  ;;  %v13066_v43 = vld [vmem:[%s17461_s5 + $0xb0] sm:$0xff] }
 0x5e2   : > { %7883 = vmatpush.bf16.msra.mxu3 %v13066_v43 }
 0x5e3   : > { %11600 = vmatmul.msk.bf16.gmra.mxu1 %vm691_vm1, %v6303_v58 }
 0x5e4   : > { %v6616_v56 = vpop.f32.mrf.mxu2 }
 0x5e5   : > { %v6686_v26 = vadd.f32 %v6616_v56, %v6475_v38  ;;  %v5986_v37 = vpop.f32.mrf.mxu0  ;;  %v6310_v38 = vrot.slane %v6308_v19, 1 }
 0x5e6   : > { %v6054_v31 = vadd.f32 %v5986_v37, %v15325_v28  ;;  %v6777_v37 = vrot.slane %v6312_v53, 1 }
 0x5e8   : > { %v15654_v42 = vpop.f32.mrf.mxu1  ;;  %v6871_v30 = vpop.f32.mrf.mxu3  ;;  %11523 = vmatmul.msk.bf16.gmra.mxu0 %vm691_vm1, %v13025_v45  ;;  %v6476_v58 = vadd.f32 %v6408_v33, %v6054_v31  ;;  %v6311_v45 = vsel %vm558_vm2, %v6306_v29, %v6310_v38  ;;  %v6533_v33 = vrot.slane %v15649_v44, 1  ;;  %v15684_v31 = vld [vmem:[%s13584_s17 + $0x98] sm:$0xff] }
 0x5e9   : > { %17656 = vst [vmem:[#allocation7_spill] sm:$0xff] %v15654_v42  ;;  %v15657_v51 = vadd.f32 %v6871_v30, %v6686_v26  ;;  %11617 = vmatmul.msk.bf16.gmra.mxu2 %vm691_vm1, %v6532_v5  ;;  %v6778_v5 = vrot.slane %v6308_v19, 2 }
 0x5ea   : > { %17657 = vst [vmem:[#allocation9_spill] sm:$0xff] %v15684_v31  ;;  %v6534_v29 = vsel %vm963_vm3, %v6531_v3, %v6533_v33  ;;  %v6110_v3 = vld [vmem:[%s13584_s17 + $0xa0] sm:$0x1] }
 0x5ec   : > { %v6619_v4 = vpop.f32.mrf.mxu2 }
 0x5ed   : > { %v15662_v40 = vadd.f32 %v6619_v4, %v6476_v58  ;;  %11634 = vmatmul.msk.bf16.gmra.mxu3 %vm691_vm1, %v6776_v9  ;;  %v5988_v28 = vpop.f32.mrf.mxu0  ;;  %v13026_v9 = vld [vmem:[%s13584_s17 + $0x88] sm:$0xff]  ;;  %v6779_v4 = vor.u32 %v6778_v5, %v6777_v37  ;;  %v6320_v5 = vshrl.u32 %v15684_v31, 16 }
 0x5ee   : > { %v15667_v56 = vadd.f32 %v5988_v28, %v15335_v7  ;;  %v13058_v7 = vld [vmem:[%s17461_s5 + $0x70] sm:$0xff] }
 0x5ef   : > { %7674 = vmatpush.bf16.msra.mxu1 %v13058_v7  ;;  %v6780_v19 = vsel %vm1175_vm4, %v6775_v12, %v6779_v4  ;;  %v6314_v7 = vor.u32 %v6312_v53, %v6310_v38  ;;  %v6535_v53 = vrot.slane %v15684_v31, 1 }
 0x5f0   : > { %v6413_v26 = vpop.f32.mrf.mxu1  ;;  %v15673_v34 = vpop.f32.mrf.mxu3 }
 0x5f3   : > { %11601 = vmatmul.msk.bf16.gmra.mxu1 %vm691_vm1, %v6311_v45  ;;  %v6316_v45 = vshll.u32 %v15684_v31, 16 }
 0x5f4   : > { %v15686_v30 = vpop.f32.mrf.mxu2 }
 0x5f5   : > { %17658 = vst [vmem:[#allocation11_spill] sm:$0xff] %v15686_v30  ;;  %v5991_v58 = vpop.f32.mrf.mxu0  ;;  %v6318_v30 = vrot.slane %v6316_v45, 1 }
 0x5f6   : > { %v6056_v28 = vadd.f32 %v5991_v58, %v15347_v49 }
 0x5f7   : > { %v6319_v12 = vsel %vm558_vm2, %v6314_v7, %v6318_v30 }
 0x5f8   : > { %v15691_v16 = vpop.f32.mrf.mxu1  ;;  %v15694_v44 = vpop.f32.mrf.mxu3  ;;  %11524 = vmatmul.msk.bf16.gmra.mxu0 %vm691_vm1, %v13026_v9  ;;  %v6478_v43 = vadd.f32 %v6413_v26, %v6056_v28  ;;  %v6178_v26 = vunpack.c.l.b16 %v6110_v3 }
 0x5f9   : > { %17659 = vst [vmem:[#allocation10_spill] sm:$0xff] %v15691_v16  ;;  %11618 = vmatmul.msk.bf16.gmra.mxu2 %vm691_vm1, %v6534_v29  ;;  %v6782_v29 = vrot.slane %v6316_v45, 2  ;;  %v13027_v16 = vld [vmem:[%s13584_s17 + $0x90] sm:$0xff] }
 0x5fa   : > { %v6195_v28 = vpack.c.b16 %v6178_v26, %v6178_v26 }
 0x5fc   : > { %v6624_v42 = vpop.f32.mrf.mxu2 }
 0x5fd   : > { %v15700_v37 = vadd.f32 %v6624_v42, %v6478_v43  ;;  %11635 = vmatmul.msk.bf16.gmra.mxu3 %vm691_vm1, %v6780_v19  ;;  %v5993_v49 = vpop.f32.mrf.mxu0  ;;  %v6781_v42 = vrot.slane %v6320_v5, 1  ;;  %v6711_v19 = vld [vmem:[%s13584_s17 + $0xa0] sm:$0x3] }
 0x5fe   : > { %v15705_v9 = vadd.f32 %v5993_v49, %v15355_v0  ;;  %v6536_v0 = vsel %vm963_vm3, %v6533_v33, %v6535_v53 }
 0x5ff   : > { %17660 = vst [vmem:[#allocation12_spill] sm:$0xff] %v15700_v37  ;;  %v6783_v49 = vor.u32 %v6782_v29, %v6781_v42 }
 0x600   : > { %17661 = vst [vmem:[#allocation13_spill] sm:$0xff] %v15705_v9  ;;  %v6418_v58 = vpop.f32.mrf.mxu1  ;;  %v15708_v38 = vpop.f32.mrf.mxu3  ;;  %v6715_v9 = vunpack.c.l.b16 %v6711_v19 }
 0x601   : > { %17662 = vst [vmem:[#allocation14_spill] sm:$0xff] %v15708_v38  ;;  %v6324_v38 = vshll.u32 %v6195_v28, 16  ;;  %v6784_v45 = vsel %vm1175_vm4, %v6779_v4, %v6783_v49 }
 0x603   : > { %11602 = vmatmul.msk.bf16.gmra.mxu1 %vm691_vm1, %v6319_v12  ;;  %v15725_v12 = vpack.c.b16 %v6715_v9, %v6715_v9  ;;  %v6326_v33 = vrot.slane %v6324_v38, 1  ;;  %v6537_v38 = vrot.slane %v6195_v28, 1 }
 0x604   : > { %v15713_v43 = vpop.f32.mrf.mxu2 }
 0x605   : > { %17663 = vst [vmem:[#allocation16_spill] sm:$0xff] %v15713_v43  ;;  %v5996_v37 = vpop.f32.mrf.mxu0  ;;  %v6322_v43 = vor.u32 %v6320_v5, %v6318_v30  ;;  %v6789_v19 = vshll.u32 %v15725_v12, 16  ;;  %v13049_v30 = vld [vmem:[%s17461_s5 + $0x28] sm:$0xff] }
 0x606   : > { %v6058_v7 = vadd.f32 %v5996_v37, %v15367_v32  ;;  %17664 = vst [vmem:[#allocation15_spill] sm:$0xff] %v15725_v12  ;;  %v6786_v37 = vshrl.u32 %v15725_v12, 16  ;;  %7765 = vmatpush.bf16.msra.mxu2 %v13049_v30  ;;  %v6966_v12 = vld [vmem:[%s13584_s17 + $0x20] sm:$0xc] }
 0x607   : > { %v6327_v9 = vsel %vm558_vm2, %v6322_v43, %v6326_v33  ;;  %v6538_v33 = vsel %vm963_vm3, %v6535_v53, %v6537_v38  ;;  %v17665_v53 = vunpack.c.h.b16 %v15371_v22 }
 0x608   : > { %v15718_v3 = vpop.f32.mrf.mxu1  ;;  %v15720_v31 = vpop.f32.mrf.mxu3  ;;  %11525 = vmatmul.msk.bf16.gmra.mxu0 %vm691_vm1, %v13027_v16  ;;  %v6480_v26 = vadd.f32 %v6418_v58, %v6058_v7  ;;  %v13065_v58 = vld [vmem:[%s17461_s5 + $0xa8] sm:$0xff]  ;;  %v6788_v43 = vrot.slane %v6786_v37, 1 }
 0x609   : > { %11619 = vmatmul.msk.bf16.gmra.mxu2 %vm691_vm1, %v6536_v0  ;;  %v6791_v0 = vrot.slane %v6789_v19, 2  ;;  %7884 = vmatpush.bf16.msra.mxu3 %v13065_v58  ;;  %v6970_v19 = vunpack.c.l.b16 %v6966_v12 }
 0x60b   : > { %v6971_v38 = vpack.c.b16 %v17665_v53, %v6970_v19 }
 0x60c   : > { %v6629_v42 = vpop.f32.mrf.mxu2 }
 0x60d   : > { %v15727_v29 = vadd.f32 %v6629_v42, %v6480_v26  ;;  %11636 = vmatmul.msk.bf16.gmra.mxu3 %vm691_vm1, %v6784_v45  ;;  %v5998_v32 = vpop.f32.mrf.mxu0  ;;  %v13028_v45 = vld [vmem:[%s13584_s17 + $0x98] sm:$0xff]  ;;  %v6792_v42 = vor.u32 %v6791_v0, %v6788_v43 }
 0x60e   : > { %v15733_v16 = vadd.f32 %v5998_v32, %v15384_v21  ;;  %v13057_v21 = vld [vmem:[%s17461_s5 + $0x68] sm:$0xff] }
 0x60f   : > { %7675 = vmatpush.bf16.msra.mxu1 %v13057_v21  ;;  %v6793_v37 = vsel %vm1175_vm4, %v6783_v49, %v6792_v42 }
 0x610   : > { %v6423_v4 = vpop.f32.mrf.mxu1  ;;  %v15739_v5 = vpop.f32.mrf.mxu3 }
 0x613   : > { %11603 = vmatmul.msk.bf16.gmra.mxu1 %vm691_vm1, %v6327_v9 }
 0x614   : > { %v15748_v7 = vpop.f32.mrf.mxu2 }
 0x615   : > { %v6001_v26 = vpop.f32.mrf.mxu0 }
 0x616   : > { %v6060_v32 = vadd.f32 %v6001_v26, %v15395_v61  ;;  %v6972_v26 = vrot.slane %v6971_v38, 2  ;;  %v13048_v38 = vld [vmem:[%s17461_s5 + $0x20] sm:$0xff] }
 0x617   : > { %7766 = vmatpush.bf16.msra.mxu2 %v13048_v38 }
 0x618   : > { %v15753_v30 = vpop.f32.mrf.mxu1  ;;  %v15756_v28 = vpop.f32.mrf.mxu3  ;;  %11526 = vmatmul.msk.bf16.gmra.mxu0 %vm691_vm1, %v13028_v45  ;;  %v6482_v9 = vadd.f32 %v6423_v4, %v6060_v32 }
 0x619   : > { %11620 = vmatmul.msk.bf16.gmra.mxu2 %vm691_vm1, %v6538_v33  ;;  %v13370_v33 = vld [vmem:[%s13584_s17 + $0x28] sm:$0xff] }
 0x61a   : > { %v6973_v49 = vrot.slane %v13370_v33, 2  ;;  %v13371_v33 = vld [vmem:[%s13584_s17 + $0x30] sm:$0xff] }
 0x61c   : > { %v6634_v58 = vpop.f32.mrf.mxu2  ;;  %v6974_v42 = vsel %vm1431_vm5, %v6972_v26, %v6973_v49  ;;  %v13064_v26 = vld [vmem:[%s17461_s5 + $0xa0] sm:$0xff] }
 0x61d   : > { %v15761_v21 = vadd.f32 %v6634_v58, %v6482_v9  ;;  %11637 = vmatmul.msk.bf16.gmra.mxu3 %vm691_vm1, %v6793_v37  ;;  %v6003_v61 = vpop.f32.mrf.mxu0 }
 0x61e   : > { %v15767_v43 = vadd.f32 %v6003_v61, %v15406_v24  ;;  %7885 = vmatpush.bf16.msra.mxu3 %v13064_v26 }
 0x620   : > { %v6428_v0 = vpop.f32.mrf.mxu1  ;;  %v15769_v45 = vpop.f32.mrf.mxu3 }
 0x624   : > { %v15772_v12 = vpop.f32.mrf.mxu2 }
 0x625   : > { %v6006_v4 = vpop.f32.mrf.mxu0 }
 0x626   : > { %v6062_v32 = vadd.f32 %v6006_v4, %v15415_v59  ;;  %v6975_v4 = vrot.slane %v13371_v33, 2 }
 0x628   : > { %v15776_v37 = vpop.f32.mrf.mxu1  ;;  %v15778_v22 = vpop.f32.mrf.mxu3  ;;  %11639 = vmatmul.msk.bf16.vlgmr.msra.gmra.mxu0 %vm691_vm1, %v6974_v42  ;;  %v6484_v24 = vadd.f32 %v6428_v0, %v6062_v32  ;;  %v13056_v0 = vld [vmem:[%s17461_s5 + $0x60] sm:$0xff]  ;;  %v6976_v32 = vsel %vm1431_vm5, %v6973_v49, %v6975_v4  ;;  %v13372_v49 = vld [vmem:[%s13584_s17 + $0x38] sm:$0xff] }
 0x629   : > { %17666 = vst [vmem:[#allocation17_spill] sm:$0xff] %v15776_v37  ;;  %7676 = vmatpush.bf16.msra.mxu1 %v13056_v0 }
 0x62c   : > { %v6639_v19 = vpop.f32.mrf.mxu2 }
 0x62d   : > { %v15781_v9 = vadd.f32 %v6639_v19, %v6484_v24  ;;  %v6008_v58 = vpop.f32.mrf.mxu0 }
 0x62e   : > { %v15784_v61 = vadd.f32 %v6008_v58, %v15426_v55 }
 0x62f   : > { %17667 = vst [vmem:[#allocation18_spill] sm:$0xff] %v15781_v9  ;;  %v6977_v9 = vrot.slane %v13372_v49, 2 }
 0x630   : > { %17668 = vst [vmem:[#allocation19_spill] sm:$0xff] %v15784_v61  ;;  %v6433_v53 = vpop.f32.mrf.mxu1  ;;  %v15789_v59 = vpop.f32.mrf.mxu3 }
 0x631   : > { %17669 = vst [vmem:[#allocation20_spill] sm:$0xff] %v15789_v59 }
 0x634   : > { %v15798_v55 = vpop.f32.mrf.mxu2 }
 0x635   : > { %17670 = vst [vmem:[#allocation21_spill] sm:$0xff] %v15798_v55  ;;  %v6011_v42 = vpop.f32.mrf.mxu0 }
 0x636   : > { %v6064_v24 = vadd.f32 %v6011_v42, %v15435_v14 }
 0x638   : > { %v15802_v19 = vpop.f32.mrf.mxu1  ;;  %v15804_v58 = vpop.f32.mrf.mxu3  ;;  %v6486_v38 = vadd.f32 %v6433_v53, %v6064_v24  ;;  %11640 = vmatmul.msk.bf16.gmra.mxu0 %vm691_vm1, %v6976_v32 }
 0x639   : > { %17671 = vst [vmem:[#allocation22_spill] sm:$0xff] %v15802_v19  ;;  %v6978_v19 = vsel %vm1431_vm5, %v6975_v4, %v6977_v9  ;;  %v13047_v4 = vld [vmem:[%s17461_s5 + $0x18] sm:$0xff] }
 0x63a   : > { %7767 = vmatpush.bf16.msra.mxu2 %v13047_v4 }
 0x63c   : > { %v6644_v37 = vpop.f32.mrf.mxu2 }
 0x63d   : > { %v6697_v61 = vadd.f32 %v6644_v37, %v6486_v38  ;;  %v6013_v33 = vpop.f32.mrf.mxu0 }
 0x63e   : > { %v15808_v26 = vadd.f32 %v6013_v33, %v15446_v23 }
 0x640   : > { %v6438_v0 = vpop.f32.mrf.mxu1  ;;  %v6899_v55 = vpop.f32.mrf.mxu3 }
 0x641   : > { %v15810_v59 = vadd.f32 %v6899_v55, %v6697_v61 }
 0x644   : > { %v15813_v14 = vpop.f32.mrf.mxu2 }
 0x645   : > { %v6016_v42 = vpop.f32.mrf.mxu0 }
 0x646   : > { %v6066_v53 = vadd.f32 %v6016_v42, %v15455_v20  ;;  %v13373_v42 = vld [vmem:[%s13584_s17 + $0x40] sm:$0xff]  ;;  %s13391_s17 = sshra.s32 %s10616_s22, 4  ;;  %s13392_s17 = int_to_ptr.hbm [resolvable:$true] %s13391_s17 }
 0x647   : > { %s13393_s0 = scalar_lea.hbm %s13392_s17, 1  ;;  %p13398_p0 = scmp.lt.s32.totalorder %s13392_s17, %s17469_s13 }
 0x648   : > { %v15817_v32 = vpop.f32.mrf.mxu1  ;;  %v15819_v37 = vpop.f32.mrf.mxu3  ;;  %v6488_v23 = vadd.f32 %v6438_v0, %v6066_v53  ;;  %11641 = vmatmul.msk.bf16.gmra.mxu0 %vm691_vm1, %v6978_v19  ;;  %v13063_v0 = vld [vmem:[%s17461_s5 + $0x98] sm:$0xff]  ;;  %p13394_p11 = scmp.ne.s32.totalorder %s13392_s17, %s13393_s0  ;;  %p13399_p1 = scmp.lt.s32.totalorder %s13397_s29, %s13393_s0 }
 0x649   : > { %17672 = vst [vmem:[#allocation23_spill] sm:$0xff] %v15817_v32  ;;  %v13055_v19 = vld [vmem:[%s17461_s5 + $0x58] sm:$0xff]  ;;  %7886 = vmatpush.bf16.msra.mxu3 %v13063_v0 }
 0x64a   : > { %7677 = vmatpush.bf16.msra.mxu1 %v13055_v19  ;;  %p13395_p12 = pnand %p13394_p11, %p13549_p5  ;;  %p13400_p2 = por %p13399_p1, %p13398_p0 }
 0x64c   : > { %v6649_v24 = vpop.f32.mrf.mxu2  ;;  %p13396_p13 = pneg %p13395_p12 }
 0x64d   : > { %v6699_v61 = vadd.f32 %v6649_v24, %v6488_v23  ;;  %v6018_v55 = vpop.f32.mrf.mxu0 }
 0x64e   : > { %v15823_v38 = vadd.f32 %v6018_v55, %v15466_v52  ;;  %v6979_v52 = vrot.slane %v13373_v42, 2  ;;  %p13401_p3 = pnand %p13400_p2, %p13396_p13 }
 0x650   : > { %17673 = vst [vmem:[#allocation24_spill] sm:$0xff] %v15823_v38  ;;  %v6443_v33 = vpop.f32.mrf.mxu1  ;;  %v6904_v20 = vpop.f32.mrf.mxu3  ;;  %v6980_v24 = vsel %vm1431_vm5, %v6977_v9, %v6979_v52  ;;  %v6981_v9 = vrot.slane %v15460_v25, 2 }
 0x651   : > { %v15828_v49 = vadd.f32 %v6904_v20, %v6699_v61 }
 0x653   : > { %17674 = vst [vmem:[#allocation25_spill] sm:$0xff] %v15828_v49 }
 0x654   : > { %v15837_v53 = vpop.f32.mrf.mxu2 }
 0x655   : > { %17675 = vst [vmem:[#allocation26_spill] sm:$0xff] %v15837_v53  ;;  %v6021_v23 = vpop.f32.mrf.mxu0 }
 0x656   : > { %v6068_v61 = vadd.f32 %v6021_v23, %v15475_v50 }
 0x658   : > { %v15841_v55 = vpop.f32.mrf.mxu1  ;;  %v15843_v4 = vpop.f32.mrf.mxu3  ;;  %v6490_v20 = vadd.f32 %v6443_v33, %v6068_v61  ;;  %11642 = vmatmul.msk.bf16.gmra.mxu0 %vm691_vm1, %v6980_v24 }
 0x659   : > { %17676 = vst [vmem:[#allocation27_spill] sm:$0xff] %v15841_v55  ;;  %v6982_v55 = vsel %vm1431_vm5, %v6979_v52, %v6981_v9  ;;  %v13046_v52 = vld [vmem:[%s17461_s5 + $0x10] sm:$0xff] }
 0x65a   : > { %7768 = vmatpush.bf16.msra.mxu2 %v13046_v52 }
 0x65c   : > { %v6654_v32 = vpop.f32.mrf.mxu2 }
 0x65d   : > { %v6701_v38 = vadd.f32 %v6654_v32, %v6490_v20  ;;  %v6023_v49 = vpop.f32.mrf.mxu0 }
 0x65e   : > { %v15847_v0 = vadd.f32 %v6023_v49, %v15486_v62 }
 0x660   : > { %v6448_v19 = vpop.f32.mrf.mxu1  ;;  %v6909_v42 = vpop.f32.mrf.mxu3 }
 0x661   : > { %v15849_v53 = vadd.f32 %v6909_v42, %v6701_v38 }
 0x664   : > { %v15852_v50 = vpop.f32.mrf.mxu2 }
 0x665   : > { %v6026_v23 = vpop.f32.mrf.mxu0 }
 0x666   : > { %v6070_v33 = vadd.f32 %v6026_v23, %v15495_v35 }
 0x668   : > { %v15856_v24 = vpop.f32.mrf.mxu1  ;;  %v15858_v32 = vpop.f32.mrf.mxu3  ;;  %v6492_v61 = vadd.f32 %v6448_v19, %v6070_v33  ;;  %11643 = vmatmul.msk.bf16.gmra.mxu0 %vm691_vm1, %v6982_v55  ;;  %v13062_v19 = vld [vmem:[%s17461_s5 + $0x90] sm:$0xff] }
 0x669   : > { %17677 = vst [vmem:[#allocation28_spill] sm:$0xff] %v15856_v24  ;;  %v13054_v55 = vld [vmem:[%s17461_s5 + $0x50] sm:$0xff]  ;;  %7887 = vmatpush.bf16.msra.mxu3 %v13062_v19 }
 0x66a   : > { %7678 = vmatpush.bf16.msra.mxu1 %v13054_v55 }
 0x66c   : > { %v6659_v62 = vpop.f32.mrf.mxu2 }
 0x66d   : > { %v6703_v49 = vadd.f32 %v6659_v62, %v6492_v61  ;;  %v6028_v38 = vpop.f32.mrf.mxu0 }
 0x66e   : > { %v15862_v20 = vadd.f32 %v6028_v38, %v15506_v18  ;;  %v6983_v18 = vrot.slane %v15480_v36, 2 }
 0x670   : > { %17678 = vst [vmem:[#allocation29_spill] sm:$0xff] %v15862_v20  ;;  %v6453_v25 = vpop.f32.mrf.mxu1  ;;  %v6914_v42 = vpop.f32.mrf.mxu3  ;;  %v6984_v61 = vsel %vm1431_vm5, %v6981_v9, %v6983_v18  ;;  %v6985_v9 = vrot.slane %v15500_v54, 2 }
 0x671   : > { %v15867_v35 = vadd.f32 %v6914_v42, %v6703_v49 }
 0x674   : > { %v15876_v23 = vpop.f32.mrf.mxu2 }
 0x675   : > { %17679 = vst [vmem:[#allocation30_spill] sm:$0xff] %v15876_v23  ;;  %v6031_v33 = vpop.f32.mrf.mxu0 }
 0x676   : > { %v6072_v62 = vadd.f32 %v6031_v33, %v15515_v2 }
 0x678   : > { %v15880_v49 = vpop.f32.mrf.mxu3  ;;  %v15882_v38 = vpop.f32.mrf.mxu1  ;;  %v6494_v52 = vadd.f32 %v6453_v25, %v6072_v62  ;;  %11644 = vmatmul.msk.bf16.gmra.mxu0 %vm691_vm1, %v6984_v61 }
 0x679   : > { %17680 = vst [vmem:[#allocation31_spill] sm:$0xff] %v15882_v38  ;;  %v6986_v38 = vsel %vm1431_vm5, %v6983_v18, %v6985_v9  ;;  %v6987_v18 = vrot.slane %v15520_v17, 2  ;;  %v13061_v17 = vld [vmem:[%s17461_s5 + $0x88] sm:$0xff] }
 0x67a   : > { %7888 = vmatpush.bf16.msra.mxu3 %v13061_v17  ;;  %v15940_v17 = vld [vmem:[%s17459_s3] ss:$0 sm:$0xff] }
 0x67c   : > { %v6664_v42 = vpop.f32.mrf.mxu2 }
 0x67d   : > { %v6705_v24 = vadd.f32 %v6664_v42, %v6494_v52  ;;  %v6033_v20 = vpop.f32.mrf.mxu0 }
 0x67e   : > { %v15886_v36 = vadd.f32 %v6033_v20, %v15526_v15 }
 0x680   : > { %v6919_v19 = vpop.f32.mrf.mxu3  ;;  %v6458_v23 = vpop.f32.mrf.mxu1 }
 0x681   : > { %v15888_v55 = vadd.f32 %v6919_v19, %v6705_v24 }
 0x684   : > { %v15891_v2 = vpop.f32.mrf.mxu2 }
 0x685   : > { %17681 = vst [vmem:[#allocation32_spill] sm:$0xff] %v15891_v2  ;;  %v6036_v33 = vpop.f32.mrf.mxu0 }
 0x686   : > { %v6074_v25 = vadd.f32 %v6036_v33, %v15535_v6 }
 0x688   : > { %v15895_v61 = vpop.f32.mrf.mxu3  ;;  %v6496_v62 = vadd.f32 %v6458_v23, %v6074_v25  ;;  %11645 = vmatmul.msk.bf16.gmra.mxu0 %vm691_vm1, %v6986_v38  ;;  %v15898_v20 = vpop.f32.mrf.mxu1  ;;  %v6988_v23 = vsel %vm1431_vm5, %v6985_v9, %v6987_v18  ;;  %v13053_v9 = vld [vmem:[%s17461_s5 + $0x48] sm:$0xff] }
 0x689   : > { %17682 = vst [vmem:[#allocation33_spill] sm:$0xff] %v15898_v20  ;;  %7679 = vmatpush.bf16.msra.mxu1 %v13053_v9 }
 0x68c   : > { %v6669_v15 = vpop.f32.mrf.mxu2 }
 0x68d   : > { %v6707_v24 = vadd.f32 %v6669_v15, %v6496_v62  ;;  %v6038_v52 = vpop.f32.mrf.mxu0  ;;  %v13045_v15 = vld [vmem:[%s17461_s5 + $0x8] sm:$0xff] }
 0x68e   : > { %v15901_v42 = vadd.f32 %v6038_v52, %v15546_v46  ;;  %7769 = vmatpush.bf16.msra.mxu2 %v13045_v15 }
 0x690   : > { %v6924_v54 = vpop.f32.mrf.mxu3  ;;  %v6463_v33 = vpop.f32.mrf.mxu1 }
 0x691   : > { %v15903_v19 = vadd.f32 %v6924_v54, %v6707_v24 }
 0x694   : > { %v15906_v2 = vpop.f32.mrf.mxu2 }
 0x695   : > { %17683 = vst [vmem:[#allocation34_spill] sm:$0xff] %v15906_v2  ;;  %v6041_v6 = vpop.f32.mrf.mxu0  ;;  %v6993_v2 = vrot.slane %v15580_v60, 2 }
 0x696   : > { %v6076_v38 = vadd.f32 %v6041_v6, %v15555_v63 }
 0x698   : > { %v15910_v25 = vpop.f32.mrf.mxu3  ;;  %v6498_v62 = vadd.f32 %v6463_v33, %v6076_v38  ;;  %11646 = vmatmul.msk.bf16.gmra.mxu0 %vm691_vm1, %v6988_v23  ;;  %v6989_v33 = vrot.slane %v15540_v48, 2  ;;  %v15931_v23 = vld [vmem:[%s17687_s2] ss:$0 sm:$0xff] }
 0x699   : > { %17684 = vst [vmem:[#allocation35_spill] sm:$0xff] %v15910_v25 }
 0x69c   : > { %v6674_v46 = vpop.f32.mrf.mxu2 }
 0x69d   : > { %v6709_v24 = vadd.f32 %v6674_v46, %v6498_v62  ;;  %v6043_v63 = vpop.f32.mrf.mxu0  ;;  %v6990_v62 = vsel %vm1431_vm5, %v6987_v18, %v6989_v33  ;;  %v15947_v18 = vld [vmem:[%s17460_s4] ss:$0 sm:$0xff] }
 0x69e   : > { %v15923_v52 = vadd.f32 %v6043_v63, %v15566_v1  ;;  %v6991_v63 = vrot.slane %v15560_v10, 2  ;;  %v13044_v10 = vld [vmem:[%s17461_s5] sm:$0xff] }
 0x69f   : > { %7770 = vmatpush.bf16.msra.mxu2 %v13044_v10 }
 0x6a0   : > { %17685 = vst [vmem:[#allocation36_spill] sm:$0xff] %v15923_v52  ;;  %v6929_v54 = vpop.f32.mrf.mxu3 }
 0x6a1   : > { %v15925_v6 = vadd.f32 %v6929_v54, %v6709_v24 }
 0x6a3   : > { %17686 = vst [vmem:[#allocation37_spill] sm:$0xff] %v15925_v6 }
 0x6a5   : > { %v7065_v38 = vpop.f32.mrf.mxu0 }
 0x6a6   : > { %v7145_v46 = vadd.f32 %v7065_v38, %v15575_v27 }
 0x6a8   : > { %v7181_v15 = vadd.f32 %v15931_v23, %v7145_v46  ;;  %11647 = vmatmul.msk.bf16.gmra.mxu0 %vm691_vm1, %v6990_v62 }
 0x6aa   : > { %v7213_v1 = vmax.f32 %v7181_v15, 0.0  ;;  %v6992_v15 = vsel %vm1431_vm5, %v6989_v33, %v6991_v63  ;;  %v13052_v33 = vld [vmem:[%s17461_s5 + $0x40] sm:$0xff] }
 0x6ab   : > { %7680 = vmatpush.bf16.msra.mxu1 %v13052_v33 }
 0x6ac   : > { %v7249_v24 = vmul.f32 %v15940_v17, %v7213_v1 }
 0x6ad   : > { %v7067_v48 = vpop.f32.mrf.mxu0 }
 0x6ae   : > { %v7146_v9 = vadd.f32 %v7067_v48, %v15586_v39  ;;  %v7285_v38 = vadd.f32 %v15947_v18, %v7249_v24 }
 0x6b0   : > { %v7182_v27 = vadd.f32 %v15931_v23, %v7146_v9  ;;  %v7350_v48 = vrot.slane %v7285_v38, 1  ;;  %v13060_v9 = vld [vmem:[%s17461_s5 + $0x80] sm:$0xff] }
 0x6b1   : > { %7889 = vmatpush.bf16.msra.mxu3 %v13060_v9  ;;  %v6994_v9 = vsel %vm1431_vm5, %v6991_v63, %v6993_v2 }
 0x6b2   : > { %v7214_v54 = vmax.f32 %v7182_v27, 0.0 }
 0x6b4   : > { %v7250_v62 = vmul.f32 %v15940_v17, %v7214_v54 }
 0x6b5   : > { %v7070_v46 = vpop.f32.mrf.mxu0 }
 0x6b6   : > { %v7286_v39 = vadd.f32 %v15947_v18, %v7250_v62  ;;  %v7147_v1 = vadd.f32 %v7070_v46, %v15595_v8 }
 0x6b8   : > { %v7351_v52 = vrot.slane %v7286_v39, 1  ;;  %v7183_v6 = vadd.f32 %v15931_v23, %v7147_v1  ;;  %11648 = vmatmul.msk.bf16.gmra.mxu0 %vm691_vm1, %v6992_v15 }
 0x6ba   : > { %v7352_v8 = vsel %vm963_vm3, %v7350_v48, %v7351_v52  ;;  %v7215_v24 = vmax.f32 %v7183_v6, 0.0 }
 0x6bb   : > { %v7445_v27 = vmax.f32 %v7285_v38, %v7352_v8 }
 0x6bc   : > { %v7251_v54 = vmul.f32 %v15940_v17, %v7215_v24 }
 0x6bd   : > { %v7072_v62 = vpop.f32.mrf.mxu0 }
 0x6be   : > { %v7287_v46 = vadd.f32 %v15947_v18, %v7251_v54  ;;  %v7148_v15 = vadd.f32 %v7072_v62, %v15606_v47 }
 0x6c0   : > { %v7353_v1 = vrot.slane %v7287_v46, 1  ;;  %v7184_v25 = vadd.f32 %v15931_v23, %v7148_v15 }
 0x6c2   : > { %v7354_v20 = vsel %vm963_vm3, %v7351_v52, %v7353_v1  ;;  %v7216_v48 = vmax.f32 %v7184_v25, 0.0 }
 0x6c3   : > { %v7446_v6 = vmax.f32 %v7286_v39, %v7354_v20 }
 0x6c4   : > { %v7252_v10 = vmul.f32 %v15940_v17, %v7216_v48  ;;  %v17688_v48 = vld [vmem:[#allocation6_spill] sm:$0xff] }
 0x6c5   : > { %v7075_v38 = vpop.f32.mrf.mxu0 }
 0x6c6   : > { %v7288_v33 = vadd.f32 %v15947_v18, %v7252_v10  ;;  %v7149_v8 = vadd.f32 %v7075_v38, %v15618_v41  ;;  %v6995_v10 = vrot.slane %v17688_v48, 2 }
 0x6c8   : > { %v7355_v24 = vrot.slane %v7288_v33, 1  ;;  %v7185_v47 = vadd.f32 %v15931_v23, %v7149_v8  ;;  %11649 = vmatmul.msk.bf16.gmra.mxu0 %vm691_vm1, %v6994_v9 }
 0x6ca   : > { %v7356_v60 = vsel %vm963_vm3, %v7353_v1, %v7355_v24  ;;  %v7217_v54 = vmax.f32 %v7185_v47, 0.0  ;;  %v6996_v47 = vsel %vm1431_vm5, %v6993_v2, %v6995_v10 }
 0x6cb   : > { %v7447_v52 = vmax.f32 %v7287_v46, %v7356_v60 }
 0x6cc   : > { %v7253_v20 = vmul.f32 %v15940_v17, %v7217_v54 }
 0x6cd   : > { %v7077_v25 = vpop.f32.mrf.mxu0  ;;  %v7477_v39 = vmax.f32 %v7445_v27, %v7447_v52 }
 0x6ce   : > { %v7289_v62 = vadd.f32 %v15947_v18, %v7253_v20  ;;  %v7150_v63 = vadd.f32 %v7077_v25, %v15635_v11 }
 0x6cf   : > { %v7507_v27 = vpack.c.bf16 %v7477_v39, %v7477_v39  ;;  %v13091_v39 = vld [vmem:[%s17461_s5 + $0x178] sm:$0xff] }
 0x6d0   : > { %v7357_v15 = vrot.slane %v7289_v62, 1  ;;  %v7186_v41 = vadd.f32 %v15931_v23, %v7150_v63  ;;  %8237 = vmatpush.bf16.msrb.mxu3 %v13091_v39 }
 0x6d2   : > { %v7358_v38 = vsel %vm963_vm3, %v7355_v24, %v7357_v15  ;;  %v7218_v9 = vmax.f32 %v7186_v41, 0.0  ;;  %v7584_v24 = vunpack.c.l.b16 %v7507_v27 }
 0x6d3   : > { %v7448_v8 = vmax.f32 %v7288_v33, %v7358_v38  ;;  %v13075_v38 = vld [vmem:[%s17461_s5 + $0xf8] sm:$0xff] }
 0x6d4   : > { %v7254_v1 = vmul.f32 %v15940_v17, %v7218_v9  ;;  %8006 = vmatpush.bf16.msrb.mxu1 %v13075_v38 }
 0x6d5   : > { %v7080_v46 = vpop.f32.mrf.mxu0  ;;  %v7478_v60 = vmax.f32 %v7446_v6, %v7448_v8 }
 0x6d6   : > { %v7290_v54 = vadd.f32 %v15947_v18, %v7254_v1  ;;  %v7151_v11 = vadd.f32 %v7080_v46, %v15644_v13  ;;  %v13083_v13 = vld [vmem:[%s17461_s5 + $0x138] sm:$0xff] }
 0x6d7   : > { %v7508_v20 = vpack.c.bf16 %v7478_v60, %v7478_v60  ;;  %8123 = vmatpush.bf16.msrb.mxu2 %v13083_v13 }
 0x6d8   : > { %v7359_v25 = vrot.slane %v7290_v54, 1  ;;  %v7187_v63 = vadd.f32 %v15931_v23, %v7151_v11  ;;  %11650 = vmatmul.msk.bf16.gmra.mxu0 %vm691_vm1, %v6996_v47  ;;  %v6997_v11 = vrot.slane %v15629_v57, 2 }
 0x6d9   : > { %v15993_v41 = vunpack.c.l.b16 %v7508_v20 }
 0x6da   : > { %v7219_v33 = vmax.f32 %v7187_v63, 0.0  ;;  %v7360_v48 = vsel %vm963_vm3, %v7357_v15, %v7359_v25  ;;  %v6998_v38 = vsel %vm1431_vm5, %v6995_v10, %v6997_v11  ;;  %v17690_v10 = vld [vmem:[#allocation11_spill] sm:$0xff] }
 0x6db   : > { %v15997_v2 = vpack.c.b16 %v15993_v41, %v7584_v24  ;;  %v7449_v6 = vmax.f32 %v7289_v62, %v7360_v48  ;;  %v6942_v48 = vadd.f32 %v15673_v34, %v15662_v40  ;;  %v13123_v40 = vld [vmem:[%s17461_s5 + $0x278] sm:$0xff] }
 0x6dc   : > { %v7255_v9 = vmul.f32 %v15940_v17, %v7219_v33  ;;  %8679 = vmatpush.bf16.msrb.mxu0 %v13123_v40 }
 0x6dd   : > { %v7082_v1 = vpop.f32.mrf.mxu0  ;;  %7771 = vmatmul.bf16.vlgmr.msra.gmra.mxu2 %v15997_v2  ;;  %v7479_v15 = vmax.f32 %v7447_v52, %v7449_v6 }
 0x6de   : > { %v7291_v62 = vadd.f32 %v15947_v18, %v7255_v9  ;;  %v7152_v46 = vadd.f32 %v7082_v1, %v15657_v51  ;;  %v13082_v51 = vld [vmem:[%s17461_s5 + $0x130] sm:$0xff] }
 0x6df   : > { %v7509_v47 = vpack.c.bf16 %v7479_v15, %v7479_v15  ;;  %8124 = vmatpush.bf16.msrb.mxu2 %v13082_v51  ;;  %v17689_v1 = vld [vmem:[#allocation7_spill] sm:$0xff] }
 0x6e0   : > { %v7361_v60 = vrot.slane %v7291_v62, 1  ;;  %v7188_v27 = vadd.f32 %v15931_v23, %v7152_v46  ;;  %v6477_v15 = vadd.f32 %v17689_v1, %v15667_v56 }
 0x6e1   : > { %v16014_v20 = vunpack.c.l.b16 %v7509_v47 }
 0x6e2   : > { %v7220_v63 = vmax.f32 %v7188_v27, 0.0  ;;  %v7362_v24 = vsel %vm963_vm3, %v7359_v25, %v7361_v60  ;;  %v6688_v27 = vadd.f32 %v17690_v10, %v6477_v15  ;;  %v13121_v10 = vld [vmem:[%s17461_s5 + $0x268] sm:$0xff] }
 0x6e3   : > { %v16017_v33 = vmax.f32 %v7290_v54, %v7362_v24 }
 0x6e4   : > { %v7256_v13 = vmul.f32 %v15940_v17, %v7220_v63  ;;  %v6943_v56 = vadd.f32 %v15694_v44, %v6688_v27 }
 0x6e5   : > { %v7085_v39 = vpop.f32.mrf.mxu0  ;;  %v7480_v54 = vmax.f32 %v7448_v8, %v16017_v33 }
 0x6e6   : > { %v7292_v25 = vadd.f32 %v15947_v18, %v7256_v13  ;;  %v7153_v9 = vadd.f32 %v7085_v39, %v6942_v48  ;;  %v13122_v13 = vld [vmem:[%s17461_s5 + $0x270] sm:$0xff] }
 0x6e7   : > { %v7510_v46 = vpack.c.bf16 %v7480_v54, %v7480_v54  ;;  %v7938_v54 = vrot.slane %v15997_v2, 3  ;;  %8680 = vmatpush.bf16.msrb.mxu0 %v13122_v13 }
 0x6e8   : > { %v7363_v34 = vrot.slane %v7292_v25, 1  ;;  %v7189_v47 = vadd.f32 %v15931_v23, %v7153_v9  ;;  %11651 = vmatmul.msk.bf16.gmra.mxu0 %vm691_vm1, %v6998_v38  ;;  %v7605_v38 = vrot.slane %v15997_v2, 1 }
 0x6e9   : > { %v16040_v8 = vunpack.c.l.b16 %v7510_v46 }
 0x6ea   : > { %v7364_v63 = vsel %vm963_vm3, %v7361_v60, %v7363_v34  ;;  %v7221_v24 = vmax.f32 %v7189_v47, 0.0  ;;  %v7814_v60 = vrot.slane %v15997_v2, 2 }
 0x6eb   : > { %v16044_v51 = vmax.f32 %v7291_v62, %v7364_v63  ;;  %v16048_v48 = vpack.c.b16 %v16040_v8, %v16014_v20  ;;  %8681 = vmatpush.bf16.msrb.mxu0 %v13121_v10 }
 0x6ec   : > { %v7257_v39 = vmul.f32 %v15940_v17, %v7221_v24 }
 0x6ed   : > { %v7087_v44 = vpop.f32.mrf.mxu0  ;;  %v7481_v62 = vmax.f32 %v7449_v6, %v16044_v51  ;;  %7776 = vmatmul.bf16.gmra.mxu2 %v16048_v48  ;;  %v7606_v9 = vrot.slane %v16048_v48, 1  ;;  %v7815_v1 = vrot.slane %v16048_v48, 2  ;;  %v17541_v15 = vrot.slane %v16048_v48, 3 }
 0x6ee   : > { %v7293_v46 = vadd.f32 %v15947_v18, %v7257_v39  ;;  %v7154_v40 = vadd.f32 %v7087_v44, %v6943_v56  ;;  %v17691_v56 = vld [vmem:[#allocation8_spill] sm:$0xff] }
 0x6ef   : > { %v7607_v47 = vsel %vm963_vm3, %v7605_v38, %v7606_v9  ;;  %v7816_v2 = vsel %vm1431_vm5, %v7814_v60, %v7815_v1  ;;  %v7511_v6 = vpack.c.bf16 %v7481_v62, %v7481_v62  ;;  %v16075_v27 = vsel %vm7937_vm6, %v7938_v54, %v17541_v15  ;;  %v13090_v38 = vld [vmem:[%s17461_s5 + $0x170] sm:$0xff] }
 0x6f0   : > { %v7365_v63 = vrot.slane %v7293_v46, 1  ;;  %v7190_v24 = vadd.f32 %v15931_v23, %v7154_v40  ;;  %7681 = vmatmul.bf16.vlgmr.msra.gmra.mxu1 %v7607_v47  ;;  %7890 = vmatmul.bf16.vlgmr.msra.gmra.mxu3 %v7816_v2  ;;  %v6999_v13 = vrot.slane %v17691_v56, 2  ;;  %v13074_v60 = vld [vmem:[%s17461_s5 + $0xf0] sm:$0xff]  ;;  %v13120_v40 = vld [vmem:[%s17461_s5 + $0x260] sm:$0xff] }
 0x6f1   : > { %v16079_v39 = vunpack.c.l.b16 %v7511_v6  ;;  %8238 = vmatpush.bf16.msrb.mxu3 %v13090_v38  ;;  %8007 = vmatpush.bf16.msrb.mxu1 %v13074_v60  ;;  %v17692_v2 = vld [vmem:[#allocation12_spill] sm:$0xff]  ;;  %v17693_v6 = vld [vmem:[#allocation14_spill] sm:$0xff] }
 0x6f2   : > { %v7366_v54 = vsel %vm963_vm3, %v7363_v34, %v7365_v63  ;;  %v7222_v44 = vmax.f32 %v7190_v24, 0.0  ;;  %v6944_v15 = vadd.f32 %v17693_v6, %v17692_v2  ;;  %8682 = vmatpush.bf16.msrb.mxu0 %v13120_v40  ;;  %v17695_v2 = vld [vmem:[#allocation10_spill] sm:$0xff] }
 0x6f3   : > { %v16088_v62 = vmax.f32 %v7292_v25, %v7366_v54  ;;  %v7000_v25 = vsel %vm1431_vm5, %v6997_v11, %v6999_v13  ;;  %v13119_v54 = vld [vmem:[%s17461_s5 + $0x258] sm:$0xff]  ;;  %v13081_v11 = vld [vmem:[%s17461_s5 + $0x128] sm:$0xff]  ;;  %v13080_v56 = vld [vmem:[%s17461_s5 + $0x120] sm:$0xff] }
 0x6f4   : > { %v7258_v52 = vmul.f32 %v15940_v17, %v7222_v44  ;;  %v17694_v44 = vld [vmem:[#allocation13_spill] sm:$0xff]  ;;  %8125 = vmatpush.bf16.msrb.mxu2 %v13081_v11 }
 0x6f5   : > { %v7482_v34 = vmax.f32 %v16017_v33, %v16088_v62  ;;  %v7090_v10 = vpop.f32.mrf.mxu0  ;;  %v6479_v6 = vadd.f32 %v17695_v2, %v17694_v44 }
 0x6f6   : > { %v7294_v24 = vadd.f32 %v15947_v18, %v7258_v52  ;;  %v7155_v38 = vadd.f32 %v7090_v10, %v6944_v15  ;;  %v13089_v52 = vld [vmem:[%s17461_s5 + $0x168] sm:$0xff]  ;;  %8683 = vmatpush.bf16.msrb.mxu0 %v13119_v54  ;;  %v17696_v15 = vld [vmem:[#allocation16_spill] sm:$0xff] }
 0x6f7   : > { %v7512_v60 = vpack.c.bf16 %v7482_v34, %v7482_v34  ;;  %v6690_v40 = vadd.f32 %v17696_v15, %v6479_v6  ;;  %8239 = vmatpush.bf16.msrb.mxu3 %v13089_v52 }
 0x6f8   : > { %v7367_v33 = vrot.slane %v7294_v24, 1  ;;  %v7191_v47 = vadd.f32 %v15931_v23, %v7155_v38  ;;  %11652 = vmatmul.msk.bf16.gmra.mxu0 %vm691_vm1, %v7000_v25  ;;  %v13118_v25 = vld [vmem:[%s17461_s5 + $0x250] sm:$0xff]  ;;  %8126 = vmatpush.bf16.msrb.mxu2 %v13080_v56 }
 0x6f9   : > { %v7589_v57 = vunpack.c.l.b16 %v7512_v60  ;;  %v6945_v60 = vadd.f32 %v15720_v31, %v6690_v40  ;;  %v13117_v40 = vld [vmem:[%s17461_s5 + $0x248] sm:$0xff] }
 0x6fa   : > { %v7368_v34 = vsel %vm963_vm3, %v7365_v63, %v7367_v33  ;;  %v7223_v10 = vmax.f32 %v7191_v47, 0.0  ;;  %8684 = vmatpush.bf16.msrb.mxu0 %v13118_v25 }
 0x6fb   : > { %v7453_v44 = vmax.f32 %v7293_v46, %v7368_v34  ;;  %v16122_v38 = vpack.c.b16 %v7589_v57, %v16079_v39 }
 0x6fc   : > { %v7259_v2 = vmul.f32 %v15940_v17, %v7223_v10  ;;  %v17697_v10 = vld [vmem:[#allocation9_spill] sm:$0xff] }
 0x6fd   : > { %v7092_v54 = vpop.f32.mrf.mxu0  ;;  %7779 = vmatmul.bf16.gmra.mxu2 %v16122_v38  ;;  %v7608_v63 = vrot.slane %v16122_v38, 1  ;;  %v7817_v46 = vrot.slane %v16122_v38, 2  ;;  %v7483_v47 = vmax.f32 %v16044_v51, %v7453_v44  ;;  %v7001_v25 = vrot.slane %v17697_v10, 2 }
 0x6fe   : > { %v7295_v6 = vadd.f32 %v15947_v18, %v7259_v2  ;;  %v7156_v11 = vadd.f32 %v7092_v54, %v6945_v60  ;;  %8685 = vmatpush.bf16.msrb.mxu0 %v13117_v40 }
 0x6ff   : > { %v7609_v52 = vsel %vm963_vm3, %v7606_v9, %v7608_v63  ;;  %v7818_v31 = vsel %vm1431_vm5, %v7815_v1, %v7817_v46  ;;  %v7513_v15 = vpack.c.bf16 %v7483_v47, %v7483_v47  ;;  %v13073_v9 = vld [vmem:[%s17461_s5 + $0xe8] sm:$0xff]  ;;  %v13116_v47 = vld [vmem:[%s17461_s5 + $0x240] sm:$0xff]  ;;  %v7002_v40 = vsel %vm1431_vm5, %v6999_v13, %v7001_v25 }
 0x700   : > { %v7369_v34 = vrot.slane %v7295_v6, 1  ;;  %v7192_v51 = vadd.f32 %v15931_v23, %v7156_v11  ;;  %7686 = vmatmul.bf16.gmra.mxu1 %v7609_v52  ;;  %7895 = vmatmul.bf16.gmra.mxu3 %v7818_v31  ;;  %v6946_v52 = vadd.f32 %v15739_v5, %v15727_v29  ;;  %v13088_v13 = vld [vmem:[%s17461_s5 + $0x160] sm:$0xff] }
 0x701   : > { %v7590_v60 = vunpack.c.l.b16 %v7513_v15  ;;  %8008 = vmatpush.bf16.msrb.mxu1 %v13073_v9  ;;  %8240 = vmatpush.bf16.msrb.mxu3 %v13088_v13 }
 0x702   : > { %v7370_v1 = vsel %vm963_vm3, %v7367_v33, %v7369_v34  ;;  %v7224_v2 = vmax.f32 %v7192_v51, 0.0  ;;  %8686 = vmatpush.bf16.msrb.mxu0 %v13116_v47 }
 0x703   : > { %v7454_v54 = vmax.f32 %v7294_v24, %v7370_v1  ;;  %v16152_v11 = vpack.c.b16 %v7590_v60, %v7589_v57  ;;  %v6481_v57 = vadd.f32 %v15718_v3, %v15733_v16 }
 0x704   : > { %v7260_v31 = vmul.f32 %v15940_v17, %v7224_v2 }
 0x705   : > { %v7095_v15 = vpop.f32.mrf.mxu0  ;;  %v7484_v33 = vmax.f32 %v16088_v62, %v7454_v54  ;;  %v13072_v62 = vld [vmem:[%s17461_s5 + $0xe0] sm:$0xff]  ;;  %v6692_v3 = vadd.f32 %v15748_v7, %v6481_v57 }
 0x706   : > { %v7296_v24 = vadd.f32 %v15947_v18, %v7260_v31  ;;  %v7157_v51 = vadd.f32 %v7095_v15, %v6946_v52  ;;  %8009 = vmatpush.bf16.msrb.mxu1 %v13072_v62 }
 0x707   : > { %v7514_v10 = vpack.c.bf16 %v7484_v33, %v7484_v33  ;;  %v6947_v52 = vadd.f32 %v15756_v28, %v6692_v3 }
 0x708   : > { %v7371_v9 = vrot.slane %v7296_v24, 1  ;;  %v7193_v29 = vadd.f32 %v15931_v23, %v7157_v51  ;;  %11653 = vmatmul.msk.bf16.gmra.mxu0 %vm691_vm1, %v7002_v40 }
 0x709   : > { %v7591_v5 = vunpack.c.l.b16 %v7514_v10 }
 0x70a   : > { %v7372_v16 = vsel %vm963_vm3, %v7369_v34, %v7371_v9  ;;  %v7225_v1 = vmax.f32 %v7193_v29, 0.0  ;;  %v17698_v29 = vld [vmem:[#allocation15_spill] sm:$0xff] }
 0x70b   : > { %v7455_v2 = vmax.f32 %v7295_v6, %v7372_v16  ;;  %v16177_v47 = vpack.c.b16 %v7591_v5, %v7590_v60  ;;  %v7003_v56 = vrot.slane %v17698_v29, 2 }
 0x70c   : > { %v7261_v31 = vmul.f32 %v15940_v17, %v7225_v1 }
 0x70d   : > { %v7485_v15 = vmax.f32 %v7453_v44, %v7455_v2  ;;  %v7097_v40 = vpop.f32.mrf.mxu0  ;;  %7784 = vmatmul.bf16.gmra.mxu2 %v16177_v47  ;;  %v7610_v33 = vrot.slane %v16177_v47, 1  ;;  %v7819_v7 = vrot.slane %v16177_v47, 2 }
 0x70e   : > { %v7297_v34 = vadd.f32 %v15947_v18, %v7261_v31  ;;  %v7158_v6 = vadd.f32 %v7097_v40, %v6947_v52  ;;  %v7004_v31 = vsel %vm1431_vm5, %v7001_v25, %v7003_v56  ;;  %v13078_v56 = vld [vmem:[%s17461_s5 + $0x110] sm:$0xff] }
 0x70f   : > { %v7515_v60 = vpack.c.bf16 %v7485_v15, %v7485_v15  ;;  %v16186_v51 = vsel %vm963_vm3, %v7608_v63, %v7610_v33  ;;  %v16189_v28 = vsel %vm1431_vm5, %v7817_v46, %v7819_v7  ;;  %v6948_v63 = vadd.f32 %v15769_v45, %v15761_v21  ;;  %v13071_v21 = vld [vmem:[%s17461_s5 + $0xd8] sm:$0xff] }
 0x710   : > { %v7373_v10 = vrot.slane %v7297_v34, 1  ;;  %v7194_v44 = vadd.f32 %v15931_v23, %v7158_v6  ;;  %7689 = vmatmul.bf16.gmra.mxu1 %v16186_v51  ;;  %7898 = vmatmul.bf16.gmra.mxu3 %v16189_v28  ;;  %v6483_v45 = vadd.f32 %v15753_v30, %v15767_v43 }
 0x711   : > { %v7592_v57 = vunpack.c.l.b16 %v7515_v60  ;;  %8010 = vmatpush.bf16.msrb.mxu1 %v13071_v21 }
 0x712   : > { %v7374_v13 = vsel %vm963_vm3, %v7371_v9, %v7373_v10  ;;  %v7226_v62 = vmax.f32 %v7194_v44, 0.0  ;;  %v13079_v9 = vld [vmem:[%s17461_s5 + $0x118] sm:$0xff]  ;;  %v6694_v60 = vadd.f32 %v15772_v12, %v6483_v45  ;;  %v17699_v45 = vld [vmem:[#allocation18_spill] sm:$0xff] }
 0x713   : > { %v7456_v3 = vmax.f32 %v7296_v24, %v7374_v13  ;;  %v16196_v16 = vpack.c.b16 %v7592_v57, %v7591_v5  ;;  %v13087_v24 = vld [vmem:[%s17461_s5 + $0x158] sm:$0xff]  ;;  %8127 = vmatpush.bf16.msrb.mxu2 %v13079_v9 }
 0x714   : > { %v7262_v46 = vmul.f32 %v15940_v17, %v7226_v62  ;;  %8241 = vmatpush.bf16.msrb.mxu3 %v13087_v24  ;;  %v6949_v43 = vadd.f32 %v15778_v22, %v6694_v60 }
 0x715   : > { %v7486_v1 = vmax.f32 %v7454_v54, %v7456_v3  ;;  %v7100_v52 = vpop.f32.mrf.mxu0 }
 0x716   : > { %v7298_v15 = vadd.f32 %v15947_v18, %v7262_v46  ;;  %v7159_v40 = vadd.f32 %v7100_v52, %v6948_v63 }
 0x717   : > { %v7516_v6 = vpack.c.bf16 %v7486_v1, %v7486_v1  ;;  %8128 = vmatpush.bf16.msrb.mxu2 %v13078_v56 }
 0x718   : > { %v7375_v25 = vrot.slane %v7298_v15, 1  ;;  %v7195_v54 = vadd.f32 %v15931_v23, %v7159_v40  ;;  %11654 = vmatmul.msk.bf16.gmra.mxu0 %vm691_vm1, %v7004_v31  ;;  %v13086_v40 = vld [vmem:[%s17461_s5 + $0x150] sm:$0xff] }
 0x719   : > { %v7593_v5 = vunpack.c.l.b16 %v7516_v6  ;;  %v13070_v6 = vld [vmem:[%s17461_s5 + $0xd0] sm:$0xff]  ;;  %8242 = vmatpush.bf16.msrb.mxu3 %v13086_v40 }
 0x71a   : > { %v7376_v44 = vsel %vm963_vm3, %v7373_v10, %v7375_v25  ;;  %v7227_v29 = vmax.f32 %v7195_v54, 0.0  ;;  %8011 = vmatpush.bf16.msrb.mxu1 %v13070_v6  ;;  %v17700_v54 = vld [vmem:[#allocation20_spill] sm:$0xff]  ;;  %v17703_v6 = vld [vmem:[#allocation21_spill] sm:$0xff] }
 0x71b   : > { %v7457_v13 = vmax.f32 %v7297_v34, %v7376_v44  ;;  %v16221_v30 = vpack.c.b16 %v7593_v5, %v7592_v57  ;;  %v6950_v60 = vadd.f32 %v17700_v54, %v17699_v45 }
 0x71c   : > { %v7263_v62 = vmul.f32 %v15940_v17, %v7227_v29  ;;  %v13077_v29 = vld [vmem:[%s17461_s5 + $0x108] sm:$0xff] }
 0x71d   : > { %v7487_v63 = vmax.f32 %v7455_v2, %v7457_v13  ;;  %v7102_v46 = vpop.f32.mrf.mxu0  ;;  %7787 = vmatmul.bf16.gmra.mxu2 %v16221_v30  ;;  %v7612_v12 = vrot.slane %v16221_v30, 1  ;;  %v7821_v10 = vrot.slane %v16221_v30, 2 }
 0x71e   : > { %v7299_v1 = vadd.f32 %v15947_v18, %v7263_v62  ;;  %v7160_v52 = vadd.f32 %v7102_v46, %v6949_v43  ;;  %8129 = vmatpush.bf16.msrb.mxu2 %v13077_v29  ;;  %v17701_v46 = vld [vmem:[#allocation19_spill] sm:$0xff] }
 0x71f   : > { %v7517_v31 = vpack.c.bf16 %v7487_v63, %v7487_v63  ;;  %v16230_v34 = vsel %vm963_vm3, %v7610_v33, %v7612_v12  ;;  %v16233_v22 = vsel %vm1431_vm5, %v7819_v7, %v7821_v10 }
 0x720   : > { %v7377_v57 = vrot.slane %v7299_v1, 1  ;;  %v7196_v2 = vadd.f32 %v15931_v23, %v7160_v52  ;;  %7694 = vmatmul.bf16.gmra.mxu1 %v16230_v34  ;;  %7903 = vmatmul.bf16.gmra.mxu3 %v16233_v22 }
 0x721   : > { %v7594_v33 = vunpack.c.l.b16 %v7517_v31 }
 0x722   : > { %v7378_v9 = vsel %vm963_vm3, %v7375_v25, %v7377_v57  ;;  %v7228_v7 = vmax.f32 %v7196_v2, 0.0  ;;  %v13085_v2 = vld [vmem:[%s17461_s5 + $0x148] sm:$0xff] }
 0x723   : > { %v7458_v24 = vmax.f32 %v7298_v15, %v7378_v9  ;;  %v16245_v21 = vpack.c.b16 %v7594_v33, %v7593_v5  ;;  %v17702_v15 = vld [vmem:[#allocation17_spill] sm:$0xff]  ;;  %8243 = vmatpush.bf16.msrb.mxu3 %v13085_v2 }
 0x724   : > { %v7264_v44 = vmul.f32 %v15940_v17, %v7228_v7  ;;  %v6485_v5 = vadd.f32 %v17702_v15, %v17701_v46 }
 0x725   : > { %v7488_v56 = vmax.f32 %v7456_v3, %v7458_v24  ;;  %v7105_v43 = vpop.f32.mrf.mxu0  ;;  %v13076_v3 = vld [vmem:[%s17461_s5 + $0x100] sm:$0xff] }
 0x726   : > { %v7300_v62 = vadd.f32 %v15947_v18, %v7264_v44  ;;  %v7161_v25 = vadd.f32 %v7105_v43, %v6950_v60  ;;  %v6696_v9 = vadd.f32 %v17703_v6, %v6485_v5  ;;  %8130 = vmatpush.bf16.msrb.mxu2 %v13076_v3 }
 0x727   : > { %v7518_v63 = vpack.c.bf16 %v7488_v56, %v7488_v56 }
 0x728   : > { %v7379_v52 = vrot.slane %v7300_v62, 1  ;;  %v7197_v31 = vadd.f32 %v15931_v23, %v7161_v25  ;;  %8687 = vmatmul.bf16.vlgmr.msrb.gmra.mxu0 %v16152_v11  ;;  %v6951_v44 = vadd.f32 %v15804_v58, %v6696_v9 }
 0x729   : > { %v7595_v40 = vunpack.c.l.b16 %v7518_v63 }
 0x72a   : > { %v7229_v7 = vmax.f32 %v7197_v31, 0.0  ;;  %v7380_v45 = vsel %vm963_vm3, %v7377_v57, %v7379_v52 }
 0x72b   : > { %v16266_v54 = vpack.c.b16 %v7595_v40, %v7594_v33  ;;  %v7459_v60 = vmax.f32 %v7299_v1, %v7380_v45 }
 0x72c   : > { %v7265_v29 = vmul.f32 %v15940_v17, %v7229_v7 }
 0x72d   : > { %v7107_v56 = vpop.f32.mrf.mxu0  ;;  %7790 = vmatmul.bf16.gmra.mxu2 %v16266_v54  ;;  %v7614_v43 = vrot.slane %v16266_v54, 1  ;;  %v7823_v25 = vrot.slane %v16266_v54, 2  ;;  %v7489_v63 = vmax.f32 %v7457_v13, %v7459_v60  ;;  %v13069_v13 = vld [vmem:[%s17461_s5 + $0xc8] sm:$0xff] }
 0x72e   : > { %v7301_v46 = vadd.f32 %v15947_v18, %v7265_v29  ;;  %v7162_v57 = vadd.f32 %v7107_v56, %v6951_v44  ;;  %8012 = vmatpush.bf16.msrb.mxu1 %v13069_v13  ;;  %v17704_v56 = vld [vmem:[#allocation22_spill] sm:$0xff] }
 0x72f   : > { %v16275_v15 = vsel %vm963_vm3, %v7612_v12, %v7614_v43  ;;  %v16278_v1 = vsel %vm1431_vm5, %v7821_v10, %v7823_v25  ;;  %v7519_v58 = vpack.c.bf16 %v7489_v63, %v7489_v63  ;;  %v6487_v63 = vadd.f32 %v17704_v56, %v15808_v26 }
 0x730   : > { %v7381_v33 = vrot.slane %v7301_v46, 1  ;;  %v7198_v5 = vadd.f32 %v15931_v23, %v7162_v57  ;;  %7697 = vmatmul.bf16.gmra.mxu1 %v16275_v15  ;;  %7906 = vmatmul.bf16.gmra.mxu3 %v16278_v1 }
 0x731   : > { %v7596_v31 = vunpack.c.l.b16 %v7519_v58 }
 0x732   : > { %v7382_v2 = vsel %vm963_vm3, %v7379_v52, %v7381_v33  ;;  %v7230_v12 = vmax.f32 %v7198_v5, 0.0 }
 0x733   : > { %v7460_v3 = vmax.f32 %v7300_v62, %v7382_v2  ;;  %v16287_v10 = vpack.c.b16 %v7596_v31, %v7595_v40  ;;  %v6698_v40 = vadd.f32 %v15813_v14, %v6487_v63  ;;  %v7707_v13 = vpack.c.b16 %v7596_v31, %v7596_v31 }
 0x734   : > { %v7266_v6 = vmul.f32 %v15940_v17, %v7230_v12 }
 0x735   : > { %v7490_v9 = vmax.f32 %v7458_v24, %v7460_v3  ;;  %v7110_v7 = vpop.f32.mrf.mxu0  ;;  %v13084_v24 = vld [vmem:[%s17461_s5 + $0x140] sm:$0xff]  ;;  %v6953_v12 = vadd.f32 %v15819_v37, %v6698_v40 }
 0x736   : > { %v7302_v45 = vadd.f32 %v15947_v18, %v7266_v6  ;;  %v7163_v44 = vadd.f32 %v7110_v7, %v15810_v59  ;;  %v13068_v59 = vld [vmem:[%s17461_s5 + $0xc0] sm:$0xff]  ;;  %8244 = vmatpush.bf16.msrb.mxu3 %v13084_v24 }
 0x737   : > { %v7520_v29 = vpack.c.bf16 %v7490_v9, %v7490_v9  ;;  %8013 = vmatpush.bf16.msrb.mxu1 %v13068_v59 }
 0x738   : > { %v7383_v57 = vrot.slane %v7302_v45, 1  ;;  %v7199_v52 = vadd.f32 %v15931_v23, %v7163_v44  ;;  %8692 = vmatmul.bf16.gmra.mxu0 %v16196_v16 }
 0x739   : > { %v16296_v62 = vunpack.c.l.b16 %v7520_v29 }
 0x73a   : > { %v7231_v58 = vmax.f32 %v7199_v52, 0.0  ;;  %v7384_v26 = vsel %vm963_vm3, %v7381_v33, %v7383_v57 }
 0x73b   : > { %v16307_v5 = vpack.c.b16 %v16296_v62, %v7596_v31  ;;  %v7461_v2 = vmax.f32 %v7301_v46, %v7384_v26 }
 0x73c   : > { %v7267_v14 = vmul.f32 %v15940_v17, %v7231_v58 }
 0x73d   : > { %v7112_v6 = vpop.f32.mrf.mxu0  ;;  %7793 = vmatmul.bf16.gmra.mxu2 %v7707_v13  ;;  %v16312_v9 = vrot.slane %v16307_v5, 1  ;;  %v16315_v7 = vrot.slane %v16307_v5, 2  ;;  %v7491_v33 = vmax.f32 %v7459_v60, %v7461_v2  ;;  %v17706_v13 = vld [vmem:[#allocation25_spill] sm:$0xff] }
 0x73e   : > { %v7303_v44 = vadd.f32 %v15947_v18, %v7267_v14  ;;  %v7164_v29 = vadd.f32 %v7112_v6, %v6953_v12  ;;  %v17707_v6 = vld [vmem:[#allocation24_spill] sm:$0xff] }
 0x73f   : > { %v16320_v46 = vsel %vm963_vm3, %v7614_v43, %v16312_v9  ;;  %v16324_v37 = vsel %vm1431_vm5, %v7823_v25, %v16315_v7  ;;  %v7521_v31 = vpack.c.bf16 %v7491_v33, %v7491_v33  ;;  %v17708_v33 = vld [vmem:[#allocation23_spill] sm:$0xff] }
 0x740   : > { %17705 = vst [vmem:[#allocation6_spill] sm:$0xff] %v16320_v46  ;;  %v7385_v56 = vrot.slane %v7303_v44, 1  ;;  %v7200_v63 = vadd.f32 %v15931_v23, %v7164_v29  ;;  %7700 = vmatmul.bf16.gmra.mxu1 %v16320_v46  ;;  %7909 = vmatmul.bf16.gmra.mxu3 %v16324_v37  ;;  %v6489_v29 = vadd.f32 %v17708_v33, %v17707_v6  ;;  %v17709_v46 = vld [vmem:[#allocation26_spill] sm:$0xff] }
 0x741   : > { %v8181_v60 = vunpack.c.l.b16 %v7521_v31 }
 0x742   : > { %v7232_v52 = vmax.f32 %v7200_v63, 0.0  ;;  %v7386_v40 = vsel %vm963_vm3, %v7383_v57, %v7385_v56 }
 0x743   : > { %v16331_v58 = vpack.c.b16 %v8181_v60, %v16296_v62  ;;  %v7462_v43 = vmax.f32 %v7302_v45, %v7386_v40  ;;  %v6700_v45 = vadd.f32 %v17709_v46, %v6489_v29 }
 0x744   : > { %v7268_v24 = vmul.f32 %v15940_v17, %v7232_v52 }
 0x745   : > { %v7115_v25 = vpop.f32.mrf.mxu0  ;;  %v7492_v59 = vmax.f32 %v7460_v3, %v7462_v43  ;;  %v13107_v3 = vld [vmem:[%s17461_s5 + $0x1f8] sm:$0xff]  ;;  %v6955_v46 = vadd.f32 %v15843_v4, %v6700_v45 }
 0x746   : > { %v7304_v26 = vadd.f32 %v15947_v18, %v7268_v24  ;;  %v7165_v12 = vadd.f32 %v7115_v25, %v17706_v13  ;;  %v13115_v24 = vld [vmem:[%s17461_s5 + $0x238] sm:$0xff]  ;;  %8460 = vmatpush.bf16.msra.mxu2 %v13107_v3 }
 0x747   : > { %v7522_v14 = vpack.c.bf16 %v7492_v59, %v7492_v59  ;;  %v13099_v25 = vld [vmem:[%s17461_s5 + $0x1b8] sm:$0xff]  ;;  %8570 = vmatpush.bf16.msra.mxu3 %v13115_v24 }
 0x748   : > { %v7387_v31 = vrot.slane %v7304_v26, 1  ;;  %v7201_v63 = vadd.f32 %v15931_v23, %v7165_v12  ;;  %8695 = vmatmul.bf16.gmra.mxu0 %v16245_v21  ;;  %8350 = vmatpush.bf16.msra.mxu1 %v13099_v25 }
 0x749   : > { %v8182_v57 = vunpack.c.l.b16 %v7522_v14  ;;  %v17710_v14 = vpack.c.b16 %v16014_v20, %v15993_v41 }
 0x74a   : > { %v7233_v40 = vmax.f32 %v7201_v63, 0.0  ;;  %v7388_v52 = vsel %vm963_vm3, %v7385_v56, %v7387_v31 }
 0x74b   : > { %v7463_v59 = vmax.f32 %v7303_v44, %v7388_v52  ;;  %v16351_v13 = vpack.c.b16 %v8182_v57, %v8181_v60 }
 0x74c   : > { %v7269_v12 = vmul.f32 %v15940_v17, %v7233_v40 }
 0x74d   : > { %v7117_v56 = vpop.f32.mrf.mxu0  ;;  %8131 = vmatmul.bf16.vlgmr.msrb.gmra.mxu2 %v17710_v14  ;;  %v7493_v6 = vmax.f32 %v7461_v2, %v7463_v59  ;;  %v16376_v14 = vpop.f32.mrf.mxu2 }
 0x74e   : > { %v7305_v33 = vadd.f32 %v15947_v18, %v7269_v12  ;;  %v7166_v29 = vadd.f32 %v7117_v56, %v6955_v46  ;;  %v13155_v46 = vld [vmem:[%s17461_s5 + $0x378] sm:$0xff]  ;;  %v17711_v56 = vld [vmem:[#allocation27_spill] sm:$0xff] }
 0x74f   : > { %v7523_v63 = vpack.c.bf16 %v7493_v6, %v7493_v6  ;;  %9126 = vmatpush.bf16.msra.mxu0 %v13155_v46  ;;  %v13153_v46 = vld [vmem:[%s17461_s5 + $0x368] sm:$0xff] }
 0x750   : > { %v7389_v44 = vrot.slane %v7305_v33, 1  ;;  %v7202_v60 = vadd.f32 %v15931_v23, %v7166_v29  ;;  %7703 = vmatmul.bf16.gmra.mxu1 %v16312_v9  ;;  %7912 = vmatmul.bf16.gmra.mxu3 %v16315_v7 }
 0x751   : > { %v16362_v4 = vunpack.c.l.b16 %v7523_v63 }
 0x752   : > { %v7234_v45 = vmax.f32 %v7202_v60, 0.0  ;;  %v7390_v41 = vsel %vm963_vm3, %v7387_v31, %v7389_v44  ;;  %v6491_v31 = vadd.f32 %v17711_v56, %v15847_v0  ;;  %v13154_v60 = vld [vmem:[%s17461_s5 + $0x370] sm:$0xff] }
 0x753   : > { %v16366_v20 = vpack.c.b16 %v16362_v4, %v8182_v57  ;;  %v7464_v2 = vmax.f32 %v7304_v26, %v7390_v41  ;;  %9127 = vmatpush.bf16.msra.mxu0 %v13154_v60 }
 0x754   : > { %v7270_v40 = vmul.f32 %v15940_v17, %v7234_v45  ;;  %v6702_v6 = vadd.f32 %v15852_v50, %v6491_v31  ;;  %v17712_v50 = vpack.c.b16 %v16079_v39, %v16040_v8  ;;  %v13114_v8 = vld [vmem:[%s17461_s5 + $0x230] sm:$0xff] }
 0x755   : > { %v7120_v52 = vpop.f32.mrf.mxu0  ;;  %v7494_v3 = vmax.f32 %v7462_v43, %v7464_v2  ;;  %v13106_v43 = vld [vmem:[%s17461_s5 + $0x1f0] sm:$0xff]  ;;  %8571 = vmatpush.bf16.msra.mxu3 %v13114_v8 }
 0x756   : > { %v7306_v24 = vadd.f32 %v15947_v18, %v7270_v40  ;;  %v7167_v25 = vadd.f32 %v7120_v52, %v15849_v53  ;;  %8461 = vmatpush.bf16.msra.mxu2 %v13106_v43  ;;  %v6957_v41 = vadd.f32 %v15858_v32, %v6702_v6  ;;  %v13098_v39 = vld [vmem:[%s17461_s5 + $0x1b0] sm:$0xff] }
 0x757   : > { %v7524_v12 = vpack.c.bf16 %v7494_v3, %v7494_v3  ;;  %9128 = vmatpush.bf16.msra.mxu0 %v13153_v46  ;;  %8351 = vmatpush.bf16.msra.mxu1 %v13098_v39 }
 0x758   : > { %v7391_v57 = vrot.slane %v7306_v24, 1  ;;  %v7203_v26 = vadd.f32 %v15931_v23, %v7167_v25  ;;  %8700 = vmatmul.bf16.gmra.mxu0 %v16287_v10 }
 0x759   : > { %v16383_v53 = vunpack.c.l.b16 %v7524_v12 }
 0x75a   : > { %v7392_v29 = vsel %vm963_vm3, %v7389_v44, %v7391_v57  ;;  %v7235_v63 = vmax.f32 %v7203_v26, 0.0 }
 0x75b   : > { %v16387_v0 = vmax.f32 %v7305_v33, %v7392_v29  ;;  %v16394_v45 = vpack.c.b16 %v16383_v53, %v16362_v4 }
 0x75c   : > { %v7271_v40 = vmul.f32 %v15940_v17, %v7235_v63  ;;  %v16425_v63 = vpop.f32.mrf.mxu1 }
 0x75d   : > { %v7122_v52 = vpop.f32.mrf.mxu0  ;;  %8136 = vmatmul.bf16.gmra.mxu2 %v17712_v50  ;;  %v7495_v33 = vmax.f32 %v7463_v59, %v16387_v0  ;;  %v17713_v50 = vld [vmem:[#allocation29_spill] sm:$0xff] }
 0x75e   : > { %v7307_v44 = vadd.f32 %v15947_v18, %v7271_v40  ;;  %v7168_v3 = vadd.f32 %v7122_v52, %v6957_v41  ;;  %v13151_v52 = vld [vmem:[%s17461_s5 + $0x358] sm:$0xff] }
 0x75f   : > { %v7525_v25 = vpack.c.bf16 %v7495_v33, %v7495_v33  ;;  %v17714_v33 = vld [vmem:[#allocation28_spill] sm:$0xff] }
 0x760   : > { %v7393_v12 = vrot.slane %v7307_v44, 1  ;;  %v7204_v32 = vadd.f32 %v15931_v23, %v7168_v3  ;;  %v7772_v56 = vpop.f32.mrf.mxu2  ;;  %8014 = vmatmul.bf16.vlgmr.msrb.gmra.mxu1 %v16075_v27  ;;  %8245 = vmatmul.bf16.vlgmr.msrb.gmra.mxu3 %v16122_v38  ;;  %v13152_v27 = vld [vmem:[%s17461_s5 + $0x360] sm:$0xff]  ;;  %v6493_v3 = vadd.f32 %v17714_v33, %v17713_v50 }
 0x761   : > { %v8737_v59 = vunpack.c.l.b16 %v7525_v25  ;;  %9129 = vmatpush.bf16.msra.mxu0 %v13152_v27  ;;  %v7941_v27 = vrot.slane %v16122_v38, 3  ;;  %v13111_v38 = vld [vmem:[%s17461_s5 + $0x218] sm:$0xff] }
 0x762   : > { %v7394_v31 = vsel %vm963_vm3, %v7391_v57, %v7393_v12  ;;  %v7236_v26 = vmax.f32 %v7204_v32, 0.0  ;;  %v17715_v32 = vld [vmem:[#allocation30_spill] sm:$0xff] }
 0x763   : > { %v16416_v43 = vmax.f32 %v7306_v24, %v7394_v31  ;;  %v16422_v6 = vpack.c.b16 %v8737_v59, %v16383_v53  ;;  %v6704_v8 = vadd.f32 %v17715_v32, %v6493_v3  ;;  %v17716_v3 = vrot.slane %v16048_v48, 3 }
 0x764   : > { %v7272_v29 = vmul.f32 %v15940_v17, %v7236_v26  ;;  %v16445_v26 = vpop.f32.mrf.mxu3 }
 0x765   : > { %v7125_v60 = vpop.f32.mrf.mxu0  ;;  %v7496_v57 = vmax.f32 %v7464_v2, %v16416_v43  ;;  %9130 = vmatpush.bf16.msra.mxu0 %v13151_v52  ;;  %v16468_v52 = vld [vmem:[%s17460_s4] ss:$0 sm:$0xff] }
 0x766   : > { %v7308_v24 = vadd.f32 %v15947_v18, %v7272_v29  ;;  %v7169_v41 = vadd.f32 %v7125_v60, %v15867_v35  ;;  %v13105_v18 = vld [vmem:[%s17461_s5 + $0x1e8] sm:$0xff]  ;;  %v13150_v60 = vld [vmem:[%s17461_s5 + $0x350] sm:$0xff] }
 0x767   : > { %v7526_v40 = vpack.c.bf16 %v7496_v57, %v7496_v57  ;;  %v13113_v35 = vld [vmem:[%s17461_s5 + $0x228] sm:$0xff]  ;;  %8462 = vmatpush.bf16.msra.mxu2 %v13105_v18  ;;  %v6959_v57 = vadd.f32 %v15880_v49, %v6704_v8 }
 0x768   : > { %v7395_v25 = vrot.slane %v7308_v24, 1  ;;  %v7205_v17 = vadd.f32 %v15931_v23, %v7169_v41  ;;  %v7774_v46 = vpop.f32.mrf.mxu2  ;;  %8703 = vmatmul.bf16.gmra.mxu0 %v16331_v58  ;;  %8572 = vmatpush.bf16.msra.mxu3 %v13113_v35  ;;  %v13149_v18 = vld [vmem:[%s17461_s5 + $0x348] sm:$0xff] }
 0x769   : > { %v8738_v2 = vunpack.c.l.b16 %v7526_v40  ;;  %9131 = vmatpush.bf16.msra.mxu0 %v13150_v60 }
 0x76a   : > { %v7396_v39 = vsel %vm963_vm3, %v7393_v12, %v7395_v25  ;;  %v7237_v31 = vmax.f32 %v7205_v17, 0.0  ;;  %v16459_v12 = vld [vmem:[%s17459_s3] ss:$0 sm:$0xff]  ;;  %v7942_v17 = vsel %vm7937_vm6, %v17716_v3, %v7941_v27 }
 0x76b   : > { %v16447_v23 = vmax.f32 %v7307_v44, %v7396_v39  ;;  %v16450_v29 = vpack.c.b16 %v8738_v2, %v8737_v59 }
 0x76c   : > { %v7273_v44 = vmul.f32 %v16459_v12, %v7237_v31 }
 0x76d   : > { %v7127_v41 = vpop.f32.mrf.mxu0  ;;  %v7682_v40 = vpop.f32.mrf.mxu1  ;;  %8139 = vmatmul.bf16.gmra.mxu2 %v16152_v11  ;;  %v7497_v59 = vmax.f32 %v16387_v0, %v16447_v23  ;;  %v13097_v0 = vld [vmem:[%s17461_s5 + $0x1a8] sm:$0xff]  ;;  %9132 = vmatpush.bf16.msra.mxu0 %v13149_v18 }
 0x76e   : > { %v7309_v49 = vadd.f32 %v16468_v52, %v7273_v44  ;;  %v7170_v50 = vadd.f32 %v7127_v41, %v6959_v57  ;;  %v7773_v33 = vadd.f32 %v7772_v56, %v7682_v40  ;;  %v16485_v56 = vld [vmem:[%s17687_s2] ss:$0 sm:$0xff]  ;;  %8352 = vmatpush.bf16.msra.mxu1 %v13097_v0  ;;  %v17717_v18 = vld [vmem:[#allocation31_spill] sm:$0xff] }
 0x76f   : > { %v7527_v11 = vpack.c.bf16 %v7497_v59, %v7497_v59  ;;  %v13148_v44 = vld [vmem:[%s17461_s5 + $0x340] sm:$0xff] }
 0x770   : > { %v7397_v35 = vrot.slane %v7309_v49, 1  ;;  %v7206_v32 = vadd.f32 %v16485_v56, %v7170_v50  ;;  %v7777_v48 = vpop.f32.mrf.mxu2  ;;  %8019 = vmatmul.bf16.gmra.mxu1 %v7942_v17  ;;  %8250 = vmatmul.bf16.gmra.mxu3 %v16177_v47 }
 0x771   : > { %v16489_v8 = vunpack.c.l.b16 %v7527_v11  ;;  %9133 = vmatpush.bf16.msra.mxu0 %v13148_v44 }
 0x772   : > { %v7398_v39 = vsel %vm963_vm3, %v7395_v25, %v7397_v35  ;;  %v7238_v31 = vmax.f32 %v7206_v32, 0.0  ;;  %v6495_v32 = vadd.f32 %v17717_v18, %v15886_v36  ;;  %v13096_v36 = vld [vmem:[%s17461_s5 + $0x1a0] sm:$0xff] }
 0x773   : > { %v7468_v60 = vmax.f32 %v7308_v24, %v7398_v39  ;;  %v7891_v57 = vpop.f32.mrf.mxu3  ;;  %v16496_v41 = vpack.c.b16 %v16489_v8, %v8738_v2  ;;  %8353 = vmatpush.bf16.msra.mxu1 %v13096_v36 }
 0x774   : > { %v7274_v40 = vmul.f32 %v16459_v12, %v7238_v31  ;;  %v16499_v59 = vadd.f32 %v7891_v57, %v7773_v33 }
 0x775   : > { %v7498_v50 = vmax.f32 %v16416_v43, %v7468_v60  ;;  %v7130_v3 = vpop.f32.mrf.mxu0  ;;  %v7684_v17 = vpop.f32.mrf.mxu1  ;;  %v13104_v43 = vld [vmem:[%s17461_s5 + $0x1e0] sm:$0xff] }
 0x776   : > { %v7310_v25 = vadd.f32 %v16468_v52, %v7274_v40  ;;  %v7171_v24 = vadd.f32 %v7130_v3, %v15888_v55  ;;  %v7775_v11 = vadd.f32 %v7774_v46, %v7684_v17  ;;  %v13112_v55 = vld [vmem:[%s17461_s5 + $0x220] sm:$0xff]  ;;  %v17718_v46 = vld [vmem:[#allocation32_spill] sm:$0xff]  ;;  %v7943_v3 = vrot.slane %v16177_v47, 3  ;;  %8463 = vmatpush.bf16.msra.mxu2 %v13104_v43 }
 0x777   : > { %v7528_v0 = vpack.c.bf16 %v7498_v50, %v7498_v50  ;;  %v6706_v31 = vadd.f32 %v17718_v46, %v6495_v32  ;;  %8573 = vmatpush.bf16.msra.mxu3 %v13112_v55 }
 0x778   : > { %v7399_v2 = vrot.slane %v7310_v25, 1  ;;  %v7207_v48 = vadd.f32 %v16485_v56, %v7171_v24  ;;  %v7778_v39 = vpop.f32.mrf.mxu2  ;;  %8706 = vmatmul.bf16.gmra.mxu0 %v16366_v20 }
 0x779   : > { %v16508_v33 = vunpack.c.l.b16 %v7528_v0  ;;  %v6961_v24 = vadd.f32 %v15895_v61, %v6706_v31  ;;  %v16538_v61 = vsel %vm7937_vm6, %v7941_v27, %v7943_v3  ;;  %v13103_v31 = vld [vmem:[%s17461_s5 + $0x1d8] sm:$0xff] }
 0x77a   : > { %v7400_v57 = vsel %vm963_vm3, %v7397_v35, %v7399_v2  ;;  %v7239_v44 = vmax.f32 %v7207_v48, 0.0  ;;  %v13095_v27 = vld [vmem:[%s17461_s5 + $0x198] sm:$0xff]  ;;  %8464 = vmatpush.bf16.msra.mxu2 %v13103_v31 }
 0x77b   : > { %v7469_v40 = vmax.f32 %v7309_v49, %v7400_v57  ;;  %v7893_v50 = vpop.f32.mrf.mxu3  ;;  %v16524_v17 = vpack.c.b16 %v16508_v33, %v16489_v8  ;;  %8574 = vmatpush.bf16.msra.mxu3 %v13111_v38  ;;  %8354 = vmatpush.bf16.msra.mxu1 %v13095_v27  ;;  %v17720_v38 = vld [vmem:[#allocation34_spill] sm:$0xff] }
 0x77c   : > { %v7275_v0 = vmul.f32 %v16459_v12, %v7239_v44  ;;  %v16528_v18 = vadd.f32 %v7893_v50, %v7775_v11 }
 0x77d   : > { %v7499_v35 = vmax.f32 %v16447_v23, %v7469_v40  ;;  %v7132_v32 = vpop.f32.mrf.mxu0  ;;  %v7687_v49 = vpop.f32.mrf.mxu1  ;;  %8144 = vmatmul.bf16.gmra.mxu2 %v16196_v16 }
 0x77e   : > { %v7311_v48 = vadd.f32 %v16468_v52, %v7275_v0  ;;  %v7172_v39 = vadd.f32 %v7132_v32, %v6961_v24 }
 0x77f   : > { %v7529_v43 = vpack.c.bf16 %v7499_v35, %v7499_v35 }
 0x780   : > { %v7401_v11 = vrot.slane %v7311_v48, 1  ;;  %v7208_v55 = vadd.f32 %v16485_v56, %v7172_v39  ;;  %v7780_v36 = vpop.f32.mrf.mxu2  ;;  %8022 = vmatmul.bf16.gmra.mxu1 %v16538_v61  ;;  %8253 = vmatmul.bf16.gmra.mxu3 %v16221_v30  ;;  %v8627_v39 = vpack.c.b16 %v16383_v53, %v16383_v53  ;;  %v7945_v53 = vrot.slane %v16221_v30, 3 }
 0x781   : > { %v9293_v16 = vunpack.c.l.b16 %v7529_v43  ;;  %v17719_v43 = vld [vmem:[#allocation33_spill] sm:$0xff] }
 0x782   : > { %v7402_v23 = vsel %vm963_vm3, %v7399_v2, %v7401_v11  ;;  %v7240_v46 = vmax.f32 %v7208_v55, 0.0  ;;  %v6497_v55 = vadd.f32 %v17719_v43, %v15901_v42 }
 0x783   : > { %v7470_v57 = vmax.f32 %v7310_v25, %v7402_v23  ;;  %v7896_v44 = vpop.f32.mrf.mxu3  ;;  %v16554_v50 = vpack.c.b16 %v9293_v16, %v16508_v33 }
 0x784   : > { %v7276_v2 = vmul.f32 %v16459_v12, %v7240_v46  ;;  %v6708_v44 = vadd.f32 %v17720_v38, %v6497_v55 }
 0x785   : > { %v7500_v24 = vmax.f32 %v7468_v60, %v7470_v57  ;;  %v7135_v0 = vpop.f32.mrf.mxu0  ;;  %v7688_v35 = vpop.f32.mrf.mxu1 }
 0x786   : > { %v7312_v32 = vadd.f32 %v16468_v52, %v7276_v2  ;;  %v7173_v49 = vadd.f32 %v7135_v0, %v15903_v19  ;;  %v17721_v0 = vld [vmem:[#allocation35_spill] sm:$0xff] }
 0x787   : > { %v7530_v25 = vpack.c.bf16 %v7500_v24, %v7500_v24  ;;  %v6963_v42 = vadd.f32 %v17721_v0, %v6708_v44  ;;  %v16588_v44 = vsel %vm7937_vm6, %v7943_v3, %v7945_v53 }
 0x788   : > { %v7403_v23 = vrot.slane %v7312_v32, 1  ;;  %v7209_v46 = vadd.f32 %v16485_v56, %v7173_v49  ;;  %v7782_v31 = vpop.f32.mrf.mxu2  ;;  %8709 = vmatmul.bf16.gmra.mxu0 %v8627_v39 }
 0x789   : > { %v9294_v60 = vunpack.c.l.b16 %v7530_v25 }
 0x78a   : > { %v7404_v27 = vsel %vm963_vm3, %v7401_v11, %v7403_v23  ;;  %v7241_v2 = vmax.f32 %v7209_v46, 0.0  ;;  %v13102_v46 = vld [vmem:[%s17461_s5 + $0x1d0] sm:$0xff] }
 0x78b   : > { %v16566_v35 = vmax.f32 %v7311_v48, %v7404_v27  ;;  %v7897_v19 = vpop.f32.mrf.mxu3  ;;  %v16569_v24 = vpack.c.b16 %v9294_v60, %v9293_v16  ;;  %v13110_v16 = vld [vmem:[%s17461_s5 + $0x210] sm:$0xff]  ;;  %8465 = vmatpush.bf16.msra.mxu2 %v13102_v46 }
 0x78c   : > { %v7277_v43 = vmul.f32 %v16459_v12, %v7241_v2  ;;  %8575 = vmatpush.bf16.msra.mxu3 %v13110_v16  ;;  %v13101_v19 = vld [vmem:[%s17461_s5 + $0x1c8] sm:$0xff] }
 0x78d   : > { %v7501_v49 = vmax.f32 %v7469_v40, %v16566_v35  ;;  %v7137_v39 = vpop.f32.mrf.mxu0  ;;  %v7690_v25 = vpop.f32.mrf.mxu1  ;;  %8147 = vmatmul.bf16.gmra.mxu2 %v16245_v21  ;;  %v13094_v40 = vld [vmem:[%s17461_s5 + $0x190] sm:$0xff] }
 0x78e   : > { %v7313_v11 = vadd.f32 %v16468_v52, %v7277_v43  ;;  %v7174_v55 = vadd.f32 %v7137_v39, %v6963_v42  ;;  %v7781_v48 = vadd.f32 %v7780_v36, %v7690_v25  ;;  %8355 = vmatpush.bf16.msra.mxu1 %v13094_v40  ;;  %v13109_v39 = vld [vmem:[%s17461_s5 + $0x208] sm:$0xff] }
 0x78f   : > { %v7531_v38 = vpack.c.bf16 %v7501_v49, %v7501_v49  ;;  %v7947_v49 = vrot.slane %v16266_v54, 3  ;;  %8466 = vmatpush.bf16.msra.mxu2 %v13101_v19 }
 0x790   : > { %v7405_v27 = vrot.slane %v7313_v11, 1  ;;  %v7210_v36 = vadd.f32 %v16485_v56, %v7174_v55  ;;  %v7785_v2 = vpop.f32.mrf.mxu2  ;;  %8027 = vmatmul.bf16.gmra.mxu1 %v16588_v44  ;;  %8258 = vmatmul.bf16.gmra.mxu3 %v16266_v54 }
 0x791   : > { %v16596_v0 = vunpack.c.l.b16 %v7531_v38  ;;  %8576 = vmatpush.bf16.msra.mxu3 %v13109_v39 }
 0x792   : > { %v7406_v47 = vsel %vm963_vm3, %v7403_v23, %v7405_v27  ;;  %v7242_v3 = vmax.f32 %v7210_v36, 0.0  ;;  %v17722_v36 = vld [vmem:[#allocation37_spill] sm:$0xff] }
 0x793   : > { %v7472_v42 = vmax.f32 %v7312_v32, %v7406_v47  ;;  %v7899_v43 = vpop.f32.mrf.mxu3  ;;  %v16604_v25 = vpack.c.b16 %v16596_v0, %v9294_v60  ;;  %v13093_v32 = vld [vmem:[%s17461_s5 + $0x188] sm:$0xff] }
 0x794   : > { %v7278_v55 = vmul.f32 %v16459_v12, %v7242_v3  ;;  %v16607_v46 = vadd.f32 %v7899_v43, %v7781_v48  ;;  %v16617_v48 = vsel %vm7937_vm6, %v7945_v53, %v7947_v49  ;;  %8356 = vmatpush.bf16.msra.mxu1 %v13093_v32 }
 0x795   : > { %v7502_v16 = vmax.f32 %v7470_v57, %v7472_v42  ;;  %v7140_v38 = vpop.f32.mrf.mxu0  ;;  %v7692_v23 = vpop.f32.mrf.mxu1  ;;  %v17723_v57 = vld [vmem:[#allocation36_spill] sm:$0xff] }
 0x796   : > { %v7314_v40 = vadd.f32 %v16468_v52, %v7278_v55  ;;  %v7175_v2 = vadd.f32 %v7140_v38, %v17722_v36  ;;  %v7783_v47 = vadd.f32 %v7782_v31, %v7692_v23  ;;  %v6499_v19 = vadd.f32 %v16425_v63, %v17723_v57  ;;  %v13100_v31 = vld [vmem:[%s17461_s5 + $0x1c0] sm:$0xff] }
 0x797   : > { %v7532_v60 = vpack.c.bf16 %v7502_v16, %v7502_v16  ;;  %8467 = vmatpush.bf16.msra.mxu2 %v13100_v31 }
 0x798   : > { %v7407_v3 = vrot.slane %v7314_v40, 1  ;;  %v7211_v43 = vadd.f32 %v16485_v56, %v7175_v2  ;;  %v7786_v39 = vpop.f32.mrf.mxu2  ;;  %9134 = vmatmul.bf16.vlgmr.msra.gmra.mxu0 %v16617_v48  ;;  %v6710_v16 = vadd.f32 %v16376_v14, %v6499_v19 }
 0x799   : > { %v16626_v55 = vunpack.c.l.b16 %v7532_v60 }
 0x79a   : > { %v7408_v53 = vsel %vm963_vm3, %v7405_v27, %v7407_v3  ;;  %v7243_v38 = vmax.f32 %v7211_v43, 0.0  ;;  %v6965_v36 = vadd.f32 %v16445_v26, %v6710_v16  ;;  %v13108_v26 = vld [vmem:[%s17461_s5 + $0x200] sm:$0xff] }
 0x79b   : > { %v7473_v23 = vmax.f32 %v7313_v11, %v7408_v53  ;;  %v7901_v63 = vpop.f32.mrf.mxu3  ;;  %v16632_v32 = vpack.c.b16 %v16626_v55, %v16596_v0  ;;  %8577 = vmatpush.bf16.msra.mxu3 %v13108_v26 }
 0x79c   : > { %v7279_v2 = vmul.f32 %v16459_v12, %v7243_v38  ;;  %v16636_v57 = vadd.f32 %v7901_v63, %v7783_v47 }
 0x79d   : > { %v7142_v60 = vpop.f32.mrf.mxu0  ;;  %v7695_v39 = vpop.f32.mrf.mxu1  ;;  %8150 = vmatmul.bf16.gmra.mxu2 %v16287_v10  ;;  %v7503_v14 = vmax.f32 %v16566_v35, %v7473_v23 }
 0x79e   : > { %v7315_v27 = vadd.f32 %v16468_v52, %v7279_v2  ;;  %v7176_v11 = vadd.f32 %v7142_v60, %v6965_v36  ;;  %v7949_v36 = vrot.slane %v16307_v5, 3 }
 0x79f   : > { %v7533_v19 = vpack.c.bf16 %v7503_v14, %v7503_v14 }
 0x7a0   : > { %v7409_v43 = vrot.slane %v7315_v27, 1  ;;  %v7212_v31 = vadd.f32 %v16485_v56, %v7176_v11  ;;  %v7788_v53 = vpop.f32.mrf.mxu2  ;;  %8030 = vmatmul.bf16.gmra.mxu1 %v16617_v48  ;;  %8261 = vmatmul.bf16.gmra.mxu3 %v16307_v5  ;;  %v13092_v56 = vld [vmem:[%s17461_s5 + $0x180] sm:$0xff] }
 0x7a1   : > { %v16647_v47 = vunpack.c.l.b16 %v7533_v19  ;;  %8357 = vmatpush.bf16.msra.mxu1 %v13092_v56 }
 0x7a2   : > { %v7410_v35 = vsel %vm963_vm3, %v7407_v3, %v7409_v43  ;;  %v7244_v16 = vmax.f32 %v7212_v31, 0.0 }
 0x7a3   : > { %17724 = vst [vmem:[#allocation7_spill] sm:$0xff] %v16647_v47  ;;  %v7474_v38 = vmax.f32 %v7314_v40, %v7410_v35  ;;  %v7904_v63 = vpop.f32.mrf.mxu3  ;;  %v16663_v40 = vsel %vm7937_vm6, %v7947_v49, %v7949_v36 }
 0x7a4   : > { %v7280_v60 = vmul.f32 %v16459_v12, %v7244_v16 }
 0x7a5   : > { %v7504_v39 = vmax.f32 %v7472_v42, %v7474_v38  ;;  %v7696_v14 = vpop.f32.mrf.mxu1  ;;  %v16657_v11 = vpop.f32.mrf.mxu0 }
 0x7a6   : > { %v7316_v3 = vadd.f32 %v16468_v52, %v7280_v60  ;;  %v8067_v52 = vpack.c.b16 %v16296_v62, %v16296_v62  ;;  %v13147_v62 = vld [vmem:[%s17461_s5 + $0x338] sm:$0xff] }
 0x7a7   : > { %v7534_v19 = vpack.c.bf16 %v7504_v39, %v7504_v39  ;;  %v13139_v39 = vld [vmem:[%s17461_s5 + $0x2f8] sm:$0xff]  ;;  %9016 = vmatpush.bf16.msrb.mxu3 %v13147_v62 }
 0x7a8   : > { %v7411_v31 = vrot.slane %v7316_v3, 1  ;;  %v7789_v53 = vpop.f32.mrf.mxu2  ;;  %9139 = vmatmul.bf16.gmra.mxu0 %v16663_v40  ;;  %8906 = vmatpush.bf16.msrb.mxu2 %v13139_v39  ;;  %v13138_v39 = vld [vmem:[%s17461_s5 + $0x2f0] sm:$0xff] }
 0x7a9   : > { %v16666_v26 = vunpack.c.l.b16 %v7534_v19  ;;  %v8515_v53 = vrot.slane %v16351_v13, 3 }
 0x7aa   : > { %v7412_v12 = vsel %vm963_vm3, %v7409_v43, %v7411_v31  ;;  %v7476_v42 = vmax.f32 %v7316_v3, %v7411_v31 }
 0x7ab   : > { %17725 = vst [vmem:[#allocation11_spill] sm:$0xff] %v16666_v26  ;;  %v7475_v35 = vmax.f32 %v7315_v27, %v7412_v12  ;;  %v7905_v16 = vpop.f32.mrf.mxu3  ;;  %v16673_v63 = vpack.c.b16 %v16666_v26, %v16647_v47  ;;  %v16967_v26 = vrot.slane %v16632_v32, 2 }
 0x7ac   : > { %v7506_v49 = vmax.f32 %v7474_v38, %v7476_v42  ;;  %v13131_v38 = vld [vmem:[%s17461_s5 + $0x2b8] sm:$0xff]  ;;  %8907 = vmatpush.bf16.msrb.mxu2 %v13138_v39  ;;  %v13170_v42 = vld [vmem:[%s17461_s5 + $0x3f0] sm:$0xff] }
 0x7ad   : > { %v7698_v56 = vpop.f32.mrf.mxu1  ;;  %8153 = vmatmul.bf16.gmra.mxu2 %v8067_v52  ;;  %v16675_v60 = vpop.f32.mrf.mxu0  ;;  %v7505_v43 = vmax.f32 %v7473_v23, %v7475_v35  ;;  %8793 = vmatpush.bf16.msrb.mxu1 %v13131_v38  ;;  %v16700_v52 = vsel %vm7937_vm6, %v7949_v36, %v8515_v53  ;;  %v13130_v38 = vld [vmem:[%s17461_s5 + $0x2b0] sm:$0xff]  ;;  %17728 = vst [vmem:[#allocation12_spill] sm:$0xff] %v16967_v26 }
 0x7ae   : > { %v7536_v14 = vpack.c.bf16 %v7506_v49, %v7506_v49 }
 0x7af   : > { %v7535_v27 = vpack.c.bf16 %v7505_v43, %v7505_v43 }
 0x7b0   : > { %v7791_v3 = vpop.f32.mrf.mxu2  ;;  %8033 = vmatmul.bf16.gmra.mxu1 %v16663_v40  ;;  %8264 = vmatmul.bf16.gmra.mxu3 %v16351_v13  ;;  %v16688_v19 = vunpack.c.l.b16 %v7536_v14 }
 0x7b1   : > { %v16690_v31 = vunpack.c.l.b16 %v7535_v27  ;;  %v8185_v27 = vpack.c.b16 %v16362_v4, %v16362_v4  ;;  %v13146_v3 = vld [vmem:[%s17461_s5 + $0x330] sm:$0xff]  ;;  %8794 = vmatpush.bf16.msrb.mxu1 %v13130_v38 }
 0x7b2   : > { %17726 = vst [vmem:[#allocation8_spill] sm:$0xff] %v16688_v19  ;;  %9017 = vmatpush.bf16.msrb.mxu3 %v13146_v3  ;;  %v13129_v3 = vld [vmem:[%s17461_s5 + $0x2a8] sm:$0xff] }
 0x7b3   : > { %v7907_v23 = vpop.f32.mrf.mxu3  ;;  %v16695_v12 = vpack.c.b16 %v16688_v19, %v16690_v31 }
 0x7b5   : > { %v7699_v35 = vpop.f32.mrf.mxu1  ;;  %v8693_v16 = vpop.f32.mrf.mxu0  ;;  %8795 = vmatpush.bf16.msrb.mxu1 %v13129_v3  ;;  %v13182_v3 = vld [vmem:[%s17461_s5 + $0x450] sm:$0xff] }
 0x7b8   : > { %v7792_v49 = vpop.f32.mrf.mxu2  ;;  %9142 = vmatmul.bf16.gmra.mxu0 %v16700_v52 }
 0x7bb   : > { %v7908_v56 = vpop.f32.mrf.mxu3 }
 0x7bc   : > { %v13137_v56 = vld [vmem:[%s17461_s5 + $0x2e8] sm:$0xff] }
 0x7bd   : > { %v7701_v43 = vpop.f32.mrf.mxu1  ;;  %8468 = vmatmul.bf16.vlgmr.msra.gmra.mxu2 %v16189_v28  ;;  %v8694_v14 = vpop.f32.mrf.mxu0  ;;  %v16716_v28 = vrot.slane %v16394_v45, 3 }
 0x7be   : > { %8908 = vmatpush.bf16.msrb.mxu2 %v13137_v56  ;;  %v13186_v43 = vld [vmem:[%s17461_s5 + $0x470] sm:$0xff] }
 0x7bf   : > { %v16722_v16 = vsel %vm7937_vm6, %v8515_v53, %v16716_v28  ;;  %v13145_v53 = vld [vmem:[%s17461_s5 + $0x328] sm:$0xff] }
 0x7c0   : > { %v7794_v62 = vpop.f32.mrf.mxu2  ;;  %8036 = vmatmul.bf16.gmra.mxu1 %v7949_v36  ;;  %8267 = vmatmul.bf16.gmra.mxu3 %v8185_v27  ;;  %v13187_v36 = vld [vmem:[%s17461_s5 + $0x478] sm:$0xff] }
 0x7c1   : > { %9572 = vmatpush.bf16.msrb.mxu0 %v13187_v36  ;;  %9018 = vmatpush.bf16.msrb.mxu3 %v13145_v53  ;;  %v13185_v62 = vld [vmem:[%s17461_s5 + $0x468] sm:$0xff] }
 0x7c3   : > { %v7910_v23 = vpop.f32.mrf.mxu3 }
 0x7c4   : > { %v9071_v23 = vrot.slane %v16450_v29, 3 }
 0x7c5   : > { %v7702_v35 = vpop.f32.mrf.mxu1  ;;  %v16718_v4 = vpop.f32.mrf.mxu0  ;;  %9573 = vmatpush.bf16.msrb.mxu0 %v13186_v43  ;;  %v13144_v43 = vld [vmem:[%s17461_s5 + $0x320] sm:$0xff] }
 0x7c6   : > { %v13184_v35 = vld [vmem:[%s17461_s5 + $0x460] sm:$0xff]  ;;  %v16754_v56 = vsel %vm7937_vm6, %v16716_v28, %v9071_v23  ;;  %9019 = vmatpush.bf16.msrb.mxu3 %v13144_v43  ;;  %v16780_v43 = vrot.slane %v16524_v17, 3 }
 0x7c8   : > { %v7795_v49 = vpop.f32.mrf.mxu2  ;;  %9147 = vmatmul.bf16.gmra.mxu0 %v16722_v16 }
 0x7c9   : > { %9574 = vmatpush.bf16.msrb.mxu0 %v13185_v62 }
 0x7cb   : > { %v7911_v39 = vpop.f32.mrf.mxu3 }
 0x7cc   : > { %v13136_v39 = vld [vmem:[%s17461_s5 + $0x2e0] sm:$0xff] }
 0x7cd   : > { %v7704_v14 = vpop.f32.mrf.mxu1  ;;  %8473 = vmatmul.bf16.gmra.mxu2 %v16233_v22  ;;  %v16738_v27 = vpop.f32.mrf.mxu0  ;;  %9575 = vmatpush.bf16.msrb.mxu0 %v13184_v35 }
 0x7ce   : > { %8909 = vmatpush.bf16.msrb.mxu2 %v13136_v39  ;;  %v13128_v14 = vld [vmem:[%s17461_s5 + $0x2a0] sm:$0xff] }
 0x7cf   : > { %8796 = vmatpush.bf16.msrb.mxu1 %v13128_v14 }
 0x7d0   : > { %v8132_v38 = vpop.f32.mrf.mxu2  ;;  %8358 = vmatmul.bf16.vlgmr.msra.gmra.mxu1 %v16186_v51  ;;  %8578 = vmatmul.bf16.vlgmr.msra.gmra.mxu3 %v16538_v61  ;;  %v13183_v51 = vld [vmem:[%s17461_s5 + $0x458] sm:$0xff] }
 0x7d1   : > { %9576 = vmatpush.bf16.msrb.mxu0 %v13183_v51 }
 0x7d3   : > { %v7913_v22 = vpop.f32.mrf.mxu3 }
 0x7d5   : > { %v7705_v36 = vpop.f32.mrf.mxu1  ;;  %v8701_v49 = vpop.f32.mrf.mxu0  ;;  %9577 = vmatpush.bf16.msrb.mxu0 %v13182_v3 }
 0x7d6   : > { %v13181_v36 = vld [vmem:[%s17461_s5 + $0x448] sm:$0xff] }
 0x7d8   : > { %v8134_v61 = vpop.f32.mrf.mxu2  ;;  %9150 = vmatmul.bf16.gmra.mxu0 %v16754_v56 }
 0x7d9   : > { %9578 = vmatpush.bf16.msrb.mxu0 %v13181_v36 }
 0x7db   : > { %v7914_v53 = vpop.f32.mrf.mxu3 }
 0x7dd   : > { %v8015_v62 = vpop.f32.mrf.mxu1  ;;  %8476 = vmatmul.bf16.gmra.mxu2 %v16278_v1  ;;  %v8702_v22 = vpop.f32.mrf.mxu0 }
 0x7de   : > { %v8040_v35 = vadd.f32 %v8015_v62, %v16499_v59  ;;  %v13180_v59 = vld [vmem:[%s17461_s5 + $0x440] sm:$0xff] }
 0x7df   : > { %9579 = vmatpush.bf16.msrb.mxu0 %v13180_v59  ;;  %v13134_v59 = vld [vmem:[%s17461_s5 + $0x2d0] sm:$0xff] }
 0x7e0   : > { %v8137_v49 = vpop.f32.mrf.mxu2  ;;  %8363 = vmatmul.bf16.gmra.mxu1 %v16230_v34  ;;  %8583 = vmatmul.bf16.gmra.mxu3 %v16588_v44  ;;  %v8157_v51 = vadd.f32 %v8132_v38, %v8040_v35  ;;  %v13135_v34 = vld [vmem:[%s17461_s5 + $0x2d8] sm:$0xff]  ;;  %v16793_v44 = vsel %vm7937_vm6, %v9071_v23, %v16780_v43 }
 0x7e1   : > { %8910 = vmatpush.bf16.msrb.mxu2 %v13135_v34  ;;  %v13143_v35 = vld [vmem:[%s17461_s5 + $0x318] sm:$0xff] }
 0x7e2   : > { %9020 = vmatpush.bf16.msrb.mxu3 %v13143_v35 }
 0x7e3   : > { %v8246_v39 = vpop.f32.mrf.mxu3 }
 0x7e4   : > { %v16785_v53 = vadd.f32 %v8246_v39, %v8157_v51 }
 0x7e5   : > { %v8017_v14 = vpop.f32.mrf.mxu1  ;;  %v8704_v3 = vpop.f32.mrf.mxu0  ;;  %8911 = vmatpush.bf16.msrb.mxu2 %v13134_v59 }
 0x7e6   : > { %v8041_v62 = vadd.f32 %v8017_v14, %v16528_v18  ;;  %v13127_v18 = vld [vmem:[%s17461_s5 + $0x298] sm:$0xff] }
 0x7e7   : > { %8797 = vmatpush.bf16.msrb.mxu1 %v13127_v18 }
 0x7e8   : > { %v8138_v38 = vpop.f32.mrf.mxu2  ;;  %9153 = vmatmul.bf16.gmra.mxu0 %v16793_v44  ;;  %v8158_v22 = vadd.f32 %v8134_v61, %v8041_v62  ;;  %v13142_v62 = vld [vmem:[%s17461_s5 + $0x310] sm:$0xff] }
 0x7e9   : > { %9021 = vmatpush.bf16.msrb.mxu3 %v13142_v62  ;;  %v8405_v38 = vrot.slane %v16351_v13, 2 }
 0x7eb   : > { %v8248_v36 = vpop.f32.mrf.mxu3  ;;  %v16820_v35 = vsel %vm1431_vm5, %v16315_v7, %v8405_v38  ;;  %v13141_v7 = vld [vmem:[%s17461_s5 + $0x308] sm:$0xff] }
 0x7ec   : > { %v16802_v49 = vadd.f32 %v8248_v36, %v8158_v22 }
 0x7ed   : > { %v8020_v23 = vpop.f32.mrf.mxu1  ;;  %8481 = vmatmul.bf16.gmra.mxu2 %v16324_v37  ;;  %v8705_v51 = vpop.f32.mrf.mxu0  ;;  %9022 = vmatpush.bf16.msrb.mxu3 %v13141_v7 }
 0x7f0   : > { %v8140_v39 = vpop.f32.mrf.mxu2  ;;  %8366 = vmatmul.bf16.gmra.mxu1 %v16275_v15  ;;  %8586 = vmatmul.bf16.gmra.mxu3 %v16617_v48  ;;  %v13126_v48 = vld [vmem:[%s17461_s5 + $0x290] sm:$0xff] }
 0x7f1   : > { %8798 = vmatpush.bf16.msrb.mxu1 %v13126_v48 }
 0x7f3   : > { %v8251_v61 = vpop.f32.mrf.mxu3 }
 0x7f4   : > { %v17727_v61 = vld [vmem:[#allocation6_spill] sm:$0xff] }
 0x7f5   : > { %v8021_v14 = vpop.f32.mrf.mxu1  ;;  %v8707_v3 = vpop.f32.mrf.mxu0 }
 0x7f6   : > { %v13133_v14 = vld [vmem:[%s17461_s5 + $0x2c8] sm:$0xff] }
 0x7f7   : > { %8912 = vmatpush.bf16.msrb.mxu2 %v13133_v14 }
 0x7f8   : > { %v8142_v34 = vpop.f32.mrf.mxu2  ;;  %9156 = vmatmul.bf16.gmra.mxu0 %v16780_v43 }
 0x7fb   : > { %v8252_v22 = vpop.f32.mrf.mxu3 }
 0x7fd   : > { %v8023_v18 = vpop.f32.mrf.mxu1  ;;  %8484 = vmatmul.bf16.gmra.mxu2 %v16820_v35  ;;  %v8708_v36 = vpop.f32.mrf.mxu0 }
 0x7fe   : > { %v8042_v23 = vadd.f32 %v8023_v18, %v16607_v46  ;;  %v8407_v36 = vrot.slane %v16394_v45, 2 }
 0x800   : > { %v8145_v51 = vpop.f32.mrf.mxu2  ;;  %8371 = vmatmul.bf16.gmra.mxu1 %v17727_v61  ;;  %8591 = vmatmul.bf16.gmra.mxu3 %v16663_v40  ;;  %v8159_v59 = vadd.f32 %v8140_v39, %v8042_v23  ;;  %v13125_v40 = vld [vmem:[%s17461_s5 + $0x288] sm:$0xff]  ;;  %v13132_v23 = vld [vmem:[%s17461_s5 + $0x2c0] sm:$0xff] }
 0x801   : > { %8799 = vmatpush.bf16.msrb.mxu1 %v13125_v40  ;;  %8913 = vmatpush.bf16.msrb.mxu2 %v13132_v23  ;;  %v13124_v40 = vld [vmem:[%s17461_s5 + $0x280] sm:$0xff]  ;;  %v16866_v23 = vrot.slane %v16394_v45, 1 }
 0x803   : > { %v8254_v3 = vpop.f32.mrf.mxu3 }
 0x804   : > { %v16832_v62 = vadd.f32 %v8254_v3, %v8159_v59  ;;  %v8295_v59 = vrot.slane %v16351_v13, 1  ;;  %v16847_v3 = vsel %vm1431_vm5, %v8405_v38, %v8407_v36 }
 0x805   : > { %v8025_v48 = vpop.f32.mrf.mxu1  ;;  %v8710_v46 = vpop.f32.mrf.mxu0  ;;  %8800 = vmatpush.bf16.msrb.mxu1 %v13124_v40  ;;  %v13163_v40 = vld [vmem:[%s17461_s5 + $0x3b8] sm:$0xff] }
 0x806   : > { %v8043_v39 = vadd.f32 %v8025_v48, %v16636_v57  ;;  %v13140_v46 = vld [vmem:[%s17461_s5 + $0x300] sm:$0xff] }
 0x807   : > { %9023 = vmatpush.bf16.msrb.mxu3 %v13140_v46 }
 0x808   : > { %v8146_v22 = vpop.f32.mrf.mxu2  ;;  %9580 = vmatmul.bf16.vlgmr.msrb.gmra.mxu0 %v16820_v35  ;;  %v8160_v18 = vadd.f32 %v8142_v34, %v8043_v39  ;;  %v16852_v34 = vsel %vm963_vm3, %v16312_v9, %v8295_v59 }
 0x809   : > { %9235 = vmatpush.bf16.msra.mxu1 %v13163_v40  ;;  %v13178_v40 = vld [vmem:[%s17461_s5 + $0x430] sm:$0xff] }
 0x80b   : > { %v8256_v51 = vpop.f32.mrf.mxu3 }
 0x80c   : > { %v16844_v14 = vadd.f32 %v8256_v51, %v8160_v18 }
 0x80d   : > { %v8028_v57 = vpop.f32.mrf.mxu1  ;;  %8487 = vmatmul.bf16.gmra.mxu2 %v16847_v3  ;;  %v8711_v7 = vpop.f32.mrf.mxu0 }
 0x80e   : > { %v13171_v7 = vld [vmem:[%s17461_s5 + $0x3f8] sm:$0xff] }
 0x80f   : > { %9349 = vmatpush.bf16.msra.mxu2 %v13171_v7 }
 0x810   : > { %v8148_v48 = vpop.f32.mrf.mxu2  ;;  %8374 = vmatmul.bf16.gmra.mxu1 %v16852_v34  ;;  %8594 = vmatmul.bf16.gmra.mxu3 %v16700_v52 }
 0x811   : > { %v16875_v48 = vsel %vm963_vm3, %v8295_v59, %v16866_v23  ;;  %v8961_v59 = vrot.slane %v16450_v29, 2 }
 0x813   : > { %v8259_v38 = vpop.f32.mrf.mxu3  ;;  %9350 = vmatpush.bf16.msra.mxu2 %v13170_v42 }
 0x814   : > { %v13179_v38 = vld [vmem:[%s17461_s5 + $0x438] sm:$0xff] }
 0x815   : > { %v8029_v39 = vpop.f32.mrf.mxu1  ;;  %v16862_v22 = vpop.f32.mrf.mxu0  ;;  %9462 = vmatpush.bf16.msra.mxu3 %v13179_v38 }
 0x818   : > { %v8149_v9 = vpop.f32.mrf.mxu2  ;;  %9585 = vmatmul.bf16.gmra.mxu0 %v16847_v3 }
 0x819   : > { %9463 = vmatpush.bf16.msra.mxu3 %v13178_v40  ;;  %v13218_v40 = vld [vmem:[%s17461_s5 + $0x570] sm:$0xff] }
 0x81b   : > { %v8260_v18 = vpop.f32.mrf.mxu3 }
 0x81d   : > { %v8031_v51 = vpop.f32.mrf.mxu1  ;;  %8490 = vmatmul.bf16.gmra.mxu2 %v8407_v36  ;;  %v16868_v57 = vpop.f32.mrf.mxu0 }
 0x81e   : > { %v16887_v51 = vsel %vm1431_vm5, %v8407_v36, %v8961_v59  ;;  %v13162_v36 = vld [vmem:[%s17461_s5 + $0x3b0] sm:$0xff] }
 0x81f   : > { %9236 = vmatpush.bf16.msra.mxu1 %v13162_v36 }
 0x820   : > { %v8151_v46 = vpop.f32.mrf.mxu2  ;;  %8377 = vmatmul.bf16.gmra.mxu1 %v16875_v48  ;;  %8597 = vmatmul.bf16.gmra.mxu3 %v16722_v16 }
 0x823   : > { %v8262_v39 = vpop.f32.mrf.mxu3 }
 0x825   : > { %v8032_v9 = vpop.f32.mrf.mxu1  ;;  %v9140_v18 = vpop.f32.mrf.mxu0 }
 0x828   : > { %v8152_v7 = vpop.f32.mrf.mxu2  ;;  %9588 = vmatmul.bf16.gmra.mxu0 %v16887_v51 }
 0x82b   : > { %v8263_v46 = vpop.f32.mrf.mxu3 }
 0x82c   : > { %v13169_v46 = vld [vmem:[%s17461_s5 + $0x3e8] sm:$0xff] }
 0x82d   : > { %v8034_v2 = vpop.f32.mrf.mxu1  ;;  %8914 = vmatmul.bf16.vlgmr.msrb.gmra.mxu2 %v16275_v15  ;;  %v9141_v38 = vpop.f32.mrf.mxu0  ;;  %v16903_v15 = vrot.slane %v16524_v17, 2 }
 0x82e   : > { %9351 = vmatpush.bf16.msra.mxu2 %v13169_v46  ;;  %v13216_v46 = vld [vmem:[%s17461_s5 + $0x560] sm:$0xff] }
 0x82f   : > { %v16909_v18 = vsel %vm1431_vm5, %v8961_v59, %v16903_v15  ;;  %v13177_v59 = vld [vmem:[%s17461_s5 + $0x428] sm:$0xff] }
 0x830   : > { %v8154_v39 = vpop.f32.mrf.mxu2  ;;  %8380 = vmatmul.bf16.gmra.mxu1 %v16866_v23  ;;  %8600 = vmatmul.bf16.gmra.mxu3 %v16716_v28  ;;  %v13219_v28 = vld [vmem:[%s17461_s5 + $0x578] sm:$0xff] }
 0x831   : > { %10018 = vmatpush.bf16.msra.mxu0 %v13219_v28  ;;  %9464 = vmatpush.bf16.msra.mxu3 %v13177_v59 }
 0x833   : > { %v8265_v2 = vpop.f32.mrf.mxu3 }
 0x834   : > { %v13161_v2 = vld [vmem:[%s17461_s5 + $0x3a8] sm:$0xff] }
 0x835   : > { %v8035_v42 = vpop.f32.mrf.mxu1  ;;  %v16905_v9 = vpop.f32.mrf.mxu0  ;;  %10019 = vmatpush.bf16.msra.mxu0 %v13218_v40  ;;  %9237 = vmatpush.bf16.msra.mxu1 %v13161_v2  ;;  %v13176_v2 = vld [vmem:[%s17461_s5 + $0x420] sm:$0xff] }
 0x836   : > { %v13217_v42 = vld [vmem:[%s17461_s5 + $0x568] sm:$0xff]  ;;  %9465 = vmatpush.bf16.msra.mxu3 %v13176_v2 }
 0x838   : > { %v8155_v7 = vpop.f32.mrf.mxu2  ;;  %9593 = vmatmul.bf16.gmra.mxu0 %v16909_v18 }
 0x839   : > { %10020 = vmatpush.bf16.msra.mxu0 %v13217_v42  ;;  %v9517_v7 = vrot.slane %v16569_v24, 2 }
 0x83b   : > { %v8266_v38 = vpop.f32.mrf.mxu3  ;;  %v16941_v59 = vsel %vm1431_vm5, %v16903_v15, %v9517_v7 }
 0x83d   : > { %v8037_v39 = vpop.f32.mrf.mxu1  ;;  %8919 = vmatmul.bf16.gmra.mxu2 %v17727_v61  ;;  %v16925_v36 = vpop.f32.mrf.mxu0  ;;  %10021 = vmatpush.bf16.msra.mxu0 %v13216_v46  ;;  %v13214_v46 = vld [vmem:[%s17461_s5 + $0x550] sm:$0xff] }
 0x83e   : > { %v13168_v39 = vld [vmem:[%s17461_s5 + $0x3e0] sm:$0xff] }
 0x83f   : > { %9352 = vmatpush.bf16.msra.mxu2 %v13168_v39 }
 0x840   : > { %v8469_v28 = vpop.f32.mrf.mxu2  ;;  %8801 = vmatmul.bf16.vlgmr.msrb.gmra.mxu1 %v16221_v30  ;;  %9024 = vmatmul.bf16.vlgmr.msrb.gmra.mxu3 %v16278_v1  ;;  %v13215_v30 = vld [vmem:[%s17461_s5 + $0x558] sm:$0xff] }
 0x841   : > { %10022 = vmatpush.bf16.msra.mxu0 %v13215_v30  ;;  %v13213_v30 = vld [vmem:[%s17461_s5 + $0x548] sm:$0xff] }
 0x843   : > { %v8268_v61 = vpop.f32.mrf.mxu3 }
 0x844   : > { %v13160_v61 = vld [vmem:[%s17461_s5 + $0x3a0] sm:$0xff] }
 0x845   : > { %v8038_v38 = vpop.f32.mrf.mxu1  ;;  %v9148_v40 = vpop.f32.mrf.mxu0  ;;  %9238 = vmatpush.bf16.msra.mxu1 %v13160_v61  ;;  %10023 = vmatpush.bf16.msra.mxu0 %v13214_v46 }
 0x848   : > { %v8471_v1 = vpop.f32.mrf.mxu2  ;;  %9596 = vmatmul.bf16.gmra.mxu0 %v16941_v59 }
 0x849   : > { %10024 = vmatpush.bf16.msra.mxu0 %v13213_v30  ;;  %v13175_v30 = vld [vmem:[%s17461_s5 + $0x418] sm:$0xff] }
 0x84a   : > { %9466 = vmatpush.bf16.msra.mxu3 %v13175_v30 }
 0x84b   : > { %v8269_v42 = vpop.f32.mrf.mxu3 }
 0x84d   : > { %v8359_v38 = vpop.f32.mrf.mxu1  ;;  %8922 = vmatmul.bf16.gmra.mxu2 %v16852_v34  ;;  %v9149_v40 = vpop.f32.mrf.mxu0 }
 0x84e   : > { %v8384_v19 = vadd.f32 %v8359_v38, %v16785_v53  ;;  %v13212_v53 = vld [vmem:[%s17461_s5 + $0x540] sm:$0xff] }
 0x84f   : > { %10025 = vmatpush.bf16.msra.mxu0 %v13212_v53 }
 0x850   : > { %v8474_v39 = vpop.f32.mrf.mxu2  ;;  %8806 = vmatmul.bf16.gmra.mxu1 %v16266_v54  ;;  %9029 = vmatmul.bf16.gmra.mxu3 %v16324_v37  ;;  %v8494_v2 = vadd.f32 %v8469_v28, %v8384_v19  ;;  %v13167_v54 = vld [vmem:[%s17461_s5 + $0x3d8] sm:$0xff]  ;;  %v16980_v37 = vsel %vm1431_vm5, %v9517_v7, %v16967_v26 }
 0x851   : > { %9353 = vmatpush.bf16.msra.mxu2 %v13167_v54  ;;  %v13174_v54 = vld [vmem:[%s17461_s5 + $0x410] sm:$0xff] }
 0x852   : > { %9467 = vmatpush.bf16.msra.mxu3 %v13174_v54 }
 0x853   : > { %v8579_v42 = vpop.f32.mrf.mxu3 }
 0x854   : > { %v16972_v61 = vadd.f32 %v8579_v42, %v8494_v2 }
 0x855   : > { %v8361_v46 = vpop.f32.mrf.mxu1  ;;  %v9151_v38 = vpop.f32.mrf.mxu0 }
 0x856   : > { %v8385_v40 = vadd.f32 %v8361_v46, %v16802_v49  ;;  %v13159_v49 = vld [vmem:[%s17461_s5 + $0x398] sm:$0xff]  ;;  %v13166_v46 = vld [vmem:[%s17461_s5 + $0x3d0] sm:$0xff] }
 0x857   : > { %9239 = vmatpush.bf16.msra.mxu1 %v13159_v49  ;;  %9354 = vmatpush.bf16.msra.mxu2 %v13166_v46 }
 0x858   : > { %v8475_v19 = vpop.f32.mrf.mxu2  ;;  %9599 = vmatmul.bf16.gmra.mxu0 %v16980_v37  ;;  %v8495_v28 = vadd.f32 %v8471_v1, %v8385_v40 }
 0x85b   : > { %v8581_v39 = vpop.f32.mrf.mxu3 }
 0x85c   : > { %v16989_v2 = vadd.f32 %v8581_v39, %v8495_v28  ;;  %v8851_v28 = vrot.slane %v16450_v29, 1 }
 0x85d   : > { %v8364_v7 = vpop.f32.mrf.mxu1  ;;  %8927 = vmatmul.bf16.gmra.mxu2 %v16875_v48  ;;  %v9152_v42 = vpop.f32.mrf.mxu0 }
 0x85e   : > { %v17007_v49 = vsel %vm963_vm3, %v16866_v23, %v8851_v28  ;;  %v13173_v23 = vld [vmem:[%s17461_s5 + $0x408] sm:$0xff] }
 0x85f   : > { %9468 = vmatpush.bf16.msra.mxu3 %v13173_v23 }
 0x860   : > { %v8477_v53 = vpop.f32.mrf.mxu2  ;;  %8809 = vmatmul.bf16.gmra.mxu1 %v16307_v5  ;;  %9032 = vmatmul.bf16.gmra.mxu3 %v16820_v35  ;;  %v13158_v35 = vld [vmem:[%s17461_s5 + $0x390] sm:$0xff] }
 0x861   : > { %9240 = vmatpush.bf16.msra.mxu1 %v13158_v35 }
 0x863   : > { %v8584_v1 = vpop.f32.mrf.mxu3 }
 0x865   : > { %v8365_v38 = vpop.f32.mrf.mxu1  ;;  %v9154_v40 = vpop.f32.mrf.mxu0 }
 0x866   : > { %v13165_v38 = vld [vmem:[%s17461_s5 + $0x3c8] sm:$0xff] }
 0x867   : > { %9355 = vmatpush.bf16.msra.mxu2 %v13165_v38 }
 0x868   : > { %v8479_v19 = vpop.f32.mrf.mxu2  ;;  %9602 = vmatmul.bf16.gmra.mxu0 %v16967_v26 }
 0x86b   : > { %v8585_v30 = vpop.f32.mrf.mxu3 }
 0x86d   : > { %v8367_v39 = vpop.f32.mrf.mxu1  ;;  %8930 = vmatmul.bf16.gmra.mxu2 %v17007_v49  ;;  %v9155_v7 = vpop.f32.mrf.mxu0 }
 0x86e   : > { %v8386_v42 = vadd.f32 %v8367_v39, %v16832_v62  ;;  %v8853_v7 = vrot.slane %v16524_v17, 1 }
 0x870   : > { %v8482_v1 = vpop.f32.mrf.mxu2  ;;  %8814 = vmatmul.bf16.gmra.mxu1 %v16351_v13  ;;  %9037 = vmatmul.bf16.gmra.mxu3 %v16847_v3  ;;  %v8496_v46 = vadd.f32 %v8477_v53, %v8386_v42  ;;  %v13157_v3 = vld [vmem:[%s17461_s5 + $0x388] sm:$0xff]  ;;  %v13164_v42 = vld [vmem:[%s17461_s5 + $0x3c0] sm:$0xff]  ;;  %v17033_v38 = vsel %vm963_vm3, %v8851_v28, %v8853_v7 }
 0x871   : > { %9241 = vmatpush.bf16.msra.mxu1 %v13157_v3  ;;  %9356 = vmatpush.bf16.msra.mxu2 %v13164_v42  ;;  %v13156_v28 = vld [vmem:[%s17461_s5 + $0x380] sm:$0xff] }
 0x873   : > { %v8587_v40 = vpop.f32.mrf.mxu3 }
 0x874   : > { %v17019_v54 = vadd.f32 %v8587_v40, %v8496_v46 }
 0x875   : > { %v8369_v35 = vpop.f32.mrf.mxu1  ;;  %v9157_v62 = vpop.f32.mrf.mxu0  ;;  %9242 = vmatpush.bf16.msra.mxu1 %v13156_v28 }
 0x876   : > { %v8387_v53 = vadd.f32 %v8369_v35, %v16844_v14 }
 0x878   : > { %v8483_v30 = vpop.f32.mrf.mxu2  ;;  %10026 = vmatmul.bf16.vlgmr.msra.gmra.mxu0 %v17007_v49  ;;  %v8497_v39 = vadd.f32 %v8479_v19, %v8387_v53  ;;  %v13172_v19 = vld [vmem:[%s17461_s5 + $0x400] sm:$0xff] }
 0x879   : > { %9469 = vmatpush.bf16.msra.mxu3 %v13172_v19 }
 0x87b   : > { %v8589_v1 = vpop.f32.mrf.mxu3 }
 0x87c   : > { %v17030_v46 = vadd.f32 %v8589_v1, %v8497_v39  ;;  %v13203_v1 = vld [vmem:[%s17461_s5 + $0x4f8] sm:$0xff] }
 0x87d   : > { %v8372_v40 = vpop.f32.mrf.mxu1  ;;  %8933 = vmatmul.bf16.gmra.mxu2 %v17033_v38  ;;  %v9158_v14 = vpop.f32.mrf.mxu0 }
 0x87e   : > { %9791 = vmatpush.bf16.msrb.mxu2 %v13203_v1  ;;  %v13211_v14 = vld [vmem:[%s17461_s5 + $0x538] sm:$0xff]  ;;  %v13202_v1 = vld [vmem:[%s17461_s5 + $0x4f0] sm:$0xff] }
 0x87f   : > { %9905 = vmatpush.bf16.msrb.mxu3 %v13211_v14 }
 0x880   : > { %v8485_v23 = vpop.f32.mrf.mxu2  ;;  %8817 = vmatmul.bf16.gmra.mxu1 %v16394_v45  ;;  %9040 = vmatmul.bf16.gmra.mxu3 %v16887_v51 }
 0x881   : > { %v13195_v23 = vld [vmem:[%s17461_s5 + $0x4b8] sm:$0xff] }
 0x882   : > { %9682 = vmatpush.bf16.msrb.mxu1 %v13195_v23  ;;  %v8741_v23 = vpack.c.b16 %v16489_v8, %v16489_v8  ;;  %9792 = vmatpush.bf16.msrb.mxu2 %v13202_v1 }
 0x883   : > { %v8592_v35 = vpop.f32.mrf.mxu3 }
 0x884   : > { %v9407_v35 = vrot.slane %v16569_v24, 1 }
 0x885   : > { %v8373_v62 = vpop.f32.mrf.mxu1  ;;  %v17044_v3 = vpop.f32.mrf.mxu0 }
 0x888   : > { %v8486_v53 = vpop.f32.mrf.mxu2  ;;  %10031 = vmatmul.bf16.gmra.mxu0 %v17033_v38 }
 0x889   : > { %v17062_v53 = vsel %vm963_vm3, %v8853_v7, %v9407_v35 }
 0x88b   : > { %v8593_v30 = vpop.f32.mrf.mxu3 }
 0x88d   : > { %v8375_v39 = vpop.f32.mrf.mxu1  ;;  %8936 = vmatmul.bf16.gmra.mxu2 %v8853_v7  ;;  %v17047_v42 = vpop.f32.mrf.mxu0  ;;  %v13210_v7 = vld [vmem:[%s17461_s5 + $0x530] sm:$0xff] }
 0x88e   : > { %9906 = vmatpush.bf16.msrb.mxu3 %v13210_v7 }
 0x890   : > { %v8488_v40 = vpop.f32.mrf.mxu2  ;;  %8820 = vmatmul.bf16.gmra.mxu1 %v16450_v29  ;;  %9043 = vmatmul.bf16.gmra.mxu3 %v16909_v18 }
 0x893   : > { %v8595_v19 = vpop.f32.mrf.mxu3 }
 0x895   : > { %v8376_v28 = vpop.f32.mrf.mxu1  ;;  %v9586_v62 = vpop.f32.mrf.mxu0 }
 0x896   : > { %v13194_v28 = vld [vmem:[%s17461_s5 + $0x4b0] sm:$0xff]  ;;  %v17079_v62 = vrot.slane %v16632_v32, 1 }
 0x897   : > { %9683 = vmatpush.bf16.msrb.mxu1 %v13194_v28 }
 0x898   : > { %v8489_v30 = vpop.f32.mrf.mxu2  ;;  %10034 = vmatmul.bf16.gmra.mxu0 %v17062_v53 }
 0x89b   : > { %v8596_v39 = vpop.f32.mrf.mxu3 }
 0x89c   : > { %v17085_v39 = vsel %vm963_vm3, %v9407_v35, %v17079_v62  ;;  %v13193_v35 = vld [vmem:[%s17461_s5 + $0x4a8] sm:$0xff] }
 0x89d   : > { %v8378_v40 = vpop.f32.mrf.mxu1  ;;  %9357 = vmatmul.bf16.vlgmr.msra.gmra.mxu2 %v16307_v5  ;;  %v9587_v14 = vpop.f32.mrf.mxu0  ;;  %9684 = vmatpush.bf16.msrb.mxu1 %v13193_v35 }
 0x89e   : > { %v13209_v14 = vld [vmem:[%s17461_s5 + $0x528] sm:$0xff] }
 0x89f   : > { %9907 = vmatpush.bf16.msrb.mxu3 %v13209_v14  ;;  %v13192_v14 = vld [vmem:[%s17461_s5 + $0x4a0] sm:$0xff] }
 0x8a0   : > { %v8491_v19 = vpop.f32.mrf.mxu2  ;;  %8823 = vmatmul.bf16.gmra.mxu1 %v8741_v23  ;;  %9046 = vmatmul.bf16.gmra.mxu3 %v16903_v15  ;;  %v13201_v15 = vld [vmem:[%s17461_s5 + $0x4e8] sm:$0xff] }
 0x8a1   : > { %9793 = vmatpush.bf16.msrb.mxu2 %v13201_v15  ;;  %9685 = vmatpush.bf16.msrb.mxu1 %v13192_v14  ;;  %v13199_v14 = vld [vmem:[%s17461_s5 + $0x4d8] sm:$0xff] }
 0x8a3   : > { %v8598_v5 = vpop.f32.mrf.mxu3 }
 0x8a4   : > { %v9963_v5 = vrot.slane %v16673_v63, 1 }
 0x8a5   : > { %v8379_v8 = vpop.f32.mrf.mxu1  ;;  %v17081_v30 = vpop.f32.mrf.mxu0 }
 0x8a8   : > { %v8492_v1 = vpop.f32.mrf.mxu2  ;;  %10039 = vmatmul.bf16.gmra.mxu0 %v17085_v39 }
 0x8ab   : > { %v8599_v40 = vpop.f32.mrf.mxu3 }
 0x8ac   : > { %v13200_v40 = vld [vmem:[%s17461_s5 + $0x4e0] sm:$0xff] }
 0x8ad   : > { %v8381_v23 = vpop.f32.mrf.mxu1  ;;  %9362 = vmatmul.bf16.gmra.mxu2 %v16351_v13  ;;  %v17095_v7 = vpop.f32.mrf.mxu0  ;;  %v9964_v13 = vsel %vm963_vm3, %v17079_v62, %v9963_v5 }
 0x8ae   : > { %9794 = vmatpush.bf16.msrb.mxu2 %v13200_v40  ;;  %v8713_v23 = vadd.f32 %v16657_v11, %v16972_v61  ;;  %v8714_v11 = vadd.f32 %v16675_v60, %v16989_v2  ;;  %v13191_v60 = vld [vmem:[%s17461_s5 + $0x498] sm:$0xff] }
 0x8af   : > { %9686 = vmatpush.bf16.msrb.mxu1 %v13191_v60 }
 0x8b0   : > { %v8915_v19 = vpop.f32.mrf.mxu2  ;;  %9243 = vmatmul.bf16.vlgmr.msra.gmra.mxu1 %v16245_v21  ;;  %9470 = vmatmul.bf16.vlgmr.msra.gmra.mxu3 %v16852_v34  ;;  %v13208_v21 = vld [vmem:[%s17461_s5 + $0x520] sm:$0xff] }
 0x8b1   : > { %9908 = vmatpush.bf16.msrb.mxu3 %v13208_v21  ;;  %v9965_v21 = vrot.slane %v16695_v12, 1 }
 0x8b2   : > { %9795 = vmatpush.bf16.msrb.mxu2 %v13199_v14 }
 0x8b3   : > { %v8601_v28 = vpop.f32.mrf.mxu3 }
 0x8b5   : > { %v8382_v8 = vpop.f32.mrf.mxu1  ;;  %v9594_v1 = vpop.f32.mrf.mxu0 }
 0x8b8   : > { %v8917_v15 = vpop.f32.mrf.mxu2  ;;  %10042 = vmatmul.bf16.gmra.mxu0 %v9964_v13 }
 0x8bb   : > { %v8602_v34 = vpop.f32.mrf.mxu3 }
 0x8bd   : > { %v8802_v35 = vpop.f32.mrf.mxu1  ;;  %9365 = vmatmul.bf16.gmra.mxu2 %v16394_v45  ;;  %v9595_v28 = vpop.f32.mrf.mxu0 }
 0x8be   : > { %v8827_v8 = vadd.f32 %v8802_v35, %v8713_v23 }
 0x8c0   : > { %v8920_v1 = vpop.f32.mrf.mxu2  ;;  %9248 = vmatmul.bf16.gmra.mxu1 %v16287_v10  ;;  %9475 = vmatmul.bf16.gmra.mxu3 %v16875_v48  ;;  %v8940_v13 = vadd.f32 %v8915_v19, %v8827_v8  ;;  %v9966_v10 = vsel %vm963_vm3, %v9963_v5, %v9965_v21  ;;  %v13207_v19 = vld [vmem:[%s17461_s5 + $0x518] sm:$0xff] }
 0x8c1   : > { %9909 = vmatpush.bf16.msrb.mxu3 %v13207_v19  ;;  %v13197_v19 = vld [vmem:[%s17461_s5 + $0x4c8] sm:$0xff] }
 0x8c3   : > { %v9025_v40 = vpop.f32.mrf.mxu3 }
 0x8c4   : > { %v17120_v34 = vadd.f32 %v9025_v40, %v8940_v13  ;;  %v13206_v13 = vld [vmem:[%s17461_s5 + $0x510] sm:$0xff] }
 0x8c5   : > { %v8804_v61 = vpop.f32.mrf.mxu1  ;;  %v9597_v47 = vpop.f32.mrf.mxu0  ;;  %9910 = vmatpush.bf16.msrb.mxu3 %v13206_v13 }
 0x8c6   : > { %v8828_v26 = vadd.f32 %v8804_v61, %v8714_v11  ;;  %v13190_v11 = vld [vmem:[%s17461_s5 + $0x490] sm:$0xff]  ;;  %v8715_v61 = vadd.f32 %v16718_v4, %v17019_v54  ;;  %v13205_v4 = vld [vmem:[%s17461_s5 + $0x508] sm:$0xff] }
 0x8c7   : > { %9687 = vmatpush.bf16.msrb.mxu1 %v13190_v11 }
 0x8c8   : > { %v8921_v23 = vpop.f32.mrf.mxu2  ;;  %10045 = vmatmul.bf16.gmra.mxu0 %v9966_v10  ;;  %v8941_v48 = vadd.f32 %v8917_v15, %v8828_v26  ;;  %v13198_v15 = vld [vmem:[%s17461_s5 + $0x4d0] sm:$0xff] }
 0x8c9   : > { %9796 = vmatpush.bf16.msrb.mxu2 %v13198_v15  ;;  %9911 = vmatpush.bf16.msrb.mxu3 %v13205_v4 }
 0x8cb   : > { %v9027_v47 = vpop.f32.mrf.mxu3 }
 0x8cc   : > { %v17134_v2 = vadd.f32 %v9027_v47, %v8941_v48  ;;  %v8716_v47 = vadd.f32 %v16738_v27, %v17030_v46 }
 0x8cd   : > { %v8807_v35 = vpop.f32.mrf.mxu1  ;;  %9370 = vmatmul.bf16.gmra.mxu2 %v16450_v29  ;;  %v9598_v5 = vpop.f32.mrf.mxu0 }
 0x8ce   : > { %9797 = vmatpush.bf16.msrb.mxu2 %v13197_v19 }
 0x8d0   : > { %v8923_v28 = vpop.f32.mrf.mxu2  ;;  %9251 = vmatmul.bf16.gmra.mxu1 %v16331_v58  ;;  %9478 = vmatmul.bf16.gmra.mxu3 %v17007_v49 }
 0x8d3   : > { %v9030_v26 = vpop.f32.mrf.mxu3 }
 0x8d5   : > { %v8808_v8 = vpop.f32.mrf.mxu1  ;;  %v9600_v1 = vpop.f32.mrf.mxu0 }
 0x8d6   : > { %v13196_v8 = vld [vmem:[%s17461_s5 + $0x4c0] sm:$0xff] }
 0x8d7   : > { %9798 = vmatpush.bf16.msrb.mxu2 %v13196_v8 }
 0x8d8   : > { %v8925_v40 = vpop.f32.mrf.mxu2  ;;  %10048 = vmatmul.bf16.gmra.mxu0 %v9965_v21 }
 0x8db   : > { %v9031_v49 = vpop.f32.mrf.mxu3 }
 0x8dd   : > { %v8810_v14 = vpop.f32.mrf.mxu1  ;;  %9373 = vmatmul.bf16.gmra.mxu2 %v16524_v17  ;;  %v9601_v10 = vpop.f32.mrf.mxu0 }
 0x8de   : > { %v8829_v23 = vadd.f32 %v8810_v14, %v8715_v61  ;;  %v13188_v61 = vld [vmem:[%s17461_s5 + $0x480] sm:$0xff] }
 0x8e0   : > { %v8928_v48 = vpop.f32.mrf.mxu2  ;;  %9256 = vmatmul.bf16.gmra.mxu1 %v16366_v20  ;;  %9483 = vmatmul.bf16.gmra.mxu3 %v17033_v38  ;;  %v8942_v21 = vadd.f32 %v8923_v28, %v8829_v23  ;;  %v13189_v38 = vld [vmem:[%s17461_s5 + $0x488] sm:$0xff] }
 0x8e1   : > { %9688 = vmatpush.bf16.msrb.mxu1 %v13189_v38 }
 0x8e3   : > { %v9033_v60 = vpop.f32.mrf.mxu3 }
 0x8e4   : > { %v17159_v54 = vadd.f32 %v9033_v60, %v8942_v21  ;;  %v9297_v21 = vpack.c.b16 %v16596_v0, %v16596_v0  ;;  %v13235_v60 = vld [vmem:[%s17461_s5 + $0x5f8] sm:$0xff] }
 0x8e5   : > { %v8812_v35 = vpop.f32.mrf.mxu1  ;;  %v9603_v5 = vpop.f32.mrf.mxu0  ;;  %9689 = vmatpush.bf16.msrb.mxu1 %v13188_v61  ;;  %10238 = vmatpush.bf16.msra.mxu2 %v13235_v60  ;;  %v13227_v0 = vld [vmem:[%s17461_s5 + $0x5b8] sm:$0xff]  ;;  %v13233_v61 = vld [vmem:[%s17461_s5 + $0x5e8] sm:$0xff] }
 0x8e6   : > { %v8830_v28 = vadd.f32 %v8812_v35, %v8716_v47  ;;  %v13243_v47 = vld [vmem:[%s17461_s5 + $0x638] sm:$0xff] }
 0x8e8   : > { %v8929_v26 = vpop.f32.mrf.mxu2  ;;  %v8943_v15 = vadd.f32 %v8925_v40, %v8830_v28  ;;  %v13204_v40 = vld [vmem:[%s17461_s5 + $0x500] sm:$0xff] }
 0x8e9   : > { %9912 = vmatpush.bf16.msrb.mxu3 %v13204_v40  ;;  %10128 = vmatpush.bf16.msra.mxu1 %v13227_v0 }
 0x8eb   : > { %v9035_v1 = vpop.f32.mrf.mxu3 }
 0x8ec   : > { %v17169_v13 = vadd.f32 %v9035_v1, %v8943_v15  ;;  %v13234_v15 = vld [vmem:[%s17461_s5 + $0x5f0] sm:$0xff]  ;;  %v9183_v1 = vpack.c.b16 %v16508_v33, %v16508_v33 }
 0x8ed   : > { %v8815_v27 = vpop.f32.mrf.mxu1  ;;  %9376 = vmatmul.bf16.gmra.mxu2 %v16569_v24  ;;  %v9604_v46 = vpop.f32.mrf.mxu0  ;;  %10347 = vmatpush.bf16.msra.mxu3 %v13243_v47 }
 0x8ee   : > { %10239 = vmatpush.bf16.msra.mxu2 %v13234_v15  ;;  %v13242_v27 = vld [vmem:[%s17461_s5 + $0x630] sm:$0xff] }
 0x8f0   : > { %v8931_v11 = vpop.f32.mrf.mxu2  ;;  %9259 = vmatmul.bf16.gmra.mxu1 %v16422_v6  ;;  %9486 = vmatmul.bf16.gmra.mxu3 %v17062_v53 }
 0x8f1   : > { %v13226_v11 = vld [vmem:[%s17461_s5 + $0x5b0] sm:$0xff]  ;;  %10348 = vmatpush.bf16.msra.mxu3 %v13242_v27  ;;  %v9161_v27 = vadd.f32 %v16868_v57, %v17134_v2 }
 0x8f2   : > { %10129 = vmatpush.bf16.msra.mxu1 %v13226_v11  ;;  %10240 = vmatpush.bf16.msra.mxu2 %v13233_v61  ;;  %v13231_v11 = vld [vmem:[%s17461_s5 + $0x5d8] sm:$0xff] }
 0x8f3   : > { %v9038_v49 = vpop.f32.mrf.mxu3 }
 0x8f5   : > { %v8816_v14 = vpop.f32.mrf.mxu1  ;;  %v17180_v10 = vpop.f32.mrf.mxu0 }
 0x8f8   : > { %v8932_v23 = vpop.f32.mrf.mxu2 }
 0x8fb   : > { %v9039_v48 = vpop.f32.mrf.mxu3 }
 0x8fd   : > { %v8818_v53 = vpop.f32.mrf.mxu1  ;;  %9379 = vmatmul.bf16.gmra.mxu2 %v9297_v21  ;;  %v17184_v19 = vpop.f32.mrf.mxu0  ;;  %v13225_v21 = vld [vmem:[%s17461_s5 + $0x5a8] sm:$0xff] }
 0x8fe   : > { %10130 = vmatpush.bf16.msra.mxu1 %v13225_v21 }
 0x900   : > { %v8934_v4 = vpop.f32.mrf.mxu2  ;;  %9262 = vmatmul.bf16.gmra.mxu1 %v16496_v41  ;;  %9489 = vmatmul.bf16.gmra.mxu3 %v17085_v39 }
 0x903   : > { %v9041_v35 = vpop.f32.mrf.mxu3 }
 0x904   : > { %v13240_v35 = vld [vmem:[%s17461_s5 + $0x620] sm:$0xff] }
 0x905   : > { %v8819_v5 = vpop.f32.mrf.mxu1  ;;  %v10032_v38 = vpop.f32.mrf.mxu0 }
 0x908   : > { %v8935_v28 = vpop.f32.mrf.mxu2 }
 0x90b   : > { %v9042_v26 = vpop.f32.mrf.mxu3 }
 0x90d   : > { %v8821_v39 = vpop.f32.mrf.mxu1  ;;  %9799 = vmatmul.bf16.vlgmr.msrb.gmra.mxu2 %v16331_v58  ;;  %v10033_v8 = vpop.f32.mrf.mxu0 }
 0x910   : > { %v8937_v46 = vpop.f32.mrf.mxu2  ;;  %9265 = vmatmul.bf16.gmra.mxu1 %v9183_v1  ;;  %9492 = vmatmul.bf16.gmra.mxu3 %v17079_v62  ;;  %v13241_v62 = vld [vmem:[%s17461_s5 + $0x628] sm:$0xff] }
 0x911   : > { %10349 = vmatpush.bf16.msra.mxu3 %v13241_v62 }
 0x913   : > { %v9044_v58 = vpop.f32.mrf.mxu3 }
 0x915   : > { %v8822_v40 = vpop.f32.mrf.mxu1  ;;  %v17210_v49 = vpop.f32.mrf.mxu0  ;;  %10350 = vmatpush.bf16.msra.mxu3 %v13240_v35 }
 0x918   : > { %v8938_v33 = vpop.f32.mrf.mxu2 }
 0x91b   : > { %v9045_v14 = vpop.f32.mrf.mxu3 }
 0x91d   : > { %v8824_v23 = vpop.f32.mrf.mxu1  ;;  %9804 = vmatmul.bf16.gmra.mxu2 %v16366_v20  ;;  %v17219_v48 = vpop.f32.mrf.mxu0  ;;  %v13232_v20 = vld [vmem:[%s17461_s5 + $0x5e0] sm:$0xff] }
 0x91e   : > { %10241 = vmatpush.bf16.msra.mxu2 %v13232_v20  ;;  %v13230_v23 = vld [vmem:[%s17461_s5 + $0x5d0] sm:$0xff] }
 0x920   : > { %v9358_v53 = vpop.f32.mrf.mxu2  ;;  %9690 = vmatmul.bf16.vlgmr.msrb.gmra.mxu1 %v16700_v52  ;;  %9913 = vmatmul.bf16.vlgmr.msrb.gmra.mxu3 %v16394_v45  ;;  %v13224_v52 = vld [vmem:[%s17461_s5 + $0x5a0] sm:$0xff]  ;;  %v9160_v45 = vadd.f32 %v16862_v22, %v17120_v34 }
 0x921   : > { %10131 = vmatpush.bf16.msra.mxu1 %v13224_v52 }
 0x922   : > { %10242 = vmatpush.bf16.msra.mxu2 %v13231_v11 }
 0x923   : > { %v9047_v60 = vpop.f32.mrf.mxu3 }
 0x924   : > { %v13238_v60 = vld [vmem:[%s17461_s5 + $0x610] sm:$0xff] }
 0x925   : > { %v8825_v4 = vpop.f32.mrf.mxu1  ;;  %v10040_v47 = vpop.f32.mrf.mxu0 }
 0x926   : > { %10243 = vmatpush.bf16.msra.mxu2 %v13230_v23  ;;  %v13222_v47 = vld [vmem:[%s17461_s5 + $0x590] sm:$0xff]  ;;  %v9629_v23 = vrot.slane %v16632_v32, 3 }
 0x928   : > { %v9360_v0 = vpop.f32.mrf.mxu2 }
 0x92b   : > { %v9048_v5 = vpop.f32.mrf.mxu3 }
 0x92d   : > { %v9244_v38 = vpop.f32.mrf.mxu1  ;;  %9807 = vmatmul.bf16.gmra.mxu2 %v16422_v6  ;;  %v10041_v28 = vpop.f32.mrf.mxu0 }
 0x92e   : > { %v9269_v26 = vadd.f32 %v9244_v38, %v9160_v45  ;;  %v13229_v38 = vld [vmem:[%s17461_s5 + $0x5c8] sm:$0xff] }
 0x92f   : > { %10244 = vmatpush.bf16.msra.mxu2 %v13229_v38 }
 0x930   : > { %v9363_v15 = vpop.f32.mrf.mxu2  ;;  %9695 = vmatmul.bf16.gmra.mxu1 %v16722_v16  ;;  %9918 = vmatmul.bf16.gmra.mxu3 %v16450_v29  ;;  %v9383_v39 = vadd.f32 %v9358_v53, %v9269_v26  ;;  %v13239_v29 = vld [vmem:[%s17461_s5 + $0x618] sm:$0xff]  ;;  %v9163_v26 = vadd.f32 %v16925_v36, %v17169_v13 }
 0x931   : > { %v13223_v16 = vld [vmem:[%s17461_s5 + $0x598] sm:$0xff]  ;;  %10351 = vmatpush.bf16.msra.mxu3 %v13239_v29 }
 0x932   : > { %10132 = vmatpush.bf16.msra.mxu1 %v13223_v16 }
 0x933   : > { %v9471_v8 = vpop.f32.mrf.mxu3 }
 0x934   : > { %v17240_v1 = vadd.f32 %v9471_v8, %v9383_v39  ;;  %v13221_v8 = vld [vmem:[%s17461_s5 + $0x588] sm:$0xff] }
 0x935   : > { %v9246_v46 = vpop.f32.mrf.mxu1  ;;  %v10043_v22 = vpop.f32.mrf.mxu0  ;;  %10352 = vmatpush.bf16.msra.mxu3 %v13238_v60 }
 0x936   : > { %v9270_v34 = vadd.f32 %v9246_v46, %v9161_v27  ;;  %10133 = vmatpush.bf16.msra.mxu1 %v13222_v47 }
 0x938   : > { %v9364_v58 = vpop.f32.mrf.mxu2  ;;  %v9384_v40 = vadd.f32 %v9360_v0, %v9270_v34  ;;  %v9162_v0 = vadd.f32 %v16905_v9, %v17159_v54  ;;  %v13237_v9 = vld [vmem:[%s17461_s5 + $0x608] sm:$0xff]  ;;  %v13228_v34 = vld [vmem:[%s17461_s5 + $0x5c0] sm:$0xff] }
 0x939   : > { %10353 = vmatpush.bf16.msra.mxu3 %v13237_v9  ;;  %10245 = vmatpush.bf16.msra.mxu2 %v13228_v34  ;;  %v9627_v58 = vrot.slane %v16569_v24, 3 }
 0x93a   : > { %10134 = vmatpush.bf16.msra.mxu1 %v13221_v8  ;;  %v9606_v8 = vadd.f32 %v17044_v3, %v17240_v1 }
 0x93b   : > { %v9473_v57 = vpop.f32.mrf.mxu3  ;;  %v9628_v29 = vsel %vm7937_vm6, %v16780_v43, %v9627_v58  ;;  %v9739_v43 = vpack.c.b16 %v16626_v55, %v16626_v55 }
 0x93c   : > { %v17253_v2 = vadd.f32 %v9473_v57, %v9384_v40  ;;  %v13236_v57 = vld [vmem:[%s17461_s5 + $0x600] sm:$0xff] }
 0x93d   : > { %v9249_v33 = vpop.f32.mrf.mxu1  ;;  %9812 = vmatmul.bf16.gmra.mxu2 %v16496_v41  ;;  %v10044_v61 = vpop.f32.mrf.mxu0  ;;  %10354 = vmatpush.bf16.msra.mxu3 %v13236_v57 }
 0x940   : > { %v9366_v14 = vpop.f32.mrf.mxu2  ;;  %9698 = vmatmul.bf16.gmra.mxu1 %v16754_v56  ;;  %9921 = vmatmul.bf16.gmra.mxu3 %v16524_v17 }
 0x943   : > { %v9476_v62 = vpop.f32.mrf.mxu3 }
 0x945   : > { %v9250_v21 = vpop.f32.mrf.mxu1  ;;  %v10046_v53 = vpop.f32.mrf.mxu0 }
 0x946   : > { %v9630_v53 = vsel %vm7937_vm6, %v9627_v58, %v9629_v23 }
 0x948   : > { %v9368_v4 = vpop.f32.mrf.mxu2 }
 0x94b   : > { %v9477_v17 = vpop.f32.mrf.mxu3 }
 0x94d   : > { %v9252_v20 = vpop.f32.mrf.mxu1  ;;  %9815 = vmatmul.bf16.gmra.mxu2 %v16554_v50  ;;  %v10047_v35 = vpop.f32.mrf.mxu0 }
 0x94e   : > { %v9271_v5 = vadd.f32 %v9252_v20, %v9162_v0  ;;  %v9853_v35 = vpack.c.b16 %v16690_v31, %v16690_v31 }
 0x950   : > { %v9371_v52 = vpop.f32.mrf.mxu2  ;;  %9703 = vmatmul.bf16.gmra.mxu1 %v16793_v44  ;;  %9926 = vmatmul.bf16.gmra.mxu3 %v16569_v24  ;;  %v9385_v45 = vadd.f32 %v9366_v14, %v9271_v5  ;;  %v13220_v24 = vld [vmem:[%s17461_s5 + $0x580] sm:$0xff] }
 0x951   : > { %10135 = vmatpush.bf16.msra.mxu1 %v13220_v24 }
 0x953   : > { %v9479_v28 = vpop.f32.mrf.mxu3 }
 0x954   : > { %v17278_v54 = vadd.f32 %v9479_v28, %v9385_v45 }
 0x955   : > { %v9254_v15 = vpop.f32.mrf.mxu1  ;;  %v10049_v39 = vpop.f32.mrf.mxu0 }
 0x956   : > { %v9272_v27 = vadd.f32 %v9254_v15, %v9163_v26 }
 0x958   : > { %v9372_v46 = vpop.f32.mrf.mxu2  ;;  %v9386_v22 = vadd.f32 %v9368_v4, %v9272_v27 }
 0x95b   : > { %v9481_v11 = vpop.f32.mrf.mxu3 }
 0x95c   : > { %v17289_v36 = vadd.f32 %v9481_v11, %v9386_v22 }
 0x95d   : > { %v9257_v13 = vpop.f32.mrf.mxu1  ;;  %9818 = vmatmul.bf16.gmra.mxu2 %v16604_v25  ;;  %v10050_v40 = vpop.f32.mrf.mxu0 }
 0x960   : > { %v9374_v16 = vpop.f32.mrf.mxu2  ;;  %9706 = vmatmul.bf16.gmra.mxu1 %v9628_v29  ;;  %9929 = vmatmul.bf16.gmra.mxu3 %v16632_v32 }
 0x963   : > { %v9484_v33 = vpop.f32.mrf.mxu3 }
 0x964   : > { %v10183_v33 = vrot.slane %v16673_v63, 3 }
 0x965   : > { %v9258_v61 = vpop.f32.mrf.mxu1 }
 0x966   : > { %v10184_v24 = vsel %vm7937_vm6, %v9629_v23, %v10183_v33 }
 0x968   : > { %v9375_v14 = vpop.f32.mrf.mxu2 }
 0x969   : > { %v13251_v14 = vld [vmem:[%s17465_s9 + $0x38] sm:$0xff] }
 0x96a   : > { %10495 = vmatpush.bf16.msrb.mxu0 %v13251_v14 }
 0x96b   : > { %v9485_v62 = vpop.f32.mrf.mxu3 }
 0x96d   : > { %v9260_v21 = vpop.f32.mrf.mxu1  ;;  %9821 = vmatmul.bf16.gmra.mxu2 %v9739_v43 }
 0x970   : > { %v9377_v60 = vpop.f32.mrf.mxu2  ;;  %9709 = vmatmul.bf16.gmra.mxu1 %v9630_v53  ;;  %9932 = vmatmul.bf16.gmra.mxu3 %v16673_v63 }
 0x973   : > { %v9487_v4 = vpop.f32.mrf.mxu3 }
 0x974   : > { %v10185_v4 = vrot.slane %v16695_v12, 3 }
 0x975   : > { %v9261_v47 = vpop.f32.mrf.mxu1 }
 0x978   : > { %v9378_v17 = vpop.f32.mrf.mxu2 }
 0x979   : > { %v10073_v17 = vrot.slane %v16673_v63, 2 }
 0x97b   : > { %v9488_v0 = vpop.f32.mrf.mxu3 }
 0x97d   : > { %v9263_v20 = vpop.f32.mrf.mxu1  ;;  %10246 = vmatmul.bf16.vlgmr.msra.gmra.mxu2 %v16754_v56 }
 0x97e   : > { %v13250_v20 = vld [vmem:[%s17465_s9 + $0x30] sm:$0xff] }
 0x97f   : > { %10496 = vmatpush.bf16.msrb.mxu0 %v13250_v20  ;;  %v13329_v20 = vld [vmem:[%s17464_s8] ss:$0 sm:$0xff] }
 0x980   : > { %v9380_v5 = vpop.f32.mrf.mxu2  ;;  %9712 = vmatmul.bf16.gmra.mxu1 %v9629_v23  ;;  %9935 = vmatmul.bf16.gmra.mxu3 %v9853_v35 }
 0x981   : > { %v17730_v5 = vld [vmem:[#allocation7_spill] sm:$0xff] }
 0x983   : > { %v9490_v32 = vpop.f32.mrf.mxu3 }
 0x984   : > { %v17731_v32 = vpack.c.b16 %v17730_v5, %v16626_v55  ;;  %v17732_v55 = vld [vmem:[#allocation11_spill] sm:$0xff] }
 0x985   : > { %v9264_v52 = vpop.f32.mrf.mxu1 }
 0x988   : > { %v9381_v45 = vpop.f32.mrf.mxu2 }
 0x98b   : > { %v9491_v38 = vpop.f32.mrf.mxu3 }
 0x98d   : > { %v9266_v28 = vpop.f32.mrf.mxu1  ;;  %10251 = vmatmul.bf16.gmra.mxu2 %v16793_v44 }
 0x98e   : > { %v10075_v28 = vrot.slane %v16695_v12, 2  ;;  %v13248_v12 = vld [vmem:[%s17465_s9 + $0x20] sm:$0xff] }
 0x990   : > { %v9800_v9 = vpop.f32.mrf.mxu2  ;;  %10136 = vmatmul.bf16.vlgmr.msra.gmra.mxu1 %v16887_v51  ;;  %10355 = vmatmul.bf16.vlgmr.msra.gmra.mxu3 %v16422_v6  ;;  %v9607_v6 = vadd.f32 %v17047_v42, %v17253_v2  ;;  %v9608_v2 = vadd.f32 %v17081_v30, %v17278_v54  ;;  %v9609_v30 = vadd.f32 %v17095_v7, %v17289_v36  ;;  %v17729_v7 = vld [vmem:[#allocation12_spill] sm:$0xff] }
 0x991   : > { %v10074_v36 = vsel %vm1431_vm5, %v17729_v7, %v10073_v17 }
 0x993   : > { %v9493_v26 = vpop.f32.mrf.mxu3 }
 0x995   : > { %v9267_v56 = vpop.f32.mrf.mxu1 }
 0x996   : > { %v10076_v56 = vsel %vm1431_vm5, %v10073_v17, %v10075_v28 }
 0x998   : > { %v9802_v15 = vpop.f32.mrf.mxu2 }
 0x99b   : > { %v9494_v39 = vpop.f32.mrf.mxu3 }
 0x99c   : > { %v17733_v39 = vpack.c.b16 %v16690_v31, %v17732_v55 }
 0x99d   : > { %v9691_v27 = vpop.f32.mrf.mxu1  ;;  %10254 = vmatmul.bf16.gmra.mxu2 %v9628_v29 }
 0x99e   : > { %v9716_v46 = vadd.f32 %v9691_v27, %v9606_v8 }
 0x9a0   : > { %v9805_v22 = vpop.f32.mrf.mxu2  ;;  %10141 = vmatmul.bf16.gmra.mxu1 %v16909_v18  ;;  %10360 = vmatmul.bf16.gmra.mxu3 %v16496_v41  ;;  %v9825_v44 = vadd.f32 %v9800_v9, %v9716_v46  ;;  %v13249_v9 = vld [vmem:[%s17465_s9 + $0x28] sm:$0xff] }
 0x9a1   : > { %10497 = vmatpush.bf16.msrb.mxu0 %v13249_v9 }
 0x9a3   : > { %v9914_v34 = vpop.f32.mrf.mxu3 }
 0x9a4   : > { %v17316_v51 = vadd.f32 %v9914_v34, %v9825_v44  ;;  %v17734_v34 = vld [vmem:[#allocation8_spill] sm:$0xff] }
 0x9a5   : > { %v9693_v11 = vpop.f32.mrf.mxu1  ;;  %10498 = vmatpush.bf16.msrb.mxu0 %v13248_v12 }
 0x9a6   : > { %v9717_v58 = vadd.f32 %v9693_v11, %v9607_v6  ;;  %v10295_v6 = vpack.c.b16 %v17734_v34, %v17734_v34 }
 0x9a8   : > { %v9806_v13 = vpop.f32.mrf.mxu2  ;;  %v9826_v40 = vadd.f32 %v9802_v15, %v9717_v58 }
 0x9ab   : > { %v9916_v3 = vpop.f32.mrf.mxu3 }
 0x9ac   : > { %v17320_v1 = vadd.f32 %v9916_v3, %v9826_v40 }
 0x9ad   : > { %v9696_v29 = vpop.f32.mrf.mxu1  ;;  %10259 = vmatmul.bf16.gmra.mxu2 %v9630_v53 }
 0x9ae   : > { %v13247_v29 = vld [vmem:[%s17465_s9 + $0x18] sm:$0xff] }
 0x9af   : > { %10499 = vmatpush.bf16.msrb.mxu0 %v13247_v29 }
 0x9b0   : > { %v9808_v16 = vpop.f32.mrf.mxu2  ;;  %10144 = vmatmul.bf16.gmra.mxu1 %v16941_v59  ;;  %10363 = vmatmul.bf16.gmra.mxu3 %v16554_v50 }
 0x9b3   : > { %v9919_v41 = vpop.f32.mrf.mxu3 }
 0x9b5   : > { %v9697_v18 = vpop.f32.mrf.mxu1 }
 0x9b8   : > { %v9810_v57 = vpop.f32.mrf.mxu2 }
 0x9bb   : > { %v9920_v42 = vpop.f32.mrf.mxu3 }
 0x9bd   : > { %v9699_v61 = vpop.f32.mrf.mxu1  ;;  %10262 = vmatmul.bf16.gmra.mxu2 %v10184_v24 }
 0x9be   : > { %v9718_v59 = vadd.f32 %v9699_v61, %v9608_v2  ;;  %v10052_v2 = vadd.f32 %v17180_v10, %v17316_v51  ;;  %v13328_v10 = vld [vmem:[%s17463_s7] ss:$0 sm:$0xff] }
 0x9c0   : > { %v9813_v50 = vpop.f32.mrf.mxu2  ;;  %10149 = vmatmul.bf16.gmra.mxu1 %v16980_v37  ;;  %10368 = vmatmul.bf16.gmra.mxu3 %v16604_v25  ;;  %v9827_v62 = vadd.f32 %v9808_v16, %v9718_v59  ;;  %v10186_v25 = vsel %vm7937_vm6, %v10183_v33, %v10185_v4  ;;  %v13246_v33 = vld [vmem:[%s17465_s9 + $0x10] sm:$0xff] }
 0x9c1   : > { %10500 = vmatpush.bf16.msrb.mxu0 %v13246_v33  ;;  %v13327_v50 = vld [vmem:[%s17462_s6] ss:$0 sm:$0xff] }
 0x9c3   : > { %v9922_v43 = vpop.f32.mrf.mxu3 }
 0x9c4   : > { %v17333_v21 = vadd.f32 %v9922_v43, %v9827_v62 }
 0x9c5   : > { %v9701_v54 = vpop.f32.mrf.mxu1 }
 0x9c6   : > { %v9719_v23 = vadd.f32 %v9701_v54, %v9609_v30  ;;  %v10053_v30 = vadd.f32 %v17184_v19, %v17320_v1  ;;  %v13245_v19 = vld [vmem:[%s17465_s9 + $0x8] sm:$0xff]  ;;  %v10054_v55 = vadd.f32 %v17210_v49, %v17333_v21 }
 0x9c7   : > { %10501 = vmatpush.bf16.msrb.mxu0 %v13245_v19  ;;  %v13255_v19 = vld [vmem:[%s17467_s11 + $0x18] sm:$0xff] }
 0x9c8   : > { %v9814_v53 = vpop.f32.mrf.mxu2  ;;  %v9828_v60 = vadd.f32 %v9810_v57, %v9719_v23 }
 0x9cb   : > { %v9924_v47 = vpop.f32.mrf.mxu3 }
 0x9cc   : > { %v17339_v0 = vadd.f32 %v9924_v47, %v9828_v60 }
 0x9cd   : > { %v9704_v37 = vpop.f32.mrf.mxu1  ;;  %10265 = vmatmul.bf16.gmra.mxu2 %v10186_v25 }
 0x9d0   : > { %v9816_v35 = vpop.f32.mrf.mxu2  ;;  %10152 = vmatmul.bf16.gmra.mxu1 %v10074_v36  ;;  %10371 = vmatmul.bf16.gmra.mxu3 %v17731_v32 }
 0x9d3   : > { %v9927_v63 = vpop.f32.mrf.mxu3 }
 0x9d5   : > { %v9705_v52 = vpop.f32.mrf.mxu1 }
 0x9d8   : > { %v9817_v45 = vpop.f32.mrf.mxu2 }
 0x9db   : > { %v9928_v38 = vpop.f32.mrf.mxu3 }
 0x9dd   : > { %v9707_v26 = vpop.f32.mrf.mxu1  ;;  %10268 = vmatmul.bf16.gmra.mxu2 %v10185_v4 }
 0x9e0   : > { %v9819_v15 = vpop.f32.mrf.mxu2  ;;  %10155 = vmatmul.bf16.gmra.mxu1 %v10076_v56  ;;  %10374 = vmatmul.bf16.gmra.mxu3 %v17733_v39  ;;  %v13244_v56 = vld [vmem:[%s17465_s9] sm:$0xff] }
 0x9e1   : > { %10502 = vmatpush.bf16.msrb.mxu0 %v13244_v56 }
 0x9e3   : > { %v9930_v8 = vpop.f32.mrf.mxu3 }
 0x9e5   : > { %v9708_v27 = vpop.f32.mrf.mxu1 }
 0x9e8   : > { %v9820_v46 = vpop.f32.mrf.mxu2 }
 0x9eb   : > { %v9931_v22 = vpop.f32.mrf.mxu3 }
 0x9ed   : > { %v9710_v44 = vpop.f32.mrf.mxu1 }
 0x9ee   : > { %v10055_v44 = vadd.f32 %v17219_v48, %v17339_v0 }
 0x9f0   : > { %v9822_v11 = vpop.f32.mrf.mxu2  ;;  %10158 = vmatmul.bf16.gmra.mxu1 %v10075_v28  ;;  %10377 = vmatmul.bf16.gmra.mxu3 %v10295_v6 }
 0x9f3   : > { %v9933_v58 = vpop.f32.mrf.mxu3 }
 0x9f5   : > { %v9711_v13 = vpop.f32.mrf.mxu1 }
 0x9f8   : > { %v9823_v31 = vpop.f32.mrf.mxu2 }
 0x9fb   : > { %v9934_v40 = vpop.f32.mrf.mxu3 }
 0x9fd   : > { %v9713_v3 = vpop.f32.mrf.mxu1 }
 0xa00   : > { %v10247_v16 = vpop.f32.mrf.mxu2 }
 0xa03   : > { %v9936_v41 = vpop.f32.mrf.mxu3 }
 0xa05   : > { %v9714_v18 = vpop.f32.mrf.mxu1 }
 0xa08   : > { %v10249_v57 = vpop.f32.mrf.mxu2 }
 0xa0b   : > { %v9937_v42 = vpop.f32.mrf.mxu3 }
 0xa0d   : > { %v10137_v24 = vpop.f32.mrf.mxu1 }
 0xa0e   : > { %v10162_v61 = vadd.f32 %v10137_v24, %v10052_v2 }
 0xa10   : > { %v10252_v14 = vpop.f32.mrf.mxu2  ;;  %v10272_v59 = vadd.f32 %v10247_v16, %v10162_v61 }
 0xa13   : > { %v10356_v62 = vpop.f32.mrf.mxu3 }
 0xa14   : > { %v10381_v43 = vadd.f32 %v10356_v62, %v10272_v59 }
 0xa15   : > { %v10139_v54 = vpop.f32.mrf.mxu1 }
 0xa16   : > { %v10389_v23 = vadd.f32 %v13327_v50, %v10381_v43  ;;  %v10163_v53 = vadd.f32 %v10139_v54, %v10053_v30 }
 0xa18   : > { %v10253_v60 = vpop.f32.mrf.mxu2  ;;  %v10393_v4 = vmax.f32 %v10389_v23, 0.0  ;;  %v10273_v51 = vadd.f32 %v10249_v57, %v10163_v53 }
 0xa1a   : > { %v10401_v37 = vmul.f32 %v13328_v10, %v10393_v4  ;;  %v13259_v4 = vld [vmem:[%s17467_s11 + $0x38] sm:$0xff] }
 0xa1b   : > { %v10358_v47 = vpop.f32.mrf.mxu3  ;;  %10575 = vmatpush.bf16.msra.mxu0 %v13259_v4 }
 0xa1c   : > { %v10382_v17 = vadd.f32 %v10358_v47, %v10273_v51  ;;  %v10409_v35 = vadd.f32 %v13329_v20, %v10401_v37  ;;  %v13258_v51 = vld [vmem:[%s17467_s11 + $0x30] sm:$0xff] }
 0xa1d   : > { %v10142_v25 = vpop.f32.mrf.mxu1 }
 0xa1e   : > { %v10390_v7 = vadd.f32 %v13327_v50, %v10382_v17  ;;  %v10418_v45 = vrot.slane %v10409_v35, 2  ;;  %v13257_v17 = vld [vmem:[%s17467_s11 + $0x28] sm:$0xff] }
 0xa1f   : > { %10576 = vmatpush.bf16.msra.mxu0 %v13258_v51 }
 0xa20   : > { %v10394_v1 = vmax.f32 %v10390_v7, 0.0  ;;  %v10255_v36 = vpop.f32.mrf.mxu2 }
 0xa22   : > { %v10402_v5 = vmul.f32 %v13328_v10, %v10394_v1 }
 0xa23   : > { %v10361_v32 = vpop.f32.mrf.mxu3  ;;  %10577 = vmatpush.bf16.msra.mxu0 %v13257_v17 }
 0xa24   : > { %v10410_v63 = vadd.f32 %v13329_v20, %v10402_v5 }
 0xa25   : > { %v10143_v52 = vpop.f32.mrf.mxu1 }
 0xa26   : > { %v10419_v38 = vrot.slane %v10410_v63, 2  ;;  %v13253_v52 = vld [vmem:[%s17467_s11 + $0x8] sm:$0xff] }
 0xa28   : > { %v10420_v28 = vsel %vm1431_vm5, %v10418_v45, %v10419_v38  ;;  %v10257_v9 = vpop.f32.mrf.mxu2  ;;  %v13252_v45 = vld [vmem:[%s17467_s11] sm:$0xff] }
 0xa29   : > { %v10426_v26 = vmax.f32 %v10409_v35, %v10420_v28  ;;  %v13254_v35 = vld [vmem:[%s17467_s11 + $0x10] sm:$0xff]  ;;  %v10446_v38 = vld [vmem:[%s17466_s10] sm:$0x1] }
 0xa2b   : > { %v10362_v15 = vpop.f32.mrf.mxu3 }
 0xa2d   : > { %v10145_v39 = vpop.f32.mrf.mxu1 }
 0xa2e   : > { %v10164_v8 = vadd.f32 %v10145_v39, %v10054_v55  ;;  %v10526_v55 = vld [vmem:[%s17468_s12] sm:$0x1] }
 0xa30   : > { %v10260_v27 = vpop.f32.mrf.mxu2  ;;  %v10274_v46 = vadd.f32 %v10255_v36, %v10164_v8 }
 0xa33   : > { %v10364_v12 = vpop.f32.mrf.mxu3 }
 0xa34   : > { %v10383_v22 = vadd.f32 %v10364_v12, %v10274_v46 }
 0xa35   : > { %v10147_v34 = vpop.f32.mrf.mxu1 }
 0xa36   : > { %v10391_v6 = vadd.f32 %v13327_v50, %v10383_v22  ;;  %v10165_v11 = vadd.f32 %v10147_v34, %v10055_v44 }
 0xa38   : > { %v10261_v58 = vpop.f32.mrf.mxu2  ;;  %v10395_v13 = vmax.f32 %v10391_v6, 0.0  ;;  %v10275_v31 = vadd.f32 %v10257_v9, %v10165_v11 }
 0xa3a   : > { %v10403_v16 = vmul.f32 %v13328_v10, %v10395_v13 }
 0xa3b   : > { %v10366_v40 = vpop.f32.mrf.mxu3 }
 0xa3c   : > { %v10384_v3 = vadd.f32 %v10366_v40, %v10275_v31  ;;  %v10411_v18 = vadd.f32 %v13329_v20, %v10403_v16 }
 0xa3d   : > { %v10150_v29 = vpop.f32.mrf.mxu1 }
 0xa3e   : > { %v10392_v49 = vadd.f32 %v13327_v50, %v10384_v3  ;;  %v10421_v24 = vrot.slane %v10411_v18, 2 }
 0xa40   : > { %v10396_v21 = vmax.f32 %v10392_v49, 0.0  ;;  %v10263_v41 = vpop.f32.mrf.mxu2 }
 0xa42   : > { %v10404_v57 = vmul.f32 %v13328_v10, %v10396_v21 }
 0xa43   : > { %v10369_v33 = vpop.f32.mrf.mxu3 }
 0xa44   : > { %v10412_v42 = vadd.f32 %v13329_v20, %v10404_v57  ;;  %v13256_v20 = vld [vmem:[%s17467_s11 + $0x20] sm:$0xff] }
 0xa45   : > { %v10151_v2 = vpop.f32.mrf.mxu1  ;;  %10578 = vmatpush.bf16.msra.mxu0 %v13256_v20 }
 0xa46   : > { %v10422_v48 = vrot.slane %v10412_v42, 2 }
 0xa48   : > { %v10423_v0 = vsel %vm1431_vm5, %v10421_v24, %v10422_v48  ;;  %v10264_v61 = vpop.f32.mrf.mxu2 }
 0xa49   : > { %v10427_v14 = vmax.f32 %v10411_v18, %v10423_v0  ;;  %10579 = vmatpush.bf16.msra.mxu0 %v13255_v19 }
 0xa4b   : > { %v10370_v59 = vpop.f32.mrf.mxu3  ;;  %v10428_v62 = vmax.f32 %v10426_v26, %v10427_v14 }
 0xa4d   : > { %v10153_v43 = vpop.f32.mrf.mxu1  ;;  %v10429_v30 = vpack.c.bf16 %v10428_v62, %v10428_v62  ;;  %10580 = vmatpush.bf16.msra.mxu0 %v13254_v35 }
 0xa4f   : > { %10503 = vmatmul.bf16.vlgmr.msrb.gmra.mxu0 %v10429_v30 }
 0xa50   : > { %v10266_v54 = vpop.f32.mrf.mxu2 }
 0xa51   : > { %10581 = vmatpush.bf16.msra.mxu0 %v13253_v52 }
 0xa53   : > { %v10372_v50 = vpop.f32.mrf.mxu3 }
 0xa55   : > { %v10154_v23 = vpop.f32.mrf.mxu1  ;;  %10582 = vmatpush.bf16.msra.mxu0 %v13252_v45 }
 0xa58   : > { %v10267_v53 = vpop.f32.mrf.mxu2 }
 0xa5b   : > { %v10373_v60 = vpop.f32.mrf.mxu3 }
 0xa5d   : > { %v10156_v10 = vpop.f32.mrf.mxu1 }
 0xa60   : > { %v10269_v47 = vpop.f32.mrf.mxu2 }
 0xa63   : > { %v10375_v25 = vpop.f32.mrf.mxu3 }
 0xa65   : > { %v10157_v37 = vpop.f32.mrf.mxu1 }
 0xa68   : > { %v10270_v7 = vpop.f32.mrf.mxu2 }
 0xa6b   : > { %v10376_v1 = vpop.f32.mrf.mxu3 }
 0xa6d   : > { %v10159_v36 = vpop.f32.mrf.mxu1 }
 0xa73   : > { %v10378_v5 = vpop.f32.mrf.mxu3 }
 0xa75   : > { %v10160_v32 = vpop.f32.mrf.mxu1 }
 0xa7b   : > { %v10379_v63 = vpop.f32.mrf.mxu3 }
 0xacc   : > { %v10504_v28 = vpop.f32.mrf.mxu0 }
 0xacd   : > { %v10505_v9 = vadd.f32 %v10504_v28, %v10446_v38 }
 0xacf   : > { %v10508_v26 = vmax.f32 %v10505_v9, 0.0 }
 0xad1   : > { %v10509_v56 = vpack.c.bf16 %v10508_v26, %v10508_v26 }
 0xad3   : > { %10583 = vmatmul.bf16.vlgmr.msra.gmra.mxu0 %v10509_v56 }
 0xad4   : > { %v10506_v15 = vpop.f32.mrf.mxu0 }
 0xb50   : > { %v10584_v39 = vpop.f32.mrf.mxu0 }
 0xb51   : > { %v10585_v8 = vadd.f32 %v10584_v39, %v10526_v55 }
 0xb53   : > { %v10589_v27 = vsel %vm10588_vm7, %v10585_v8, -inf }
 0xb54   : > { %10590 = vmax.xlane.f32.xlu0 %v10589_v27 }
 0xb58   : > { %v10586_v46 = vpop.f32.mrf.mxu0 }
 0xbc7   : > { %v10591_v12 = vpop.xlane.xlu0 %10590 }
 0xbc8   : > { %v10592_v22 = vsub.f32 %v10585_v8, %v10591_v12 }
 0xbca   : > { %v10593_v44 = vmul.f32 1.442695, %v10592_v22 }
 0xbcc   : > { %13330 = vpow2.f32 %v10593_v44 }
 0xbd2   : > { %v13331_v34 = vpop.eup %13330 }
 0xbd3   : > { %v10595_v6 = vsel %vm10588_vm7, %v13331_v34, 0.0 }
 0xbd4   : > { %10596 = vadd.xlane.f32.xlu0 %v10595_v6 }
 0xc47   : > { %v10597_v11 = vpop.xlane.xlu0 %10596 }
 0xc48   : > { %13332 = vlog2.f32 %v10597_v11 }
 0xc4e   : > { %v13333_v58 = vpop.eup %13332 }
 0xc4f   : > { %v10599_v13 = vmul.f32 0.6931472, %v13333_v58 }
 0xc51   : > { %v10600_v31 = vsub.f32 %v10592_v22, %v10599_v13 }
 0xc53   : > { %10601 = vst [vmem:[%s432_s20] sm:$0x1] %v10600_v31 }
 0xc54   : > { %13404 = shalt.err (!%p13401_p3)
}
 0xc55   : > { %13285 = dma.vmem_to_hbm [thread:$0]  (%p13549_p5), %s10614_s21, 16, %s10616_s22, %s10603_s23  }
 0xc56 PF: > { %p13291_p4 = scmp.ge.s32.totalorder %s13439_s28, 2  ;;  %s10627_s24 = sand.u32 1, %s13427_s25  }
 0xc57   : > { %s10628_s16 = scalar_lea.sflag [#allocation3], %s10627_s24 }
 0xc58   : > { %p13288_p7 = pnand %p13291_p4, %p13553_p6 }
 0xc5a   : > { %p13289_p8 = pneg %p13288_p7 }
 0xc5c   : > { %13422 = dma.done.wait (%p13289_p8), %s10628_s16, 16  }
 0xc5d   : > { %13424 = vsyncadd (%p13289_p8), %s10628_s16, 4294967280  ;;  %s17735_s0 = sld [smem:[#allocation5_spill]]  ;;  %p23_p9 = scmp.ge.s32.totalorder %s13536_s14, 4  }
 0xc5e   : > { %s17736_s25 = smov %s13431_s26  ;;  %s17737_s26 = smov %s13435_s27 }
 0xc5f   : > { %s17739_s28 = smov %s13536_s14  ;;  %25 = sbr.rel (!%p23_p9) target bundleno = 7 (0x7), region = 155 }
 0xc63   : > { %s17738_s27 = smov %s17735_s0 }
 0xc64   :  { %10633 = vsyncpa [#allocation3], 1 }
 0xc65   :  { %10635 = vsyncpa [#allocation3 + $0x1], 1 }

</bundles_post_ra>
